<compile_context>
chip_gen: v7x
topology: tpu7x:2x2x1
jax: 0.10.0
libtpu: 0.0.40
codegen_flags: <defaults>
</compile_context>

<pallas_src>
import functools

import jax
import jax.numpy as jnp
from jax.experimental import pallas as pl
from jax.experimental.pallas import tpu as pltpu

EPS = 1e-5          # BatchNorm1d default eps
EDGE_TILE = 128     # per-tile one-hots are (EDGE_TILE, Ns)/(Ns, EDGE_TILE); E padded to multiple


def _one_hot_bf16(cmp):
    # bool -> f32 -> bf16 (exact 0/1); avoids relying on a direct i1->bf16 lowering path.
    return cmp.astype(jnp.float32).astype(jnp.bfloat16)


# ---------------------------------------------------------------------------
# Fused kernel:
#   ee_all = edge_attr @ [We_0 | ... | We_{L-1}] + bias      (hoisted, one wide bf16 matmul)
#   for each of L layers (custom GCNConv + outer ReLU):
#     hw = h @ W + b                                          (bf16 MXU, f32 acc)
#     aggr = 0
#     for each edge tile (EDGE_TILE edges):
#       hj   = one_hot(row_tile) @ hw                         (bf16 MXU gather)
#       msg  = norm_tile * relu(hj + ee_tile)                 (f32 VPU; norm not folded)
#       aggr += one_hot_T(col_tile) @ msg                     (bf16 MXU scatter, f32 acc)
#     h = relu(aggr + relu(hw + root) / deg)
#   x_struct = one_hot(indicator) @ h                         (bf16 MXU scatter)
#   out = BN_train(concat[x, x_struct]) @ W_out + b_out       (BN & Linear split per half)
# ---------------------------------------------------------------------------
def _fused_khop_kernel(edge_tile,
                       xs_ref, x_ref, ea_ref, row_ref, col_ref, sind_ref,
                       norm_ref, deginv_ref,
                       w_ref, b_ref, wec_ref, bec_ref, root_ref,
                       g1_ref, bb1_ref, g2_ref, bb2_ref,
                       w1_ref, w2_ref, bo_ref,
                       o_ref,
                       ee_ref, aggr_ref):
    Ns, D = xs_ref.shape
    Ep = ea_ref.shape[0]          # padded edge count (multiple of edge_tile)
    N = x_ref.shape[0]
    L = w_ref.shape[0]
    ET = edge_tile
    n_tiles = Ep // ET
    bf16 = jnp.bfloat16

    # --- hoisted, fused edge-attr encoder: one (Ep, L*D) matmul instead of L narrow ones ---
    ea_bf = ea_ref[...].astype(bf16)
    ee_all = jnp.dot(ea_bf, wec_ref[...].astype(bf16),
                     preferred_element_type=jnp.float32) + bec_ref[...]     # (Ep, L*D) f32
    for l in range(L):
        ee_ref[l] = ee_all[:, l * D:(l + 1) * D]                            # (Ep, D) per layer

    deginv = deginv_ref[...]          # (Ns, 1) f32
    h = xs_ref[...]                   # (Ns, D) f32 = x[subgraph_node_index] (gathered in wrapper)

    # L GCN layers (custom GCNConv) + StructureExtractor's outer ReLU, statically unrolled.
    for l in range(L):
        hw = jnp.dot(h.astype(bf16), w_ref[l].astype(bf16),
                     preferred_element_type=jnp.float32) + b_ref[l]          # (Ns, D) f32
        hw_bf = hw.astype(bf16)

        aggr_ref[...] = jnp.zeros_like(aggr_ref)                             # f32 accumulator

        for t in range(n_tiles):                                             # E-tiled reduction
            e0 = t * ET
            row_t = row_ref[e0:e0 + ET, :]        # (ET, 1) int32
            col_t = col_ref[:, e0:e0 + ET]        # (1, ET) int32
            norm_t = norm_ref[e0:e0 + ET, :]      # (ET, 1) f32

            grow_t = _one_hot_bf16(
                jax.lax.broadcasted_iota(jnp.int32, (ET, Ns), 1) == row_t)   # (ET, Ns)
            hj = jnp.dot(grow_t, hw_bf, preferred_element_type=jnp.float32)  # (ET, D) gather

            ee_t = ee_ref[l, e0:e0 + ET, :]                                  # (ET, D) f32
            msg = norm_t * jnp.maximum(hj + ee_t, 0.0)                       # f32 VPU

            scol_t = _one_hot_bf16(
                jax.lax.broadcasted_iota(jnp.int32, (Ns, ET), 0) == col_t)   # (Ns, ET)
            aggr_ref[...] += jnp.dot(scol_t, msg.astype(bf16),
                                     preferred_element_type=jnp.float32)     # scatter_add

        self_term = jnp.maximum(hw + root_ref[l], 0.0) * deginv              # f32 VPU
        h = jnp.maximum(aggr_ref[...] + self_term, 0.0)                      # outer ReLU

    # scatter_add over subgraph_indicator_index: (N, Ns) bf16 one-hot @ (Ns, D) bf16, f32 acc
    ind = _one_hot_bf16(jax.lax.broadcasted_iota(jnp.int32, (N, Ns), 0) == sind_ref[...])
    x_struct = jnp.dot(ind, h.astype(bf16), preferred_element_type=jnp.float32)   # (N, D)

    # BatchNorm1d(2D) in training mode is per-feature -> split across the concat halves (f32).
    def bn(v, gamma, beta):
        mean = jnp.mean(v, axis=0, keepdims=True)
        var = jnp.mean((v - mean) ** 2, axis=0, keepdims=True)               # biased variance
        return gamma * (v - mean) * jax.lax.rsqrt(var + EPS) + beta

    y1 = bn(x_ref[...], g1_ref[...], bb1_ref[...])
    y2 = bn(x_struct, g2_ref[...], bb2_ref[...])

    # out_proj: Linear(2D, D) split as y1 @ W1 + y2 @ W2 + b (no in-kernel concat needed).
    o_ref[...] = (jnp.dot(y1.astype(bf16), w1_ref[...].astype(bf16),
                          preferred_element_type=jnp.float32)
                  + jnp.dot(y2.astype(bf16), w2_ref[...].astype(bf16),
                            preferred_element_type=jnp.float32)
                  + bo_ref[...])


# ---------------------------------------------------------------------------
# Wrapper: cheap O(E)/O(Ns) glue (row gather, degree/norm vectors, E padding, weight
# stacking) in plain JAX, then one fused pallas_call.
# ---------------------------------------------------------------------------
def khop_structure_extractor_forward(params, x, subgraph_edge_index,
                                     subgraph_indicator_index,
                                     subgraph_node_index, subgraph_edge_attr,
                                     *, edge_tile=EDGE_TILE):
    N, D = x.shape
    De = subgraph_edge_attr.shape[1]
    row = subgraph_edge_index[0].astype(jnp.int32)
    col = subgraph_edge_index[1].astype(jnp.int32)
    Ns = subgraph_node_index.shape[0]
    E = row.shape[0]
    L = len(params["gcn"])

    # Direct O(Ns*D) row gather replaces the (Ns, N) one-hot MXU gather of the previous version.
    xs = x[subgraph_node_index].astype(jnp.float32)

    # Degree on edge sources (row), as in the custom GCNConv; deg >= 1 so never inf.
    deg = jnp.zeros((Ns,), jnp.float32).at[row].add(1.0) + 1.0
    dis = 1.0 / jnp.sqrt(deg)
    norm = dis[row] * dis[col]
    deginv = (1.0 / deg).reshape(Ns, 1)

    # Pad E to a multiple of edge_tile with zero-contribution edges:
    # out-of-range indices -> all-zero one-hot rows/columns, and norm=0 kills the message.
    Ep = ((E + edge_tile - 1) // edge_tile) * edge_tile
    pad = Ep - E
    if pad:
        row = jnp.concatenate([row, jnp.full((pad,), Ns, jnp.int32)])
        col = jnp.concatenate([col, jnp.full((pad,), Ns, jnp.int32)])
        norm = jnp.concatenate([norm, jnp.zeros((pad,), jnp.float32)])
        ea = jnp.concatenate(
            [subgraph_edge_attr.astype(jnp.float32), jnp.zeros((pad, De), jnp.float32)], axis=0)
    else:
        ea = subgraph_edge_attr.astype(jnp.float32)

    row2 = row.reshape(Ep, 1)
    col2 = col.reshape(1, Ep)
    norm2 = norm.reshape(Ep, 1)
    sind = subgraph_indicator_index.astype(jnp.int32).reshape(1, Ns)

    # Stacked / fused per-layer weights.
    W = jnp.stack([lyr["w"] for lyr in params["gcn"]])                    # (L, D, D)
    B = jnp.stack([lyr["b"] for lyr in params["gcn"]])                    # (L, 1, D)
    Wec = jnp.concatenate([lyr["we"] for lyr in params["gcn"]], axis=1)   # (De, L*D) fused
    Bec = jnp.concatenate([lyr["be"] for lyr in params["gcn"]], axis=1)   # (1, L*D)
    Root = jnp.stack([lyr["root"] for lyr in params["gcn"]])              # (L, 1, D)

    ins = (xs, x, ea, row2, col2, sind, norm2, deginv,
           W, B, Wec, Bec, Root,
           params["bn_g1"], params["bn_b1"], params["bn_g2"], params["bn_b2"],
           params["w_out1"], params["w_out2"], params["b_out"])

    flops = 2 * (Ep * De * L * D                       # fused edge encoder
                 + L * (Ns * D * D + 2 * Ep * Ns * D)  # h@W, gather, scatter per layer
                 + N * Ns * D                          # indicator scatter
                 + 2 * N * D * D)                      # out_proj (two halves)
    bytes_accessed = 4 * (Ns * D + 2 * N * D + Ep * De + 3 * Ep + Ns + 2 * Ns
                          + L * (D * D + De * D + 3 * D) + 2 * D * D + 5 * D)
    cost = pl.CostEstimate(flops=int(flops), transcendentals=int(2 * D),
                           bytes_accessed=int(bytes_accessed))

    vmem = pl.BlockSpec(memory_space=pltpu.MemorySpace.VMEM)
    kernel = functools.partial(_fused_khop_kernel, edge_tile)

    return pl.pallas_call(
        kernel,
        out_shape=jax.ShapeDtypeStruct((N, D), jnp.float32),
        in_specs=[vmem] * len(ins),
        out_specs=vmem,
        scratch_shapes=[pltpu.VMEM((L, Ep, D), jnp.float32),   # cached fused edge embeddings
                        pltpu.VMEM((Ns, D), jnp.float32)],     # per-layer aggr accumulator
        compiler_params=pltpu.CompilerParams(vmem_limit_bytes=48 << 20),  # v7x headroom (<64MiB)
        cost_estimate=cost,
    )(*ins)


# ---------------------------------------------------------------------------
# Pure-JAX f32 reference (gather/scatter form) for a correctness check.
# ---------------------------------------------------------------------------
def reference_forward(params, x, subgraph_edge_index, subgraph_indicator_index,
                      subgraph_node_index, subgraph_edge_attr):
    N, D = x.shape
    row, col = subgraph_edge_index[0], subgraph_edge_index[1]
    Ns = subgraph_node_index.shape[0]

    xs = x[subgraph_node_index]
    deg = jnp.zeros((Ns,), jnp.float32).at[row].add(1.0) + 1.0
    dis = 1.0 / jnp.sqrt(deg)
    norm = dis[row] * dis[col]

    h_cur = xs
    for lyr in params["gcn"]:
        h = h_cur @ lyr["w"] + lyr["b"]
        ee = subgraph_edge_attr @ lyr["we"] + lyr["be"]
        msg = norm[:, None] * jnp.maximum(h[row] + ee, 0.0)
        aggr = jnp.zeros_like(h).at[col].add(msg)
        self_term = jnp.maximum(h + lyr["root"], 0.0) / deg[:, None]
        h_cur = jnp.maximum(aggr + self_term, 0.0)

    x_struct = jnp.zeros((N, D), jnp.float32).at[subgraph_indicator_index].add(h_cur)
    cat = jnp.concatenate([x, x_struct], axis=-1)
    mean = cat.mean(axis=0, keepdims=True)
    var = ((cat - mean) ** 2).mean(axis=0, keepdims=True)
    gamma = jnp.concatenate([params["bn_g1"], params["bn_g2"]], axis=-1)
    beta = jnp.concatenate([params["bn_b1"], params["bn_b2"]], axis=-1)
    y = gamma * (cat - mean) / jnp.sqrt(var + EPS) + beta
    w_full = jnp.concatenate([params["w_out1"], params["w_out2"]], axis=0)
    return y @ w_full + params["b_out"]


def init_params(key, embed_dim, edge_dim, num_layers):
    keys = jax.random.split(key, 6 * num_layers + 3)
    gcn = []
    k = 0
    for _ in range(num_layers):
        gcn.append({
            "w":    0.1 * jax.random.normal(keys[k + 0], (embed_dim, embed_dim), jnp.float32),
            "b":    0.1 * jax.random.normal(keys[k + 1], (1, embed_dim), jnp.float32),
            "we":   0.1 * jax.random.normal(keys[k + 2], (edge_dim, embed_dim), jnp.float32),
            "be":   0.1 * jax.random.normal(keys[k + 3], (1, embed_dim), jnp.float32),
            "root": 0.1 * jax.random.normal(keys[k + 4], (1, embed_dim), jnp.float32),
        })
        k += 5
    params = {
        "gcn": gcn,
        # BatchNorm1d(2*embed_dim) fresh init: weight=1, bias=0 (split per concat half)
        "bn_g1": jnp.ones((1, embed_dim), jnp.float32),
        "bn_b1": jnp.zeros((1, embed_dim), jnp.float32),
        "bn_g2": jnp.ones((1, embed_dim), jnp.float32),
        "bn_b2": jnp.zeros((1, embed_dim), jnp.float32),
        # out_proj: Linear(2*embed_dim, embed_dim), stored as (2D, D) split in two halves
        "w_out1": 0.1 * jax.random.normal(keys[k + 0], (embed_dim, embed_dim), jnp.float32),
        "w_out2": 0.1 * jax.random.normal(keys[k + 1], (embed_dim, embed_dim), jnp.float32),
        "b_out":  0.1 * jax.random.normal(keys[k + 2], (1, embed_dim), jnp.float32),
    }
    return params


if __name__ == "__main__":
    key = jax.random.PRNGKey(0)
    N, D, De = 64, 32, 16          # graph nodes, embed_dim, edge_dim
    Ns, E = 128, 300               # k-hop subgraph nodes / edges (E padded to 384 -> 3 edge tiles)
    num_layers = 3

    ks = jax.random.split(key, 8)
    x = jax.random.normal(ks[0], (N, D), jnp.float32)
    subgraph_node_index = jax.random.randint(ks[1], (Ns,), 0, N)
    subgraph_edge_index = jnp.stack([
        jax.random.randint(ks[2], (E,), 0, Ns),
        jax.random.randint(ks[3], (E,), 0, Ns),
    ], axis=0)
    subgraph_edge_attr = jax.random.normal(ks[4], (E, De), jnp.float32)
    subgraph_indicator_index = jax.random.randint(ks[5], (Ns,), 0, N)

    params = init_params(ks[6], D, De, num_layers)

    out = khop_structure_extractor_forward(
        params, x, subgraph_edge_index, subgraph_indicator_index,
        subgraph_node_index, subgraph_edge_attr)
    out = jax.block_until_ready(out)

    ref = reference_forward(
        params, x, subgraph_edge_index, subgraph_indicator_index,
        subgraph_node_index, subgraph_edge_attr)

    assert out.shape == (N, D)
    assert bool(jnp.all(jnp.isfinite(out)))
    # bf16 MXU operands + f32 accumulation -> compare against the f32 reference with a
    # bf16-appropriate tolerance (norm-based check averages out elementwise rounding noise).
    rel = float(jnp.linalg.norm(out - ref) / jnp.linalg.norm(ref))
    assert rel < 3e-2, f"relative error too large: {rel}"
    assert bool(jnp.allclose(out, ref, atol=1e-1, rtol=1e-1))
    print("KERNEL_OK")
</pallas_src>

<mosaic_0001>
module attributes {stable_mosaic.version = 11 : i64} {
  func.func @_fused_khop_kernel(%arg0: memref<128x32xf32, #tpu.memory_space<vmem>>, %arg1: memref<64x32xf32, #tpu.memory_space<vmem>>, %arg2: memref<384x16xf32, #tpu.memory_space<vmem>>, %arg3: memref<384x1xi32, #tpu.memory_space<vmem>>, %arg4: memref<1x384xi32, #tpu.memory_space<vmem>>, %arg5: memref<1x128xi32, #tpu.memory_space<vmem>>, %arg6: memref<384x1xf32, #tpu.memory_space<vmem>>, %arg7: memref<128x1xf32, #tpu.memory_space<vmem>>, %arg8: memref<3x32x32xf32, #tpu.memory_space<vmem>>, %arg9: memref<3x1x32xf32, #tpu.memory_space<vmem>>, %arg10: memref<16x96xf32, #tpu.memory_space<vmem>>, %arg11: memref<1x96xf32, #tpu.memory_space<vmem>>, %arg12: memref<3x1x32xf32, #tpu.memory_space<vmem>>, %arg13: memref<1x32xf32, #tpu.memory_space<vmem>>, %arg14: memref<1x32xf32, #tpu.memory_space<vmem>>, %arg15: memref<1x32xf32, #tpu.memory_space<vmem>>, %arg16: memref<1x32xf32, #tpu.memory_space<vmem>>, %arg17: memref<32x32xf32, #tpu.memory_space<vmem>>, %arg18: memref<32x32xf32, #tpu.memory_space<vmem>>, %arg19: memref<1x32xf32, #tpu.memory_space<vmem>>, %arg20: memref<64x32xf32, #tpu.memory_space<vmem>>, %arg21: memref<3x384x32xf32, #tpu.memory_space<vmem>>, %arg22: memref<128x32xf32, #tpu.memory_space<vmem>>) attributes {dimension_semantics = [], scalar_prefetch = 0 : i64, scratch_operands = 2 : i64, tpu.core_type = #tpu.core_type<tc>} {
    %c0 = arith.constant 0 : index
    %c0_0 = arith.constant 0 : index
    %0 = vector.load %arg2[%c0, %c0_0] : memref<384x16xf32, #tpu.memory_space<vmem>>, vector<384x16xf32>
    %1 = arith.truncf %0 : vector<384x16xf32> to vector<384x16xbf16>
    %c0_1 = arith.constant 0 : index
    %c0_2 = arith.constant 0 : index
    %2 = vector.load %arg10[%c0_1, %c0_2] : memref<16x96xf32, #tpu.memory_space<vmem>>, vector<16x96xf32>
    %3 = arith.truncf %2 : vector<16x96xf32> to vector<16x96xbf16>
    %cst = arith.constant dense<0.000000e+00> : vector<384x96xf32>
    %4 = tpu.matmul %1, %3, %cst {dimension_numbers = #tpu.dot_dimension_numbers<[1], [0], [0], [1], [0, 0, 1, 1], [], []>} : vector<384x16xbf16>, vector<16x96xbf16>, vector<384x96xf32> -> vector<384x96xf32>
    %c0_3 = arith.constant 0 : index
    %c0_4 = arith.constant 0 : index
    %5 = vector.load %arg11[%c0_3, %c0_4] : memref<1x96xf32, #tpu.memory_space<vmem>>, vector<1x96xf32>
    %6 = vector.broadcast %5 : vector<1x96xf32> to vector<384x96xf32>
    %7 = arith.addf %4, %6 : vector<384x96xf32>
    %8 = vector.extract_strided_slice %7 {offsets = [0, 0], sizes = [384, 32], strides = [1, 1]} : vector<384x96xf32> to vector<384x32xf32>
    %c0_5 = arith.constant 0 : index
    %c0_6 = arith.constant 0 : index
    %c0_7 = arith.constant 0 : index
    %9 = vector.load %arg21[%c0_5, %c0_6, %c0_7] : memref<3x384x32xf32, #tpu.memory_space<vmem>>, vector<1x384x32xf32>
    %10 = vector.shape_cast %9 : vector<1x384x32xf32> to vector<384x32xf32>
    %11 = vector.shape_cast %8 : vector<384x32xf32> to vector<1x384x32xf32>
    tpu.vector_store %arg21[%c0_5, %c0_6, %c0_7], %11 {strides = array<i32>} : memref<3x384x32xf32, #tpu.memory_space<vmem>>, vector<1x384x32xf32>,
    %12 = vector.extract_strided_slice %7 {offsets = [0, 32], sizes = [384, 32], strides = [1, 1]} : vector<384x96xf32> to vector<384x32xf32>
    %c1 = arith.constant 1 : index
    %c0_8 = arith.constant 0 : index
    %c0_9 = arith.constant 0 : index
    %13 = vector.load %arg21[%c1, %c0_8, %c0_9] : memref<3x384x32xf32, #tpu.memory_space<vmem>>, vector<1x384x32xf32>
    %14 = vector.shape_cast %13 : vector<1x384x32xf32> to vector<384x32xf32>
    %15 = vector.shape_cast %12 : vector<384x32xf32> to vector<1x384x32xf32>
    tpu.vector_store %arg21[%c1, %c0_8, %c0_9], %15 {strides = array<i32>} : memref<3x384x32xf32, #tpu.memory_space<vmem>>, vector<1x384x32xf32>,
    %16 = vector.extract_strided_slice %7 {offsets = [0, 64], sizes = [384, 32], strides = [1, 1]} : vector<384x96xf32> to vector<384x32xf32>
    %c2 = arith.constant 2 : index
    %c0_10 = arith.constant 0 : index
    %c0_11 = arith.constant 0 : index
    %17 = vector.load %arg21[%c2, %c0_10, %c0_11] : memref<3x384x32xf32, #tpu.memory_space<vmem>>, vector<1x384x32xf32>
    %18 = vector.shape_cast %17 : vector<1x384x32xf32> to vector<384x32xf32>
    %19 = vector.shape_cast %16 : vector<384x32xf32> to vector<1x384x32xf32>
    tpu.vector_store %arg21[%c2, %c0_10, %c0_11], %19 {strides = array<i32>} : memref<3x384x32xf32, #tpu.memory_space<vmem>>, vector<1x384x32xf32>,
    %c0_12 = arith.constant 0 : index
    %c0_13 = arith.constant 0 : index
    %20 = vector.load %arg7[%c0_12, %c0_13] : memref<128x1xf32, #tpu.memory_space<vmem>>, vector<128x1xf32>
    %c0_14 = arith.constant 0 : index
    %c0_15 = arith.constant 0 : index
    %21 = vector.load %arg0[%c0_14, %c0_15] : memref<128x32xf32, #tpu.memory_space<vmem>>, vector<128x32xf32>
    %22 = arith.truncf %21 : vector<128x32xf32> to vector<128x32xbf16>
    %c0_16 = arith.constant 0 : index
    %c0_17 = arith.constant 0 : index
    %c0_18 = arith.constant 0 : index
    %23 = vector.load %arg8[%c0_16, %c0_17, %c0_18] : memref<3x32x32xf32, #tpu.memory_space<vmem>>, vector<1x32x32xf32>
    %24 = vector.shape_cast %23 : vector<1x32x32xf32> to vector<32x32xf32>
    %25 = arith.truncf %24 : vector<32x32xf32> to vector<32x32xbf16>
    %cst_19 = arith.constant dense<0.000000e+00> : vector<128x32xf32>
    %26 = tpu.matmul %22, %25, %cst_19 {dimension_numbers = #tpu.dot_dimension_numbers<[1], [0], [0], [1], [0, 0, 1, 1], [], []>} : vector<128x32xbf16>, vector<32x32xbf16>, vector<128x32xf32> -> vector<128x32xf32>
    %c0_20 = arith.constant 0 : index
    %c0_21 = arith.constant 0 : index
    %c0_22 = arith.constant 0 : index
    %27 = vector.load %arg9[%c0_20, %c0_21, %c0_22] : memref<3x1x32xf32, #tpu.memory_space<vmem>>, vector<1x1x32xf32>
    %28 = vector.shape_cast %27 : vector<1x1x32xf32> to vector<1x32xf32>
    %29 = vector.broadcast %28 : vector<1x32xf32> to vector<128x32xf32>
    %30 = arith.addf %26, %29 : vector<128x32xf32>
    %31 = arith.truncf %30 : vector<128x32xf32> to vector<128x32xbf16>
    %cst_23 = arith.constant 0.000000e+00 : f32
    %32 = vector.broadcast %cst_23 : f32 to vector<128x32xf32>
    %c0_24 = arith.constant 0 : index
    %c0_25 = arith.constant 0 : index
    %33 = vector.load %arg22[%c0_24, %c0_25] : memref<128x32xf32, #tpu.memory_space<vmem>>, vector<128x32xf32>
    tpu.vector_store %arg22[%c0_24, %c0_25], %32 {strides = array<i32>} : memref<128x32xf32, #tpu.memory_space<vmem>>, vector<128x32xf32>,
    %c0_26 = arith.constant 0 : index
    %c0_27 = arith.constant 0 : index
    %34 = vector.load %arg3[%c0_26, %c0_27] : memref<384x1xi32, #tpu.memory_space<vmem>>, vector<128x1xi32>
    %c0_28 = arith.constant 0 : index
    %c0_29 = arith.constant 0 : index
    %35 = vector.load %arg4[%c0_28, %c0_29] : memref<1x384xi32, #tpu.memory_space<vmem>>, vector<1x128xi32>
    %c0_30 = arith.constant 0 : index
    %c0_31 = arith.constant 0 : index
    %36 = vector.load %arg6[%c0_30, %c0_31] : memref<384x1xf32, #tpu.memory_space<vmem>>, vector<128x1xf32>
    %37 = tpu.iota {dimensions = array<i32: 1>} : vector<128x128xi32>
    %38 = vector.broadcast %34 : vector<128x1xi32> to vector<128x128xi32>
    %39 = arith.cmpi eq, %37, %38 : vector<128x128xi32>
    %40 = arith.extui %39 : vector<128x128xi1> to vector<128x128xi32>
    %41 = arith.sitofp %40 : vector<128x128xi32> to vector<128x128xf32>
    %42 = arith.truncf %41 : vector<128x128xf32> to vector<128x128xbf16>
    %cst_32 = arith.constant dense<0.000000e+00> : vector<128x32xf32>
    %43 = tpu.matmul %42, %31, %cst_32 {dimension_numbers = #tpu.dot_dimension_numbers<[1], [0], [0], [1], [0, 0, 1, 1], [], []>} : vector<128x128xbf16>, vector<128x32xbf16>, vector<128x32xf32> -> vector<128x32xf32>
    %c0_33 = arith.constant 0 : index
    %c0_34 = arith.constant 0 : index
    %c0_35 = arith.constant 0 : index
    %44 = vector.load %arg21[%c0_33, %c0_34, %c0_35] : memref<3x384x32xf32, #tpu.memory_space<vmem>>, vector<1x128x32xf32>
    %45 = vector.shape_cast %44 : vector<1x128x32xf32> to vector<128x32xf32>
    %46 = arith.addf %43, %45 : vector<128x32xf32>
    %cst_36 = arith.constant 0.000000e+00 : f32
    %47 = vector.broadcast %cst_36 : f32 to vector<128x32xf32>
    %48 = arith.maximumf %46, %47 : vector<128x32xf32>
    %49 = vector.broadcast %36 : vector<128x1xf32> to vector<128x32xf32>
    %50 = arith.mulf %49, %48 : vector<128x32xf32>
    %51 = tpu.iota {dimensions = array<i32: 0>} : vector<128x128xi32>
    %52 = vector.broadcast %35 : vector<1x128xi32> to vector<128x128xi32>
    %53 = arith.cmpi eq, %51, %52 : vector<128x128xi32>
    %54 = arith.extui %53 : vector<128x128xi1> to vector<128x128xi32>
    %55 = arith.sitofp %54 : vector<128x128xi32> to vector<128x128xf32>
    %56 = arith.truncf %55 : vector<128x128xf32> to vector<128x128xbf16>
    %c0_37 = arith.constant 0 : index
    %c0_38 = arith.constant 0 : index
    %57 = vector.load %arg22[%c0_37, %c0_38] : memref<128x32xf32, #tpu.memory_space<vmem>>, vector<128x32xf32>
    %58 = arith.truncf %50 : vector<128x32xf32> to vector<128x32xbf16>
    %cst_39 = arith.constant dense<0.000000e+00> : vector<128x32xf32>
    %59 = tpu.matmul %56, %58, %cst_39 {dimension_numbers = #tpu.dot_dimension_numbers<[1], [0], [0], [1], [0, 0, 1, 1], [], []>} : vector<128x128xbf16>, vector<128x32xbf16>, vector<128x32xf32> -> vector<128x32xf32>
    %60 = arith.addf %57, %59 : vector<128x32xf32>
    %c0_40 = arith.constant 0 : index
    %c0_41 = arith.constant 0 : index
    %61 = vector.load %arg22[%c0_40, %c0_41] : memref<128x32xf32, #tpu.memory_space<vmem>>, vector<128x32xf32>
    tpu.vector_store %arg22[%c0_40, %c0_41], %60 {strides = array<i32>} : memref<128x32xf32, #tpu.memory_space<vmem>>, vector<128x32xf32>,
    %c128 = arith.constant 128 : index
    %c0_42 = arith.constant 0 : index
    %62 = vector.load %arg3[%c128, %c0_42] : memref<384x1xi32, #tpu.memory_space<vmem>>, vector<128x1xi32>
    %c0_43 = arith.constant 0 : index
    %c128_44 = arith.constant 128 : index
    %63 = vector.load %arg4[%c0_43, %c128_44] : memref<1x384xi32, #tpu.memory_space<vmem>>, vector<1x128xi32>
    %c128_45 = arith.constant 128 : index
    %c0_46 = arith.constant 0 : index
    %64 = vector.load %arg6[%c128_45, %c0_46] : memref<384x1xf32, #tpu.memory_space<vmem>>, vector<128x1xf32>
    %65 = tpu.iota {dimensions = array<i32: 1>} : vector<128x128xi32>
    %66 = vector.broadcast %62 : vector<128x1xi32> to vector<128x128xi32>
    %67 = arith.cmpi eq, %65, %66 : vector<128x128xi32>
    %68 = arith.extui %67 : vector<128x128xi1> to vector<128x128xi32>
    %69 = arith.sitofp %68 : vector<128x128xi32> to vector<128x128xf32>
    %70 = arith.truncf %69 : vector<128x128xf32> to vector<128x128xbf16>
    %cst_47 = arith.constant dense<0.000000e+00> : vector<128x32xf32>
    %71 = tpu.matmul %70, %31, %cst_47 {dimension_numbers = #tpu.dot_dimension_numbers<[1], [0], [0], [1], [0, 0, 1, 1], [], []>} : vector<128x128xbf16>, vector<128x32xbf16>, vector<128x32xf32> -> vector<128x32xf32>
    %c0_48 = arith.constant 0 : index
    %c128_49 = arith.constant 128 : index
    %c0_50 = arith.constant 0 : index
    %72 = vector.load %arg21[%c0_48, %c128_49, %c0_50] : memref<3x384x32xf32, #tpu.memory_space<vmem>>, vector<1x128x32xf32>
    %73 = vector.shape_cast %72 : vector<1x128x32xf32> to vector<128x32xf32>
    %74 = arith.addf %71, %73 : vector<128x32xf32>
    %cst_51 = arith.constant 0.000000e+00 : f32
    %75 = vector.broadcast %cst_51 : f32 to vector<128x32xf32>
    %76 = arith.maximumf %74, %75 : vector<128x32xf32>
    %77 = vector.broadcast %64 : vector<128x1xf32> to vector<128x32xf32>
    %78 = arith.mulf %77, %76 : vector<128x32xf32>
    %79 = tpu.iota {dimensions = array<i32: 0>} : vector<128x128xi32>
    %80 = vector.broadcast %63 : vector<1x128xi32> to vector<128x128xi32>
    %81 = arith.cmpi eq, %79, %80 : vector<128x128xi32>
    %82 = arith.extui %81 : vector<128x128xi1> to vector<128x128xi32>
    %83 = arith.sitofp %82 : vector<128x128xi32> to vector<128x128xf32>
    %84 = arith.truncf %83 : vector<128x128xf32> to vector<128x128xbf16>
    %c0_52 = arith.constant 0 : index
    %c0_53 = arith.constant 0 : index
    %85 = vector.load %arg22[%c0_52, %c0_53] : memref<128x32xf32, #tpu.memory_space<vmem>>, vector<128x32xf32>
    %86 = arith.truncf %78 : vector<128x32xf32> to vector<128x32xbf16>
    %cst_54 = arith.constant dense<0.000000e+00> : vector<128x32xf32>
    %87 = tpu.matmul %84, %86, %cst_54 {dimension_numbers = #tpu.dot_dimension_numbers<[1], [0], [0], [1], [0, 0, 1, 1], [], []>} : vector<128x128xbf16>, vector<128x32xbf16>, vector<128x32xf32> -> vector<128x32xf32>
    %88 = arith.addf %85, %87 : vector<128x32xf32>
    %c0_55 = arith.constant 0 : index
    %c0_56 = arith.constant 0 : index
    %89 = vector.load %arg22[%c0_55, %c0_56] : memref<128x32xf32, #tpu.memory_space<vmem>>, vector<128x32xf32>
    tpu.vector_store %arg22[%c0_55, %c0_56], %88 {strides = array<i32>} : memref<128x32xf32, #tpu.memory_space<vmem>>, vector<128x32xf32>,
    %c256 = arith.constant 256 : index
    %c0_57 = arith.constant 0 : index
    %90 = vector.load %arg3[%c256, %c0_57] : memref<384x1xi32, #tpu.memory_space<vmem>>, vector<128x1xi32>
    %c0_58 = arith.constant 0 : index
    %c256_59 = arith.constant 256 : index
    %91 = vector.load %arg4[%c0_58, %c256_59] : memref<1x384xi32, #tpu.memory_space<vmem>>, vector<1x128xi32>
    %c256_60 = arith.constant 256 : index
    %c0_61 = arith.constant 0 : index
    %92 = vector.load %arg6[%c256_60, %c0_61] : memref<384x1xf32, #tpu.memory_space<vmem>>, vector<128x1xf32>
    %93 = tpu.iota {dimensions = array<i32: 1>} : vector<128x128xi32>
    %94 = vector.broadcast %90 : vector<128x1xi32> to vector<128x128xi32>
    %95 = arith.cmpi eq, %93, %94 : vector<128x128xi32>
    %96 = arith.extui %95 : vector<128x128xi1> to vector<128x128xi32>
    %97 = arith.sitofp %96 : vector<128x128xi32> to vector<128x128xf32>
    %98 = arith.truncf %97 : vector<128x128xf32> to vector<128x128xbf16>
    %cst_62 = arith.constant dense<0.000000e+00> : vector<128x32xf32>
    %99 = tpu.matmul %98, %31, %cst_62 {dimension_numbers = #tpu.dot_dimension_numbers<[1], [0], [0], [1], [0, 0, 1, 1], [], []>} : vector<128x128xbf16>, vector<128x32xbf16>, vector<128x32xf32> -> vector<128x32xf32>
    %c0_63 = arith.constant 0 : index
    %c256_64 = arith.constant 256 : index
    %c0_65 = arith.constant 0 : index
    %100 = vector.load %arg21[%c0_63, %c256_64, %c0_65] : memref<3x384x32xf32, #tpu.memory_space<vmem>>, vector<1x128x32xf32>
    %101 = vector.shape_cast %100 : vector<1x128x32xf32> to vector<128x32xf32>
    %102 = arith.addf %99, %101 : vector<128x32xf32>
    %cst_66 = arith.constant 0.000000e+00 : f32
    %103 = vector.broadcast %cst_66 : f32 to vector<128x32xf32>
    %104 = arith.maximumf %102, %103 : vector<128x32xf32>
    %105 = vector.broadcast %92 : vector<128x1xf32> to vector<128x32xf32>
    %106 = arith.mulf %105, %104 : vector<128x32xf32>
    %107 = tpu.iota {dimensions = array<i32: 0>} : vector<128x128xi32>
    %108 = vector.broadcast %91 : vector<1x128xi32> to vector<128x128xi32>
    %109 = arith.cmpi eq, %107, %108 : vector<128x128xi32>
    %110 = arith.extui %109 : vector<128x128xi1> to vector<128x128xi32>
    %111 = arith.sitofp %110 : vector<128x128xi32> to vector<128x128xf32>
    %112 = arith.truncf %111 : vector<128x128xf32> to vector<128x128xbf16>
    %c0_67 = arith.constant 0 : index
    %c0_68 = arith.constant 0 : index
    %113 = vector.load %arg22[%c0_67, %c0_68] : memref<128x32xf32, #tpu.memory_space<vmem>>, vector<128x32xf32>
    %114 = arith.truncf %106 : vector<128x32xf32> to vector<128x32xbf16>
    %cst_69 = arith.constant dense<0.000000e+00> : vector<128x32xf32>
    %115 = tpu.matmul %112, %114, %cst_69 {dimension_numbers = #tpu.dot_dimension_numbers<[1], [0], [0], [1], [0, 0, 1, 1], [], []>} : vector<128x128xbf16>, vector<128x32xbf16>, vector<128x32xf32> -> vector<128x32xf32>
    %116 = arith.addf %113, %115 : vector<128x32xf32>
    %c0_70 = arith.constant 0 : index
    %c0_71 = arith.constant 0 : index
    %117 = vector.load %arg22[%c0_70, %c0_71] : memref<128x32xf32, #tpu.memory_space<vmem>>, vector<128x32xf32>
    tpu.vector_store %arg22[%c0_70, %c0_71], %116 {strides = array<i32>} : memref<128x32xf32, #tpu.memory_space<vmem>>, vector<128x32xf32>,
    %c0_72 = arith.constant 0 : index
    %c0_73 = arith.constant 0 : index
    %c0_74 = arith.constant 0 : index
    %118 = vector.load %arg12[%c0_72, %c0_73, %c0_74] : memref<3x1x32xf32, #tpu.memory_space<vmem>>, vector<1x1x32xf32>
    %119 = vector.shape_cast %118 : vector<1x1x32xf32> to vector<1x32xf32>
    %120 = vector.broadcast %119 : vector<1x32xf32> to vector<128x32xf32>
    %121 = arith.addf %30, %120 : vector<128x32xf32>
    %cst_75 = arith.constant 0.000000e+00 : f32
    %122 = vector.broadcast %cst_75 : f32 to vector<128x32xf32>
    %123 = arith.maximumf %121, %122 : vector<128x32xf32>
    %124 = vector.broadcast %20 : vector<128x1xf32> to vector<128x32xf32>
    %125 = arith.mulf %123, %124 : vector<128x32xf32>
    %c0_76 = arith.constant 0 : index
    %c0_77 = arith.constant 0 : index
    %126 = vector.load %arg22[%c0_76, %c0_77] : memref<128x32xf32, #tpu.memory_space<vmem>>, vector<128x32xf32>
    %127 = arith.addf %126, %125 : vector<128x32xf32>
    %cst_78 = arith.constant 0.000000e+00 : f32
    %128 = vector.broadcast %cst_78 : f32 to vector<128x32xf32>
    %129 = arith.maximumf %127, %128 : vector<128x32xf32>
    %130 = arith.truncf %129 : vector<128x32xf32> to vector<128x32xbf16>
    %c1_79 = arith.constant 1 : index
    %c0_80 = arith.constant 0 : index
    %c0_81 = arith.constant 0 : index
    %131 = vector.load %arg8[%c1_79, %c0_80, %c0_81] : memref<3x32x32xf32, #tpu.memory_space<vmem>>, vector<1x32x32xf32>
    %132 = vector.shape_cast %131 : vector<1x32x32xf32> to vector<32x32xf32>
    %133 = arith.truncf %132 : vector<32x32xf32> to vector<32x32xbf16>
    %cst_82 = arith.constant dense<0.000000e+00> : vector<128x32xf32>
    %134 = tpu.matmul %130, %133, %cst_82 {dimension_numbers = #tpu.dot_dimension_numbers<[1], [0], [0], [1], [0, 0, 1, 1], [], []>} : vector<128x32xbf16>, vector<32x32xbf16>, vector<128x32xf32> -> vector<128x32xf32>
    %c1_83 = arith.constant 1 : index
    %c0_84 = arith.constant 0 : index
    %c0_85 = arith.constant 0 : index
    %135 = vector.load %arg9[%c1_83, %c0_84, %c0_85] : memref<3x1x32xf32, #tpu.memory_space<vmem>>, vector<1x1x32xf32>
    %136 = vector.shape_cast %135 : vector<1x1x32xf32> to vector<1x32xf32>
    %137 = vector.broadcast %136 : vector<1x32xf32> to vector<128x32xf32>
    %138 = arith.addf %134, %137 : vector<128x32xf32>
    %139 = arith.truncf %138 : vector<128x32xf32> to vector<128x32xbf16>
    %cst_86 = arith.constant 0.000000e+00 : f32
    %140 = vector.broadcast %cst_86 : f32 to vector<128x32xf32>
    %c0_87 = arith.constant 0 : index
    %c0_88 = arith.constant 0 : index
    %141 = vector.load %arg22[%c0_87, %c0_88] : memref<128x32xf32, #tpu.memory_space<vmem>>, vector<128x32xf32>
    tpu.vector_store %arg22[%c0_87, %c0_88], %140 {strides = array<i32>} : memref<128x32xf32, #tpu.memory_space<vmem>>, vector<128x32xf32>,
    %c0_89 = arith.constant 0 : index
    %c0_90 = arith.constant 0 : index
    %142 = vector.load %arg3[%c0_89, %c0_90] : memref<384x1xi32, #tpu.memory_space<vmem>>, vector<128x1xi32>
    %c0_91 = arith.constant 0 : index
    %c0_92 = arith.constant 0 : index
    %143 = vector.load %arg4[%c0_91, %c0_92] : memref<1x384xi32, #tpu.memory_space<vmem>>, vector<1x128xi32>
    %c0_93 = arith.constant 0 : index
    %c0_94 = arith.constant 0 : index
    %144 = vector.load %arg6[%c0_93, %c0_94] : memref<384x1xf32, #tpu.memory_space<vmem>>, vector<128x1xf32>
    %145 = tpu.iota {dimensions = array<i32: 1>} : vector<128x128xi32>
    %146 = vector.broadcast %142 : vector<128x1xi32> to vector<128x128xi32>
    %147 = arith.cmpi eq, %145, %146 : vector<128x128xi32>
    %148 = arith.extui %147 : vector<128x128xi1> to vector<128x128xi32>
    %149 = arith.sitofp %148 : vector<128x128xi32> to vector<128x128xf32>
    %150 = arith.truncf %149 : vector<128x128xf32> to vector<128x128xbf16>
    %cst_95 = arith.constant dense<0.000000e+00> : vector<128x32xf32>
    %151 = tpu.matmul %150, %139, %cst_95 {dimension_numbers = #tpu.dot_dimension_numbers<[1], [0], [0], [1], [0, 0, 1, 1], [], []>} : vector<128x128xbf16>, vector<128x32xbf16>, vector<128x32xf32> -> vector<128x32xf32>
    %c1_96 = arith.constant 1 : index
    %c0_97 = arith.constant 0 : index
    %c0_98 = arith.constant 0 : index
    %152 = vector.load %arg21[%c1_96, %c0_97, %c0_98] : memref<3x384x32xf32, #tpu.memory_space<vmem>>, vector<1x128x32xf32>
    %153 = vector.shape_cast %152 : vector<1x128x32xf32> to vector<128x32xf32>
    %154 = arith.addf %151, %153 : vector<128x32xf32>
    %cst_99 = arith.constant 0.000000e+00 : f32
    %155 = vector.broadcast %cst_99 : f32 to vector<128x32xf32>
    %156 = arith.maximumf %154, %155 : vector<128x32xf32>
    %157 = vector.broadcast %144 : vector<128x1xf32> to vector<128x32xf32>
    %158 = arith.mulf %157, %156 : vector<128x32xf32>
    %159 = tpu.iota {dimensions = array<i32: 0>} : vector<128x128xi32>
    %160 = vector.broadcast %143 : vector<1x128xi32> to vector<128x128xi32>
    %161 = arith.cmpi eq, %159, %160 : vector<128x128xi32>
    %162 = arith.extui %161 : vector<128x128xi1> to vector<128x128xi32>
    %163 = arith.sitofp %162 : vector<128x128xi32> to vector<128x128xf32>
    %164 = arith.truncf %163 : vector<128x128xf32> to vector<128x128xbf16>
    %c0_100 = arith.constant 0 : index
    %c0_101 = arith.constant 0 : index
    %165 = vector.load %arg22[%c0_100, %c0_101] : memref<128x32xf32, #tpu.memory_space<vmem>>, vector<128x32xf32>
    %166 = arith.truncf %158 : vector<128x32xf32> to vector<128x32xbf16>
    %cst_102 = arith.constant dense<0.000000e+00> : vector<128x32xf32>
    %167 = tpu.matmul %164, %166, %cst_102 {dimension_numbers = #tpu.dot_dimension_numbers<[1], [0], [0], [1], [0, 0, 1, 1], [], []>} : vector<128x128xbf16>, vector<128x32xbf16>, vector<128x32xf32> -> vector<128x32xf32>
    %168 = arith.addf %165, %167 : vector<128x32xf32>
    %c0_103 = arith.constant 0 : index
    %c0_104 = arith.constant 0 : index
    %169 = vector.load %arg22[%c0_103, %c0_104] : memref<128x32xf32, #tpu.memory_space<vmem>>, vector<128x32xf32>
    tpu.vector_store %arg22[%c0_103, %c0_104], %168 {strides = array<i32>} : memref<128x32xf32, #tpu.memory_space<vmem>>, vector<128x32xf32>,
    %c128_105 = arith.constant 128 : index
    %c0_106 = arith.constant 0 : index
    %170 = vector.load %arg3[%c128_105, %c0_106] : memref<384x1xi32, #tpu.memory_space<vmem>>, vector<128x1xi32>
    %c0_107 = arith.constant 0 : index
    %c128_108 = arith.constant 128 : index
    %171 = vector.load %arg4[%c0_107, %c128_108] : memref<1x384xi32, #tpu.memory_space<vmem>>, vector<1x128xi32>
    %c128_109 = arith.constant 128 : index
    %c0_110 = arith.constant 0 : index
    %172 = vector.load %arg6[%c128_109, %c0_110] : memref<384x1xf32, #tpu.memory_space<vmem>>, vector<128x1xf32>
    %173 = tpu.iota {dimensions = array<i32: 1>} : vector<128x128xi32>
    %174 = vector.broadcast %170 : vector<128x1xi32> to vector<128x128xi32>
    %175 = arith.cmpi eq, %173, %174 : vector<128x128xi32>
    %176 = arith.extui %175 : vector<128x128xi1> to vector<128x128xi32>
    %177 = arith.sitofp %176 : vector<128x128xi32> to vector<128x128xf32>
    %178 = arith.truncf %177 : vector<128x128xf32> to vector<128x128xbf16>
    %cst_111 = arith.constant dense<0.000000e+00> : vector<128x32xf32>
    %179 = tpu.matmul %178, %139, %cst_111 {dimension_numbers = #tpu.dot_dimension_numbers<[1], [0], [0], [1], [0, 0, 1, 1], [], []>} : vector<128x128xbf16>, vector<128x32xbf16>, vector<128x32xf32> -> vector<128x32xf32>
    %c1_112 = arith.constant 1 : index
    %c128_113 = arith.constant 128 : index
    %c0_114 = arith.constant 0 : index
    %180 = vector.load %arg21[%c1_112, %c128_113, %c0_114] : memref<3x384x32xf32, #tpu.memory_space<vmem>>, vector<1x128x32xf32>
    %181 = vector.shape_cast %180 : vector<1x128x32xf32> to vector<128x32xf32>
    %182 = arith.addf %179, %181 : vector<128x32xf32>
    %cst_115 = arith.constant 0.000000e+00 : f32
    %183 = vector.broadcast %cst_115 : f32 to vector<128x32xf32>
    %184 = arith.maximumf %182, %183 : vector<128x32xf32>
    %185 = vector.broadcast %172 : vector<128x1xf32> to vector<128x32xf32>
    %186 = arith.mulf %185, %184 : vector<128x32xf32>
    %187 = tpu.iota {dimensions = array<i32: 0>} : vector<128x128xi32>
    %188 = vector.broadcast %171 : vector<1x128xi32> to vector<128x128xi32>
    %189 = arith.cmpi eq, %187, %188 : vector<128x128xi32>
    %190 = arith.extui %189 : vector<128x128xi1> to vector<128x128xi32>
    %191 = arith.sitofp %190 : vector<128x128xi32> to vector<128x128xf32>
    %192 = arith.truncf %191 : vector<128x128xf32> to vector<128x128xbf16>
    %c0_116 = arith.constant 0 : index
    %c0_117 = arith.constant 0 : index
    %193 = vector.load %arg22[%c0_116, %c0_117] : memref<128x32xf32, #tpu.memory_space<vmem>>, vector<128x32xf32>
    %194 = arith.truncf %186 : vector<128x32xf32> to vector<128x32xbf16>
    %cst_118 = arith.constant dense<0.000000e+00> : vector<128x32xf32>
    %195 = tpu.matmul %192, %194, %cst_118 {dimension_numbers = #tpu.dot_dimension_numbers<[1], [0], [0], [1], [0, 0, 1, 1], [], []>} : vector<128x128xbf16>, vector<128x32xbf16>, vector<128x32xf32> -> vector<128x32xf32>
    %196 = arith.addf %193, %195 : vector<128x32xf32>
    %c0_119 = arith.constant 0 : index
    %c0_120 = arith.constant 0 : index
    %197 = vector.load %arg22[%c0_119, %c0_120] : memref<128x32xf32, #tpu.memory_space<vmem>>, vector<128x32xf32>
    tpu.vector_store %arg22[%c0_119, %c0_120], %196 {strides = array<i32>} : memref<128x32xf32, #tpu.memory_space<vmem>>, vector<128x32xf32>,
    %c256_121 = arith.constant 256 : index
    %c0_122 = arith.constant 0 : index
    %198 = vector.load %arg3[%c256_121, %c0_122] : memref<384x1xi32, #tpu.memory_space<vmem>>, vector<128x1xi32>
    %c0_123 = arith.constant 0 : index
    %c256_124 = arith.constant 256 : index
    %199 = vector.load %arg4[%c0_123, %c256_124] : memref<1x384xi32, #tpu.memory_space<vmem>>, vector<1x128xi32>
    %c256_125 = arith.constant 256 : index
    %c0_126 = arith.constant 0 : index
    %200 = vector.load %arg6[%c256_125, %c0_126] : memref<384x1xf32, #tpu.memory_space<vmem>>, vector<128x1xf32>
    %201 = tpu.iota {dimensions = array<i32: 1>} : vector<128x128xi32>
    %202 = vector.broadcast %198 : vector<128x1xi32> to vector<128x128xi32>
    %203 = arith.cmpi eq, %201, %202 : vector<128x128xi32>
    %204 = arith.extui %203 : vector<128x128xi1> to vector<128x128xi32>
    %205 = arith.sitofp %204 : vector<128x128xi32> to vector<128x128xf32>
    %206 = arith.truncf %205 : vector<128x128xf32> to vector<128x128xbf16>
    %cst_127 = arith.constant dense<0.000000e+00> : vector<128x32xf32>
    %207 = tpu.matmul %206, %139, %cst_127 {dimension_numbers = #tpu.dot_dimension_numbers<[1], [0], [0], [1], [0, 0, 1, 1], [], []>} : vector<128x128xbf16>, vector<128x32xbf16>, vector<128x32xf32> -> vector<128x32xf32>
    %c1_128 = arith.constant 1 : index
    %c256_129 = arith.constant 256 : index
    %c0_130 = arith.constant 0 : index
    %208 = vector.load %arg21[%c1_128, %c256_129, %c0_130] : memref<3x384x32xf32, #tpu.memory_space<vmem>>, vector<1x128x32xf32>
    %209 = vector.shape_cast %208 : vector<1x128x32xf32> to vector<128x32xf32>
    %210 = arith.addf %207, %209 : vector<128x32xf32>
    %cst_131 = arith.constant 0.000000e+00 : f32
    %211 = vector.broadcast %cst_131 : f32 to vector<128x32xf32>
    %212 = arith.maximumf %210, %211 : vector<128x32xf32>
    %213 = vector.broadcast %200 : vector<128x1xf32> to vector<128x32xf32>
    %214 = arith.mulf %213, %212 : vector<128x32xf32>
    %215 = tpu.iota {dimensions = array<i32: 0>} : vector<128x128xi32>
    %216 = vector.broadcast %199 : vector<1x128xi32> to vector<128x128xi32>
    %217 = arith.cmpi eq, %215, %216 : vector<128x128xi32>
    %218 = arith.extui %217 : vector<128x128xi1> to vector<128x128xi32>
    %219 = arith.sitofp %218 : vector<128x128xi32> to vector<128x128xf32>
    %220 = arith.truncf %219 : vector<128x128xf32> to vector<128x128xbf16>
    %c0_132 = arith.constant 0 : index
    %c0_133 = arith.constant 0 : index
    %221 = vector.load %arg22[%c0_132, %c0_133] : memref<128x32xf32, #tpu.memory_space<vmem>>, vector<128x32xf32>
    %222 = arith.truncf %214 : vector<128x32xf32> to vector<128x32xbf16>
    %cst_134 = arith.constant dense<0.000000e+00> : vector<128x32xf32>
    %223 = tpu.matmul %220, %222, %cst_134 {dimension_numbers = #tpu.dot_dimension_numbers<[1], [0], [0], [1], [0, 0, 1, 1], [], []>} : vector<128x128xbf16>, vector<128x32xbf16>, vector<128x32xf32> -> vector<128x32xf32>
    %224 = arith.addf %221, %223 : vector<128x32xf32>
    %c0_135 = arith.constant 0 : index
    %c0_136 = arith.constant 0 : index
    %225 = vector.load %arg22[%c0_135, %c0_136] : memref<128x32xf32, #tpu.memory_space<vmem>>, vector<128x32xf32>
    tpu.vector_store %arg22[%c0_135, %c0_136], %224 {strides = array<i32>} : memref<128x32xf32, #tpu.memory_space<vmem>>, vector<128x32xf32>,
    %c1_137 = arith.constant 1 : index
    %c0_138 = arith.constant 0 : index
    %c0_139 = arith.constant 0 : index
    %226 = vector.load %arg12[%c1_137, %c0_138, %c0_139] : memref<3x1x32xf32, #tpu.memory_space<vmem>>, vector<1x1x32xf32>
    %227 = vector.shape_cast %226 : vector<1x1x32xf32> to vector<1x32xf32>
    %228 = vector.broadcast %227 : vector<1x32xf32> to vector<128x32xf32>
    %229 = arith.addf %138, %228 : vector<128x32xf32>
    %cst_140 = arith.constant 0.000000e+00 : f32
    %230 = vector.broadcast %cst_140 : f32 to vector<128x32xf32>
    %231 = arith.maximumf %229, %230 : vector<128x32xf32>
    %232 = vector.broadcast %20 : vector<128x1xf32> to vector<128x32xf32>
    %233 = arith.mulf %231, %232 : vector<128x32xf32>
    %c0_141 = arith.constant 0 : index
    %c0_142 = arith.constant 0 : index
    %234 = vector.load %arg22[%c0_141, %c0_142] : memref<128x32xf32, #tpu.memory_space<vmem>>, vector<128x32xf32>
    %235 = arith.addf %234, %233 : vector<128x32xf32>
    %cst_143 = arith.constant 0.000000e+00 : f32
    %236 = vector.broadcast %cst_143 : f32 to vector<128x32xf32>
    %237 = arith.maximumf %235, %236 : vector<128x32xf32>
    %238 = arith.truncf %237 : vector<128x32xf32> to vector<128x32xbf16>
    %c2_144 = arith.constant 2 : index
    %c0_145 = arith.constant 0 : index
    %c0_146 = arith.constant 0 : index
    %239 = vector.load %arg8[%c2_144, %c0_145, %c0_146] : memref<3x32x32xf32, #tpu.memory_space<vmem>>, vector<1x32x32xf32>
    %240 = vector.shape_cast %239 : vector<1x32x32xf32> to vector<32x32xf32>
    %241 = arith.truncf %240 : vector<32x32xf32> to vector<32x32xbf16>
    %cst_147 = arith.constant dense<0.000000e+00> : vector<128x32xf32>
    %242 = tpu.matmul %238, %241, %cst_147 {dimension_numbers = #tpu.dot_dimension_numbers<[1], [0], [0], [1], [0, 0, 1, 1], [], []>} : vector<128x32xbf16>, vector<32x32xbf16>, vector<128x32xf32> -> vector<128x32xf32>
    %c2_148 = arith.constant 2 : index
    %c0_149 = arith.constant 0 : index
    %c0_150 = arith.constant 0 : index
    %243 = vector.load %arg9[%c2_148, %c0_149, %c0_150] : memref<3x1x32xf32, #tpu.memory_space<vmem>>, vector<1x1x32xf32>
    %244 = vector.shape_cast %243 : vector<1x1x32xf32> to vector<1x32xf32>
    %245 = vector.broadcast %244 : vector<1x32xf32> to vector<128x32xf32>
    %246 = arith.addf %242, %245 : vector<128x32xf32>
    %247 = arith.truncf %246 : vector<128x32xf32> to vector<128x32xbf16>
    %cst_151 = arith.constant 0.000000e+00 : f32
    %248 = vector.broadcast %cst_151 : f32 to vector<128x32xf32>
    %c0_152 = arith.constant 0 : index
    %c0_153 = arith.constant 0 : index
    %249 = vector.load %arg22[%c0_152, %c0_153] : memref<128x32xf32, #tpu.memory_space<vmem>>, vector<128x32xf32>
    tpu.vector_store %arg22[%c0_152, %c0_153], %248 {strides = array<i32>} : memref<128x32xf32, #tpu.memory_space<vmem>>, vector<128x32xf32>,
    %c0_154 = arith.constant 0 : index
    %c0_155 = arith.constant 0 : index
    %250 = vector.load %arg3[%c0_154, %c0_155] : memref<384x1xi32, #tpu.memory_space<vmem>>, vector<128x1xi32>
    %c0_156 = arith.constant 0 : index
    %c0_157 = arith.constant 0 : index
    %251 = vector.load %arg4[%c0_156, %c0_157] : memref<1x384xi32, #tpu.memory_space<vmem>>, vector<1x128xi32>
    %c0_158 = arith.constant 0 : index
    %c0_159 = arith.constant 0 : index
    %252 = vector.load %arg6[%c0_158, %c0_159] : memref<384x1xf32, #tpu.memory_space<vmem>>, vector<128x1xf32>
    %253 = tpu.iota {dimensions = array<i32: 1>} : vector<128x128xi32>
    %254 = vector.broadcast %250 : vector<128x1xi32> to vector<128x128xi32>
    %255 = arith.cmpi eq, %253, %254 : vector<128x128xi32>
    %256 = arith.extui %255 : vector<128x128xi1> to vector<128x128xi32>
    %257 = arith.sitofp %256 : vector<128x128xi32> to vector<128x128xf32>
    %258 = arith.truncf %257 : vector<128x128xf32> to vector<128x128xbf16>
    %cst_160 = arith.constant dense<0.000000e+00> : vector<128x32xf32>
    %259 = tpu.matmul %258, %247, %cst_160 {dimension_numbers = #tpu.dot_dimension_numbers<[1], [0], [0], [1], [0, 0, 1, 1], [], []>} : vector<128x128xbf16>, vector<128x32xbf16>, vector<128x32xf32> -> vector<128x32xf32>
    %c2_161 = arith.constant 2 : index
    %c0_162 = arith.constant 0 : index
    %c0_163 = arith.constant 0 : index
    %260 = vector.load %arg21[%c2_161, %c0_162, %c0_163] : memref<3x384x32xf32, #tpu.memory_space<vmem>>, vector<1x128x32xf32>
    %261 = vector.shape_cast %260 : vector<1x128x32xf32> to vector<128x32xf32>
    %262 = arith.addf %259, %261 : vector<128x32xf32>
    %cst_164 = arith.constant 0.000000e+00 : f32
    %263 = vector.broadcast %cst_164 : f32 to vector<128x32xf32>
    %264 = arith.maximumf %262, %263 : vector<128x32xf32>
    %265 = vector.broadcast %252 : vector<128x1xf32> to vector<128x32xf32>
    %266 = arith.mulf %265, %264 : vector<128x32xf32>
    %267 = tpu.iota {dimensions = array<i32: 0>} : vector<128x128xi32>
    %268 = vector.broadcast %251 : vector<1x128xi32> to vector<128x128xi32>
    %269 = arith.cmpi eq, %267, %268 : vector<128x128xi32>
    %270 = arith.extui %269 : vector<128x128xi1> to vector<128x128xi32>
    %271 = arith.sitofp %270 : vector<128x128xi32> to vector<128x128xf32>
    %272 = arith.truncf %271 : vector<128x128xf32> to vector<128x128xbf16>
    %c0_165 = arith.constant 0 : index
    %c0_166 = arith.constant 0 : index
    %273 = vector.load %arg22[%c0_165, %c0_166] : memref<128x32xf32, #tpu.memory_space<vmem>>, vector<128x32xf32>
    %274 = arith.truncf %266 : vector<128x32xf32> to vector<128x32xbf16>
    %cst_167 = arith.constant dense<0.000000e+00> : vector<128x32xf32>
    %275 = tpu.matmul %272, %274, %cst_167 {dimension_numbers = #tpu.dot_dimension_numbers<[1], [0], [0], [1], [0, 0, 1, 1], [], []>} : vector<128x128xbf16>, vector<128x32xbf16>, vector<128x32xf32> -> vector<128x32xf32>
    %276 = arith.addf %273, %275 : vector<128x32xf32>
    %c0_168 = arith.constant 0 : index
    %c0_169 = arith.constant 0 : index
    %277 = vector.load %arg22[%c0_168, %c0_169] : memref<128x32xf32, #tpu.memory_space<vmem>>, vector<128x32xf32>
    tpu.vector_store %arg22[%c0_168, %c0_169], %276 {strides = array<i32>} : memref<128x32xf32, #tpu.memory_space<vmem>>, vector<128x32xf32>,
    %c128_170 = arith.constant 128 : index
    %c0_171 = arith.constant 0 : index
    %278 = vector.load %arg3[%c128_170, %c0_171] : memref<384x1xi32, #tpu.memory_space<vmem>>, vector<128x1xi32>
    %c0_172 = arith.constant 0 : index
    %c128_173 = arith.constant 128 : index
    %279 = vector.load %arg4[%c0_172, %c128_173] : memref<1x384xi32, #tpu.memory_space<vmem>>, vector<1x128xi32>
    %c128_174 = arith.constant 128 : index
    %c0_175 = arith.constant 0 : index
    %280 = vector.load %arg6[%c128_174, %c0_175] : memref<384x1xf32, #tpu.memory_space<vmem>>, vector<128x1xf32>
    %281 = tpu.iota {dimensions = array<i32: 1>} : vector<128x128xi32>
    %282 = vector.broadcast %278 : vector<128x1xi32> to vector<128x128xi32>
    %283 = arith.cmpi eq, %281, %282 : vector<128x128xi32>
    %284 = arith.extui %283 : vector<128x128xi1> to vector<128x128xi32>
    %285 = arith.sitofp %284 : vector<128x128xi32> to vector<128x128xf32>
    %286 = arith.truncf %285 : vector<128x128xf32> to vector<128x128xbf16>
    %cst_176 = arith.constant dense<0.000000e+00> : vector<128x32xf32>
    %287 = tpu.matmul %286, %247, %cst_176 {dimension_numbers = #tpu.dot_dimension_numbers<[1], [0], [0], [1], [0, 0, 1, 1], [], []>} : vector<128x128xbf16>, vector<128x32xbf16>, vector<128x32xf32> -> vector<128x32xf32>
    %c2_177 = arith.constant 2 : index
    %c128_178 = arith.constant 128 : index
    %c0_179 = arith.constant 0 : index
    %288 = vector.load %arg21[%c2_177, %c128_178, %c0_179] : memref<3x384x32xf32, #tpu.memory_space<vmem>>, vector<1x128x32xf32>
    %289 = vector.shape_cast %288 : vector<1x128x32xf32> to vector<128x32xf32>
    %290 = arith.addf %287, %289 : vector<128x32xf32>
    %cst_180 = arith.constant 0.000000e+00 : f32
    %291 = vector.broadcast %cst_180 : f32 to vector<128x32xf32>
    %292 = arith.maximumf %290, %291 : vector<128x32xf32>
    %293 = vector.broadcast %280 : vector<128x1xf32> to vector<128x32xf32>
    %294 = arith.mulf %293, %292 : vector<128x32xf32>
    %295 = tpu.iota {dimensions = array<i32: 0>} : vector<128x128xi32>
    %296 = vector.broadcast %279 : vector<1x128xi32> to vector<128x128xi32>
    %297 = arith.cmpi eq, %295, %296 : vector<128x128xi32>
    %298 = arith.extui %297 : vector<128x128xi1> to vector<128x128xi32>
    %299 = arith.sitofp %298 : vector<128x128xi32> to vector<128x128xf32>
    %300 = arith.truncf %299 : vector<128x128xf32> to vector<128x128xbf16>
    %c0_181 = arith.constant 0 : index
    %c0_182 = arith.constant 0 : index
    %301 = vector.load %arg22[%c0_181, %c0_182] : memref<128x32xf32, #tpu.memory_space<vmem>>, vector<128x32xf32>
    %302 = arith.truncf %294 : vector<128x32xf32> to vector<128x32xbf16>
    %cst_183 = arith.constant dense<0.000000e+00> : vector<128x32xf32>
    %303 = tpu.matmul %300, %302, %cst_183 {dimension_numbers = #tpu.dot_dimension_numbers<[1], [0], [0], [1], [0, 0, 1, 1], [], []>} : vector<128x128xbf16>, vector<128x32xbf16>, vector<128x32xf32> -> vector<128x32xf32>
    %304 = arith.addf %301, %303 : vector<128x32xf32>
    %c0_184 = arith.constant 0 : index
    %c0_185 = arith.constant 0 : index
    %305 = vector.load %arg22[%c0_184, %c0_185] : memref<128x32xf32, #tpu.memory_space<vmem>>, vector<128x32xf32>
    tpu.vector_store %arg22[%c0_184, %c0_185], %304 {strides = array<i32>} : memref<128x32xf32, #tpu.memory_space<vmem>>, vector<128x32xf32>,
    %c256_186 = arith.constant 256 : index
    %c0_187 = arith.constant 0 : index
    %306 = vector.load %arg3[%c256_186, %c0_187] : memref<384x1xi32, #tpu.memory_space<vmem>>, vector<128x1xi32>
    %c0_188 = arith.constant 0 : index
    %c256_189 = arith.constant 256 : index
    %307 = vector.load %arg4[%c0_188, %c256_189] : memref<1x384xi32, #tpu.memory_space<vmem>>, vector<1x128xi32>
    %c256_190 = arith.constant 256 : index
    %c0_191 = arith.constant 0 : index
    %308 = vector.load %arg6[%c256_190, %c0_191] : memref<384x1xf32, #tpu.memory_space<vmem>>, vector<128x1xf32>
    %309 = tpu.iota {dimensions = array<i32: 1>} : vector<128x128xi32>
    %310 = vector.broadcast %306 : vector<128x1xi32> to vector<128x128xi32>
    %311 = arith.cmpi eq, %309, %310 : vector<128x128xi32>
    %312 = arith.extui %311 : vector<128x128xi1> to vector<128x128xi32>
    %313 = arith.sitofp %312 : vector<128x128xi32> to vector<128x128xf32>
    %314 = arith.truncf %313 : vector<128x128xf32> to vector<128x128xbf16>
    %cst_192 = arith.constant dense<0.000000e+00> : vector<128x32xf32>
    %315 = tpu.matmul %314, %247, %cst_192 {dimension_numbers = #tpu.dot_dimension_numbers<[1], [0], [0], [1], [0, 0, 1, 1], [], []>} : vector<128x128xbf16>, vector<128x32xbf16>, vector<128x32xf32> -> vector<128x32xf32>
    %c2_193 = arith.constant 2 : index
    %c256_194 = arith.constant 256 : index
    %c0_195 = arith.constant 0 : index
    %316 = vector.load %arg21[%c2_193, %c256_194, %c0_195] : memref<3x384x32xf32, #tpu.memory_space<vmem>>, vector<1x128x32xf32>
    %317 = vector.shape_cast %316 : vector<1x128x32xf32> to vector<128x32xf32>
    %318 = arith.addf %315, %317 : vector<128x32xf32>
    %cst_196 = arith.constant 0.000000e+00 : f32
    %319 = vector.broadcast %cst_196 : f32 to vector<128x32xf32>
    %320 = arith.maximumf %318, %319 : vector<128x32xf32>
    %321 = vector.broadcast %308 : vector<128x1xf32> to vector<128x32xf32>
    %322 = arith.mulf %321, %320 : vector<128x32xf32>
    %323 = tpu.iota {dimensions = array<i32: 0>} : vector<128x128xi32>
    %324 = vector.broadcast %307 : vector<1x128xi32> to vector<128x128xi32>
    %325 = arith.cmpi eq, %323, %324 : vector<128x128xi32>
    %326 = arith.extui %325 : vector<128x128xi1> to vector<128x128xi32>
    %327 = arith.sitofp %326 : vector<128x128xi32> to vector<128x128xf32>
    %328 = arith.truncf %327 : vector<128x128xf32> to vector<128x128xbf16>
    %c0_197 = arith.constant 0 : index
    %c0_198 = arith.constant 0 : index
    %329 = vector.load %arg22[%c0_197, %c0_198] : memref<128x32xf32, #tpu.memory_space<vmem>>, vector<128x32xf32>
    %330 = arith.truncf %322 : vector<128x32xf32> to vector<128x32xbf16>
    %cst_199 = arith.constant dense<0.000000e+00> : vector<128x32xf32>
    %331 = tpu.matmul %328, %330, %cst_199 {dimension_numbers = #tpu.dot_dimension_numbers<[1], [0], [0], [1], [0, 0, 1, 1], [], []>} : vector<128x128xbf16>, vector<128x32xbf16>, vector<128x32xf32> -> vector<128x32xf32>
    %332 = arith.addf %329, %331 : vector<128x32xf32>
    %c0_200 = arith.constant 0 : index
    %c0_201 = arith.constant 0 : index
    %333 = vector.load %arg22[%c0_200, %c0_201] : memref<128x32xf32, #tpu.memory_space<vmem>>, vector<128x32xf32>
    tpu.vector_store %arg22[%c0_200, %c0_201], %332 {strides = array<i32>} : memref<128x32xf32, #tpu.memory_space<vmem>>, vector<128x32xf32>,
    %c2_202 = arith.constant 2 : index
    %c0_203 = arith.constant 0 : index
    %c0_204 = arith.constant 0 : index
    %334 = vector.load %arg12[%c2_202, %c0_203, %c0_204] : memref<3x1x32xf32, #tpu.memory_space<vmem>>, vector<1x1x32xf32>
    %335 = vector.shape_cast %334 : vector<1x1x32xf32> to vector<1x32xf32>
    %336 = vector.broadcast %335 : vector<1x32xf32> to vector<128x32xf32>
    %337 = arith.addf %246, %336 : vector<128x32xf32>
    %cst_205 = arith.constant 0.000000e+00 : f32
    %338 = vector.broadcast %cst_205 : f32 to vector<128x32xf32>
    %339 = arith.maximumf %337, %338 : vector<128x32xf32>
    %340 = vector.broadcast %20 : vector<128x1xf32> to vector<128x32xf32>
    %341 = arith.mulf %339, %340 : vector<128x32xf32>
    %c0_206 = arith.constant 0 : index
    %c0_207 = arith.constant 0 : index
    %342 = vector.load %arg22[%c0_206, %c0_207] : memref<128x32xf32, #tpu.memory_space<vmem>>, vector<128x32xf32>
    %343 = arith.addf %342, %341 : vector<128x32xf32>
    %cst_208 = arith.constant 0.000000e+00 : f32
    %344 = vector.broadcast %cst_208 : f32 to vector<128x32xf32>
    %345 = arith.maximumf %343, %344 : vector<128x32xf32>
    %346 = tpu.iota {dimensions = array<i32: 0>} : vector<64x128xi32>
    %c0_209 = arith.constant 0 : index
    %c0_210 = arith.constant 0 : index
    %347 = vector.load %arg5[%c0_209, %c0_210] : memref<1x128xi32, #tpu.memory_space<vmem>>, vector<1x128xi32>
    %348 = vector.broadcast %347 : vector<1x128xi32> to vector<64x128xi32>
    %349 = arith.cmpi eq, %346, %348 : vector<64x128xi32>
    %350 = arith.extui %349 : vector<64x128xi1> to vector<64x128xi32>
    %351 = arith.sitofp %350 : vector<64x128xi32> to vector<64x128xf32>
    %352 = arith.truncf %351 : vector<64x128xf32> to vector<64x128xbf16>
    %353 = arith.truncf %345 : vector<128x32xf32> to vector<128x32xbf16>
    %cst_211 = arith.constant dense<0.000000e+00> : vector<64x32xf32>
    %354 = tpu.matmul %352, %353, %cst_211 {dimension_numbers = #tpu.dot_dimension_numbers<[1], [0], [0], [1], [0, 0, 1, 1], [], []>} : vector<64x128xbf16>, vector<128x32xbf16>, vector<64x32xf32> -> vector<64x32xf32>
    %c0_212 = arith.constant 0 : index
    %c0_213 = arith.constant 0 : index
    %355 = vector.load %arg1[%c0_212, %c0_213] : memref<64x32xf32, #tpu.memory_space<vmem>>, vector<64x32xf32>
    %c0_214 = arith.constant 0 : index
    %c0_215 = arith.constant 0 : index
    %356 = vector.load %arg13[%c0_214, %c0_215] : memref<1x32xf32, #tpu.memory_space<vmem>>, vector<1x32xf32>
    %c0_216 = arith.constant 0 : index
    %c0_217 = arith.constant 0 : index
    %357 = vector.load %arg14[%c0_216, %c0_217] : memref<1x32xf32, #tpu.memory_space<vmem>>, vector<1x32xf32>
    %cst_218 = arith.constant dense<0.000000e+00> : vector<32xf32>
    %358 = vector.multi_reduction <add>, %355, %cst_218 [0] : vector<64x32xf32> to vector<32xf32>
    %359 = vector.shape_cast %358 : vector<32xf32> to vector<1x32xf32>
    %cst_219 = arith.constant 6.400000e+01 : f32
    %360 = vector.broadcast %cst_219 : f32 to vector<1x32xf32>
    %361 = arith.divf %359, %360 : vector<1x32xf32>
    %362 = vector.broadcast %361 : vector<1x32xf32> to vector<64x32xf32>
    %363 = arith.subf %355, %362 : vector<64x32xf32>
    %364 = arith.mulf %363, %363 : vector<64x32xf32>
    %cst_220 = arith.constant dense<0.000000e+00> : vector<32xf32>
    %365 = vector.multi_reduction <add>, %364, %cst_220 [0] : vector<64x32xf32> to vector<32xf32>
    %366 = vector.shape_cast %365 : vector<32xf32> to vector<1x32xf32>
    %cst_221 = arith.constant 6.400000e+01 : f32
    %367 = vector.broadcast %cst_221 : f32 to vector<1x32xf32>
    %368 = arith.divf %366, %367 : vector<1x32xf32>
    %369 = vector.broadcast %361 : vector<1x32xf32> to vector<64x32xf32>
    %370 = arith.subf %355, %369 : vector<64x32xf32>
    %371 = vector.broadcast %356 : vector<1x32xf32> to vector<64x32xf32>
    %372 = arith.mulf %371, %370 : vector<64x32xf32>
    %cst_222 = arith.constant 9.99999974E-6 : f32
    %373 = vector.broadcast %cst_222 : f32 to vector<1x32xf32>
    %374 = arith.addf %368, %373 : vector<1x32xf32>
    %375 = math.rsqrt %374 : vector<1x32xf32>
    %376 = vector.broadcast %375 : vector<1x32xf32> to vector<64x32xf32>
    %377 = arith.mulf %372, %376 : vector<64x32xf32>
    %378 = vector.broadcast %357 : vector<1x32xf32> to vector<64x32xf32>
    %379 = arith.addf %377, %378 : vector<64x32xf32>
    %c0_223 = arith.constant 0 : index
    %c0_224 = arith.constant 0 : index
    %380 = vector.load %arg15[%c0_223, %c0_224] : memref<1x32xf32, #tpu.memory_space<vmem>>, vector<1x32xf32>
    %c0_225 = arith.constant 0 : index
    %c0_226 = arith.constant 0 : index
    %381 = vector.load %arg16[%c0_225, %c0_226] : memref<1x32xf32, #tpu.memory_space<vmem>>, vector<1x32xf32>
    %cst_227 = arith.constant dense<0.000000e+00> : vector<32xf32>
    %382 = vector.multi_reduction <add>, %354, %cst_227 [0] : vector<64x32xf32> to vector<32xf32>
    %383 = vector.shape_cast %382 : vector<32xf32> to vector<1x32xf32>
    %cst_228 = arith.constant 6.400000e+01 : f32
    %384 = vector.broadcast %cst_228 : f32 to vector<1x32xf32>
    %385 = arith.divf %383, %384 : vector<1x32xf32>
    %386 = vector.broadcast %385 : vector<1x32xf32> to vector<64x32xf32>
    %387 = arith.subf %354, %386 : vector<64x32xf32>
    %388 = arith.mulf %387, %387 : vector<64x32xf32>
    %cst_229 = arith.constant dense<0.000000e+00> : vector<32xf32>
    %389 = vector.multi_reduction <add>, %388, %cst_229 [0] : vector<64x32xf32> to vector<32xf32>
    %390 = vector.shape_cast %389 : vector<32xf32> to vector<1x32xf32>
    %cst_230 = arith.constant 6.400000e+01 : f32
    %391 = vector.broadcast %cst_230 : f32 to vector<1x32xf32>
    %392 = arith.divf %390, %391 : vector<1x32xf32>
    %393 = vector.broadcast %385 : vector<1x32xf32> to vector<64x32xf32>
    %394 = arith.subf %354, %393 : vector<64x32xf32>
    %395 = vector.broadcast %380 : vector<1x32xf32> to vector<64x32xf32>
    %396 = arith.mulf %395, %394 : vector<64x32xf32>
    %cst_231 = arith.constant 9.99999974E-6 : f32
    %397 = vector.broadcast %cst_231 : f32 to vector<1x32xf32>
    %398 = arith.addf %392, %397 : vector<1x32xf32>
    %399 = math.rsqrt %398 : vector<1x32xf32>
    %400 = vector.broadcast %399 : vector<1x32xf32> to vector<64x32xf32>
    %401 = arith.mulf %396, %400 : vector<64x32xf32>
    %402 = vector.broadcast %381 : vector<1x32xf32> to vector<64x32xf32>
    %403 = arith.addf %401, %402 : vector<64x32xf32>
    %404 = arith.truncf %379 : vector<64x32xf32> to vector<64x32xbf16>
    %c0_232 = arith.constant 0 : index
    %c0_233 = arith.constant 0 : index
    %405 = vector.load %arg17[%c0_232, %c0_233] : memref<32x32xf32, #tpu.memory_space<vmem>>, vector<32x32xf32>
    %406 = arith.truncf %405 : vector<32x32xf32> to vector<32x32xbf16>
    %cst_234 = arith.constant dense<0.000000e+00> : vector<64x32xf32>
    %407 = tpu.matmul %404, %406, %cst_234 {dimension_numbers = #tpu.dot_dimension_numbers<[1], [0], [0], [1], [0, 0, 1, 1], [], []>} : vector<64x32xbf16>, vector<32x32xbf16>, vector<64x32xf32> -> vector<64x32xf32>
    %408 = arith.truncf %403 : vector<64x32xf32> to vector<64x32xbf16>
    %c0_235 = arith.constant 0 : index
    %c0_236 = arith.constant 0 : index
    %409 = vector.load %arg18[%c0_235, %c0_236] : memref<32x32xf32, #tpu.memory_space<vmem>>, vector<32x32xf32>
    %410 = arith.truncf %409 : vector<32x32xf32> to vector<32x32xbf16>
    %cst_237 = arith.constant dense<0.000000e+00> : vector<64x32xf32>
    %411 = tpu.matmul %408, %410, %cst_237 {dimension_numbers = #tpu.dot_dimension_numbers<[1], [0], [0], [1], [0, 0, 1, 1], [], []>} : vector<64x32xbf16>, vector<32x32xbf16>, vector<64x32xf32> -> vector<64x32xf32>
    %412 = arith.addf %407, %411 : vector<64x32xf32>
    %c0_238 = arith.constant 0 : index
    %c0_239 = arith.constant 0 : index
    %413 = vector.load %arg19[%c0_238, %c0_239] : memref<1x32xf32, #tpu.memory_space<vmem>>, vector<1x32xf32>
    %414 = vector.broadcast %413 : vector<1x32xf32> to vector<64x32xf32>
    %415 = arith.addf %412, %414 : vector<64x32xf32>
    %c0_240 = arith.constant 0 : index
    %c0_241 = arith.constant 0 : index
    %416 = vector.load %arg20[%c0_240, %c0_241] : memref<64x32xf32, #tpu.memory_space<vmem>>, vector<64x32xf32>
    tpu.vector_store %arg20[%c0_240, %c0_241], %415 {strides = array<i32>} : memref<64x32xf32, #tpu.memory_space<vmem>>, vector<64x32xf32>,
    return
  }
}

</mosaic_0001>

<bundles_post_ra>
// kernel: tpu_custom_call.1
= control target key start
LH: loop header
LB: loop body
LE: loop exit
PB: predicated region body
PF: predicated region fallthrough
CT: control target
= control target key end

     0   :  { %v9371_v0 = vmov 0   ;;  %vm446_vm0 = vcmask 261120   ;;  %vm148_vm1 = vcmask 130048   ;;  %s14106_s3 = inlined_call_operand.vmem [shape: s32[384,1], index: 3, kind: input, shape index: {}]   ;;  %s14107_s8 = inlined_call_operand.vmem [shape: f32[3,32,32], index: 8, kind: input, shape index: {}]   ;;  %s14108_s0 = inlined_call_operand.vmem [shape: f32[128,32], index: 0, kind: input, shape index: {}]   ;;  %s14109_s10 = inlined_call_operand.vmem [shape: f32[16,96], index: 10, kind: input, shape index: {}]   ;;  %s14110_s2 = inlined_call_operand.vmem [shape: f32[384,16], index: 2, kind: input, shape index: {}]   ;;  %s14111_s6 = inlined_call_operand.vmem [shape: f32[384,1], index: 6, kind: input, shape index: {}]   ;;  %s14112_s7 = inlined_call_operand.vmem [shape: f32[128,1], index: 7, kind: input, shape index: {}]   ;;  %s14113_s9 = inlined_call_operand.vmem [shape: f32[3,1,32], index: 9, kind: input, shape index: {}]   ;;  %s14114_s11 = inlined_call_operand.vmem [shape: f32[1,96], index: 11, kind: input, shape index: {}]   ;;  %s14115_s4 = inlined_call_operand.vmem [shape: s32[1,384], index: 4, kind: input, shape index: {}]   ;;  %s14116_s12 = inlined_call_operand.vmem [shape: f32[3,1,32], index: 12, kind: input, shape index: {}]   ;;  %s14117_s5 = inlined_call_operand.vmem [shape: s32[1,128], index: 5, kind: input, shape index: {}]   ;;  %s14118_s1 = inlined_call_operand.vmem [shape: f32[64,32], index: 1, kind: input, shape index: {}]   ;;  %s14119_s18 = inlined_call_operand.vmem [shape: f32[32,32], index: 18, kind: input, shape index: {}]   ;;  %s14120_s17 = inlined_call_operand.vmem [shape: f32[32,32], index: 17, kind: input, shape index: {}]   ;;  %s14121_s13 = inlined_call_operand.vmem [shape: f32[1,32], index: 13, kind: input, shape index: {}]   ;;  %s14122_s14 = inlined_call_operand.vmem [shape: f32[1,32], index: 14, kind: input, shape index: {}]   ;;  %s14123_s15 = inlined_call_operand.vmem [shape: f32[1,32], index: 15, kind: input, shape index: {}]   ;;  %s14124_s16 = inlined_call_operand.vmem [shape: f32[1,32], index: 16, kind: input, shape index: {}]   ;;  %s14125_s19 = inlined_call_operand.vmem [shape: f32[1,32], index: 19, kind: input, shape index: {}]   ;;  %s14126_s20 = inlined_call_operand.vmem [shape: f32[64,32], index: 20, kind: output, shape index: {}]  }
   0x1   :  { %14229 = sst [smem:[#allocation201_spill]] %s14106_s3  ;;  %9365 = vset.pattern.permute.xlu1 %v9371_v0  ;;  %9364 = vset.pattern.permute.xlu0 %v9371_v0 }
   0x2   :  { %14230 = sst [smem:[#allocation202_spill]] %s14107_s8  ;;  %s14235_s23 = sld [smem:[#allocation201_spill]] }
   0x3   :  { %14231 = sst [smem:[#allocation203_spill]] %s14108_s0  ;;  %s14236_s26 = sld [smem:[#allocation202_spill]] }
   0x4   :  { %14232 = sst [smem:[#allocation204_spill]] %s14109_s10  ;;  %s14237_s10 = sld [smem:[#allocation203_spill]] }
   0x5   :  { %14233 = sst [smem:[#allocation205_spill]] %s14110_s2  ;;  %s14238_s27 = sld [smem:[#allocation204_spill]] }
   0x6   :  { %14234 = sst [smem:[#allocation206_spill]] %s14126_s20  ;;  %s14239_s30 = sld [smem:[#allocation205_spill]] }
   0x7   :  { %s9373_s20 = smov 96   ;;  %s14863_s2 = sld [smem:[#allocation206_spill]] }
   0x8   :  { %v9484_v1 = vld [vmem:[%s14235_s23 + $0x10] sm:$0xff]  ;;  %v9489_v2 = vld [vmem:[%s14235_s23] sm:$0xff]  ;;  %v9502_v6 = vld [vmem:[%s14235_s23 + $0x18] sm:$0xff] }
   0x9   :  { %v969_v3 = vld [vmem:[%s14236_s26] sm:$0xff]  ;;  %1169 = vperm.xlu1 %9365, %v9484_v1   ;;  %1163 = vperm.xlu0 %9364, %v9489_v2   ;;  %v970_v4 = vld [vmem:[%s14236_s26 + $0x8] sm:$0xff]  ;;  %v971_v7 = vld [vmem:[%s14236_s26 + $0x10] sm:$0xff] }
   0xa   :  { %v973_v5 = vpack.c.bf16 %v970_v4, %v969_v3  ;;  %v972_v8 = vld [vmem:[%s14236_s26 + $0x18] sm:$0xff]  ;;  %v9513_v9 = vld [vmem:[%s14235_s23 + $0x8] sm:$0xff]  ;;  %v945_v11 = vld [vmem:[%s14237_s10] sm:$0xff] }
   0xb   :  { %v974_v10 = vpack.c.bf16 %v972_v8, %v971_v7  ;;  %v946_v12 = vld [vmem:[%s14237_s10 + $0x8] sm:$0xff]  ;;  %v947_v14 = vld [vmem:[%s14237_s10 + $0x10] sm:$0xff]  ;;  %v948_v15 = vld [vmem:[%s14237_s10 + $0x18] sm:$0xff] }
   0xc   :  { %8663 = vmatprep.subr.bf16.mxu1 %v973_v5  ;;  %v961_v13 = vpack.c.bf16 %v946_v12, %v945_v11  ;;  %v9532_v16 = vld [vmem:[%s14235_s23 + $0x28] sm:$0xff]  ;;  %v949_v17 = vld [vmem:[%s14237_s10 + $0x20] sm:$0xff]  ;;  %v962_v20 = vpack.c.bf16 %v948_v15, %v947_v14  ;;  %v9551_v22 = vld [vmem:[%s14235_s23 + $0x38] sm:$0xff] }
   0xd   :  { %8664 = vmatpush3.bf16.msra.mxu1 %v973_v5  ;;  %1172 = vperm.xlu1 %9365, %v9502_v6   ;;  %v950_v18 = vld [vmem:[%s14237_s10 + $0x28] sm:$0xff]  ;;  %v9543_v19 = vld [vmem:[%s14235_s23 + $0x20] sm:$0xff]  ;;  %v9556_v23 = vld [vmem:[%s14235_s23 + $0x30] sm:$0xff] }
   0xe   :  { %1166 = vperm.xlu0 %9364, %v9513_v9   ;;  %8665 = vmatprep.subr.bf16.mxu1 %v974_v10  ;;  %v963_v21 = vpack.c.bf16 %v950_v18, %v949_v17  ;;  %v951_v24 = vld [vmem:[%s14237_s10 + $0x30] sm:$0xff]  ;;  %v952_v25 = vld [vmem:[%s14237_s10 + $0x38] sm:$0xff]  ;;  %v1136_v26 = vld [vmem:[%s14235_s23 + $0x48] sm:$0xff] }
   0xf   :  { %8667 = vmatprep.mubr.msk.bf16.mxu1 %vm446_vm0, %v961_v13  ;;  %v953_v27 = vld [vmem:[%s14237_s10 + $0x40] sm:$0xff]  ;;  %v954_v28 = vld [vmem:[%s14237_s10 + $0x48] sm:$0xff]  ;;  %v964_v30 = vpack.c.bf16 %v952_v25, %v951_v24  ;;  %v1138_v32 = vld [vmem:[%s14235_s23 + $0x58] sm:$0xff] }
  0x10   :  { %v1135_v29 = vld [vmem:[%s14235_s23 + $0x40] sm:$0xff]  ;;  %v965_v31 = vpack.c.bf16 %v954_v28, %v953_v27  ;;  %v1137_v33 = vld [vmem:[%s14235_s23 + $0x50] sm:$0xff]  ;;  %v956_v35 = vld [vmem:[%s14237_s10 + $0x58] sm:$0xff] }
  0x11   :  { %8666 = vmatpush3.bf16.msra.mxu1 %v974_v10  ;;  %1178 = vperm.xlu1 %9365, %v9532_v16   ;;  %v955_v34 = vld [vmem:[%s14237_s10 + $0x50] sm:$0xff]  ;;  %v1140_v36 = vld [vmem:[%s14235_s23 + $0x68] sm:$0xff]  ;;  %v957_v37 = vld [vmem:[%s14237_s10 + $0x60] sm:$0xff] }
  0x12   :  { %1175 = vperm.xlu0 %9364, %v9543_v19   ;;  %v958_v38 = vld [vmem:[%s14237_s10 + $0x68] sm:$0xff]  ;;  %v1139_v39 = vld [vmem:[%s14235_s23 + $0x60] sm:$0xff]  ;;  %v966_v42 = vpack.c.bf16 %v956_v35, %v955_v34  ;;  %v68_v47 = vld [vmem:[%s14239_s30 + $0x10] sm:$0xff] }
  0x13   :  { %v138_v40 = vld [vmem:[%s14238_s27] sm:$0xff]  ;;  %v139_v41 = vld [vmem:[%s14238_s27 + $0x8] sm:$0xff]  ;;  %v967_v45 = vpack.c.bf16 %v958_v38, %v957_v37  ;;  %v69_v48 = vld [vmem:[%s14239_s30 + $0x18] sm:$0xff] }
  0x14   :  { %8668 = vmatmul.mubr.msk.bf16.vlgmr.msra.gmra.mrb[0].mxu1 %vm446_vm0, %v962_v20  ;;  %v140_v43 = vpack.c.bf16 %v139_v41, %v138_v40  ;;  %v66_v44 = vld [vmem:[%s14239_s30] sm:$0xff]  ;;  %v67_v46 = vld [vmem:[%s14239_s30 + $0x8] sm:$0xff]  ;;  %v1142_v49 = vld [vmem:[%s14235_s23 + $0x78] sm:$0xff]  ;;  %v115_v51 = vpack.c.bf16 %v69_v48, %v68_v47 }
  0x15   :  { %1184 = vperm.xlu1 %9365, %v9551_v22   ;;  %8671 = vmatprep.mubr.msk.bf16.mxu1 %vm446_vm0, %v963_v21  ;;  %v114_v50 = vpack.c.bf16 %v67_v46, %v66_v44  ;;  %v1141_v52 = vld [vmem:[%s14235_s23 + $0x70] sm:$0xff]  ;;  %v70_v53 = vld [vmem:[%s14239_s30 + $0x20] sm:$0xff]  ;;  %v71_v54 = vld [vmem:[%s14239_s30 + $0x28] sm:$0xff] }
  0x16   :  { %1181 = vperm.xlu0 %9364, %v9556_v23   ;;  %8613 = vmatprep.subr.bf16.mxu0 %v140_v43  ;;  %v959_v55 = vld [vmem:[%s14237_s10 + $0x70] sm:$0xff]  ;;  %v960_v56 = vld [vmem:[%s14237_s10 + $0x78] sm:$0xff]  ;;  %v116_v57 = vpack.c.bf16 %v71_v54, %v70_v53  ;;  %v1722_v58 = vld [vmem:[%s14235_s23 + $0x88] sm:$0xff] }
  0x17   :  { %8614 = vmatpush3.bf16.msra.mxu0 %v140_v43  ;;  %8615 = vmatprep.mubr.msk.bf16.mxu0 %vm148_vm1, %v114_v50  ;;  %v1721_v59 = vld [vmem:[%s14235_s23 + $0x80] sm:$0xff]  ;;  %v72_v60 = vld [vmem:[%s14239_s30 + $0x30] sm:$0xff]  ;;  %v73_v61 = vld [vmem:[%s14239_s30 + $0x38] sm:$0xff]  ;;  %v968_v62 = vpack.c.bf16 %v960_v56, %v959_v55 }
  0x18   :  { %v74_v63 = vld [vmem:[%s14239_s30 + $0x40] sm:$0xff]  ;;  %v75_v0 = vld [vmem:[%s14239_s30 + $0x48] sm:$0xff]  ;;  %v1724_v3 = vld [vmem:[%s14235_s23 + $0x98] sm:$0xff]  ;;  %v117_v4 = vpack.c.bf16 %v73_v61, %v72_v60 }
  0x19   :  { %1190 = vperm.xlu1 %9365, %v1136_v26   ;;  %v1723_v5 = vld [vmem:[%s14235_s23 + $0x90] sm:$0xff]  ;;  %v118_v7 = vpack.c.bf16 %v75_v0, %v74_v63  ;;  %v1726_v8 = vld [vmem:[%s14235_s23 + $0xa8] sm:$0xff]  ;;  %v1725_v10 = vld [vmem:[%s14235_s23 + $0xa0] sm:$0xff] }
  0x1a   :  { %1187 = vperm.xlu0 %9364, %v1135_v29   ;;  %8616 = vmatmul.mubr.msk.bf16.vlgmr.msra.gmra.mrb[0].mxu0 %vm148_vm1, %v115_v51  ;;  %v76_v11 = vld [vmem:[%s14239_s30 + $0x50] sm:$0xff]  ;;  %v77_v12 = vld [vmem:[%s14239_s30 + $0x58] sm:$0xff]  ;;  %v78_v13 = vld [vmem:[%s14239_s30 + $0x60] sm:$0xff] }
  0x1b   :  { %8619 = vmatprep.mubr.msk.bf16.mxu0 %vm148_vm1, %v116_v57  ;;  %v79_v14 = vld [vmem:[%s14239_s30 + $0x68] sm:$0xff]  ;;  %v1728_v15 = vld [vmem:[%s14235_s23 + $0xb8] sm:$0xff]  ;;  %v119_v17 = vpack.c.bf16 %v77_v12, %v76_v11  ;;  %v1727_v18 = vld [vmem:[%s14235_s23 + $0xb0] sm:$0xff] }
  0x1c   :  { %8672 = vmatmul.mubr.msk.bf16.gmra.mrb[4].mxu1 %vm446_vm0, %v964_v30  ;;  %v120_v20 = vpack.c.bf16 %v79_v14, %v78_v13  ;;  %v1730_v21 = vld [vmem:[%s14235_s23 + $0xc8] sm:$0xff]  ;;  %v1729_v24 = vld [vmem:[%s14235_s23 + $0xc0] sm:$0xff]  ;;  %v80_v25 = vld [vmem:[%s14239_s30 + $0x70] sm:$0xff] }
  0x1d   :  { %1196 = vperm.xlu1 %9365, %v1138_v32   ;;  %8675 = vmatprep.mubr.msk.bf16.mxu1 %vm446_vm0, %v965_v31  ;;  %v81_v26 = vld [vmem:[%s14239_s30 + $0x78] sm:$0xff]  ;;  %v82_v27 = vld [vmem:[%s14239_s30 + $0x80] sm:$0xff]  ;;  %v83_v28 = vld [vmem:[%s14239_s30 + $0x88] sm:$0xff] }
  0x1e   :  { %1193 = vperm.xlu0 %9364, %v1137_v33   ;;  %v1732_v29 = vld [vmem:[%s14235_s23 + $0xd8] sm:$0xff]  ;;  %v121_v30 = vpack.c.bf16 %v81_v26, %v80_v25  ;;  %v1731_v31 = vld [vmem:[%s14235_s23 + $0xd0] sm:$0xff]  ;;  %v122_v32 = vpack.c.bf16 %v83_v28, %v82_v27  ;;  %v1734_v33 = vld [vmem:[%s14235_s23 + $0xe8] sm:$0xff] }
  0x1f   :  { %v1733_v34 = vld [vmem:[%s14235_s23 + $0xe0] sm:$0xff]  ;;  %v84_v35 = vld [vmem:[%s14239_s30 + $0x90] sm:$0xff]  ;;  %v87_v38 = vld [vmem:[%s14239_s30 + $0xa8] sm:$0xff] }
  0x20   :  { %v86_v37 = vld [vmem:[%s14239_s30 + $0xa0] sm:$0xff]  ;;  %v1735_v41 = vld [vmem:[%s14235_s23 + $0xf0] sm:$0xff]  ;;  %v2297_v43 = vld [vmem:[%s14235_s23 + $0x108] sm:$0xff] }
  0x21   :  { %1202 = vperm.xlu1 %9365, %v1140_v36   ;;  %v85_v36 = vld [vmem:[%s14239_s30 + $0x98] sm:$0xff]  ;;  %v2296_v44 = vld [vmem:[%s14235_s23 + $0x100] sm:$0xff]  ;;  %v91_v50 = vld [vmem:[%s14239_s30 + $0xc8] sm:$0xff] }
  0x22   :  { %1199 = vperm.xlu0 %9364, %v1139_v39   ;;  %8620 = vmatmul.mubr.msk.bf16.gmra.mrb[4].mxu0 %vm148_vm1, %v117_v4  ;;  %v1736_v39 = vld [vmem:[%s14235_s23 + $0xf8] sm:$0xff]  ;;  %v123_v40 = vpack.c.bf16 %v85_v36, %v84_v35  ;;  %v90_v47 = vld [vmem:[%s14239_s30 + $0xc0] sm:$0xff]  ;;  %v2298_v51 = vld [vmem:[%s14235_s23 + $0x110] sm:$0xff] }
  0x23   :  { %8623 = vmatprep.mubr.msk.bf16.mxu0 %vm148_vm1, %v118_v7  ;;  %v89_v46 = vld [vmem:[%s14239_s30 + $0xb8] sm:$0xff]  ;;  %v2301_v53 = vld [vmem:[%s14235_s23 + $0x128] sm:$0xff]  ;;  %v2300_v54 = vld [vmem:[%s14235_s23 + $0x120] sm:$0xff] }
  0x24   :  { %8676 = vmatmul.mubr.msk.bf16.gmra.mrb[8].mxu1 %vm446_vm0, %v966_v42  ;;  %v124_v42 = vpack.c.bf16 %v87_v38, %v86_v37  ;;  %v2299_v48 = vld [vmem:[%s14235_s23 + $0x118] sm:$0xff]  ;;  %v92_v55 = vld [vmem:[%s14239_s30 + $0xd0] sm:$0xff]  ;;  %v2305_v60 = vld [vmem:[%s14235_s23 + $0x148] sm:$0xff] }
  0x25   :  { %1208 = vperm.xlu1 %9365, %v1142_v49   ;;  %8679 = vmatprep.mubr.msk.bf16.mxu1 %vm446_vm0, %v967_v45  ;;  %v88_v45 = vld [vmem:[%s14239_s30 + $0xb0] sm:$0xff]  ;;  %v93_v56 = vld [vmem:[%s14239_s30 + $0xd8] sm:$0xff]  ;;  %v2304_v61 = vld [vmem:[%s14235_s23 + $0x140] sm:$0xff] }
  0x26   :  { %1205 = vperm.xlu0 %9364, %v1141_v52   ;;  %v125_v49 = vpack.c.bf16 %v89_v46, %v88_v45  ;;  %v126_v52 = vpack.c.bf16 %v91_v50, %v90_v47  ;;  %v2303_v57 = vld [vmem:[%s14235_s23 + $0x138] sm:$0xff]  ;;  %v94_v63 = vld [vmem:[%s14239_s30 + $0xe0] sm:$0xff]  ;;  %v95_v0 = vld [vmem:[%s14239_s30 + $0xe8] sm:$0xff] }
  0x27   :  { %v97_v4 = vld [vmem:[%s14239_s30 + $0xf8] sm:$0xff]  ;;  %v128_v7 = vpack.c.bf16 %v95_v0, %v94_v63  ;;  %v2308_v11 = vld [vmem:[%s14235_s23 + $0x160] sm:$0xff]  ;;  %v2310_v13 = vld [vmem:[%s14235_s23 + $0x170] sm:$0xff] }
  0x28   :  { %v2311_v12 = vld [vmem:[%s14235_s23 + $0x178] sm:$0xff]  ;;  %v1145_v14 = vld [vmem:[%s14111_s6 + $0x8] sm:$0xff]  ;;  %v1146_v26 = vld [vmem:[%s14111_s6 + $0x10] sm:$0xff] }
  0x29   :  { %1758 = vperm.xlu1 %9365, %v1722_v58   ;;  %v127_v58 = vpack.c.bf16 %v93_v56, %v92_v55  ;;  %v101_v25 = vld [vmem:[%s14239_s30 + $0x118] sm:$0xff]  ;;  %v1149_v28 = vld [vmem:[%s14111_s6 + $0x28] sm:$0xff]  ;;  %v104_v35 = vld [vmem:[%s14239_s30 + $0x130] sm:$0xff] }
  0x2a   :  { %1755 = vperm.xlu0 %9364, %v1721_v59   ;;  %8624 = vmatmul.mubr.msk.bf16.gmra.mrb[8].mxu0 %vm148_vm1, %v119_v17  ;;  %v2302_v59 = vld [vmem:[%s14235_s23 + $0x130] sm:$0xff]  ;;  %v98_v17 = vld [vmem:[%s14239_s30 + $0x100] sm:$0xff]  ;;  %v105_v36 = vld [vmem:[%s14239_s30 + $0x138] sm:$0xff] }
  0x2b   :  { %8627 = vmatprep.mubr.msk.bf16.mxu0 %vm148_vm1, %v120_v20  ;;  %v1147_v20 = vld [vmem:[%s14111_s6 + $0x18] sm:$0xff]  ;;  %v133_v37 = vpack.c.bf16 %v105_v36, %v104_v35  ;;  %v1153_v38 = vld [vmem:[%s14111_s6 + $0x48] sm:$0xff]  ;;  %v108_v45 = vld [vmem:[%s14239_s30 + $0x150] sm:$0xff] }
  0x2c   :  { %8680 = vmatmul.mubr.msk.bf16.gmra.mrb[12].mxu1 %vm446_vm0, %v968_v62  ;;  %v2307_v62 = vld [vmem:[%s14235_s23 + $0x158] sm:$0xff]  ;;  %v112_v56 = vld [vmem:[%s14239_s30 + $0x170] sm:$0xff] }
  0x2d   :  { %1764 = vperm.xlu1 %9365, %v1724_v3   ;;  %v96_v3 = vld [vmem:[%s14239_s30 + $0xf0] sm:$0xff]  ;;  %v109_v46 = vld [vmem:[%s14239_s30 + $0x158] sm:$0xff] }
  0x2e   :  { %1761 = vperm.xlu0 %9364, %v1723_v5   ;;  %v2306_v5 = vld [vmem:[%s14235_s23 + $0x150] sm:$0xff]  ;;  %v135_v47 = vpack.c.bf16 %v109_v46, %v108_v45  ;;  %v1159_v50 = vld [vmem:[%s14111_s6 + $0x78] sm:$0xff]  ;;  %v2318_v45 = vld [vmem:[%s14111_s6 + $0x128] sm:$0xff] }
  0x2f   :  { %v1741_v0 = vld [vmem:[%s14111_s6 + $0x98] sm:$0xff]  ;;  %v2317_v46 = vld [vmem:[%s14111_s6 + $0x120] sm:$0xff] }
  0x31   :  { %1770 = vperm.xlu1 %9365, %v1726_v8   ;;  %v129_v8 = vpack.c.bf16 %v97_v4, %v96_v3  ;;  %v1740_v3 = vld [vmem:[%s14111_s6 + $0x90] sm:$0xff] }
  0x32   :  { %1767 = vperm.xlu0 %9364, %v1725_v10   ;;  %8628 = vmatmul.mubr.msk.bf16.gmra.mrb[12].mxu0 %vm148_vm1, %v121_v30  ;;  %v2309_v10 = vld [vmem:[%s14235_s23 + $0x168] sm:$0xff]  ;;  %v1151_v30 = vld [vmem:[%s14111_s6 + $0x38] sm:$0xff] }
  0x33   :  { %8631 = vmatprep.mubr.msk.bf16.mxu0 %vm148_vm1, %v122_v32  ;;  %v102_v32 = vld [vmem:[%s14239_s30 + $0x120] sm:$0xff] }
  0x35   :  { %1776 = vperm.xlu1 %9365, %v1728_v15   ;;  %v1144_v15 = vld [vmem:[%s14111_s6] sm:$0xff] }
  0x36   :  { %1773 = vperm.xlu0 %9364, %v1727_v18   ;;  %v99_v18 = vld [vmem:[%s14239_s30 + $0x108] sm:$0xff] }
  0x39   :  { %1782 = vperm.xlu1 %9365, %v1730_v21   ;;  %v130_v21 = vpack.c.bf16 %v99_v18, %v98_v17  ;;  %v1747_v18 = vld [vmem:[%s14111_s6 + $0xc8] sm:$0xff] }
  0x3a   :  { %1779 = vperm.xlu0 %9364, %v1729_v24   ;;  %8632 = vmatmul.mubr.msk.bf16.gmra.mrb[16].mxu0 %vm148_vm1, %v123_v40  ;;  %v100_v24 = vld [vmem:[%s14239_s30 + $0x110] sm:$0xff]  ;;  %v1155_v40 = vld [vmem:[%s14111_s6 + $0x58] sm:$0xff] }
  0x3b   :  { %8635 = vmatprep.mubr.msk.bf16.mxu0 %vm148_vm1, %v124_v42  ;;  %v131_v27 = vpack.c.bf16 %v101_v25, %v100_v24  ;;  %v106_v42 = vld [vmem:[%s14239_s30 + $0x140] sm:$0xff]  ;;  %v1749_v25 = vld [vmem:[%s14111_s6 + $0xd8] sm:$0xff] }
  0x3d   :  { %1788 = vperm.xlu1 %9365, %v1732_v29   ;;  %v1148_v29 = vld [vmem:[%s14111_s6 + $0x20] sm:$0xff] }
  0x3e   :  { %1785 = vperm.xlu0 %9364, %v1731_v31   ;;  %v1150_v31 = vld [vmem:[%s14111_s6 + $0x30] sm:$0xff] }
  0x41   :  { %1794 = vperm.xlu1 %9365, %v1734_v33   ;;  %v103_v33 = vld [vmem:[%s14239_s30 + $0x128] sm:$0xff] }
  0x42   :  { %1791 = vperm.xlu0 %9364, %v1733_v34   ;;  %8636 = vmatmul.mubr.msk.bf16.gmra.mrb[20].mxu0 %vm148_vm1, %v125_v49  ;;  %v132_v34 = vpack.c.bf16 %v103_v33, %v102_v32  ;;  %v1156_v49 = vld [vmem:[%s14111_s6 + $0x60] sm:$0xff]  ;;  %v1753_v33 = vld [vmem:[%s14111_s6 + $0xf8] sm:$0xff] }
  0x43   :  { %8639 = vmatprep.mubr.msk.bf16.mxu0 %vm148_vm1, %v126_v52  ;;  %v110_v52 = vld [vmem:[%s14239_s30 + $0x160] sm:$0xff] }
  0x45   :  { %1800 = vperm.xlu1 %9365, %v1736_v39   ;;  %v1152_v39 = vld [vmem:[%s14111_s6 + $0x40] sm:$0xff] }
  0x46   :  { %1797 = vperm.xlu0 %9364, %v1735_v41   ;;  %v1154_v41 = vld [vmem:[%s14111_s6 + $0x50] sm:$0xff] }
  0x49   :  { %2333 = vperm.xlu1 %9365, %v2297_v43   ;;  %v107_v43 = vld [vmem:[%s14239_s30 + $0x148] sm:$0xff] }
  0x4a   :  { %2330 = vperm.xlu0 %9364, %v2296_v44   ;;  %8640 = vmatmul.mubr.msk.bf16.gmra.mrb[24].mxu0 %vm148_vm1, %v127_v58  ;;  %v134_v44 = vpack.c.bf16 %v107_v43, %v106_v42  ;;  %v2315_v42 = vld [vmem:[%s14111_s6 + $0x110] sm:$0xff] }
  0x4b   :  { %8643 = vmatprep.mubr.msk.bf16.mxu0 %vm148_vm1, %v128_v7  ;;  %v1743_v7 = vld [vmem:[%s14111_s6 + $0xa8] sm:$0xff] }
  0x4d   :  { %2339 = vperm.xlu1 %9365, %v2299_v48   ;;  %v1157_v48 = vld [vmem:[%s14111_s6 + $0x68] sm:$0xff] }
  0x4e   :  { %2336 = vperm.xlu0 %9364, %v2298_v51   ;;  %v1158_v51 = vld [vmem:[%s14111_s6 + $0x70] sm:$0xff] }
  0x51   :  { %2345 = vperm.xlu1 %9365, %v2301_v53   ;;  %v111_v53 = vld [vmem:[%s14239_s30 + $0x168] sm:$0xff] }
  0x52   :  { %2342 = vperm.xlu0 %9364, %v2300_v54   ;;  %8644 = vmatmul.mubr.msk.bf16.gmra.mrb[28].mxu0 %vm148_vm1, %v129_v8  ;;  %v14133_v54 = vlaneseq  ;;  %v136_v55 = vpack.c.bf16 %v111_v53, %v110_v52  ;;  %v1742_v8 = vld [vmem:[%s14111_s6 + $0xa0] sm:$0xff]  ;;  %v2322_v53 = vld [vmem:[%s14111_s6 + $0x148] sm:$0xff] }
  0x53   :  { %8647 = vmatprep.mubr.msk.bf16.mxu0 %vm148_vm1, %v130_v21 }
  0x55   :  { %2351 = vperm.xlu1 %9365, %v2303_v57   ;;  %v113_v57 = vld [vmem:[%s14239_s30 + $0x178] sm:$0xff] }
  0x56   :  { %2348 = vperm.xlu0 %9364, %v2302_v59   ;;  %v137_v58 = vpack.c.bf16 %v113_v57, %v112_v56  ;;  %v1739_v59 = vld [vmem:[%s14111_s6 + $0x88] sm:$0xff] }
  0x59   :  { %2357 = vperm.xlu1 %9365, %v2305_v60   ;;  %v1738_v60 = vld [vmem:[%s14111_s6 + $0x80] sm:$0xff] }
  0x5a   :  { %2354 = vperm.xlu0 %9364, %v2304_v61   ;;  %8648 = vmatmul.mubr.msk.bf16.gmra.mrb[32].mxu0 %vm148_vm1, %v131_v27  ;;  %v9946_v61 = vand.u32 127, %v14133_v54 }
  0x5b   :  { %8651 = vmatprep.mubr.msk.bf16.mxu0 %vm148_vm1, %v132_v34  ;;  %v1752_v34 = vld [vmem:[%s14111_s6 + $0xf0] sm:$0xff] }
  0x5c   :  { %14240 = vst [vmem:[#allocation4_spill] sm:$0xff] %v9946_v61 }
  0x5d   :  { %2363 = vperm.xlu1 %9365, %v2307_v62  }
  0x5e   :  { %2360 = vperm.xlu0 %9364, %v2306_v5  }
  0x61   :  { %2369 = vperm.xlu1 %9365, %v2309_v10  }
  0x62   :  { %2366 = vperm.xlu0 %9364, %v2308_v11   ;;  %8652 = vmatmul.mubr.msk.bf16.gmra.mrb[36].mxu0 %vm148_vm1, %v133_v37  ;;  %v14134_v11 = vmov 1.0|1.0   ;;  %v2314_v37 = vld [vmem:[%s14111_s6 + $0x108] sm:$0xff] }
  0x63   :  { %8655 = vmatprep.mubr.msk.bf16.mxu0 %vm148_vm1, %v134_v44 }
  0x65   :  { %2375 = vperm.xlu1 %9365, %v2311_v12  }
  0x66   :  { %2372 = vperm.xlu0 %9364, %v2310_v13   ;;  %v1745_v13 = vld [vmem:[%s14111_s6 + $0xb8] sm:$0xff] }
  0x69   :  { %1402 = vperm.xlu1 %9365, %v1145_v14   ;;  %v1744_v14 = vld [vmem:[%s14111_s6 + $0xb0] sm:$0xff] }
  0x6a   :  { %1397 = vperm.xlu0 %9364, %v1144_v15   ;;  %8656 = vmatmul.mubr.msk.bf16.gmra.mrb[40].mxu0 %vm148_vm1, %v135_v47 }
  0x6b   :  { %8659 = vmatprep.mubr.msk.bf16.mxu0 %vm148_vm1, %v136_v55  ;;  %v2321_v55 = vld [vmem:[%s14111_s6 + $0x140] sm:$0xff] }
  0x6d   :  { %1412 = vperm.xlu1 %9365, %v1147_v20   ;;  %v1746_v20 = vld [vmem:[%s14111_s6 + $0xc0] sm:$0xff] }
  0x6e   :  { %1407 = vperm.xlu0 %9364, %v1146_v26   ;;  %v1748_v26 = vld [vmem:[%s14111_s6 + $0xd0] sm:$0xff] }
  0x71   :  { %1422 = vperm.xlu1 %9365, %v1149_v28  }
  0x72   :  { %1417 = vperm.xlu0 %9364, %v1148_v29   ;;  %8660 = vmatmul.mubr.msk.bf16.gmra.mrb[44].mxu0 %vm148_vm1, %v137_v58  ;;  %v1751_v29 = vld [vmem:[%s14111_s6 + $0xe8] sm:$0xff]  ;;  %v2324_v58 = vld [vmem:[%s14111_s6 + $0x158] sm:$0xff] }
  0x75   :  { %1432 = vperm.xlu1 %9365, %v1151_v30   ;;  %v1750_v30 = vld [vmem:[%s14111_s6 + $0xe0] sm:$0xff] }
  0x76   :  { %1427 = vperm.xlu0 %9364, %v1150_v31  }
  0x79   :  { %1442 = vperm.xlu1 %9365, %v1153_v38   ;;  %v2313_v38 = vld [vmem:[%s14111_s6 + $0x100] sm:$0xff] }
  0x7a   :  { %1437 = vperm.xlu0 %9364, %v1152_v39  }
  0x7d   :  { %1452 = vperm.xlu1 %9365, %v1155_v40  }
  0x7e   :  { %1447 = vperm.xlu0 %9364, %v1154_v41   ;;  %v2316_v41 = vld [vmem:[%s14111_s6 + $0x118] sm:$0xff] }
  0x81   :  { %1462 = vperm.xlu1 %9365, %v1157_v48  }
  0x82   :  { %1457 = vperm.xlu0 %9364, %v1156_v49   ;;  %v2320_v49 = vld [vmem:[%s14111_s6 + $0x138] sm:$0xff] }
  0x85   :  { %1472 = vperm.xlu1 %9365, %v1159_v50   ;;  %v2319_v50 = vld [vmem:[%s14111_s6 + $0x130] sm:$0xff] }
  0x86   :  { %1467 = vperm.xlu0 %9364, %v1158_v51  }
  0x88   :  { %v9948_v62 = vpop.permute.xlu1 %1169  ;;  %v1164_v63 = vpop.permute.xlu0 %1163 }
  0x89   :  { %1994 = vperm.xlu1 %9365, %v1739_v59   ;;  %vm1210_vm2 = vcmp.eq.s32.totalorder %v9946_v61, %v1164_v63  ;;  %v2323_v59 = vld [vmem:[%s14111_s6 + $0x150] sm:$0xff]  ;;  %vm1212_vm8 = vcmp.eq.s32.totalorder %v9946_v61, %v9948_v62  ;;  %v14287_v62 = vmov 1.0|1.0  }
  0x8a   :  { %1989 = vperm.xlu0 %9364, %v1738_v60  }
  0x8c   :  { %v9957_v4 = vpop.permute.xlu1 %1172 }
  0x8d   :  { %v1167_v5 = vpop.permute.xlu0 %1166  ;;  %2004 = vperm.xlu1 %9365, %v1741_v0   ;;  %v2326_v0 = vld [vmem:[%s14111_s6 + $0x168] sm:$0xff]  ;;  %vm1213_vm9 = vcmp.eq.s32.totalorder %v9946_v61, %v9957_v4 }
  0x8e   :  { %vm1211_vm3 = vcmp.eq.s32.totalorder %v9946_v61, %v1167_v5  ;;  %1999 = vperm.xlu0 %9364, %v1740_v3   ;;  %v2325_v3 = vld [vmem:[%s14111_s6 + $0x160] sm:$0xff]  ;;  %vm7616_vm14 = vmpackc.low %vm1213_vm9, %vm1212_vm8  ;;  %v3802_v4 = vld [vmem:[%s14235_s23 + $0xa8] sm:$0xff] }
  0x8f   :  { %vm7614_vm4 = vmpackc.low %vm1211_vm3, %vm1210_vm2 }
  0x90   :  { %v9966_v10 = vpop.permute.xlu1 %1178  ;;  %8699 = vmatprep.mubr.msk.bf16.mxu1 %vm7614_vm4, %v14134_v11 }
  0x91   :  { %v9969_v12 = vpop.permute.xlu0 %1175  ;;  %2014 = vperm.xlu1 %9365, %v1743_v7   ;;  %vm1215_vm12 = vcmp.eq.s32.totalorder %v9946_v61, %v9966_v10 }
  0x92   :  { %2009 = vperm.xlu0 %9364, %v1742_v8   ;;  %v2328_v8 = vld [vmem:[%s14111_s6 + $0x178] sm:$0xff]  ;;  %vm1214_vm13 = vcmp.eq.s32.totalorder %v9946_v61, %v9969_v12 }
  0x93   :  { %vm7618_vm3 = vmpackc.low %vm1215_vm12, %vm1214_vm13 }
  0x94   :  { %v9977_v15 = vpop.permute.xlu1 %1184 }
  0x95   :  { %v9979_v17 = vpop.permute.xlu0 %1181  ;;  %2024 = vperm.xlu1 %9365, %v1745_v13   ;;  %v2327_v13 = vld [vmem:[%s14111_s6 + $0x170] sm:$0xff] }
  0x96   :  { %2019 = vperm.xlu0 %9364, %v1744_v14  }
  0x98   :  { %v9987_v21 = vpop.permute.xlu1 %1190 }
  0x99   :  { %v9989_v24 = vpop.permute.xlu0 %1187  ;;  %2034 = vperm.xlu1 %9365, %v1747_v18   ;;  %vm1219_vm9 = vcmp.eq.s32.totalorder %v9946_v61, %v9987_v21 }
  0x9a   :  { %2029 = vperm.xlu0 %9364, %v1746_v20   ;;  %v930_v20 = vld [vmem:[%s14112_s7 + $0x8] sm:$0xff] }
  0x9c   :  { %v9997_v27 = vpop.permute.xlu1 %1196 }
  0x9d   :  { %v9999_v28 = vpop.permute.xlu0 %1193  ;;  %2044 = vperm.xlu1 %9365, %v1749_v25   ;;  %v929_v25 = vld [vmem:[%s14112_s7] sm:$0xff] }
  0x9e   :  { %2039 = vperm.xlu0 %9364, %v1748_v26  }
  0xa0   :  { %v10007_v31 = vpop.permute.xlu1 %1202 }
  0xa1   :  { %v10009_v32 = vpop.permute.xlu0 %1199  ;;  %2054 = vperm.xlu1 %9365, %v1751_v29  }
  0xa2   :  { %2049 = vperm.xlu0 %9364, %v1750_v30   ;;  %v932_v30 = vld [vmem:[%s14112_s7 + $0x18] sm:$0xff] }
  0xa4   :  { %v10017_v35 = vpop.permute.xlu1 %1208 }
  0xa5   :  { %v10019_v36 = vpop.permute.xlu0 %1205  ;;  %2064 = vperm.xlu1 %9365, %v1753_v33   ;;  %v931_v33 = vld [vmem:[%s14112_s7 + $0x10] sm:$0xff] }
  0xa6   :  { %2059 = vperm.xlu0 %9364, %v1752_v34  }
  0xa8   :  { %v1759_v39 = vpop.permute.xlu1 %1758 }
  0xa9   :  { %vm1803_vm5 = vcmp.eq.s32.totalorder %v9946_v61, %v1759_v39  ;;  %v1756_v40 = vpop.permute.xlu0 %1755  ;;  %2569 = vperm.xlu1 %9365, %v2314_v37   ;;  %v933_v39 = vld [vmem:[%s14112_s7 + $0x20] sm:$0xff] }
  0xaa   :  { %vm1802_vm6 = vcmp.eq.s32.totalorder %v9946_v61, %v1756_v40  ;;  %2564 = vperm.xlu0 %9364, %v2313_v38   ;;  %v934_v38 = vld [vmem:[%s14112_s7 + $0x28] sm:$0xff] }
  0xab   :  { %vm7679_vm7 = vmpackc.low %vm1803_vm5, %vm1802_vm6  ;;  %vm1217_vm5 = vcmp.eq.s32.totalorder %v9946_v61, %v9977_v15  ;;  %vm1216_vm6 = vcmp.eq.s32.totalorder %v9946_v61, %v9979_v17  ;;  %v3806_v15 = vld [vmem:[%s14235_s23 + $0xc8] sm:$0xff]  ;;  %v3805_v17 = vld [vmem:[%s14235_s23 + $0xc0] sm:$0xff] }
  0xac   :  { %v10035_v43 = vpop.permute.xlu1 %1764  ;;  %8763 = vmatprep.mubr.msk.bf16.mxu0 %vm7679_vm7, %v14134_v11 }
  0xad   :  { %v10038_v44 = vpop.permute.xlu0 %1761  ;;  %2579 = vperm.xlu1 %9365, %v2316_v41   ;;  %vm1805_vm10 = vcmp.eq.s32.totalorder %v9946_v61, %v10035_v43  ;;  %v3801_v43 = vld [vmem:[%s14235_s23 + $0xa0] sm:$0xff] }
  0xae   :  { %2574 = vperm.xlu0 %9364, %v2315_v42   ;;  %v936_v42 = vld [vmem:[%s14112_s7 + $0x38] sm:$0xff]  ;;  %vm1804_vm11 = vcmp.eq.s32.totalorder %v9946_v61, %v10038_v44 }
  0xaf   :  { %vm7681_vm2 = vmpackc.low %vm1805_vm10, %vm1804_vm11  ;;  %vm1218_vm10 = vcmp.eq.s32.totalorder %v9946_v61, %v9989_v24 }
  0xb0   :  { %v10046_v47 = vpop.permute.xlu1 %1770  ;;  %vm7620_vm11 = vmpackc.low %vm1217_vm5, %vm1216_vm6  ;;  %vm1223_vm6 = vcmp.eq.s32.totalorder %v9946_v61, %v10007_v31 }
  0xb1   :  { %v10048_v48 = vpop.permute.xlu0 %1767  ;;  %2589 = vperm.xlu1 %9365, %v2318_v45   ;;  %v935_v45 = vld [vmem:[%s14112_s7 + $0x30] sm:$0xff]  ;;  %vm1807_vm15 = vcmp.eq.s32.totalorder %v9946_v61, %v10046_v47 }
  0xb2   :  { %2584 = vperm.xlu0 %9364, %v2317_v46   ;;  %vm1806_vm1 = vcmp.eq.s32.totalorder %v9946_v61, %v10048_v48 }
  0xb3   :  { %vm7683_vm4 = vmpackc.low %vm1807_vm15, %vm1806_vm1 }
  0xb4   :  { %v10056_v51 = vpop.permute.xlu1 %1776  ;;  %vm7622_vm15 = vmpackc.low %vm1219_vm9, %vm1218_vm10 }
  0xb5   :  { %v10058_v52 = vpop.permute.xlu0 %1773  ;;  %2599 = vperm.xlu1 %9365, %v2320_v49   ;;  %vm1809_vm7 = vcmp.eq.s32.totalorder %v9946_v61, %v10056_v51 }
  0xb6   :  { %2594 = vperm.xlu0 %9364, %v2319_v50   ;;  %v938_v50 = vld [vmem:[%s14112_s7 + $0x48] sm:$0xff]  ;;  %vm1808_vm8 = vcmp.eq.s32.totalorder %v9946_v61, %v10058_v52 }
  0xb8   :  { %v10066_v56 = vpop.permute.xlu1 %1782 }
  0xb9   :  { %v10068_v57 = vpop.permute.xlu0 %1779  ;;  %2609 = vperm.xlu1 %9365, %v2322_v53   ;;  %v937_v53 = vld [vmem:[%s14112_s7 + $0x40] sm:$0xff]  ;;  %vm1811_vm12 = vcmp.eq.s32.totalorder %v9946_v61, %v10066_v56 }
  0xba   :  { %2604 = vperm.xlu0 %9364, %v2321_v55   ;;  %vm1810_vm13 = vcmp.eq.s32.totalorder %v9946_v61, %v10068_v57  ;;  %v3808_v57 = vld [vmem:[%s14235_s23 + $0xd8] sm:$0xff] }
  0xbb   :  { %vm7687_vm1 = vmpackc.low %vm1811_vm12, %vm1810_vm13 }
  0xbc   :  { %v10076_v60 = vpop.permute.xlu1 %1788 }
  0xbd   :  { %v10078_v63 = vpop.permute.xlu0 %1785  ;;  %2619 = vperm.xlu1 %9365, %v2324_v58  }
  0xbe   :  { %2614 = vperm.xlu0 %9364, %v2323_v59   ;;  %v940_v59 = vld [vmem:[%s14112_s7 + $0x58] sm:$0xff]  ;;  %vm1812_vm5 = vcmp.eq.s32.totalorder %v9946_v61, %v10078_v63 }
  0xc0   :  { %v10086_v5 = vpop.permute.xlu1 %1794 }
  0xc1   :  { %v10088_v7 = vpop.permute.xlu0 %1791  ;;  %2629 = vperm.xlu1 %9365, %v2326_v0   ;;  %v939_v0 = vld [vmem:[%s14112_s7 + $0x50] sm:$0xff]  ;;  %vm1815_vm9 = vcmp.eq.s32.totalorder %v9946_v61, %v10086_v5 }
  0xc2   :  { %2624 = vperm.xlu0 %9364, %v2325_v3   ;;  %vm1814_vm10 = vcmp.eq.s32.totalorder %v9946_v61, %v10088_v7  ;;  %v3812_v7 = vld [vmem:[%s14235_s23 + $0xf8] sm:$0xff] }
  0xc3   :  { %vm7691_vm13 = vmpackc.low %vm1815_vm9, %vm1814_vm10 }
  0xc4   :  { %v10096_v14 = vpop.permute.xlu1 %1800 }
  0xc5   :  { %v10098_v18 = vpop.permute.xlu0 %1797  ;;  %2639 = vperm.xlu1 %9365, %v2328_v8  }
  0xc6   :  { %2634 = vperm.xlu0 %9364, %v2327_v13   ;;  %v942_v13 = vld [vmem:[%s14112_s7 + $0x68] sm:$0xff] }
  0xc8   :  { %v10106_v26 = vpop.permute.xlu1 %2333 }
  0xc9   :  { %v10108_v29 = vpop.permute.xlu0 %2330  ;;  %2917 = vperm.xlu1 %9365, %v930_v20   ;;  %v941_v20 = vld [vmem:[%s14112_s7 + $0x60] sm:$0xff] }
  0xca   :  { %2912 = vperm.xlu0 %9364, %v929_v25  }
  0xcc   :  { %v10116_v34 = vpop.permute.xlu1 %2339 }
  0xcd   :  { %v10118_v37 = vpop.permute.xlu0 %2336  ;;  %2927 = vperm.xlu1 %9365, %v932_v30  }
  0xce   :  { %2922 = vperm.xlu0 %9364, %v931_v33   ;;  %v944_v33 = vld [vmem:[%s14112_s7 + $0x78] sm:$0xff]  ;;  %vm2379_vm9 = vcmp.eq.s32.totalorder %v9946_v61, %v10118_v37  ;;  %v4376_v37 = vld [vmem:[%s14235_s23 + $0x120] sm:$0xff] }
  0xd0   :  { %v10126_v40 = vpop.permute.xlu1 %2345 }
  0xd1   :  { %v10128_v41 = vpop.permute.xlu0 %2342  ;;  %2937 = vperm.xlu1 %9365, %v934_v38   ;;  %v943_v38 = vld [vmem:[%s14112_s7 + $0x70] sm:$0xff]  ;;  %vm2382_vm10 = vcmp.eq.s32.totalorder %v9946_v61, %v10126_v40 }
  0xd2   :  { %2932 = vperm.xlu0 %9364, %v933_v39  }
  0xd4   :  { %v10136_v46 = vpop.permute.xlu1 %2351 }
  0xd5   :  { %v10138_v49 = vpop.permute.xlu0 %2348  ;;  %2947 = vperm.xlu1 %9365, %v936_v42  }
  0xd6   :  { %2942 = vperm.xlu0 %9364, %v935_v45  }
  0xd8   :  { %v10146_v55 = vpop.permute.xlu1 %2357 }
  0xd9   :  { %v10148_v58 = vpop.permute.xlu0 %2354  ;;  %2957 = vperm.xlu1 %9365, %v938_v50   ;;  %v10183_v50 = vld [vmem:[%s14113_s9] ss:$0 sm:$0xff] }
  0xda   :  { %2952 = vperm.xlu0 %9364, %v937_v53  }
  0xdc   :  { %v10156_v3 = vpop.permute.xlu1 %2363 }
  0xdd   :  { %v10158_v8 = vpop.permute.xlu0 %2360  ;;  %2967 = vperm.xlu1 %9365, %v940_v59  }
  0xde   :  { %2962 = vperm.xlu0 %9364, %v939_v0  }
  0xe0   :  { %v10166_v25 = vpop.permute.xlu1 %2369 }
  0xe1   :  { %v10168_v30 = vpop.permute.xlu0 %2366  ;;  %2977 = vperm.xlu1 %9365, %v942_v13  }
  0xe2   :  { %2972 = vperm.xlu0 %9364, %v941_v20  }
  0xe4   :  { %v10176_v39 = vpop.permute.xlu1 %2375 }
  0xe5   :  { %14241 = vst [vmem:[#allocation5_spill] sm:$0xff] %v10176_v39  ;;  %v10178_v42 = vpop.permute.xlu0 %2372  ;;  %2987 = vperm.xlu1 %9365, %v944_v33  }
  0xe6   :  { %14242 = vst [vmem:[#allocation6_spill] sm:$0xff] %v10178_v42  ;;  %2982 = vperm.xlu0 %9364, %v943_v38  }
  0xe7   :  { %v8669_v45 = vpop.f32.mrb[0].mxu1 }
  0xe8   :  { %v1040_v53 = vpop.f32.mrb[1].mxu1  ;;  %v10185_v59 = vpop.permute.xlu1 %1402  ;;  %v10191_v20 = vadd.f32 %v8669_v45, %v10183_v50 }
  0xe9   :  { %14243 = vst [vmem:[#allocation7_spill] sm:$0xff] %v10185_v59  ;;  %v10187_v0 = vpop.permute.xlu0 %1397  ;;  %v8670_v13 = vpop.f32.mrb[2].mxu1  ;;  %3259 = vperm.xlu1 %9365, %v9513_v9   ;;  %v10198_v54 = vadd.f32 %v10183_v50, %v1040_v53 }
  0xea   :  { %14244 = vst [vmem:[#allocation8_spill] sm:$0xff] %v10187_v0  ;;  %14245 = vst [vmem:[#allocation9_spill] sm:$0xff] %v10191_v20  ;;  %v10194_v33 = vadd.f32 %v8670_v13, %v10183_v50  ;;  %3256 = vperm.xlu0 %9364, %v9489_v2   ;;  %v1043_v38 = vpop.f32.mrb[3].mxu1 }
  0xeb   :  { %14247 = vst [vmem:[#allocation11_spill] sm:$0xff] %v10198_v54  ;;  %v10201_v11 = vadd.f32 %v10183_v50, %v1043_v38 }
  0xec   :  { %14246 = vst [vmem:[#allocation10_spill] sm:$0xff] %v10194_v33  ;;  %v10205_v59 = vpack.c.bf16 %v10194_v33, %v10191_v20  ;;  %v10207_v9 = vpop.permute.xlu1 %1412 }
  0xed   :  { %14248 = vst [vmem:[#allocation12_spill] sm:$0xff] %v10201_v11  ;;  %14249 = vst [vmem:[#allocation13_spill] sm:$0xff] %v10207_v9  ;;  %v10211_v45 = vpack.c.bf16 %v10201_v11, %v10198_v54  ;;  %v10213_v13 = vpop.permute.xlu0 %1407  ;;  %3265 = vperm.xlu1 %9365, %v9502_v6   ;;  %v3233_v9 = vld [vmem:[%s14235_s23 + $0x58] sm:$0xff] }
  0xee   :  { %14250 = vst [vmem:[#allocation14_spill] sm:$0xff] %v10213_v13  ;;  %3262 = vperm.xlu0 %9364, %v9484_v1  }
  0xef   :  { %v8673_v2 = vpop.f32.mrb[4].mxu1  ;;  %8683 = vmatprep.subr.bf16.mxu1 %v10211_v45  ;;  %8747 = vmatprep.subr.bf16.mxu0 %v10211_v45 }
  0xf0   :  { %v1056_v53 = vpop.f32.mrb[5].mxu1  ;;  %8684 = vmatpush3.bf16.msra.mxu1 %v10211_v45  ;;  %8748 = vmatpush3.bf16.msra.mxu0 %v10211_v45  ;;  %v10221_v38 = vpop.permute.xlu1 %1422  ;;  %v10228_v1 = vadd.f32 %v8673_v2, %v10183_v50  ;;  %v3231_v2 = vld [vmem:[%s14235_s23 + $0x48] sm:$0xff] }
  0xf1   :  { %14251 = vst [vmem:[#allocation15_spill] sm:$0xff] %v10221_v38  ;;  %v10223_v11 = vpop.permute.xlu0 %1417  ;;  %v8674_v33 = vpop.f32.mrb[6].mxu1  ;;  %8685 = vmatprep.subr.bf16.mxu1 %v10205_v59  ;;  %8749 = vmatprep.subr.bf16.mxu0 %v10205_v59  ;;  %v10236_v20 = vadd.f32 %v10183_v50, %v1056_v53  ;;  %v3230_v53 = vld [vmem:[%s14235_s23 + $0x40] sm:$0xff] }
  0xf2   :  { %14252 = vst [vmem:[#allocation16_spill] sm:$0xff] %v10223_v11  ;;  %14253 = vst [vmem:[#allocation17_spill] sm:$0xff] %v10228_v1  ;;  %v10231_v6 = vadd.f32 %v8674_v33, %v10183_v50  ;;  %3271 = vperm.xlu1 %9365, %v9532_v16   ;;  %3268 = vperm.xlu0 %9364, %v9543_v19   ;;  %v1059_v54 = vpop.f32.mrb[7].mxu1 }
  0xf3   :  { %14255 = vst [vmem:[#allocation19_spill] sm:$0xff] %v10236_v20  ;;  %v10239_v38 = vadd.f32 %v10183_v50, %v1059_v54 }
  0xf4   :  { %14254 = vst [vmem:[#allocation18_spill] sm:$0xff] %v10231_v6  ;;  %v10243_v11 = vpack.c.bf16 %v10231_v6, %v10228_v1  ;;  %8686 = vmatpush3.bf16.msra.mxu1 %v10205_v59  ;;  %8750 = vmatpush3.bf16.msra.mxu0 %v10205_v59  ;;  %v10247_v33 = vpop.permute.xlu1 %1432 }
  0xf5   :  { %14256 = vst [vmem:[#allocation20_spill] sm:$0xff] %v10239_v38  ;;  %14257 = vst [vmem:[#allocation21_spill] sm:$0xff] %v10247_v33  ;;  %v10251_v16 = vpack.c.bf16 %v10239_v38, %v10236_v20  ;;  %v10253_v19 = vpop.permute.xlu0 %1427  ;;  %v10276_v20 = vld [vmem:[%s14114_s11] ss:$0 sm:$0xff] }
  0xf6   :  { %14258 = vst [vmem:[#allocation22_spill] sm:$0xff] %v10253_v19  ;;  %3277 = vperm.xlu1 %9365, %v9551_v22   ;;  %3274 = vperm.xlu0 %9364, %v9556_v23  }
  0xf7   :  { %v8677_v54 = vpop.f32.mrb[8].mxu1  ;;  %8687 = vmatprep.subr.bf16.mxu1 %v10251_v16  ;;  %8751 = vmatprep.subr.bf16.mxu0 %v10251_v16 }
  0xf8   :  { %v1072_v38 = vpop.f32.mrb[9].mxu1  ;;  %8688 = vmatpush3.bf16.msra.mxu1 %v10251_v16  ;;  %8752 = vmatpush3.bf16.msra.mxu0 %v10251_v16  ;;  %v10267_v22 = vpop.permute.xlu1 %1442  ;;  %v10279_v1 = vadd.f32 %v8677_v54, %v10183_v50  ;;  %v3232_v54 = vld [vmem:[%s14235_s23 + $0x50] sm:$0xff] }
  0xf9   :  { %14259 = vst [vmem:[#allocation23_spill] sm:$0xff] %v10267_v22  ;;  %v10269_v23 = vpop.permute.xlu0 %1437  ;;  %v8678_v6 = vpop.f32.mrb[10].mxu1  ;;  %8689 = vmatprep.subr.bf16.mxu1 %v10243_v11  ;;  %8753 = vmatprep.subr.bf16.mxu0 %v10243_v11  ;;  %v10285_v19 = vadd.f32 %v10183_v50, %v1072_v38 }
  0xfa   :  { %14260 = vst [vmem:[#allocation24_spill] sm:$0xff] %v10269_v23  ;;  %14261 = vst [vmem:[#allocation25_spill] sm:$0xff] %v10279_v1  ;;  %v10282_v33 = vadd.f32 %v8678_v6, %v10183_v50  ;;  %3283 = vperm.xlu1 %9365, %v3231_v2   ;;  %3280 = vperm.xlu0 %9364, %v3230_v53   ;;  %v1075_v22 = vpop.f32.mrb[11].mxu1  ;;  %v8617_v23 = vpop.f32.mrb[0].mxu0 }
  0xfb   :  { %14263 = vst [vmem:[#allocation27_spill] sm:$0xff] %v10285_v19  ;;  %v10288_v0 = vadd.f32 %v10183_v50, %v1075_v22  ;;  %v10297_v6 = vadd.f32 %v8617_v23, %v10276_v20  ;;  %v255_v2 = vpop.f32.mrb[1].mxu0 }
  0xfc   :  { %14262 = vst [vmem:[#allocation26_spill] sm:$0xff] %v10282_v33  ;;  %v10301_v53 = vpack.c.bf16 %v10282_v33, %v10279_v1  ;;  %8690 = vmatpush3.bf16.msra.mxu1 %v10243_v11  ;;  %8754 = vmatpush3.bf16.msra.mxu0 %v10243_v11  ;;  %v10305_v38 = vpop.permute.xlu1 %1452  ;;  %v10308_v22 = vadd.f32 %v10276_v20, %v255_v2  ;;  %v8618_v13 = vpop.f32.mrb[2].mxu0 }
  0xfd   :  { %14264 = vst [vmem:[#allocation28_spill] sm:$0xff] %v10288_v0  ;;  %14265 = vst [vmem:[#allocation29_spill] sm:$0xff] %v10297_v6  ;;  %v10312_v42 = vpack.c.bf16 %v10288_v0, %v10285_v19  ;;  %v10314_v23 = vpop.permute.xlu0 %1447  ;;  %v10319_v33 = vadd.f32 %v8618_v13, %v10276_v20  ;;  %v258_v1 = vpop.f32.mrb[3].mxu0  ;;  %v3235_v0 = vld [vmem:[%s14235_s23 + $0x68] sm:$0xff] }
  0xfe   :  { %14266 = vst [vmem:[#allocation30_spill] sm:$0xff] %v10305_v38  ;;  %14267 = vst [vmem:[#allocation31_spill] sm:$0xff] %v10308_v22  ;;  %3289 = vperm.xlu1 %9365, %v3233_v9   ;;  %3286 = vperm.xlu0 %9364, %v3232_v54   ;;  %v10324_v2 = vadd.f32 %v10276_v20, %v258_v1  ;;  %v3234_v9 = vld [vmem:[%s14235_s23 + $0x60] sm:$0xff] }
  0xff   :  { %14268 = vst [vmem:[#allocation32_spill] sm:$0xff] %v10314_v23  ;;  %449 = vst.msk [vmem:[#allocation2 + $0x10] sm:$0xff] %vm446_vm0, %v10297_v6  ;;  %v8681_v38 = vpop.f32.mrb[12].mxu1  ;;  %8691 = vmatprep.subr.bf16.mxu1 %v10312_v42  ;;  %8755 = vmatprep.subr.bf16.mxu0 %v10312_v42 }
 0x100   :  { %14269 = vst [vmem:[#allocation33_spill] sm:$0xff] %v10319_v33  ;;  %447 = vst.msk [vmem:[#allocation2] sm:$0xff] %vm446_vm0, %v10308_v22  ;;  %v1088_v13 = vpop.f32.mrb[13].mxu1  ;;  %8692 = vmatpush3.bf16.msra.mxu1 %v10312_v42  ;;  %8756 = vmatpush3.bf16.msra.mxu0 %v10312_v42  ;;  %v10338_v1 = vpop.permute.xlu1 %1462  ;;  %v10347_v23 = vadd.f32 %v8681_v38, %v10183_v50  ;;  %v3236_v38 = vld [vmem:[%s14235_s23 + $0x70] sm:$0xff] }
 0x101   :  { %14270 = vst [vmem:[#allocation34_spill] sm:$0xff] %v10324_v2  ;;  %450 = vst.msk [vmem:[#allocation2 + $0x18] sm:$0xff] %vm446_vm0, %v10319_v33  ;;  %v10342_v54 = vpop.permute.xlu0 %1457  ;;  %v8682_v19 = vpop.f32.mrb[14].mxu1  ;;  %8693 = vmatprep.subr.bf16.mxu1 %v10301_v53  ;;  %8757 = vmatprep.subr.bf16.mxu0 %v10301_v53  ;;  %v10353_v22 = vadd.f32 %v10183_v50, %v1088_v13 }
 0x102   :  { %14271 = vst [vmem:[#allocation35_spill] sm:$0xff] %v10338_v1  ;;  %448 = vst.msk [vmem:[#allocation2 + $0x8] sm:$0xff] %vm446_vm0, %v10324_v2  ;;  %v10350_v6 = vadd.f32 %v8682_v19, %v10183_v50  ;;  %3295 = vperm.xlu1 %9365, %v3235_v0   ;;  %3292 = vperm.xlu0 %9364, %v3234_v9   ;;  %v1091_v33 = vpop.f32.mrb[15].mxu1  ;;  %v8621_v1 = vpop.f32.mrb[4].mxu0  ;;  %v3237_v2 = vld [vmem:[%s14235_s23 + $0x78] sm:$0xff] }
 0x103   :  { %14272 = vst [vmem:[#allocation36_spill] sm:$0xff] %v10342_v54  ;;  %14273 = vst [vmem:[#allocation37_spill] sm:$0xff] %v10347_v23  ;;  %v10356_v54 = vadd.f32 %v10183_v50, %v1091_v33  ;;  %v10365_v19 = vadd.f32 %v8621_v1, %v10276_v20  ;;  %v271_v0 = vpop.f32.mrb[5].mxu0 }
 0x104   :  { %14274 = vst [vmem:[#allocation38_spill] sm:$0xff] %v10350_v6  ;;  %14275 = vst [vmem:[#allocation39_spill] sm:$0xff] %v10353_v22  ;;  %v10369_v9 = vpack.c.bf16 %v10350_v6, %v10347_v23  ;;  %8694 = vmatpush3.bf16.msra.mxu1 %v10301_v53  ;;  %8758 = vmatpush3.bf16.msra.mxu0 %v10301_v53  ;;  %v10373_v50 = vpop.permute.xlu1 %1472  ;;  %v10376_v33 = vadd.f32 %v10276_v20, %v271_v0  ;;  %v8622_v13 = vpop.f32.mrb[6].mxu0 }
 0x105   :  { %14276 = vst [vmem:[#allocation40_spill] sm:$0xff] %v10356_v54  ;;  %14277 = vst [vmem:[#allocation41_spill] sm:$0xff] %v10365_v19  ;;  %v10380_v39 = vpack.c.bf16 %v10356_v54, %v10353_v22  ;;  %v10382_v1 = vpop.permute.xlu0 %1467  ;;  %v10387_v6 = vadd.f32 %v8622_v13, %v10276_v20  ;;  %v274_v23 = vpop.f32.mrb[7].mxu0  ;;  %v3798_v54 = vld [vmem:[%s14235_s23 + $0x88] sm:$0xff]  ;;  %v3797_v13 = vld [vmem:[%s14235_s23 + $0x80] sm:$0xff] }
 0x106   :  { %14278 = vst [vmem:[#allocation42_spill] sm:$0xff] %v10373_v50  ;;  %14279 = vst [vmem:[#allocation43_spill] sm:$0xff] %v10376_v33  ;;  %3301 = vperm.xlu1 %9365, %v3237_v2   ;;  %3298 = vperm.xlu0 %9364, %v3236_v38   ;;  %v10392_v0 = vadd.f32 %v10276_v20, %v274_v23  ;;  %v8625_v38 = vpop.f32.mrb[8].mxu0 }
 0x107   :  { %14280 = vst [vmem:[#allocation44_spill] sm:$0xff] %v10382_v1  ;;  %453 = vst.msk [vmem:[#allocation2 + $0x30] sm:$0xff] %vm446_vm0, %v10365_v19  ;;  %8695 = vmatprep.subr.bf16.mxu1 %v10380_v39  ;;  %8759 = vmatprep.subr.bf16.mxu0 %v10380_v39  ;;  %v10419_v22 = vadd.f32 %v8625_v38, %v10276_v20  ;;  %v287_v50 = vpop.f32.mrb[9].mxu0  ;;  %v3800_v1 = vld [vmem:[%s14235_s23 + $0x98] sm:$0xff] }
 0x108   :  { %14281 = vst [vmem:[#allocation45_spill] sm:$0xff] %v10387_v6  ;;  %451 = vst.msk [vmem:[#allocation2 + $0x20] sm:$0xff] %vm446_vm0, %v10376_v33  ;;  %8696 = vmatpush3.bf16.msra.mxu1 %v10380_v39  ;;  %8760 = vmatpush3.bf16.msra.mxu0 %v10380_v39  ;;  %v10406_v23 = vpop.permute.xlu1 %1994 }
 0x109   :  { %14282 = vst [vmem:[#allocation46_spill] sm:$0xff] %v10392_v0  ;;  %454 = vst.msk [vmem:[#allocation2 + $0x38] sm:$0xff] %vm446_vm0, %v10387_v6  ;;  %v10410_v2 = vpop.permute.xlu0 %1989  ;;  %8697 = vmatprep.subr.bf16.mxu1 %v10369_v9  ;;  %8761 = vmatprep.subr.bf16.mxu0 %v10369_v9 }
 0x10a   :  { %14283 = vst [vmem:[#allocation47_spill] sm:$0xff] %v10406_v23  ;;  %452 = vst.msk [vmem:[#allocation2 + $0x28] sm:$0xff] %vm446_vm0, %v10392_v0  ;;  %3834 = vperm.xlu1 %9365, %v3798_v54   ;;  %3831 = vperm.xlu0 %9364, %v3797_v13   ;;  %v3799_v23 = vld [vmem:[%s14235_s23 + $0x90] sm:$0xff]  ;;  %v10432_v54 = vadd.f32 %v10276_v20, %v287_v50  ;;  %v8626_v13 = vpop.f32.mrb[10].mxu0 }
 0x10b   :  { %14284 = vst [vmem:[#allocation48_spill] sm:$0xff] %v10410_v2  ;;  %14285 = vst [vmem:[#allocation49_spill] sm:$0xff] %v10419_v22  ;;  %v10445_v2 = vadd.f32 %v8626_v13, %v10276_v20  ;;  %v290_v50 = vpop.f32.mrb[11].mxu0 }
 0x10c   :  { %8698 = vmatpush3.bf16.msra.mxu1 %v10369_v9  ;;  %8762 = vmatpush3.bf16.msra.mxu0 %v10369_v9  ;;  %v10440_v38 = vpop.permute.xlu1 %2004  ;;  %457 = vst.msk [vmem:[#allocation2 + $0x50] sm:$0xff] %vm446_vm0, %v10419_v22  ;;  %455 = vst.msk [vmem:[#allocation2 + $0x40] sm:$0xff] %vm446_vm0, %v10432_v54  ;;  %v10463_v13 = vadd.f32 %v10276_v20, %v290_v50  ;;  %v8629_v44 = vpop.f32.mrb[12].mxu0 }
 0x10d   :  { %14286 = vst [vmem:[#allocation50_spill] sm:$0xff] %v10440_v38  ;;  %v10457_v38 = vpop.permute.xlu0 %1999  ;;  %8811 = vmatprep.subr.bf16.mxu0 %v10211_v45  ;;  %458 = vst.msk [vmem:[#allocation2 + $0x58] sm:$0xff] %vm446_vm0, %v10445_v2  ;;  %v10508_v47 = vadd.f32 %v8629_v44, %v10276_v20  ;;  %v303_v48 = vpop.f32.mrb[13].mxu0 }
 0x10e   :  { %3840 = vperm.xlu1 %9365, %v3800_v1   ;;  %3837 = vperm.xlu0 %9364, %v3799_v23   ;;  %456 = vst.msk [vmem:[#allocation2 + $0x48] sm:$0xff] %vm446_vm0, %v10463_v13  ;;  %v3803_v1 = vld [vmem:[%s14235_s23 + $0xb0] sm:$0xff]  ;;  %v10521_v23 = vadd.f32 %v10276_v20, %v303_v48  ;;  %v8630_v50 = vpop.f32.mrb[14].mxu0 }
 0x10f   :  { %8700 = vmatmul.mubr.msk.bf16.vlgmr.msra.gmra.mrb[16].mxu1 %vm7616_vm14, %v14287_v62  ;;  %8764 = vmatmul.mubr.msk.bf16.vlgmr.msra.gmra.mrb[48].mxu0 %vm7681_vm2, %v14287_v62  ;;  %14288 = vst [vmem:[#allocation51_spill] sm:$0xff] %v10508_v47  ;;  %461 = vst.msk [vmem:[#allocation2 + $0x70] sm:$0xff] %vm446_vm0, %v10508_v47  ;;  %v306_v44 = vpop.f32.mrb[15].mxu0  ;;  %vm1221_vm2 = vcmp.eq.s32.totalorder %v9946_v61, %v9997_v27  ;;  %v3810_v27 = vld [vmem:[%s14235_s23 + $0xe8] sm:$0xff] }
 0x110   :  { %8812 = vmatpush3.bf16.msra.mxu0 %v10211_v45  ;;  %v10496_v10 = vpop.permute.xlu1 %2014  ;;  %8703 = vmatprep.mubr.msk.bf16.mxu1 %vm7618_vm3, %v14287_v62  ;;  %v3804_v45 = vld [vmem:[%s14235_s23 + $0xb8] sm:$0xff]  ;;  %459 = vst.msk [vmem:[#allocation2 + $0x60] sm:$0xff] %vm446_vm0, %v10521_v23  ;;  %v10551_v48 = vadd.f32 %v10276_v20, %v306_v44  ;;  %vm7685_vm14 = vmpackc.low %vm1809_vm7, %vm1808_vm8  ;;  %v8633_v51 = vpop.f32.mrb[16].mxu0  ;;  %vm1220_vm3 = vcmp.eq.s32.totalorder %v9946_v61, %v9999_v28  ;;  %v3809_v28 = vld [vmem:[%s14235_s23 + $0xe0] sm:$0xff] }
 0x111   :  { %v10499_v12 = vpop.permute.xlu0 %2009  ;;  %8813 = vmatprep.subr.bf16.mxu0 %v10205_v59  ;;  %8767 = vmatprep.mubr.msk.bf16.mxu0 %vm7683_vm4, %v14287_v62  ;;  %v10596_v52 = vadd.f32 %v8633_v51, %v10276_v20  ;;  %v319_v56 = vpop.f32.mrb[17].mxu0  ;;  %vm1813_vm4 = vcmp.eq.s32.totalorder %v9946_v61, %v10076_v60  ;;  %vm1222_vm7 = vcmp.eq.s32.totalorder %v9946_v61, %v10009_v32  ;;  %vm7624_vm8 = vmpackc.low %vm1221_vm2, %vm1220_vm3 }
 0x112   :  { %3846 = vperm.xlu1 %9365, %v3802_v4   ;;  %3843 = vperm.xlu0 %9364, %v3801_v43   ;;  %v10533_v43 = vadd.f32 %v8630_v50, %v10276_v20  ;;  %460 = vst.msk [vmem:[#allocation2 + $0x68] sm:$0xff] %vm446_vm0, %v10551_v48  ;;  %vm7626_vm12 = vmpackc.low %vm1223_vm6, %vm1222_vm7  ;;  %vm1816_vm2 = vcmp.eq.s32.totalorder %v9946_v61, %v10098_v18 }
 0x113   :  { %14289 = vst [vmem:[#allocation52_spill] sm:$0xff] %v10596_v52  ;;  %465 = vst.msk [vmem:[#allocation2 + $0x90] sm:$0xff] %vm446_vm0, %v10596_v52  ;;  %vm2378_vm3 = vcmp.eq.s32.totalorder %v9946_v61, %v10106_v26 }
 0x114   :  { %8814 = vmatpush3.bf16.msra.mxu0 %v10205_v59  ;;  %v10528_v4 = vpop.permute.xlu1 %2024  ;;  %462 = vst.msk [vmem:[#allocation2 + $0x78] sm:$0xff] %vm446_vm0, %v10533_v43 }
 0x115   :  { %v10545_v59 = vpop.permute.xlu0 %2019  ;;  %8815 = vmatprep.subr.bf16.mxu0 %v10251_v16 }
 0x116   :  { %3852 = vperm.xlu1 %9365, %v3804_v45   ;;  %3849 = vperm.xlu0 %9364, %v3803_v1   ;;  %v10609_v45 = vadd.f32 %v10276_v20, %v319_v56  ;;  %v8634_v1 = vpop.f32.mrb[18].mxu0 }
 0x117   :  { %8704 = vmatmul.mubr.msk.bf16.gmra.mrb[20].mxu1 %vm7620_vm11, %v14287_v62  ;;  %8768 = vmatmul.mubr.msk.bf16.gmra.mrb[52].mxu0 %vm7685_vm14, %v14287_v62  ;;  %v10621_v44 = vadd.f32 %v8634_v1, %v10276_v20  ;;  %vm7689_vm11 = vmpackc.low %vm1813_vm4, %vm1812_vm5  ;;  %vm1225_vm14 = vcmp.eq.s32.totalorder %v9946_v61, %v10017_v35  ;;  %vm2377_vm4 = vcmp.eq.s32.totalorder %v9946_v61, %v10108_v29  ;;  %v4373_v35 = vld [vmem:[%s14235_s23 + $0x108] sm:$0xff] }
 0x118   :  { %8816 = vmatpush3.bf16.msra.mxu0 %v10251_v16  ;;  %v10584_v21 = vpop.permute.xlu1 %2034  ;;  %8707 = vmatprep.mubr.msk.bf16.mxu1 %vm7622_vm15, %v14287_v62  ;;  %v3807_v16 = vld [vmem:[%s14235_s23 + $0xd0] sm:$0xff]  ;;  %14290 = vst [vmem:[#allocation53_spill] sm:$0xff] %v10609_v45  ;;  %463 = vst.msk [vmem:[#allocation2 + $0x80] sm:$0xff] %vm446_vm0, %v10609_v45  ;;  %vm1224_vm15 = vcmp.eq.s32.totalorder %v9946_v61, %v10019_v36  ;;  %v4372_v36 = vld [vmem:[%s14235_s23 + $0x100] sm:$0xff] }
 0x119   :  { %v10587_v24 = vpop.permute.xlu0 %2029  ;;  %8817 = vmatprep.subr.bf16.mxu0 %v10243_v11  ;;  %8771 = vmatprep.mubr.msk.bf16.mxu0 %vm7687_vm1, %v14287_v62  ;;  %14291 = vst [vmem:[#allocation54_spill] sm:$0xff] %v10621_v44  ;;  %466 = vst.msk [vmem:[#allocation2 + $0x98] sm:$0xff] %vm446_vm0, %v10621_v44  ;;  %vm1817_vm1 = vcmp.eq.s32.totalorder %v9946_v61, %v10096_v14 }
 0x11a   :  { %3858 = vperm.xlu1 %9365, %v3806_v15   ;;  %3855 = vperm.xlu0 %9364, %v3805_v17   ;;  %v322_v15 = vpop.f32.mrb[19].mxu0  ;;  %vm7628_vm5 = vmpackc.low %vm1225_vm14, %vm1224_vm15  ;;  %vm2384_vm14 = vcmp.eq.s32.totalorder %v9946_v61, %v10136_v46  ;;  %vm2383_vm15 = vcmp.eq.s32.totalorder %v9946_v61, %v10138_v49 }
 0x11b   :  { %v10639_v17 = vadd.f32 %v10276_v20, %v322_v15  ;;  %v8637_v60 = vpop.f32.mrb[20].mxu0  ;;  %vm7693_vm6 = vmpackc.low %vm1817_vm1, %vm1816_vm2  ;;  %vm2386_vm1 = vcmp.eq.s32.totalorder %v9946_v61, %v10146_v55  ;;  %vm2385_vm2 = vcmp.eq.s32.totalorder %v9946_v61, %v10148_v58  ;;  %v4381_v55 = vld [vmem:[%s14235_s23 + $0x148] sm:$0xff]  ;;  %v4380_v58 = vld [vmem:[%s14235_s23 + $0x140] sm:$0xff] }
 0x11c   :  { %8818 = vmatpush3.bf16.msra.mxu0 %v10243_v11  ;;  %v10616_v50 = vpop.permute.xlu1 %2044  ;;  %v10684_v63 = vadd.f32 %v8637_v60, %v10276_v20  ;;  %v335_v5 = vpop.f32.mrb[21].mxu0  ;;  %vm7744_vm7 = vmpackc.low %vm2378_vm3, %vm2377_vm4 }
 0x11d   :  { %v10633_v11 = vpop.permute.xlu0 %2039  ;;  %8819 = vmatprep.subr.bf16.mxu0 %v10312_v42  ;;  %14292 = vst [vmem:[#allocation55_spill] sm:$0xff] %v10639_v17  ;;  %464 = vst.msk [vmem:[#allocation2 + $0x88] sm:$0xff] %vm446_vm0, %v10639_v17  ;;  %v10697_v51 = vadd.f32 %v10276_v20, %v335_v5  ;;  %v8638_v56 = vpop.f32.mrb[22].mxu0 }
 0x11e   :  { %3864 = vperm.xlu1 %9365, %v3808_v57   ;;  %3861 = vperm.xlu0 %9364, %v3807_v16   ;;  %14293 = vst [vmem:[#allocation56_spill] sm:$0xff] %v10684_v63  ;;  %469 = vst.msk [vmem:[#allocation2 + $0xb0] sm:$0xff] %vm446_vm0, %v10684_v63  ;;  %v10709_v16 = vadd.f32 %v8638_v56, %v10276_v20  ;;  %v338_v1 = vpop.f32.mrb[23].mxu0 }
 0x11f   :  { %8708 = vmatmul.mubr.msk.bf16.gmra.mrb[24].mxu1 %vm7624_vm8, %v14287_v62  ;;  %8772 = vmatmul.mubr.msk.bf16.gmra.mrb[56].mxu0 %vm7689_vm11, %v14287_v62  ;;  %14294 = vst [vmem:[#allocation57_spill] sm:$0xff] %v10697_v51  ;;  %467 = vst.msk [vmem:[#allocation2 + $0xa0] sm:$0xff] %vm446_vm0, %v10697_v51  ;;  %v8641_v26 = vpop.f32.mrb[24].mxu0  ;;  %vm2380_vm8 = vcmp.eq.s32.totalorder %v9946_v61, %v10116_v34  ;;  %vm2381_vm11 = vcmp.eq.s32.totalorder %v9946_v61, %v10128_v41  ;;  %v4377_v41 = vld [vmem:[%s14235_s23 + $0x128] sm:$0xff] }
 0x120   :  { %8820 = vmatpush3.bf16.msra.mxu0 %v10312_v42  ;;  %v10672_v31 = vpop.permute.xlu1 %2054  ;;  %8711 = vmatprep.mubr.msk.bf16.mxu1 %vm7626_vm12, %v14287_v62  ;;  %v3811_v42 = vld [vmem:[%s14235_s23 + $0xf0] sm:$0xff]  ;;  %14295 = vst [vmem:[#allocation58_spill] sm:$0xff] %v10709_v16  ;;  %470 = vst.msk [vmem:[#allocation2 + $0xb8] sm:$0xff] %vm446_vm0, %v10709_v16  ;;  %v10757_v29 = vadd.f32 %v8641_v26, %v10276_v20 }
 0x121   :  { %v10675_v32 = vpop.permute.xlu0 %2049  ;;  %8821 = vmatprep.subr.bf16.mxu0 %v10301_v53  ;;  %8775 = vmatprep.mubr.msk.bf16.mxu0 %vm7691_vm13, %v14287_v62  ;;  %vm7746_vm12 = vmpackc.low %vm2380_vm8, %vm2379_vm9  ;;  %vm2389_vm8 = vcmp.eq.s32.totalorder %v9946_v61, %v10168_v30 }
 0x122   :  { %3870 = vperm.xlu1 %9365, %v3810_v27   ;;  %3867 = vperm.xlu0 %9364, %v3809_v28   ;;  %14299 = vst [vmem:[#allocation62_spill] sm:$0xff] %v10757_v29  ;;  %v351_v27 = vpop.f32.mrb[25].mxu0  ;;  %v4374_v28 = vld [vmem:[%s14235_s23 + $0x110] sm:$0xff]  ;;  %473 = vst.msk [vmem:[#allocation2 + $0xd0] sm:$0xff] %vm446_vm0, %v10757_v29 }
 0x123   :  { %v10770_v60 = vadd.f32 %v10276_v20, %v351_v27  ;;  %v8642_v5 = vpop.f32.mrb[26].mxu0  ;;  %vm7748_vm13 = vmpackc.low %vm2382_vm10, %vm2381_vm11  ;;  %v4379_v27 = vld [vmem:[%s14235_s23 + $0x138] sm:$0xff] }
 0x124   :  { %8822 = vmatpush3.bf16.msra.mxu0 %v10301_v53  ;;  %v10704_v57 = vpop.permute.xlu1 %2064  ;;  %v10723_v53 = vadd.f32 %v10276_v20, %v338_v1  ;;  %v354_v56 = vpop.f32.mrb[27].mxu0  ;;  %vm7750_vm3 = vmpackc.low %vm2384_vm14, %vm2383_vm15 }
 0x125   :  { %v10717_v15 = vpop.permute.xlu0 %2059  ;;  %8823 = vmatprep.subr.bf16.mxu0 %v10380_v39  ;;  %14300 = vst [vmem:[#allocation63_spill] sm:$0xff] %v10770_v60  ;;  %471 = vst.msk [vmem:[#allocation2 + $0xc0] sm:$0xff] %vm446_vm0, %v10770_v60  ;;  %v10789_v40 = vadd.f32 %v10276_v20, %v354_v56 }
 0x126   :  { %14296 = vst [vmem:[#allocation59_spill] sm:$0xff] %v10723_v53  ;;  %3876 = vperm.xlu1 %9365, %v3812_v7   ;;  %3873 = vperm.xlu0 %9364, %v3811_v42   ;;  %468 = vst.msk [vmem:[#allocation2 + $0xa8] sm:$0xff] %vm446_vm0, %v10723_v53  ;;  %v10782_v42 = vadd.f32 %v8642_v5, %v10276_v20 }
 0x127   :  { %8712 = vmatmul.mubr.msk.bf16.gmra.mrb[28].mxu1 %vm7628_vm5, %v14287_v62  ;;  %8776 = vmatmul.mubr.msk.bf16.gmra.mrb[60].mxu0 %vm7693_vm6, %v14287_v62  ;;  %14302 = vst [vmem:[#allocation65_spill] sm:$0xff] %v10789_v40  ;;  %472 = vst.msk [vmem:[#allocation2 + $0xc8] sm:$0xff] %vm446_vm0, %v10789_v40  ;;  %vm2388_vm5 = vcmp.eq.s32.totalorder %v9946_v61, %v10156_v3  ;;  %vm2387_vm6 = vcmp.eq.s32.totalorder %v9946_v61, %v10158_v8  ;;  %v4385_v8 = vld [vmem:[%s14235_s23 + $0x168] sm:$0xff] }
 0x128   :  { %8824 = vmatpush3.bf16.msra.mxu0 %v10380_v39  ;;  %v10750_v14 = vpop.permute.xlu1 %2569  ;;  %8827 = vmatprep.mubr.msk.bf16.mxu0 %vm7744_vm7, %v14287_v62  ;;  %v4375_v39 = vld [vmem:[%s14235_s23 + $0x118] sm:$0xff]  ;;  %14301 = vst [vmem:[#allocation64_spill] sm:$0xff] %v10782_v42  ;;  %474 = vst.msk [vmem:[#allocation2 + $0xd8] sm:$0xff] %vm446_vm0, %v10782_v42  ;;  %vm2390_vm7 = vcmp.eq.s32.totalorder %v9946_v61, %v10166_v25  ;;  %v4384_v25 = vld [vmem:[%s14235_s23 + $0x160] sm:$0xff] }
 0x129   :  { %14297 = vst [vmem:[#allocation60_spill] sm:$0xff] %v10750_v14  ;;  %v10753_v18 = vpop.permute.xlu0 %2564  ;;  %8825 = vmatprep.subr.bf16.mxu0 %v10369_v9  ;;  %vm7752_vm4 = vmpackc.low %vm2386_vm1, %vm2385_vm2 }
 0x12a   :  { %14298 = vst [vmem:[#allocation61_spill] sm:$0xff] %v10753_v18  ;;  %4409 = vperm.xlu1 %9365, %v4373_v35   ;;  %4406 = vperm.xlu0 %9364, %v4372_v36   ;;  %v8645_v35 = vpop.f32.mrb[28].mxu0  ;;  %vm7754_vm9 = vmpackc.low %vm2388_vm5, %vm2387_vm6 }
 0x12b   :  { %v10814_v36 = vadd.f32 %v8645_v35, %v10276_v20  ;;  %v367_v26 = vpop.f32.mrb[29].mxu0  ;;  %vm7756_vm10 = vmpackc.low %vm2390_vm7, %vm2389_vm8 }
 0x12c   :  { %8826 = vmatpush3.bf16.msra.mxu0 %v10369_v9  ;;  %v10777_v7 = vpop.permute.xlu1 %2579  ;;  %v8646_v5 = vpop.f32.mrb[30].mxu0 }
 0x12d   :  { %v10784_v1 = vpop.permute.xlu0 %2574  ;;  %14305 = vst [vmem:[#allocation68_spill] sm:$0xff] %v10814_v36  ;;  %477 = vst.msk [vmem:[#allocation2 + $0xf0] sm:$0xff] %vm446_vm0, %v10814_v36  ;;  %v10838_v49 = vadd.f32 %v8646_v5, %v10276_v20 }
 0x12e   :  { %4415 = vperm.xlu1 %9365, %v4375_v39   ;;  %4412 = vperm.xlu0 %9364, %v4374_v28   ;;  %v4378_v39 = vld [vmem:[%s14235_s23 + $0x130] sm:$0xff]  ;;  %v10827_v28 = vadd.f32 %v10276_v20, %v367_v26 }
 0x12f   :  { %8828 = vmatmul.mubr.msk.bf16.vlgmr.msra.gmra.mrb[64].mxu0 %vm7746_vm12, %v14287_v62  ;;  %14308 = vst [vmem:[#allocation71_spill] sm:$0xff] %v10838_v49  ;;  %478 = vst.msk [vmem:[#allocation2 + $0xf8] sm:$0xff] %vm446_vm0, %v10838_v49 }
 0x130   :  { %8831 = vmatprep.mubr.msk.bf16.mxu0 %vm7748_vm13, %v14287_v62  ;;  %v10809_v34 = vpop.permute.xlu1 %2589  ;;  %14306 = vst [vmem:[#allocation69_spill] sm:$0xff] %v10827_v28  ;;  %475 = vst.msk [vmem:[#allocation2 + $0xe0] sm:$0xff] %vm446_vm0, %v10827_v28 }
 0x131   :  { %14303 = vst [vmem:[#allocation66_spill] sm:$0xff] %v10809_v34  ;;  %v10811_v9 = vpop.permute.xlu0 %2584 }
 0x132   :  { %14304 = vst [vmem:[#allocation67_spill] sm:$0xff] %v10811_v9  ;;  %4421 = vperm.xlu1 %9365, %v4377_v41   ;;  %4418 = vperm.xlu0 %9364, %v4376_v37   ;;  %v370_v41 = vpop.f32.mrb[31].mxu0 }
 0x133   :  { %v10845_v35 = vadd.f32 %v10276_v20, %v370_v41  ;;  %v8649_v41 = vpop.f32.mrb[32].mxu0 }
 0x134   :  { %v10833_v56 = vpop.permute.xlu1 %2599 }
 0x135   :  { %14307 = vst [vmem:[#allocation70_spill] sm:$0xff] %v10833_v56  ;;  %v10840_v37 = vpop.permute.xlu0 %2594  ;;  %14310 = vst [vmem:[#allocation73_spill] sm:$0xff] %v10845_v35 }
 0x136   :  { %14309 = vst [vmem:[#allocation72_spill] sm:$0xff] %v10840_v37  ;;  %4427 = vperm.xlu1 %9365, %v4379_v27   ;;  %4424 = vperm.xlu0 %9364, %v4378_v39   ;;  %476 = vst.msk [vmem:[#allocation2 + $0xe8] sm:$0xff] %vm446_vm0, %v10845_v35  ;;  %v4383_v27 = vld [vmem:[%s14235_s23 + $0x158] sm:$0xff]  ;;  %v4382_v39 = vld [vmem:[%s14235_s23 + $0x150] sm:$0xff] }
 0x137   :  { %8832 = vmatmul.mubr.msk.bf16.gmra.mrb[68].mxu0 %vm7750_vm3, %v14287_v62 }
 0x138   :  { %8835 = vmatprep.mubr.msk.bf16.mxu0 %vm7752_vm4, %v14287_v62  ;;  %v10862_v46 = vpop.permute.xlu1 %2609 }
 0x139   :  { %14311 = vst [vmem:[#allocation74_spill] sm:$0xff] %v10862_v46  ;;  %v10864_v26 = vpop.permute.xlu0 %2604  ;;  %v14319_v46 = vld [vmem:[#allocation6_spill] sm:$0xff] }
 0x13a   :  { %14312 = vst [vmem:[#allocation75_spill] sm:$0xff] %v10864_v26  ;;  %4433 = vperm.xlu1 %9365, %v4381_v55   ;;  %4430 = vperm.xlu0 %9364, %v4380_v58   ;;  %v10897_v58 = vadd.f32 %v8649_v41, %v10276_v20  ;;  %vm2391_vm12 = vcmp.eq.s32.totalorder %v9946_v61, %v14319_v46  ;;  %v4387_v26 = vld [vmem:[%s14235_s23 + $0x178] sm:$0xff] }
 0x13c   :  { %v10880_v5 = vpop.permute.xlu1 %2619  ;;  %14317 = vst [vmem:[#allocation80_spill] sm:$0xff] %v10897_v58  ;;  %481 = vst.msk [vmem:[#allocation2 + $0x110] sm:$0xff] %vm446_vm0, %v10897_v58 }
 0x13d   :  { %14313 = vst [vmem:[#allocation76_spill] sm:$0xff] %v10880_v5  ;;  %v10882_v3 = vpop.permute.xlu0 %2614  ;;  %v14332_v5 = vld [vmem:[#allocation29_spill] sm:$0xff] }
 0x13e   :  { %14314 = vst [vmem:[#allocation77_spill] sm:$0xff] %v10882_v3  ;;  %4439 = vperm.xlu1 %9365, %v4383_v27   ;;  %4436 = vperm.xlu0 %9364, %v4382_v39   ;;  %v383_v27 = vpop.f32.mrb[33].mxu0  ;;  %v14318_v39 = vld [vmem:[#allocation5_spill] sm:$0xff] }
 0x13f   :  { %8836 = vmatmul.mubr.msk.bf16.gmra.mrb[72].mxu0 %vm7754_vm9, %v14287_v62  ;;  %vm2392_vm11 = vcmp.eq.s32.totalorder %v9946_v61, %v14318_v39 }
 0x140   :  { %8839 = vmatprep.mubr.msk.bf16.mxu0 %vm7756_vm10, %v14287_v62  ;;  %v10892_v30 = vpop.permute.xlu1 %2629  ;;  %vm7758_vm13 = vmpackc.low %vm2392_vm11, %vm2391_vm12 }
 0x141   :  { %14315 = vst [vmem:[#allocation78_spill] sm:$0xff] %v10892_v30  ;;  %v10894_v55 = vpop.permute.xlu0 %2624  ;;  %v4386_v30 = vld [vmem:[%s14235_s23 + $0x170] sm:$0xff] }
 0x142   :  { %14316 = vst [vmem:[#allocation79_spill] sm:$0xff] %v10894_v55  ;;  %4445 = vperm.xlu1 %9365, %v4385_v8   ;;  %4442 = vperm.xlu0 %9364, %v4384_v25   ;;  %v10912_v8 = vadd.f32 %v10276_v20, %v383_v27  ;;  %v8650_v25 = vpop.f32.mrb[34].mxu0 }
 0x143   :  { %v10917_v39 = vadd.f32 %v8650_v25, %v10276_v20  ;;  %v386_v46 = vpop.f32.mrb[35].mxu0 }
 0x144   :  { %14320 = vst [vmem:[#allocation5_spill] sm:$0xff] %v10912_v8  ;;  %v10914_v41 = vpop.permute.xlu1 %2639  ;;  %479 = vst.msk [vmem:[#allocation2 + $0x100] sm:$0xff] %vm446_vm0, %v10912_v8  ;;  %v10924_v55 = vadd.f32 %v10276_v20, %v386_v46  ;;  %v14328_v46 = vld [vmem:[#allocation31_spill] sm:$0xff] }
 0x145   :  { %14321 = vst [vmem:[#allocation6_spill] sm:$0xff] %v10914_v41  ;;  %14322 = vst [vmem:[#allocation81_spill] sm:$0xff] %v10917_v39  ;;  %v10919_v61 = vpop.permute.xlu0 %2634  ;;  %v14327_v41 = vld [vmem:[#allocation34_spill] sm:$0xff] }
 0x146   :  { %14323 = vst [vmem:[#allocation82_spill] sm:$0xff] %v10919_v61  ;;  %14324 = vst [vmem:[#allocation83_spill] sm:$0xff] %v10924_v55  ;;  %4451 = vperm.xlu1 %9365, %v4387_v26   ;;  %4448 = vperm.xlu0 %9364, %v4386_v30   ;;  %v14331_v61 = vld [vmem:[#allocation33_spill] sm:$0xff] }
 0x147   :  { %482 = vst.msk [vmem:[#allocation2 + $0x118] sm:$0xff] %vm446_vm0, %v10917_v39  ;;  %8840 = vmatmul.mubr.msk.bf16.gmra.mrb[76].mxu0 %vm7758_vm13, %v14287_v62  ;;  %480 = vst.msk [vmem:[#allocation2 + $0x108] sm:$0xff] %vm446_vm0, %v10924_v55 }
 0x148   :  { %v10931_v27 = vpop.permute.xlu1 %2917 }
 0x149   :  { %14325 = vst [vmem:[#allocation84_spill] sm:$0xff] %v10931_v27  ;;  %v10933_v25 = vpop.permute.xlu0 %2912  ;;  %v8653_v27 = vpop.f32.mrb[36].mxu0 }
 0x14a   :  { %14326 = vst [vmem:[#allocation85_spill] sm:$0xff] %v10933_v25  ;;  %545 = vrot.lane.b32.xlu1 %v14327_v41, %s9373_s20  ;;  %543 = vrot.lane.b32.xlu0 %v14328_v46, %s9373_s20  ;;  %v3240_v25 = vld [vmem:[%s14111_s6 + $0x8] sm:$0xff]  ;;  %v3239_v41 = vld [vmem:[%s14111_s6] sm:$0xff]  ;;  %v10954_v46 = vadd.f32 %v8653_v27, %v10276_v20 }
 0x14c   :  { %v10939_v26 = vpop.permute.xlu1 %2927  ;;  %14333 = vst [vmem:[#allocation88_spill] sm:$0xff] %v10954_v46  ;;  %485 = vst.msk [vmem:[#allocation2 + $0x130] sm:$0xff] %vm446_vm0, %v10954_v46 }
 0x14d   :  { %14329 = vst [vmem:[#allocation86_spill] sm:$0xff] %v10939_v26  ;;  %v10941_v30 = vpop.permute.xlu0 %2922  ;;  %v399_v26 = vpop.f32.mrb[37].mxu0 }
 0x14e   :  { %14330 = vst [vmem:[#allocation87_spill] sm:$0xff] %v10941_v30  ;;  %549 = vrot.lane.b32.xlu1 %v14331_v61, %s9373_s20  ;;  %547 = vrot.lane.b32.xlu0 %v14332_v5, %s9373_s20  ;;  %v10959_v61 = vadd.f32 %v10276_v20, %v399_v26  ;;  %v8654_v5 = vpop.f32.mrb[38].mxu0 }
 0x14f   :  { %v10968_v27 = vadd.f32 %v8654_v5, %v10276_v20  ;;  %v402_v34 = vpop.f32.mrb[39].mxu0  ;;  %v3241_v5 = vld [vmem:[%s14111_s6 + $0x10] sm:$0xff] }
 0x150   :  { %v10956_v30 = vpop.permute.xlu1 %2937  ;;  %14335 = vst [vmem:[#allocation90_spill] sm:$0xff] %v10959_v61  ;;  %483 = vst.msk [vmem:[#allocation2 + $0x120] sm:$0xff] %vm446_vm0, %v10959_v61 }
 0x151   :  { %14334 = vst [vmem:[#allocation89_spill] sm:$0xff] %v10956_v30  ;;  %v10961_v3 = vpop.permute.xlu0 %2932  ;;  %14337 = vst [vmem:[#allocation92_spill] sm:$0xff] %v10968_v27  ;;  %v10971_v30 = vadd.f32 %v10276_v20, %v402_v34  ;;  %v3242_v34 = vld [vmem:[%s14111_s6 + $0x18] sm:$0xff] }
 0x152   :  { %14336 = vst [vmem:[#allocation91_spill] sm:$0xff] %v10961_v3  ;;  %3495 = vperm.xlu1 %9365, %v3240_v25   ;;  %3490 = vperm.xlu0 %9364, %v3239_v41   ;;  %486 = vst.msk [vmem:[#allocation2 + $0x138] sm:$0xff] %vm446_vm0, %v10968_v27 }
 0x153   :  { %14338 = vst [vmem:[#allocation93_spill] sm:$0xff] %v10971_v30  ;;  %484 = vst.msk [vmem:[#allocation2 + $0x128] sm:$0xff] %vm446_vm0, %v10971_v30 }
 0x154   :  { %v10973_v26 = vpop.permute.xlu1 %2947 }
 0x155   :  { %14339 = vst [vmem:[#allocation94_spill] sm:$0xff] %v10973_v26  ;;  %v10977_v3 = vpop.permute.xlu0 %2942  ;;  %v8657_v26 = vpop.f32.mrb[40].mxu0 }
 0x156   :  { %14340 = vst [vmem:[#allocation95_spill] sm:$0xff] %v10977_v3  ;;  %553 = vrot.lane.b32.xlu1 %v10392_v0, %s9373_s20  ;;  %551 = vrot.lane.b32.xlu0 %v10376_v33, %s9373_s20  ;;  %v10996_v3 = vadd.f32 %v8657_v26, %v10276_v20  ;;  %v415_v0 = vpop.f32.mrb[41].mxu0 }
 0x157   :  { %v10999_v33 = vadd.f32 %v10276_v20, %v415_v0  ;;  %v8658_v9 = vpop.f32.mrb[42].mxu0 }
 0x158   :  { %v10991_v41 = vpop.permute.xlu1 %2957  ;;  %489 = vst.msk [vmem:[#allocation2 + $0x150] sm:$0xff] %vm446_vm0, %v10996_v3 }
 0x159   :  { %14341 = vst [vmem:[#allocation96_spill] sm:$0xff] %v10991_v41  ;;  %v10993_v25 = vpop.permute.xlu0 %2952  ;;  %14343 = vst [vmem:[#allocation98_spill] sm:$0xff] %v10999_v33  ;;  %v11006_v41 = vadd.f32 %v8658_v9, %v10276_v20  ;;  %v3244_v9 = vld [vmem:[%s14111_s6 + $0x28] sm:$0xff] }
 0x15a   :  { %14342 = vst [vmem:[#allocation97_spill] sm:$0xff] %v10993_v25  ;;  %3505 = vperm.xlu1 %9365, %v3242_v34   ;;  %3500 = vperm.xlu0 %9364, %v3241_v5   ;;  %v418_v25 = vpop.f32.mrb[43].mxu0  ;;  %487 = vst.msk [vmem:[#allocation2 + $0x140] sm:$0xff] %vm446_vm0, %v10999_v33  ;;  %v3243_v34 = vld [vmem:[%s14111_s6 + $0x20] sm:$0xff] }
 0x15b   :  { %v11013_v26 = vadd.f32 %v10276_v20, %v418_v25  ;;  %490 = vst.msk [vmem:[#allocation2 + $0x158] sm:$0xff] %vm446_vm0, %v11006_v41  ;;  %v8661_v0 = vpop.f32.mrb[44].mxu0 }
 0x15c   :  { %v11001_v56 = vpop.permute.xlu1 %2967  ;;  %v11030_v5 = vadd.f32 %v8661_v0, %v10276_v20  ;;  %v431_v25 = vpop.f32.mrb[45].mxu0 }
 0x15d   :  { %14344 = vst [vmem:[#allocation99_spill] sm:$0xff] %v11001_v56  ;;  %v11008_v37 = vpop.permute.xlu0 %2962  ;;  %14346 = vst [vmem:[#allocation101_spill] sm:$0xff] %v11013_v26 }
 0x15e   :  { %14345 = vst [vmem:[#allocation100_spill] sm:$0xff] %v11008_v37  ;;  %557 = vrot.lane.b32.xlu1 %v10387_v6, %s9373_s20  ;;  %555 = vrot.lane.b32.xlu0 %v10365_v19, %s9373_s20  ;;  %488 = vst.msk [vmem:[#allocation2 + $0x148] sm:$0xff] %vm446_vm0, %v11013_v26  ;;  %v11035_v37 = vadd.f32 %v10276_v20, %v431_v25  ;;  %v8662_v19 = vpop.f32.mrb[46].mxu0 }
 0x15f   :  { %493 = vst.msk [vmem:[#allocation2 + $0x170] sm:$0xff] %vm446_vm0, %v11030_v5  ;;  %v11042_v14 = vadd.f32 %v8662_v19, %v10276_v20  ;;  %v434_v18 = vpop.f32.mrb[47].mxu0  ;;  %v3245_v19 = vld [vmem:[%s14111_s6 + $0x30] sm:$0xff] }
 0x160   :  { %v11032_v56 = vpop.permute.xlu1 %2977  ;;  %491 = vst.msk [vmem:[#allocation2 + $0x160] sm:$0xff] %vm446_vm0, %v11035_v37  ;;  %v11047_v0 = vadd.f32 %v10276_v20, %v434_v18  ;;  %v3246_v20 = vld [vmem:[%s14111_s6 + $0x38] sm:$0xff] }
 0x161   :  { %14347 = vst [vmem:[#allocation102_spill] sm:$0xff] %v11032_v56  ;;  %v11037_v6 = vpop.permute.xlu0 %2972  ;;  %494 = vst.msk [vmem:[#allocation2 + $0x178] sm:$0xff] %vm446_vm0, %v11042_v14 }
 0x162   :  { %14348 = vst [vmem:[#allocation103_spill] sm:$0xff] %v11037_v6  ;;  %3515 = vperm.xlu1 %9365, %v3244_v9   ;;  %3510 = vperm.xlu0 %9364, %v3243_v34   ;;  %492 = vst.msk [vmem:[#allocation2 + $0x168] sm:$0xff] %vm446_vm0, %v11047_v0  ;;  %v3248_v6 = vld [vmem:[%s14111_s6 + $0x48] sm:$0xff] }
 0x164   :  { %v11051_v25 = vpop.permute.xlu1 %2987 }
 0x165   :  { %14349 = vst [vmem:[#allocation104_spill] sm:$0xff] %v11051_v25  ;;  %v11055_v56 = vpop.permute.xlu0 %2982 }
 0x166   :  { %14350 = vst [vmem:[#allocation105_spill] sm:$0xff] %v11055_v56  ;;  %561 = vrot.lane.b32.xlu1 %v10463_v13, %s9373_s20  ;;  %559 = vrot.lane.b32.xlu0 %v10432_v54, %s9373_s20  ;;  %v3247_v56 = vld [vmem:[%s14111_s6 + $0x40] sm:$0xff] }
 0x168   :  { %v11067_v18 = vpop.permute.xlu1 %3259 }
 0x169   :  { %v11069_v9 = vpop.permute.xlu0 %3256 }
 0x16a   :  { %3525 = vperm.xlu1 %9365, %v3246_v20   ;;  %3520 = vperm.xlu0 %9364, %v3245_v19  }
 0x16c   :  { %v11071_v34 = vpop.permute.xlu1 %3265 }
 0x16d   :  { %14351 = vst [vmem:[#allocation106_spill] sm:$0xff] %v11071_v34  ;;  %v11073_v25 = vpop.permute.xlu0 %3262 }
 0x16e   :  { %14352 = vst [vmem:[#allocation107_spill] sm:$0xff] %v11073_v25  ;;  %565 = vrot.lane.b32.xlu1 %v10445_v2, %s9373_s20  ;;  %563 = vrot.lane.b32.xlu0 %v10419_v22, %s9373_s20  ;;  %v3250_v22 = vld [vmem:[%s14111_s6 + $0x58] sm:$0xff] }
 0x171   :  { %v11085_v20 = vpop.permute.xlu1 %3271  ;;  %v11087_v19 = vpop.permute.xlu0 %3268 }
 0x172   :  { %14353 = vst [vmem:[#allocation108_spill] sm:$0xff] %v11085_v20  ;;  %14354 = vst [vmem:[#allocation109_spill] sm:$0xff] %v11087_v19  ;;  %3535 = vperm.xlu1 %9365, %v3248_v6   ;;  %3530 = vperm.xlu0 %9364, %v3247_v56   ;;  %v3249_v19 = vld [vmem:[%s14111_s6 + $0x50] sm:$0xff]  ;;  %v3252_v20 = vld [vmem:[%s14111_s6 + $0x68] sm:$0xff] }
 0x175   :  { %v11089_v25 = vpop.permute.xlu1 %3277  ;;  %v11091_v34 = vpop.permute.xlu0 %3274 }
 0x176   :  { %14355 = vst [vmem:[#allocation110_spill] sm:$0xff] %v11089_v25  ;;  %14356 = vst [vmem:[#allocation111_spill] sm:$0xff] %v11091_v34  ;;  %569 = vrot.lane.b32.xlu1 %v10551_v48, %s9373_s20  ;;  %567 = vrot.lane.b32.xlu0 %v10521_v23, %s9373_s20 }
 0x179   :  { %v11103_v6 = vpop.permute.xlu1 %3283  ;;  %v11105_v56 = vpop.permute.xlu0 %3280 }
 0x17a   :  { %14357 = vst [vmem:[#allocation112_spill] sm:$0xff] %v11103_v6  ;;  %14358 = vst [vmem:[#allocation113_spill] sm:$0xff] %v11105_v56  ;;  %3545 = vperm.xlu1 %9365, %v3250_v22   ;;  %3540 = vperm.xlu0 %9364, %v3249_v19   ;;  %v3251_v56 = vld [vmem:[%s14111_s6 + $0x60] sm:$0xff]  ;;  %v3254_v6 = vld [vmem:[%s14111_s6 + $0x78] sm:$0xff] }
 0x17d   :  { %v11107_v34 = vpop.permute.xlu1 %3289  ;;  %v11109_v25 = vpop.permute.xlu0 %3286 }
 0x17e   :  { %14359 = vst [vmem:[#allocation114_spill] sm:$0xff] %v11107_v34  ;;  %14360 = vst [vmem:[#allocation115_spill] sm:$0xff] %v11109_v25  ;;  %573 = vrot.lane.b32.xlu1 %v10533_v43, %s9373_s20  ;;  %571 = vrot.lane.b32.xlu0 %v10508_v47, %s9373_s20 }
 0x181   :  { %v11121_v22 = vpop.permute.xlu1 %3295  ;;  %v11123_v19 = vpop.permute.xlu0 %3292 }
 0x182   :  { %14361 = vst [vmem:[#allocation116_spill] sm:$0xff] %v11121_v22  ;;  %14362 = vst [vmem:[#allocation117_spill] sm:$0xff] %v11123_v19  ;;  %3555 = vperm.xlu1 %9365, %v3252_v20   ;;  %3550 = vperm.xlu0 %9364, %v3251_v56   ;;  %v3253_v19 = vld [vmem:[%s14111_s6 + $0x70] sm:$0xff] }
 0x185   :  { %v11125_v25 = vpop.permute.xlu1 %3301  ;;  %v11127_v34 = vpop.permute.xlu0 %3298 }
 0x186   :  { %14363 = vst [vmem:[#allocation118_spill] sm:$0xff] %v11125_v25  ;;  %14364 = vst [vmem:[#allocation119_spill] sm:$0xff] %v11127_v34  ;;  %577 = vrot.lane.b32.xlu1 %v10639_v17, %s9373_s20  ;;  %575 = vrot.lane.b32.xlu0 %v10609_v45, %s9373_s20  ;;  %v14367_v25 = vlaneseq  ;;  %v11152_v45 = vld [vmem:[%s14115_s4] ss:$0 sm:$0xff] }
 0x188   :  { %v11144_v34 = vshrl.u32 %v14367_v25, 7  ;;  %v3815_v25 = vld [vmem:[%s14111_s6 + $0x88] sm:$0xff] }
 0x189   :  { %v11139_v20 = vpop.permute.xlu1 %3834  ;;  %v11141_v56 = vpop.permute.xlu0 %3831 }
 0x18a   :  { %14365 = vst [vmem:[#allocation120_spill] sm:$0xff] %v11139_v20  ;;  %14366 = vst [vmem:[#allocation121_spill] sm:$0xff] %v11141_v56  ;;  %3565 = vperm.xlu1 %9365, %v3254_v6   ;;  %3560 = vperm.xlu0 %9364, %v3253_v19   ;;  %v11147_v22 = vadd.s32 8, %v11144_v34  ;;  %vm1512_vm14 = vcmp.eq.s32.totalorder %v11144_v34, %v11152_v45  ;;  %v3814_v6 = vld [vmem:[%s14111_s6 + $0x80] sm:$0xff]  ;;  %v3817_v20 = vld [vmem:[%s14111_s6 + $0x98] sm:$0xff] }
 0x18c   :  { %vm1513_vm15 = vcmp.eq.s32.totalorder %v11147_v22, %v11152_v45 }
 0x18d   :  { %v11154_v17 = vpop.permute.xlu1 %3840  ;;  %v11156_v47 = vpop.permute.xlu0 %3837  ;;  %vm7647_vm1 = vmpackc.low %vm1513_vm15, %vm1512_vm14 }
 0x18e   :  { %14368 = vst [vmem:[#allocation122_spill] sm:$0xff] %v11154_v17  ;;  %14369 = vst [vmem:[#allocation123_spill] sm:$0xff] %v11156_v47  ;;  %581 = vrot.lane.b32.xlu1 %v10621_v44, %s9373_s20  ;;  %579 = vrot.lane.b32.xlu0 %v10596_v52, %s9373_s20 }
 0x18f   :  { %8731 = vmatprep.mubr.msk.bf16.mxu1 %vm7647_vm1, %v14287_v62 }
 0x191   :  { %v11173_v19 = vpop.permute.xlu1 %3846  ;;  %v11175_v47 = vpop.permute.xlu0 %3843 }
 0x192   :  { %14370 = vst [vmem:[#allocation124_spill] sm:$0xff] %v11173_v19  ;;  %14371 = vst [vmem:[#allocation125_spill] sm:$0xff] %v11175_v47  ;;  %4070 = vperm.xlu1 %9365, %v3815_v25   ;;  %4065 = vperm.xlu0 %9364, %v3814_v6   ;;  %v3816_v47 = vld [vmem:[%s14111_s6 + $0x90] sm:$0xff]  ;;  %v3819_v19 = vld [vmem:[%s14111_s6 + $0xa8] sm:$0xff] }
 0x195   :  { %v11177_v17 = vpop.permute.xlu1 %3852  ;;  %v11179_v56 = vpop.permute.xlu0 %3849 }
 0x196   :  { %14372 = vst [vmem:[#allocation126_spill] sm:$0xff] %v11177_v17  ;;  %14373 = vst [vmem:[#allocation127_spill] sm:$0xff] %v11179_v56  ;;  %585 = vrot.lane.b32.xlu1 %v10723_v53, %s9373_s20  ;;  %583 = vrot.lane.b32.xlu0 %v10697_v51, %s9373_s20 }
 0x199   :  { %v11191_v25 = vpop.permute.xlu1 %3858  ;;  %v11193_v6 = vpop.permute.xlu0 %3855 }
 0x19a   :  { %14374 = vst [vmem:[#allocation128_spill] sm:$0xff] %v11191_v25  ;;  %14375 = vst [vmem:[#allocation129_spill] sm:$0xff] %v11193_v6  ;;  %4080 = vperm.xlu1 %9365, %v3817_v20   ;;  %4075 = vperm.xlu0 %9364, %v3816_v47   ;;  %v3818_v6 = vld [vmem:[%s14111_s6 + $0xa0] sm:$0xff]  ;;  %v3821_v25 = vld [vmem:[%s14111_s6 + $0xb8] sm:$0xff] }
 0x19d   :  { %v11195_v56 = vpop.permute.xlu1 %3864  ;;  %v11197_v17 = vpop.permute.xlu0 %3861 }
 0x19e   :  { %14376 = vst [vmem:[#allocation130_spill] sm:$0xff] %v11195_v56  ;;  %14377 = vst [vmem:[#allocation131_spill] sm:$0xff] %v11197_v17  ;;  %589 = vrot.lane.b32.xlu1 %v10709_v16, %s9373_s20  ;;  %587 = vrot.lane.b32.xlu0 %v10684_v63, %s9373_s20 }
 0x1a1   :  { %v11209_v20 = vpop.permute.xlu1 %3870  ;;  %v11211_v47 = vpop.permute.xlu0 %3867 }
 0x1a2   :  { %14378 = vst [vmem:[#allocation132_spill] sm:$0xff] %v11209_v20  ;;  %14379 = vst [vmem:[#allocation133_spill] sm:$0xff] %v11211_v47  ;;  %4090 = vperm.xlu1 %9365, %v3819_v19   ;;  %4085 = vperm.xlu0 %9364, %v3818_v6   ;;  %v3820_v47 = vld [vmem:[%s14111_s6 + $0xb0] sm:$0xff]  ;;  %v3823_v20 = vld [vmem:[%s14111_s6 + $0xc8] sm:$0xff] }
 0x1a5   :  { %v11213_v17 = vpop.permute.xlu1 %3876  ;;  %v11215_v56 = vpop.permute.xlu0 %3873 }
 0x1a6   :  { %14380 = vst [vmem:[#allocation134_spill] sm:$0xff] %v11213_v17  ;;  %14381 = vst [vmem:[#allocation135_spill] sm:$0xff] %v11215_v56  ;;  %593 = vrot.lane.b32.xlu1 %v10789_v40, %s9373_s20  ;;  %591 = vrot.lane.b32.xlu0 %v10770_v60, %s9373_s20 }
 0x1a9   :  { %v11227_v19 = vpop.permute.xlu1 %4409  ;;  %v11229_v6 = vpop.permute.xlu0 %4406 }
 0x1aa   :  { %14382 = vst [vmem:[#allocation136_spill] sm:$0xff] %v11227_v19  ;;  %14383 = vst [vmem:[#allocation137_spill] sm:$0xff] %v11229_v6  ;;  %4100 = vperm.xlu1 %9365, %v3821_v25   ;;  %4095 = vperm.xlu0 %9364, %v3820_v47   ;;  %v3822_v6 = vld [vmem:[%s14111_s6 + $0xc0] sm:$0xff]  ;;  %v3825_v19 = vld [vmem:[%s14111_s6 + $0xd8] sm:$0xff] }
 0x1ad   :  { %v11231_v56 = vpop.permute.xlu1 %4415  ;;  %v11233_v17 = vpop.permute.xlu0 %4412 }
 0x1ae   :  { %14384 = vst [vmem:[#allocation138_spill] sm:$0xff] %v11231_v56  ;;  %14385 = vst [vmem:[#allocation139_spill] sm:$0xff] %v11233_v17  ;;  %597 = vrot.lane.b32.xlu1 %v10782_v42, %s9373_s20  ;;  %595 = vrot.lane.b32.xlu0 %v10757_v29, %s9373_s20 }
 0x1b1   :  { %v11245_v25 = vpop.permute.xlu1 %4421  ;;  %v11247_v47 = vpop.permute.xlu0 %4418 }
 0x1b2   :  { %14386 = vst [vmem:[#allocation140_spill] sm:$0xff] %v11245_v25  ;;  %14387 = vst [vmem:[#allocation141_spill] sm:$0xff] %v11247_v47  ;;  %4110 = vperm.xlu1 %9365, %v3823_v20   ;;  %4105 = vperm.xlu0 %9364, %v3822_v6   ;;  %v3824_v47 = vld [vmem:[%s14111_s6 + $0xd0] sm:$0xff]  ;;  %v3827_v25 = vld [vmem:[%s14111_s6 + $0xe8] sm:$0xff] }
 0x1b5   :  { %v11249_v17 = vpop.permute.xlu1 %4427  ;;  %v11251_v56 = vpop.permute.xlu0 %4424 }
 0x1b6   :  { %14388 = vst [vmem:[#allocation142_spill] sm:$0xff] %v11249_v17  ;;  %14389 = vst [vmem:[#allocation143_spill] sm:$0xff] %v11251_v56  ;;  %601 = vrot.lane.b32.xlu1 %v10845_v35, %s9373_s20  ;;  %599 = vrot.lane.b32.xlu0 %v10827_v28, %s9373_s20  ;;  %v1861_v35 = vld [vmem:[#allocation2 + $0x98] sm:$0xff] }
 0x1b9   :  { %v11263_v20 = vpop.permute.xlu1 %4433  ;;  %v11265_v6 = vpop.permute.xlu0 %4430 }
 0x1ba   :  { %14390 = vst [vmem:[#allocation144_spill] sm:$0xff] %v11263_v20  ;;  %14391 = vst [vmem:[#allocation145_spill] sm:$0xff] %v11265_v6  ;;  %4120 = vperm.xlu1 %9365, %v3825_v19   ;;  %4115 = vperm.xlu0 %9364, %v3824_v47   ;;  %v3826_v6 = vld [vmem:[%s14111_s6 + $0xe0] sm:$0xff]  ;;  %v3829_v20 = vld [vmem:[%s14111_s6 + $0xf8] sm:$0xff] }
 0x1bd   :  { %v11267_v56 = vpop.permute.xlu1 %4439  ;;  %v11269_v17 = vpop.permute.xlu0 %4436 }
 0x1be   :  { %14392 = vst [vmem:[#allocation146_spill] sm:$0xff] %v11267_v56  ;;  %14393 = vst [vmem:[#allocation147_spill] sm:$0xff] %v11269_v17  ;;  %605 = vrot.lane.b32.xlu1 %v10838_v49, %s9373_s20  ;;  %603 = vrot.lane.b32.xlu0 %v10814_v36, %s9373_s20  ;;  %v1269_v49 = vld [vmem:[#allocation2 + $0x18] sm:$0xff] }
 0x1c1   :  { %v11281_v19 = vpop.permute.xlu1 %4445  ;;  %v11283_v47 = vpop.permute.xlu0 %4442 }
 0x1c2   :  { %14394 = vst [vmem:[#allocation148_spill] sm:$0xff] %v11281_v19  ;;  %14395 = vst [vmem:[#allocation149_spill] sm:$0xff] %v11283_v47  ;;  %4130 = vperm.xlu1 %9365, %v3827_v25   ;;  %4125 = vperm.xlu0 %9364, %v3826_v6   ;;  %v3828_v47 = vld [vmem:[%s14111_s6 + $0xf0] sm:$0xff] }
 0x1c3   :  { %v1860_v19 = vld [vmem:[#allocation2 + $0x90] sm:$0xff] }
 0x1c5   :  { %v11285_v17 = vpop.permute.xlu1 %4451  ;;  %v11287_v56 = vpop.permute.xlu0 %4448 }
 0x1c6   :  { %14396 = vst [vmem:[#allocation150_spill] sm:$0xff] %v11285_v17  ;;  %14397 = vst [vmem:[#allocation151_spill] sm:$0xff] %v11287_v56  ;;  %609 = vrot.lane.b32.xlu1 %v10924_v55, %s9373_s20  ;;  %607 = vrot.lane.b32.xlu0 %v10912_v8, %s9373_s20  ;;  %v1858_v8 = vld [vmem:[#allocation2 + $0x80] sm:$0xff] }
 0x1c9   :  { %v546_v25 = vpop.permute.xlu1 %545  ;;  %v544_v6 = vpop.permute.xlu0 %543 }
 0x1ca   :  { %689 = vst.msk [vmem:[#allocation2 + $0x188] sm:$0xff] %vm446_vm0, %v546_v25  ;;  %688 = vst.msk [vmem:[#allocation2 + $0x180] sm:$0xff] %vm446_vm0, %v544_v6  ;;  %4140 = vperm.xlu1 %9365, %v3829_v20   ;;  %4135 = vperm.xlu0 %9364, %v3828_v47   ;;  %v4390_v25 = vld [vmem:[%s14111_s6 + $0x108] sm:$0xff]  ;;  %v4389_v20 = vld [vmem:[%s14111_s6 + $0x100] sm:$0xff] }
 0x1cd   :  { %v550_v56 = vpop.permute.xlu1 %549  ;;  %v548_v17 = vpop.permute.xlu0 %547 }
 0x1ce   :  { %691 = vst.msk [vmem:[#allocation2 + $0x198] sm:$0xff] %vm446_vm0, %v550_v56  ;;  %690 = vst.msk [vmem:[#allocation2 + $0x190] sm:$0xff] %vm446_vm0, %v548_v17  ;;  %613 = vrot.lane.b32.xlu1 %v10917_v39, %s9373_s20  ;;  %611 = vrot.lane.b32.xlu0 %v10897_v58, %s9373_s20  ;;  %v1266_v58 = vld [vmem:[#allocation2] sm:$0xff] }
 0x1d1   :  { %v11313_v47 = vpop.permute.xlu1 %3495  ;;  %v11315_v6 = vpop.permute.xlu0 %3490 }
 0x1d2   :  { %14398 = vst [vmem:[#allocation152_spill] sm:$0xff] %v11313_v47  ;;  %14399 = vst [vmem:[#allocation153_spill] sm:$0xff] %v11315_v6  ;;  %4645 = vperm.xlu1 %9365, %v4390_v25   ;;  %4640 = vperm.xlu0 %9364, %v4389_v20   ;;  %v4392_v47 = vld [vmem:[%s14111_s6 + $0x118] sm:$0xff]  ;;  %v4391_v25 = vld [vmem:[%s14111_s6 + $0x110] sm:$0xff] }
 0x1d5   :  { %v554_v17 = vpop.permute.xlu1 %553  ;;  %v552_v56 = vpop.permute.xlu0 %551 }
 0x1d6   :  { %693 = vst.msk [vmem:[#allocation2 + $0x1a8] sm:$0xff] %vm446_vm0, %v554_v17  ;;  %692 = vst.msk [vmem:[#allocation2 + $0x1a0] sm:$0xff] %vm446_vm0, %v552_v56  ;;  %617 = vrot.lane.b32.xlu1 %v10971_v30, %s9373_s20  ;;  %615 = vrot.lane.b32.xlu0 %v10959_v61, %s9373_s20 }
 0x1d9   :  { %v11329_v20 = vpop.permute.xlu1 %3505  ;;  %v11331_v6 = vpop.permute.xlu0 %3500 }
 0x1da   :  { %14400 = vst [vmem:[#allocation154_spill] sm:$0xff] %v11329_v20  ;;  %14401 = vst [vmem:[#allocation155_spill] sm:$0xff] %v11331_v6  ;;  %4655 = vperm.xlu1 %9365, %v4392_v47   ;;  %4650 = vperm.xlu0 %9364, %v4391_v25   ;;  %v4394_v20 = vld [vmem:[%s14111_s6 + $0x128] sm:$0xff]  ;;  %v4393_v47 = vld [vmem:[%s14111_s6 + $0x120] sm:$0xff] }
 0x1dd   :  { %v558_v17 = vpop.permute.xlu1 %557  ;;  %v556_v56 = vpop.permute.xlu0 %555 }
 0x1de   :  { %695 = vst.msk [vmem:[#allocation2 + $0x1b8] sm:$0xff] %vm446_vm0, %v558_v17  ;;  %694 = vst.msk [vmem:[#allocation2 + $0x1b0] sm:$0xff] %vm446_vm0, %v556_v56  ;;  %621 = vrot.lane.b32.xlu1 %v10968_v27, %s9373_s20  ;;  %619 = vrot.lane.b32.xlu0 %v10954_v46, %s9373_s20  ;;  %v1268_v17 = vld [vmem:[#allocation2 + $0x10] sm:$0xff] }
 0x1e1   :  { %v11345_v25 = vpop.permute.xlu1 %3515  ;;  %v11347_v6 = vpop.permute.xlu0 %3510 }
 0x1e2   :  { %14402 = vst [vmem:[#allocation156_spill] sm:$0xff] %v11345_v25  ;;  %14403 = vst [vmem:[#allocation157_spill] sm:$0xff] %v11347_v6  ;;  %4665 = vperm.xlu1 %9365, %v4394_v20   ;;  %4660 = vperm.xlu0 %9364, %v4393_v47   ;;  %v8701_v56 = vpop.f32.mrb[16].mxu1  ;;  %v8765_v27 = vpop.f32.mrb[48].mxu0 }
 0x1e3   :  { %v1325_v61 = vadd.f32 %v8701_v56, %v1268_v17  ;;  %v1917_v46 = vadd.f32 %v8765_v27, %v1860_v19  ;;  %v1316_v30 = vpop.f32.mrb[17].mxu1  ;;  %v1908_v39 = vpop.f32.mrb[49].mxu0  ;;  %v1267_v19 = vld [vmem:[#allocation2 + $0x8] sm:$0xff] }
 0x1e4   :  { %v1317_v55 = vadd.f32 %v1316_v30, %v1266_v58  ;;  %v1909_v36 = vadd.f32 %v1908_v39, %v1858_v8  ;;  %v8702_v28 = vpop.f32.mrb[18].mxu1  ;;  %v8766_v25 = vpop.f32.mrb[50].mxu0 }
 0x1e5   :  { %v1381_v29 = vmax.f32 %v1325_v61, 0.0  ;;  %v1973_v6 = vmax.f32 %v1917_v46, 0.0  ;;  %v1328_v20 = vadd.f32 %v8702_v28, %v1269_v49  ;;  %v1920_v47 = vadd.f32 %v8766_v25, %v1861_v35  ;;  %v562_v42 = vpop.permute.xlu1 %561  ;;  %v560_v60 = vpop.permute.xlu0 %559  ;;  %v1859_v49 = vld [vmem:[#allocation2 + $0x88] sm:$0xff]  ;;  %v14406_v25 = vld [vmem:[#allocation50_spill] sm:$0xff] }
 0x1e6   :  { %v1379_v40 = vmax.f32 %v1317_v55, 0.0  ;;  %v1971_v63 = vmax.f32 %v1909_v36, 0.0  ;;  %697 = vst.msk [vmem:[#allocation2 + $0x1c8] sm:$0xff] %vm446_vm0, %v562_v42  ;;  %696 = vst.msk [vmem:[#allocation2 + $0x1c0] sm:$0xff] %vm446_vm0, %v560_v60  ;;  %v1319_v27 = vpop.f32.mrb[19].mxu1  ;;  %v1911_v58 = vpop.f32.mrb[51].mxu0  ;;  %625 = vrot.lane.b32.xlu1 %v11013_v26, %s9373_s20  ;;  %623 = vrot.lane.b32.xlu0 %v10999_v33, %s9373_s20 }
 0x1e7   :  { %v1382_v61 = vmax.f32 %v1328_v20, 0.0  ;;  %v1974_v28 = vmax.f32 %v1920_v47, 0.0  ;;  %v4396_v36 = vld [vmem:[%s14111_s6 + $0x138] sm:$0xff]  ;;  %v4395_v60 = vld [vmem:[%s14111_s6 + $0x130] sm:$0xff]  ;;  %v1320_v42 = vadd.f32 %v1319_v27, %v1267_v19  ;;  %v1912_v35 = vadd.f32 %v1911_v58, %v1859_v49  ;;  %v14405_v46 = vld [vmem:[#allocation13_spill] sm:$0xff] }
 0x1e8   :  { %v14404_v55 = vld [vmem:[#allocation14_spill] sm:$0xff]  ;;  %v2069_v39 = vmul.f32 %v10457_v38, %v1973_v6  ;;  %v14409_v47 = vld [vmem:[#allocation8_spill] sm:$0xff] }
 0x1e9   :  { %v1477_v8 = vmul.f32 %v14404_v55, %v1381_v29  ;;  %v1478_v30 = vmul.f32 %v14405_v46, %v1382_v61  ;;  %v2070_v17 = vmul.f32 %v14406_v25, %v1974_v28  ;;  %v11365_v56 = vpop.permute.xlu1 %3525  ;;  %v11367_v20 = vpop.permute.xlu0 %3520  ;;  %v1475_v33 = vmul.f32 %v14409_v47, %v1379_v40  ;;  %v14410_v26 = vld [vmem:[#allocation48_spill] sm:$0xff]  ;;  %v1272_v27 = vld [vmem:[#allocation2 + $0x30] sm:$0xff]  ;;  %v14411_v40 = vld [vmem:[#allocation7_spill] sm:$0xff] }
 0x1ea   :  { %14407 = vst [vmem:[#allocation14_spill] sm:$0xff] %v11365_v56  ;;  %14408 = vst [vmem:[#allocation13_spill] sm:$0xff] %v11367_v20  ;;  %v2067_v16 = vmul.f32 %v14410_v26, %v1971_v63  ;;  %v1380_v51 = vmax.f32 %v1320_v42, 0.0  ;;  %v1972_v53 = vmax.f32 %v1912_v35, 0.0  ;;  %4675 = vperm.xlu1 %9365, %v4396_v36   ;;  %4670 = vperm.xlu0 %9364, %v4395_v60   ;;  %v8705_v29 = vpop.f32.mrb[20].mxu1  ;;  %v1864_v19 = vld [vmem:[#allocation2 + $0xb0] sm:$0xff] }
 0x1eb   :  { %v8769_v38 = vpop.f32.mrb[52].mxu0  ;;  %v1341_v6 = vadd.f32 %v8705_v29, %v1272_v27  ;;  %v1332_v61 = vpop.f32.mrb[21].mxu1  ;;  %v1270_v28 = vld [vmem:[#allocation2 + $0x20] sm:$0xff]  ;;  %v11371_v46 = vpack.c.bf16 %v1478_v30, %v1477_v8  ;;  %v11373_v25 = vpack.c.bf16 %v2070_v17, %v2069_v39  ;;  %v14412_v26 = vld [vmem:[#allocation47_spill] sm:$0xff] }
 0x1ec   :  { %v1933_v58 = vadd.f32 %v8769_v38, %v1864_v19  ;;  %v1924_v49 = vpop.f32.mrb[53].mxu0  ;;  %v1862_v55 = vld [vmem:[#allocation2 + $0xa0] sm:$0xff]  ;;  %v1476_v63 = vmul.f32 %v14411_v40, %v1380_v51  ;;  %v2068_v42 = vmul.f32 %v14412_v26, %v1972_v53  ;;  %v1333_v36 = vadd.f32 %v1332_v61, %v1270_v28  ;;  %v1273_v35 = vld [vmem:[#allocation2 + $0x38] sm:$0xff]  ;;  %v8706_v47 = vpop.f32.mrb[22].mxu1 }
 0x1ed   :  { %v1925_v60 = vadd.f32 %v1924_v49, %v1862_v55  ;;  %v1865_v56 = vld [vmem:[#allocation2 + $0xb8] sm:$0xff]  ;;  %v8770_v20 = vpop.f32.mrb[54].mxu0  ;;  %v1385_v27 = vmax.f32 %v1341_v6, 0.0  ;;  %v1344_v19 = vadd.f32 %v8706_v47, %v1273_v35  ;;  %v566_v52 = vpop.permute.xlu1 %565  ;;  %v1271_v6 = vld [vmem:[#allocation2 + $0x28] sm:$0xff]  ;;  %v4397_v28 = vld [vmem:[%s14111_s6 + $0x140] sm:$0xff] }
 0x1ee   :  { %v1977_v29 = vmax.f32 %v1933_v58, 0.0  ;;  %v1936_v38 = vadd.f32 %v8770_v20, %v1865_v56  ;;  %v564_v44 = vpop.permute.xlu0 %563  ;;  %v1383_v8 = vmax.f32 %v1333_v36, 0.0  ;;  %699 = vst.msk [vmem:[#allocation2 + $0x1d8] sm:$0xff] %vm446_vm0, %v566_v52  ;;  %v1335_v51 = vpop.f32.mrb[23].mxu1  ;;  %629 = vrot.lane.b32.xlu1 %v11006_v41, %s9373_s20  ;;  %627 = vrot.lane.b32.xlu0 %v10996_v3, %s9373_s20  ;;  %v1584_v39 = vpack.c.bf16 %v1476_v63, %v1475_v33  ;;  %v1863_v58 = vld [vmem:[#allocation2 + $0xa8] sm:$0xff]  ;;  %v14413_v49 = vld [vmem:[#allocation22_spill] sm:$0xff] }
 0x1ef   :  { %v1975_v30 = vmax.f32 %v1925_v60, 0.0  ;;  %698 = vst.msk [vmem:[#allocation2 + $0x1d0] sm:$0xff] %vm446_vm0, %v564_v44  ;;  %v1927_v53 = vpop.f32.mrb[55].mxu0  ;;  %v11383_v17 = vpack.c.bf16 %v2068_v42, %v2067_v16  ;;  %v1386_v56 = vmax.f32 %v1344_v19, 0.0  ;;  %v4398_v52 = vld [vmem:[%s14111_s6 + $0x148] sm:$0xff]  ;;  %v1336_v44 = vadd.f32 %v1335_v51, %v1271_v6  ;;  %v14415_v36 = vld [vmem:[#allocation16_spill] sm:$0xff] }
 0x1f0   :  { %v1978_v20 = vmax.f32 %v1936_v38, 0.0  ;;  %v1928_v61 = vadd.f32 %v1927_v53, %v1863_v58  ;;  %8715 = vmatprep.subr.bf16.mxu1 %v1584_v39  ;;  %v1481_v55 = vmul.f32 %v14413_v49, %v1385_v27  ;;  %v2073_v33 = vmul.f32 %v10545_v59, %v1977_v29  ;;  %v14414_v16 = vld [vmem:[#allocation21_spill] sm:$0xff]  ;;  %v1276_v27 = vld [vmem:[#allocation2 + $0x50] sm:$0xff] }
 0x1f1   :  { %v1482_v40 = vmul.f32 %v14414_v16, %v1386_v56  ;;  %8716 = vmatpush3.bf16.msra.mxu1 %v1584_v39  ;;  %v11395_v26 = vpop.permute.xlu1 %3535  ;;  %v1479_v60 = vmul.f32 %v14415_v36, %v1383_v8  ;;  %v2071_v35 = vmul.f32 %v10499_v12, %v1975_v30  ;;  %v1384_v47 = vmax.f32 %v1336_v44, 0.0  ;;  %v1868_v29 = vld [vmem:[#allocation2 + $0xd0] sm:$0xff]  ;;  %v1274_v39 = vld [vmem:[#allocation2 + $0x40] sm:$0xff]  ;;  %v14416_v12 = vld [vmem:[#allocation15_spill] sm:$0xff] }
 0x1f2   :  { %v2074_v63 = vmul.f32 %v10528_v4, %v1978_v20  ;;  %v11397_v42 = vpop.permute.xlu0 %3530  ;;  %v1976_v19 = vmax.f32 %v1928_v61, 0.0  ;;  %8717 = vmatprep.subr.bf16.mxu1 %v11371_v46  ;;  %4685 = vperm.xlu1 %9365, %v4398_v52   ;;  %v8709_v59 = vpop.f32.mrb[24].mxu1  ;;  %v1866_v20 = vld [vmem:[#allocation2 + $0xc0] sm:$0xff]  ;;  %v1277_v61 = vld [vmem:[#allocation2 + $0x58] sm:$0xff] }
 0x1f3   :  { %v8773_v38 = vpop.f32.mrb[56].mxu0  ;;  %4680 = vperm.xlu0 %9364, %v4397_v28   ;;  %v1357_v4 = vadd.f32 %v8709_v59, %v1276_v27  ;;  %v1348_v53 = vpop.f32.mrb[25].mxu1  ;;  %v11402_v6 = vpack.c.bf16 %v1482_v40, %v1481_v55  ;;  %v1480_v30 = vmul.f32 %v14416_v12, %v1384_v47  ;;  %v1869_v16 = vld [vmem:[#allocation2 + $0xd8] sm:$0xff] }
 0x1f4   :  { %v1949_v51 = vadd.f32 %v8773_v38, %v1868_v29  ;;  %v1940_v56 = vpop.f32.mrb[57].mxu0  ;;  %v11404_v8 = vpack.c.bf16 %v2074_v63, %v2073_v33  ;;  %v2072_v58 = vmul.f32 %v10496_v10, %v1976_v19  ;;  %v1349_v52 = vadd.f32 %v1348_v53, %v1274_v39  ;;  %v8710_v49 = vpop.f32.mrb[26].mxu1  ;;  %v1867_v53 = vld [vmem:[#allocation2 + $0xc8] sm:$0xff]  ;;  %v4400_v39 = vld [vmem:[%s14111_s6 + $0x158] sm:$0xff] }
 0x1f5   :  { %v1941_v44 = vadd.f32 %v1940_v56, %v1866_v20  ;;  %v8774_v28 = vpop.f32.mrb[58].mxu0  ;;  %v1389_v36 = vmax.f32 %v1357_v4, 0.0  ;;  %8718 = vmatpush3.bf16.msra.mxu1 %v11371_v46  ;;  %v1360_v59 = vadd.f32 %v8710_v49, %v1277_v61  ;;  %v570_v55 = vpop.permute.xlu1 %569  ;;  %v1586_v19 = vpack.c.bf16 %v1480_v30, %v1479_v60  ;;  %v4399_v60 = vld [vmem:[%s14111_s6 + $0x150] sm:$0xff] }
 0x1f6   :  { %v1981_v27 = vmax.f32 %v1949_v51, 0.0  ;;  %v1952_v29 = vadd.f32 %v8774_v28, %v1869_v16  ;;  %v568_v40 = vpop.permute.xlu0 %567  ;;  %v1387_v33 = vmax.f32 %v1349_v52, 0.0  ;;  %701 = vst.msk [vmem:[#allocation2 + $0x1e8] sm:$0xff] %vm446_vm0, %v570_v55  ;;  %v1351_v10 = vpop.f32.mrb[27].mxu1  ;;  %633 = vrot.lane.b32.xlu1 %v11047_v0, %s9373_s20  ;;  %v11413_v38 = vpack.c.bf16 %v2072_v58, %v2071_v35  ;;  %v1275_v51 = vld [vmem:[#allocation2 + $0x48] sm:$0xff]  ;;  %v14417_v35 = vld [vmem:[#allocation32_spill] sm:$0xff] }
 0x1f7   :  { %v1979_v63 = vmax.f32 %v1941_v44, 0.0  ;;  %700 = vst.msk [vmem:[#allocation2 + $0x1e0] sm:$0xff] %vm446_vm0, %v568_v40  ;;  %v1943_v47 = vpop.f32.mrb[59].mxu0  ;;  %v1390_v4 = vmax.f32 %v1360_v59, 0.0  ;;  %631 = vrot.lane.b32.xlu0 %v11035_v37, %s9373_s20  ;;  %v1352_v56 = vadd.f32 %v1351_v10, %v1275_v51  ;;  %8719 = vmatprep.subr.bf16.mxu1 %v1586_v19  ;;  %v1485_v12 = vmul.f32 %v14417_v35, %v1389_v36  ;;  %v14418_v58 = vld [vmem:[#allocation30_spill] sm:$0xff]  ;;  %v14419_v16 = vld [vmem:[#allocation24_spill] sm:$0xff] }
 0x1f8   :  { %v1982_v46 = vmax.f32 %v1952_v29, 0.0  ;;  %v1944_v20 = vadd.f32 %v1943_v47, %v1867_v53  ;;  %v2077_v30 = vmul.f32 %v10633_v11, %v1981_v27  ;;  %v1483_v28 = vmul.f32 %v14419_v16, %v1387_v33  ;;  %v1280_v36 = vld [vmem:[#allocation2 + $0x70] sm:$0xff] }
 0x1f9   :  { %v1486_v52 = vmul.f32 %v14418_v58, %v1390_v4  ;;  %8720 = vmatpush3.bf16.msra.mxu1 %v1586_v19  ;;  %v11427_v61 = vpop.permute.xlu1 %3545  ;;  %v2075_v59 = vmul.f32 %v10587_v24, %v1979_v63  ;;  %v1388_v29 = vmax.f32 %v1352_v56, 0.0  ;;  %v1872_v27 = vld [vmem:[#allocation2 + $0xf0] sm:$0xff]  ;;  %v1278_v19 = vld [vmem:[#allocation2 + $0x60] sm:$0xff]  ;;  %v14420_v24 = vld [vmem:[#allocation23_spill] sm:$0xff] }
 0x1fa   :  { %v2078_v44 = vmul.f32 %v10616_v50, %v1982_v46  ;;  %v11429_v49 = vpop.permute.xlu0 %3540  ;;  %v1980_v55 = vmax.f32 %v1944_v20, 0.0  ;;  %8721 = vmatprep.subr.bf16.mxu1 %v11402_v6  ;;  %4695 = vperm.xlu1 %9365, %v4400_v39   ;;  %v8713_v11 = vpop.f32.mrb[28].mxu1  ;;  %v1870_v46 = vld [vmem:[#allocation2 + $0xe0] sm:$0xff]  ;;  %v1281_v20 = vld [vmem:[#allocation2 + $0x78] sm:$0xff] }
 0x1fb   :  { %v8777_v40 = vpop.f32.mrb[60].mxu0  ;;  %4690 = vperm.xlu0 %9364, %v4399_v60   ;;  %v1373_v50 = vadd.f32 %v8713_v11, %v1280_v36  ;;  %v1364_v47 = vpop.f32.mrb[29].mxu1  ;;  %v11434_v51 = vpack.c.bf16 %v1486_v52, %v1485_v12  ;;  %v1484_v63 = vmul.f32 %v14420_v24, %v1388_v29  ;;  %v1873_v58 = vld [vmem:[#allocation2 + $0xf8] sm:$0xff] }
 0x1fc   :  { %v1965_v10 = vadd.f32 %v8777_v40, %v1872_v27  ;;  %v1956_v4 = vpop.f32.mrb[61].mxu0  ;;  %v11436_v33 = vpack.c.bf16 %v2078_v44, %v2077_v30  ;;  %v2076_v53 = vmul.f32 %v10584_v21, %v1980_v55  ;;  %v1365_v39 = vadd.f32 %v1364_v47, %v1278_v19  ;;  %v8714_v35 = vpop.f32.mrb[30].mxu1  ;;  %v4402_v47 = vld [vmem:[%s14111_s6 + $0x168] sm:$0xff] }
 0x1fd   :  { %v1957_v56 = vadd.f32 %v1956_v4, %v1870_v46  ;;  %v8778_v60 = vpop.f32.mrb[62].mxu0  ;;  %v1393_v16 = vmax.f32 %v1373_v50, 0.0  ;;  %8722 = vmatpush3.bf16.msra.mxu1 %v11402_v6  ;;  %v1376_v11 = vadd.f32 %v8714_v35, %v1281_v20  ;;  %v574_v12 = vpop.permute.xlu1 %573  ;;  %v1588_v44 = vpack.c.bf16 %v1484_v63, %v1483_v28  ;;  %v1279_v6 = vld [vmem:[#allocation2 + $0x68] sm:$0xff]  ;;  %v4401_v28 = vld [vmem:[%s14111_s6 + $0x160] sm:$0xff] }
 0x1fe   :  { %v1985_v36 = vmax.f32 %v1965_v10, 0.0  ;;  %v1968_v27 = vadd.f32 %v8778_v60, %v1873_v58  ;;  %v572_v52 = vpop.permute.xlu0 %571  ;;  %703 = vst.msk [vmem:[#allocation2 + $0x1f8] sm:$0xff] %vm446_vm0, %v574_v12  ;;  %v1367_v30 = vpop.f32.mrb[31].mxu1  ;;  %637 = vrot.lane.b32.xlu1 %v11042_v14, %s9373_s20  ;;  %v11445_v29 = vpack.c.bf16 %v2076_v53, %v2075_v59  ;;  %v1391_v55 = vmax.f32 %v1365_v39, 0.0  ;;  %v1871_v10 = vld [vmem:[#allocation2 + $0xe8] sm:$0xff]  ;;  %v14421_v59 = vld [vmem:[#allocation44_spill] sm:$0xff] }
 0x1ff   :  { %702 = vst.msk [vmem:[#allocation2 + $0x1f0] sm:$0xff] %vm446_vm0, %v572_v52  ;;  %v1959_v21 = vpop.f32.mrb[63].mxu0  ;;  %v1394_v40 = vmax.f32 %v1376_v11, 0.0  ;;  %635 = vrot.lane.b32.xlu0 %v11030_v5, %s9373_s20  ;;  %v1983_v19 = vmax.f32 %v1957_v56, 0.0  ;;  %v1368_v4 = vadd.f32 %v1367_v30, %v1279_v6  ;;  %8723 = vmatprep.subr.bf16.mxu1 %v1588_v44  ;;  %v1489_v24 = vmul.f32 %v14421_v59, %v1393_v16  ;;  %v14422_v53 = vld [vmem:[#allocation42_spill] sm:$0xff]  ;;  %v14425_v12 = vld [vmem:[#allocation36_spill] sm:$0xff] }
 0x200   :  { %v1986_v50 = vmax.f32 %v1968_v27, 0.0  ;;  %v1960_v46 = vadd.f32 %v1959_v21, %v1871_v10  ;;  %v2081_v63 = vmul.f32 %v10717_v15, %v1985_v36  ;;  %v2435_v11 = vld [vmem:[#allocation2 + $0x110] sm:$0xff]  ;;  %v1487_v16 = vmul.f32 %v14425_v12, %v1391_v55  ;;  %v2433_v52 = vld [vmem:[#allocation2 + $0x100] sm:$0xff] }
 0x201   :  { %v1490_v39 = vmul.f32 %v14422_v53, %v1394_v40  ;;  %8724 = vmatpush3.bf16.msra.mxu1 %v1588_v44  ;;  %v11459_v35 = vpop.permute.xlu1 %3555  ;;  %v1392_v56 = vmax.f32 %v1368_v4, 0.0  ;;  %v2079_v44 = vmul.f32 %v10675_v32, %v1983_v19  ;;  %v14426_v40 = vld [vmem:[#allocation35_spill] sm:$0xff]  ;;  %v4403_v4 = vld [vmem:[%s14111_s6 + $0x170] sm:$0xff]  ;;  %v11481_v32 = vadd.s32 24, %v11144_v34  ;;  %v2434_v19 = vld [vmem:[#allocation2 + $0x108] sm:$0xff] }
 0x202   :  { %v2082_v20 = vmul.f32 %v10704_v57, %v1986_v50  ;;  %14423 = vst [vmem:[#allocation50_spill] sm:$0xff] %v11459_v35  ;;  %v11461_v58 = vpop.permute.xlu0 %3550  ;;  %v1984_v60 = vmax.f32 %v1960_v46, 0.0  ;;  %8725 = vmatprep.subr.bf16.mxu1 %v11434_v51  ;;  %4705 = vperm.xlu1 %9365, %v4402_v47   ;;  %v8829_v27 = vpop.f32.mrb[64].mxu0  ;;  %v4404_v57 = vld [vmem:[%s14111_s6 + $0x178] sm:$0xff]  ;;  %v5219_v12 = vld [vmem:[%s14235_s23] sm:$0xff] }
 0x203   :  { %14424 = vst [vmem:[#allocation8_spill] sm:$0xff] %v11461_v58  ;;  %4700 = vperm.xlu0 %9364, %v4401_v28   ;;  %v2492_v15 = vadd.f32 %v8829_v27, %v2435_v11  ;;  %v2483_v36 = vpop.f32.mrb[65].mxu0  ;;  %v1591_v30 = vpack.c.bf16 %v1490_v39, %v1489_v24  ;;  %v1488_v50 = vmul.f32 %v14426_v40, %v1392_v56  ;;  %v2436_v47 = vld [vmem:[#allocation2 + $0x118] sm:$0xff]  ;;  %v11486_v39 = vadd.s32 32, %v11144_v34  ;;  %v5220_v27 = vld [vmem:[%s14235_s23 + $0x8] sm:$0xff] }
 0x204   :  { %v11468_v21 = vpack.c.bf16 %v2082_v20, %v2081_v63  ;;  %v2080_v6 = vmul.f32 %v10672_v31, %v1984_v60  ;;  %v2484_v10 = vadd.f32 %v2483_v36, %v2433_v52  ;;  %v8830_v55 = vpop.f32.mrb[66].mxu0  ;;  %v11478_v63 = vadd.s32 16, %v11144_v34 }
 0x205   :  { %v2548_v46 = vmax.f32 %v2492_v15, 0.0  ;;  %8726 = vmatpush3.bf16.msra.mxu1 %v11434_v51  ;;  %v2495_v28 = vadd.f32 %v8830_v55, %v2436_v47  ;;  %v578_v59 = vpop.permute.xlu1 %577  ;;  %v2486_v31 = vpop.f32.mrb[67].mxu0  ;;  %v1590_v53 = vpack.c.bf16 %v1488_v50, %v1487_v16  ;;  %v11489_v51 = vadd.s32 40, %v11144_v34  ;;  %v14429_v50 = vld [vmem:[#allocation60_spill] sm:$0xff] }
 0x206   :  { %v576_v24 = vpop.permute.xlu0 %575  ;;  %705 = vst.msk [vmem:[#allocation2 + $0x208] sm:$0xff] %vm446_vm0, %v578_v59  ;;  %4715 = vperm.xlu1 %9365, %v4404_v57   ;;  %v11491_v20 = vpack.c.bf16 %v2080_v6, %v2079_v44  ;;  %v2546_v56 = vmax.f32 %v2484_v10, 0.0  ;;  %v2487_v11 = vadd.f32 %v2486_v31, %v2434_v19  ;;  %vm1514_vm2 = vcmp.eq.s32.totalorder %v11478_v63, %v11152_v45  ;;  %v2439_v44 = vld [vmem:[#allocation2 + $0x130] sm:$0xff]  ;;  %v2437_v55 = vld [vmem:[#allocation2 + $0x120] sm:$0xff]  ;;  %v2440_v59 = vld [vmem:[#allocation2 + $0x138] sm:$0xff] }
 0x207   :  { %704 = vst.msk [vmem:[#allocation2 + $0x200] sm:$0xff] %vm446_vm0, %v576_v24  ;;  %v2549_v60 = vmax.f32 %v2495_v28, 0.0  ;;  %4710 = vperm.xlu0 %9364, %v4403_v4   ;;  %8727 = vmatprep.subr.bf16.mxu1 %v1590_v53  ;;  %v2644_v16 = vmul.f32 %v10784_v1, %v2548_v46  ;;  %vm1515_vm3 = vcmp.eq.s32.totalorder %v11481_v32, %v11152_v45  ;;  %v5222_v4 = vld [vmem:[%s14235_s23 + $0x18] sm:$0xff]  ;;  %v5221_v31 = vld [vmem:[%s14235_s23 + $0x10] sm:$0xff] }
 0x208   :  { %v2547_v36 = vmax.f32 %v2487_v11, 0.0  ;;  %vm1516_vm4 = vcmp.eq.s32.totalorder %v11486_v39, %v11152_v45  ;;  %vm1517_vm5 = vcmp.eq.s32.totalorder %v11489_v51, %v11152_v45  ;;  %vm11529_vm6 = vmpackc.low %vm1515_vm3, %vm1514_vm2 }
 0x209   :  { %v2645_v15 = vmul.f32 %v10777_v7, %v2549_v60  ;;  %8728 = vmatpush3.bf16.msra.mxu1 %v1590_v53  ;;  %v11501_v52 = vpop.permute.xlu1 %3565  ;;  %v14428_v7 = vld [vmem:[#allocation61_spill] sm:$0xff]  ;;  %vm11547_vm7 = vmpackc.low %vm1517_vm5, %vm1516_vm4 }
 0x20a   :  { %14427 = vst [vmem:[#allocation48_spill] sm:$0xff] %v11501_v52  ;;  %v11503_v57 = vpop.permute.xlu0 %3560  ;;  %8729 = vmatprep.subr.bf16.mxu1 %v1591_v30  ;;  %5256 = vperm.xlu1 %9365, %v5220_v27   ;;  %v8833_v40 = vpop.f32.mrb[68].mxu0  ;;  %v2642_v1 = vmul.f32 %v14428_v7, %v2546_v56  ;;  %v2643_v6 = vmul.f32 %v14429_v50, %v2547_v36  ;;  %v11534_v27 = vadd.s32 48, %v11144_v34  ;;  %v11552_v36 = vadd.s32 56, %v11144_v34  ;;  %v5229_v52 = vld [vmem:[%s14235_s23 + $0x50] sm:$0xff] }
 0x20b   :  { %5253 = vperm.xlu0 %9364, %v5219_v12   ;;  %v2508_v10 = vadd.f32 %v8833_v40, %v2439_v44  ;;  %v2499_v47 = vpop.f32.mrb[69].mxu0  ;;  %v11518_v46 = vpack.c.bf16 %v2645_v15, %v2644_v16  ;;  %v2438_v16 = vld [vmem:[#allocation2 + $0x128] sm:$0xff]  ;;  %v11555_v44 = vadd.s32 64, %v11144_v34  ;;  %v11558_v40 = vadd.s32 72, %v11144_v34  ;;  %v2441_v15 = vld [vmem:[#allocation2 + $0x140] sm:$0xff] }
 0x20c   :  { %v2500_v28 = vadd.f32 %v2499_v47, %v2437_v55  ;;  %v8834_v24 = vpop.f32.mrb[70].mxu0  ;;  %v11536_v12 = vpack.c.bf16 %v2643_v6, %v2642_v1  ;;  %v5224_v6 = vld [vmem:[%s14235_s23 + $0x28] sm:$0xff]  ;;  %v14434_v47 = vld [vmem:[#allocation72_spill] sm:$0xff]  ;;  %vm1518_vm8 = vcmp.eq.s32.totalorder %v11534_v27, %v11152_v45  ;;  %vm1519_vm9 = vcmp.eq.s32.totalorder %v11552_v36, %v11152_v45 }
 0x20d   :  { %v2552_v19 = vmax.f32 %v2508_v10, 0.0  ;;  %8730 = vmatpush3.bf16.msra.mxu1 %v1591_v30  ;;  %v2511_v53 = vadd.f32 %v8834_v24, %v2440_v59  ;;  %v582_v56 = vpop.permute.xlu1 %581  ;;  %v2502_v30 = vpop.f32.mrb[71].mxu0  ;;  %v5223_v10 = vld [vmem:[%s14235_s23 + $0x20] sm:$0xff]  ;;  %vm1520_vm10 = vcmp.eq.s32.totalorder %v11555_v44, %v11152_v45  ;;  %vm1521_vm11 = vcmp.eq.s32.totalorder %v11558_v40, %v11152_v45  ;;  %vm11605_vm12 = vmpackc.low %vm1519_vm9, %vm1518_vm8 }
 0x20e   :  { %v580_v60 = vpop.permute.xlu0 %579  ;;  %8779 = vmatprep.subr.bf16.mxu1 %v11383_v17  ;;  %707 = vst.msk [vmem:[#allocation2 + $0x218] sm:$0xff] %vm446_vm0, %v582_v56  ;;  %5262 = vperm.xlu1 %9365, %v5222_v4   ;;  %v2550_v7 = vmax.f32 %v2500_v28, 0.0  ;;  %v2503_v50 = vadd.f32 %v2502_v30, %v2438_v16  ;;  %v14435_v4 = vld [vmem:[#allocation70_spill] sm:$0xff]  ;;  %vm11623_vm13 = vmpackc.low %vm1521_vm11, %vm1520_vm10 }
 0x20f   :  { %706 = vst.msk [vmem:[#allocation2 + $0x210] sm:$0xff] %vm446_vm0, %v580_v60  ;;  %v2553_v1 = vmax.f32 %v2511_v53, 0.0  ;;  %5259 = vperm.xlu0 %9364, %v5221_v31   ;;  %v2648_v55 = vmul.f32 %v14434_v47, %v2552_v19  ;;  %v2443_v19 = vld [vmem:[#allocation2 + $0x150] sm:$0xff]  ;;  %v2444_v47 = vld [vmem:[#allocation2 + $0x158] sm:$0xff] }
 0x210   :  { %8732 = vmatmul.mubr.msk.bf16.vlgmr.msra.gmra.mrb[32].mxu1 %vm11529_vm6, %v14287_v62  ;;  %v2551_v28 = vmax.f32 %v2503_v50, 0.0  ;;  %v14439_v60 = vld [vmem:[#allocation66_spill] sm:$0xff] }
 0x211   :  { %v2649_v59 = vmul.f32 %v14435_v4, %v2553_v1  ;;  %8780 = vmatpush3.bf16.msra.mxu1 %v11383_v17  ;;  %v11572_v24 = vpop.permute.xlu1 %4070  ;;  %8735 = vmatprep.mubr.msk.bf16.mxu1 %vm11547_vm7, %v14287_v62  ;;  %v14438_v17 = vld [vmem:[#allocation67_spill] sm:$0xff] }
 0x212   :  { %14436 = vst [vmem:[#allocation7_spill] sm:$0xff] %v11572_v24  ;;  %v11574_v31 = vpop.permute.xlu0 %4065  ;;  %8781 = vmatprep.subr.bf16.mxu1 %v11373_v25  ;;  %5268 = vperm.xlu1 %9365, %v5224_v6   ;;  %v8837_v53 = vpop.f32.mrb[72].mxu0  ;;  %v2646_v56 = vmul.f32 %v14438_v17, %v2550_v7  ;;  %v2647_v11 = vmul.f32 %v14439_v60, %v2551_v28  ;;  %v5226_v1 = vld [vmem:[%s14235_s23 + $0x38] sm:$0xff]  ;;  %v5225_v24 = vld [vmem:[%s14235_s23 + $0x30] sm:$0xff]  ;;  %v2442_v17 = vld [vmem:[#allocation2 + $0x148] sm:$0xff] }
 0x213   :  { %14437 = vst [vmem:[#allocation47_spill] sm:$0xff] %v11574_v31  ;;  %5265 = vperm.xlu0 %9364, %v5223_v10   ;;  %v2524_v30 = vadd.f32 %v8837_v53, %v2443_v19  ;;  %v2515_v16 = vpop.f32.mrb[73].mxu0  ;;  %v11593_v50 = vpack.c.bf16 %v2649_v59, %v2648_v55  ;;  %v11610_v59 = vadd.s32 80, %v11144_v34  ;;  %v14445_v31 = vld [vmem:[#allocation76_spill] sm:$0xff] }
 0x214   :  { %v2516_v6 = vadd.f32 %v2515_v16, %v2441_v15  ;;  %v8838_v4 = vpop.f32.mrb[74].mxu0  ;;  %v11612_v53 = vpack.c.bf16 %v2647_v11, %v2646_v56  ;;  %v11628_v56 = vadd.s32 88, %v11144_v34  ;;  %v11631_v11 = vadd.s32 96, %v11144_v34 }
 0x215   :  { %v2556_v7 = vmax.f32 %v2524_v30, 0.0  ;;  %8782 = vmatpush3.bf16.msra.mxu1 %v11373_v25  ;;  %v2527_v10 = vadd.f32 %v8838_v4, %v2444_v47  ;;  %v586_v28 = vpop.permute.xlu1 %585  ;;  %v2518_v25 = vpop.f32.mrb[75].mxu0  ;;  %v11634_v30 = vadd.s32 104, %v11144_v34  ;;  %v5228_v47 = vld [vmem:[%s14235_s23 + $0x48] sm:$0xff]  ;;  %v5227_v4 = vld [vmem:[%s14235_s23 + $0x40] sm:$0xff]  ;;  %vm1522_vm14 = vcmp.eq.s32.totalorder %v11610_v59, %v11152_v45 }
 0x216   :  { %v584_v19 = vpop.permute.xlu0 %583  ;;  %8783 = vmatprep.subr.bf16.mxu1 %v11413_v38  ;;  %709 = vst.msk [vmem:[#allocation2 + $0x228] sm:$0xff] %vm446_vm0, %v586_v28  ;;  %5274 = vperm.xlu1 %9365, %v5226_v1   ;;  %v2554_v16 = vmax.f32 %v2516_v6, 0.0  ;;  %v2519_v1 = vadd.f32 %v2518_v25, %v2442_v17  ;;  %v14444_v28 = vld [vmem:[#allocation77_spill] sm:$0xff]  ;;  %vm1523_vm15 = vcmp.eq.s32.totalorder %v11628_v56, %v11152_v45  ;;  %v14449_v25 = vld [vmem:[#allocation74_spill] sm:$0xff] }
 0x217   :  { %708 = vst.msk [vmem:[#allocation2 + $0x220] sm:$0xff] %vm446_vm0, %v584_v19  ;;  %v2557_v15 = vmax.f32 %v2527_v10, 0.0  ;;  %5271 = vperm.xlu0 %9364, %v5225_v24   ;;  %v2652_v19 = vmul.f32 %v14444_v28, %v2556_v7  ;;  %v2447_v7 = vld [vmem:[#allocation2 + $0x170] sm:$0xff]  ;;  %vm1524_vm1 = vcmp.eq.s32.totalorder %v11631_v11, %v11152_v45  ;;  %vm1525_vm2 = vcmp.eq.s32.totalorder %v11634_v30, %v11152_v45  ;;  %vm11681_vm3 = vmpackc.low %vm1523_vm15, %vm1522_vm14  ;;  %v11712_v45 = vld [vmem:[%s14115_s4 + $0x1] ss:$0 sm:$0xff] }
 0x218   :  { %8736 = vmatmul.mubr.msk.bf16.gmra.mrb[36].mxu1 %vm11605_vm12, %v14287_v62  ;;  %v2555_v6 = vmax.f32 %v2519_v1, 0.0  ;;  %v2445_v1 = vld [vmem:[#allocation2 + $0x160] sm:$0xff]  ;;  %vm11696_vm4 = vmpackc.low %vm1525_vm2, %vm1524_vm1  ;;  %vm2087_vm7 = vcmp.eq.s32.totalorder %v11144_v34, %v11712_v45  ;;  %vm2088_vm8 = vcmp.eq.s32.totalorder %v11147_v22, %v11712_v45  ;;  %vm2089_vm11 = vcmp.eq.s32.totalorder %v11478_v63, %v11712_v45 }
 0x219   :  { %v2653_v35 = vmul.f32 %v14445_v31, %v2557_v15  ;;  %8784 = vmatpush3.bf16.msra.mxu1 %v11413_v38  ;;  %v11648_v24 = vpop.permute.xlu1 %4080  ;;  %8739 = vmatprep.mubr.msk.bf16.mxu1 %vm11623_vm13, %v14287_v62  ;;  %v14448_v38 = vld [vmem:[#allocation75_spill] sm:$0xff]  ;;  %vm7712_vm10 = vmpackc.low %vm2088_vm8, %vm2087_vm7  ;;  %vm2090_vm12 = vcmp.eq.s32.totalorder %v11481_v32, %v11712_v45  ;;  %vm2091_vm13 = vcmp.eq.s32.totalorder %v11486_v39, %v11712_v45 }
 0x21a   :  { %14446 = vst [vmem:[#allocation22_spill] sm:$0xff] %v11648_v24  ;;  %v11650_v10 = vpop.permute.xlu0 %4075  ;;  %8785 = vmatprep.subr.bf16.mxu1 %v11404_v8  ;;  %5280 = vperm.xlu1 %9365, %v5228_v47   ;;  %v8841_v55 = vpop.f32.mrb[76].mxu0  ;;  %v2650_v31 = vmul.f32 %v14448_v38, %v2554_v16  ;;  %v2651_v17 = vmul.f32 %v14449_v25, %v2555_v6  ;;  %v5230_v47 = vld [vmem:[%s14235_s23 + $0x58] sm:$0xff]  ;;  %v11704_v38 = vadd.s32 120, %v11144_v34  ;;  %vm7714_vm15 = vmpackc.low %vm2090_vm12, %vm2089_vm11 }
 0x21b   :  { %14447 = vst [vmem:[#allocation21_spill] sm:$0xff] %v11650_v10  ;;  %5277 = vperm.xlu0 %9364, %v5227_v4   ;;  %v2540_v60 = vadd.f32 %v8841_v55, %v2447_v7  ;;  %v2531_v15 = vpop.f32.mrb[77].mxu0  ;;  %v11669_v28 = vpack.c.bf16 %v2653_v35, %v2652_v19  ;;  %v2448_v10 = vld [vmem:[#allocation2 + $0x178] sm:$0xff]  ;;  %v11701_v55 = vadd.s32 112, %v11144_v34  ;;  %vm2092_vm14 = vcmp.eq.s32.totalorder %v11489_v51, %v11712_v45 }
 0x21c   :  { %v2532_v24 = vadd.f32 %v2531_v15, %v2445_v1  ;;  %v8842_v58 = vpop.f32.mrb[78].mxu0  ;;  %v11685_v19 = vpack.c.bf16 %v2651_v17, %v2650_v31  ;;  %v14454_v15 = vld [vmem:[#allocation82_spill] sm:$0xff]  ;;  %vm7716_vm1 = vmpackc.low %vm2092_vm14, %vm2091_vm13  ;;  %vm2093_vm2 = vcmp.eq.s32.totalorder %v11534_v27, %v11712_v45  ;;  %vm2097_vm8 = vcmp.eq.s32.totalorder %v11610_v59, %v11712_v45 }
 0x21d   :  { %v2560_v16 = vmax.f32 %v2540_v60, 0.0  ;;  %8786 = vmatpush3.bf16.msra.mxu1 %v11404_v8  ;;  %v2543_v4 = vadd.f32 %v8842_v58, %v2448_v10  ;;  %v590_v6 = vpop.permute.xlu1 %589  ;;  %v2534_v8 = vpop.f32.mrb[79].mxu0  ;;  %v2446_v58 = vld [vmem:[#allocation2 + $0x168] sm:$0xff]  ;;  %v5234_v10 = vld [vmem:[%s14235_s23 + $0x78] sm:$0xff]  ;;  %vm2100_vm11 = vcmp.eq.s32.totalorder %v11634_v30, %v11712_v45  ;;  %vm2101_vm14 = vcmp.eq.s32.totalorder %v11701_v55, %v11712_v45 }
 0x21e   :  { %v588_v7 = vpop.permute.xlu0 %587  ;;  %8787 = vmatprep.subr.bf16.mxu1 %v11445_v29  ;;  %711 = vst.msk [vmem:[#allocation2 + $0x238] sm:$0xff] %vm446_vm0, %v590_v6  ;;  %5286 = vperm.xlu1 %9365, %v5230_v47   ;;  %v2558_v31 = vmax.f32 %v2532_v24, 0.0  ;;  %v2535_v17 = vadd.f32 %v2534_v8, %v2446_v58  ;;  %v5232_v60 = vld [vmem:[%s14235_s23 + $0x68] sm:$0xff]  ;;  %v5231_v24 = vld [vmem:[%s14235_s23 + $0x60] sm:$0xff]  ;;  %v14457_v8 = vld [vmem:[#allocation78_spill] sm:$0xff] }
 0x21f   :  { %710 = vst.msk [vmem:[#allocation2 + $0x230] sm:$0xff] %vm446_vm0, %v588_v7  ;;  %v2561_v25 = vmax.f32 %v2543_v4, 0.0  ;;  %5283 = vperm.xlu0 %9364, %v5229_v52   ;;  %v2656_v1 = vmul.f32 %v14454_v15, %v2560_v16  ;;  %v14455_v52 = vld [vmem:[#allocation6_spill] sm:$0xff]  ;;  %v9370_v16 = vld [vmem:[%s14115_s4] ss:$0 sm:$0xff] }
 0x220   :  { %8740 = vmatmul.mubr.msk.bf16.gmra.mrb[40].mxu1 %vm11681_vm3, %v14287_v62  ;;  %v2559_v4 = vmax.f32 %v2535_v17, 0.0  ;;  %vm1526_vm5 = vcmp.eq.s32.totalorder %v11701_v55, %v9370_v16  ;;  %vm1527_vm6 = vcmp.eq.s32.totalorder %v11704_v38, %v9370_v16  ;;  %v5233_v17 = vld [vmem:[%s14235_s23 + $0x70] sm:$0xff]  ;;  %vm2094_vm3 = vcmp.eq.s32.totalorder %v11552_v36, %v11712_v45 }
 0x221   :  { %v2657_v47 = vmul.f32 %v14455_v52, %v2561_v25  ;;  %8788 = vmatpush3.bf16.msra.mxu1 %v11445_v29  ;;  %v11723_v6 = vpop.permute.xlu1 %4090  ;;  %8743 = vmatprep.mubr.msk.bf16.mxu1 %vm11696_vm4, %v14287_v62  ;;  %v14456_v29 = vld [vmem:[#allocation79_spill] sm:$0xff]  ;;  %vm7661_vm9 = vmpackc.low %vm1527_vm6, %vm1526_vm5  ;;  %vm2095_vm4 = vcmp.eq.s32.totalorder %v11555_v44, %v11712_v45  ;;  %vm2096_vm5 = vcmp.eq.s32.totalorder %v11558_v40, %v11712_v45 }
 0x222   :  { %v11725_v7 = vpop.permute.xlu0 %4085  ;;  %8789 = vmatprep.subr.bf16.mxu1 %v11436_v33  ;;  %5292 = vperm.xlu1 %9365, %v5232_v60   ;;  %v2654_v35 = vmul.f32 %v14456_v29, %v2558_v31  ;;  %v2655_v58 = vmul.f32 %v14457_v8, %v2559_v4  ;;  %v5799_v29 = vld [vmem:[%s14235_s23 + $0xa8] sm:$0xff]  ;;  %vm7718_vm6 = vmpackc.low %vm2094_vm3, %vm2093_vm2 }
 0x223   :  { %5289 = vperm.xlu0 %9364, %v5231_v24   ;;  %v11745_v25 = vpack.c.bf16 %v2657_v47, %v2656_v1  ;;  %v5794_v24 = vld [vmem:[%s14235_s23 + $0x80] sm:$0xff]  ;;  %v5796_v47 = vld [vmem:[%s14235_s23 + $0x90] sm:$0xff]  ;;  %vm7720_vm7 = vmpackc.low %vm2096_vm5, %vm2095_vm4 }
 0x224   :  { %v11751_v15 = vpack.c.bf16 %v2655_v58, %v2654_v35  ;;  %v5800_v58 = vld [vmem:[%s14235_s23 + $0xb0] sm:$0xff] }
 0x225   :  { %8790 = vmatpush3.bf16.msra.mxu1 %v11436_v33  ;;  %v594_v60 = vpop.permute.xlu1 %593  ;;  %v5795_v33 = vld [vmem:[%s14235_s23 + $0x88] sm:$0xff] }
 0x226   :  { %v592_v31 = vpop.permute.xlu0 %591  ;;  %8791 = vmatprep.subr.bf16.mxu1 %v11491_v20  ;;  %713 = vst.msk [vmem:[#allocation2 + $0x248] sm:$0xff] %vm446_vm0, %v594_v60  ;;  %5298 = vperm.xlu1 %9365, %v5234_v10   ;;  %v5803_v60 = vld [vmem:[%s14235_s23 + $0xc8] sm:$0xff] }
 0x227   :  { %712 = vst.msk [vmem:[#allocation2 + $0x240] sm:$0xff] %vm446_vm0, %v592_v31  ;;  %5295 = vperm.xlu0 %9364, %v5233_v17  }
 0x228   :  { %8744 = vmatmul.mubr.msk.bf16.gmra.mrb[44].mxu1 %vm7661_vm9, %v14287_v62  ;;  %vm2098_vm9 = vcmp.eq.s32.totalorder %v11628_v56, %v11712_v45 }
 0x229   :  { %8792 = vmatpush3.bf16.msra.mxu1 %v11491_v20  ;;  %v11767_v1 = vpop.permute.xlu1 %4100  ;;  %8795 = vmatprep.mubr.msk.bf16.mxu1 %vm7712_vm10, %v14287_v62  ;;  %v5797_v20 = vld [vmem:[%s14235_s23 + $0x98] sm:$0xff]  ;;  %vm2099_vm10 = vcmp.eq.s32.totalorder %v11631_v11, %v11712_v45  ;;  %vm7722_vm12 = vmpackc.low %vm2098_vm9, %vm2097_vm8 }
 0x22a   :  { %v11769_v52 = vpop.permute.xlu0 %4095  ;;  %8793 = vmatprep.subr.bf16.mxu1 %v11468_v21  ;;  %5831 = vperm.xlu1 %9365, %v5795_v33   ;;  %vm7724_vm13 = vmpackc.low %vm2100_vm11, %vm2099_vm10 }
 0x22b   :  { %5828 = vperm.xlu0 %9364, %v5794_v24   ;;  %v5804_v24 = vld [vmem:[%s14235_s23 + $0xd0] sm:$0xff] }
 0x22d   :  { %8794 = vmatpush3.bf16.msra.mxu1 %v11468_v21  ;;  %v598_v4 = vpop.permute.xlu1 %597  ;;  %v5798_v21 = vld [vmem:[%s14235_s23 + $0xa0] sm:$0xff] }
 0x22e   :  { %v596_v16 = vpop.permute.xlu0 %595  ;;  %8843 = vmatprep.subr.bf16.mxu1 %v11536_v12  ;;  %715 = vst.msk [vmem:[#allocation2 + $0x258] sm:$0xff] %vm446_vm0, %v598_v4  ;;  %5837 = vperm.xlu1 %9365, %v5797_v20   ;;  %v5807_v4 = vld [vmem:[%s14235_s23 + $0xe8] sm:$0xff] }
 0x22f   :  { %714 = vst.msk [vmem:[#allocation2 + $0x250] sm:$0xff] %vm446_vm0, %v596_v16  ;;  %5834 = vperm.xlu0 %9364, %v5796_v47   ;;  %v11865_v16 = vld [vmem:[%s14115_s4 + $0x2] ss:$0 sm:$0xff] }
 0x230   :  { %8796 = vmatmul.mubr.msk.bf16.vlgmr.msra.gmra.mrb[48].mxu1 %vm7714_vm15, %v14287_v62  ;;  %vm2102_vm15 = vcmp.eq.s32.totalorder %v11704_v38, %v11712_v45  ;;  %vm2663_vm2 = vcmp.eq.s32.totalorder %v11147_v22, %v11865_v16  ;;  %v6370_v45 = vld [vmem:[%s14235_s23 + $0x108] sm:$0xff]  ;;  %vm2664_vm5 = vcmp.eq.s32.totalorder %v11478_v63, %v11865_v16  ;;  %vm2667_vm8 = vcmp.eq.s32.totalorder %v11489_v51, %v11865_v16 }
 0x231   :  { %8844 = vmatpush3.bf16.msra.mxu1 %v11536_v12  ;;  %v11799_v35 = vpop.permute.xlu1 %4110  ;;  %8799 = vmatprep.mubr.msk.bf16.mxu1 %vm7716_vm1, %v14287_v62  ;;  %v5801_v12 = vld [vmem:[%s14235_s23 + $0xb8] sm:$0xff]  ;;  %vm2662_vm1 = vcmp.eq.s32.totalorder %v11144_v34, %v11865_v16  ;;  %vm7726_vm3 = vmpackc.low %vm2102_vm15, %vm2101_vm14  ;;  %vm2668_vm11 = vcmp.eq.s32.totalorder %v11534_v27, %v11865_v16  ;;  %vm2671_vm14 = vcmp.eq.s32.totalorder %v11558_v40, %v11865_v16 }
 0x232   :  { %v11801_v8 = vpop.permute.xlu0 %4105  ;;  %8845 = vmatprep.subr.bf16.mxu1 %v11518_v46  ;;  %5843 = vperm.xlu1 %9365, %v5799_v29   ;;  %vm7777_vm4 = vmpackc.low %vm2663_vm2, %vm2662_vm1  ;;  %vm2672_vm2 = vcmp.eq.s32.totalorder %v11610_v59, %v11865_v16 }
 0x233   :  { %5840 = vperm.xlu0 %9364, %v5798_v21  }
 0x235   :  { %8846 = vmatpush3.bf16.msra.mxu1 %v11518_v46  ;;  %v602_v10 = vpop.permute.xlu1 %601  ;;  %v5802_v46 = vld [vmem:[%s14235_s23 + $0xc0] sm:$0xff] }
 0x236   :  { %v600_v17 = vpop.permute.xlu0 %599  ;;  %8847 = vmatprep.subr.bf16.mxu1 %v11612_v53  ;;  %717 = vst.msk [vmem:[#allocation2 + $0x268] sm:$0xff] %vm446_vm0, %v602_v10  ;;  %5849 = vperm.xlu1 %9365, %v5801_v12   ;;  %v5808_v12 = vld [vmem:[%s14235_s23 + $0xf0] sm:$0xff] }
 0x237   :  { %716 = vst.msk [vmem:[#allocation2 + $0x260] sm:$0xff] %vm446_vm0, %v600_v17  ;;  %5846 = vperm.xlu0 %9364, %v5800_v58  }
 0x238   :  { %8800 = vmatmul.mubr.msk.bf16.gmra.mrb[52].mxu1 %vm7718_vm6, %v14287_v62  ;;  %vm2665_vm6 = vcmp.eq.s32.totalorder %v11481_v32, %v11865_v16 }
 0x239   :  { %8848 = vmatpush3.bf16.msra.mxu1 %v11612_v53  ;;  %v11831_v31 = vpop.permute.xlu1 %4120  ;;  %8803 = vmatprep.mubr.msk.bf16.mxu1 %vm7720_vm7, %v14287_v62  ;;  %v5805_v53 = vld [vmem:[%s14235_s23 + $0xd8] sm:$0xff]  ;;  %vm2666_vm7 = vcmp.eq.s32.totalorder %v11486_v39, %v11865_v16  ;;  %vm7779_vm9 = vmpackc.low %vm2665_vm6, %vm2664_vm5  ;;  %vm2675_vm5 = vcmp.eq.s32.totalorder %v11634_v30, %v11865_v16 }
 0x23a   :  { %v11833_v33 = vpop.permute.xlu0 %4115  ;;  %8849 = vmatprep.subr.bf16.mxu1 %v11593_v50  ;;  %5855 = vperm.xlu1 %9365, %v5803_v60   ;;  %vm7781_vm10 = vmpackc.low %vm2667_vm8, %vm2666_vm7  ;;  %vm2676_vm8 = vcmp.eq.s32.totalorder %v11701_v55, %v11865_v16 }
 0x23b   :  { %5852 = vperm.xlu0 %9364, %v5802_v46   ;;  %v6371_v46 = vld [vmem:[%s14235_s23 + $0x110] sm:$0xff] }
 0x23d   :  { %8850 = vmatpush3.bf16.msra.mxu1 %v11593_v50  ;;  %v606_v20 = vpop.permute.xlu1 %605  ;;  %v5806_v50 = vld [vmem:[%s14235_s23 + $0xe0] sm:$0xff] }
 0x23e   :  { %v604_v47 = vpop.permute.xlu0 %603  ;;  %8851 = vmatprep.subr.bf16.mxu1 %v11685_v19  ;;  %719 = vst.msk [vmem:[#allocation2 + $0x278] sm:$0xff] %vm446_vm0, %v606_v20  ;;  %5861 = vperm.xlu1 %9365, %v5805_v53   ;;  %v6374_v20 = vld [vmem:[%s14235_s23 + $0x128] sm:$0xff] }
 0x23f   :  { %718 = vst.msk [vmem:[#allocation2 + $0x270] sm:$0xff] %vm446_vm0, %v604_v47  ;;  %5858 = vperm.xlu0 %9364, %v5804_v24  }
 0x240   :  { %8804 = vmatmul.mubr.msk.bf16.gmra.mrb[56].mxu1 %vm7722_vm12, %v14287_v62  ;;  %vm2669_vm12 = vcmp.eq.s32.totalorder %v11552_v36, %v11865_v16 }
 0x241   :  { %8852 = vmatpush3.bf16.msra.mxu1 %v11685_v19  ;;  %v11868_v29 = vpop.permute.xlu1 %4130  ;;  %8807 = vmatprep.mubr.msk.bf16.mxu1 %vm7724_vm13, %v14287_v62  ;;  %v5809_v19 = vld [vmem:[%s14235_s23 + $0xf8] sm:$0xff]  ;;  %vm2670_vm13 = vcmp.eq.s32.totalorder %v11555_v44, %v11865_v16  ;;  %vm7783_vm15 = vmpackc.low %vm2669_vm12, %vm2668_vm11 }
 0x242   :  { %14458 = vst [vmem:[#allocation16_spill] sm:$0xff] %v11868_v29  ;;  %v11870_v21 = vpop.permute.xlu0 %4125  ;;  %8853 = vmatprep.subr.bf16.mxu1 %v11669_v28  ;;  %5867 = vperm.xlu1 %9365, %v5807_v4   ;;  %vm7785_vm1 = vmpackc.low %vm2671_vm14, %vm2670_vm13 }
 0x243   :  { %14459 = vst [vmem:[#allocation15_spill] sm:$0xff] %v11870_v21  ;;  %5864 = vperm.xlu0 %9364, %v5806_v50   ;;  %v6376_v50 = vld [vmem:[%s14235_s23 + $0x138] sm:$0xff]  ;;  %v14595_v21 = vld [vmem:[#allocation25_spill] sm:$0xff] }
 0x245   :  { %8854 = vmatpush3.bf16.msra.mxu1 %v11669_v28  ;;  %v610_v58 = vpop.permute.xlu1 %609  ;;  %v6369_v28 = vld [vmem:[%s14235_s23 + $0x100] sm:$0xff] }
 0x246   :  { %v608_v10 = vpop.permute.xlu0 %607  ;;  %8855 = vmatprep.subr.bf16.mxu1 %v11751_v15  ;;  %721 = vst.msk [vmem:[#allocation2 + $0x288] sm:$0xff] %vm446_vm0, %v610_v58  ;;  %5873 = vperm.xlu1 %9365, %v5809_v19   ;;  %v6375_v19 = vld [vmem:[%s14235_s23 + $0x130] sm:$0xff] }
 0x247   :  { %720 = vst.msk [vmem:[#allocation2 + $0x280] sm:$0xff] %vm446_vm0, %v608_v10  ;;  %5870 = vperm.xlu0 %9364, %v5808_v12   ;;  %v6378_v10 = vld [vmem:[%s14235_s23 + $0x148] sm:$0xff] }
 0x248   :  { %8808 = vmatmul.mubr.msk.bf16.gmra.mrb[60].mxu1 %vm7726_vm3, %v14287_v62  ;;  %vm2673_vm3 = vcmp.eq.s32.totalorder %v11628_v56, %v11865_v16 }
 0x249   :  { %8856 = vmatpush3.bf16.msra.mxu1 %v11751_v15  ;;  %v11900_v17 = vpop.permute.xlu1 %4140  ;;  %8859 = vmatprep.mubr.msk.bf16.mxu1 %vm7777_vm4, %v14287_v62  ;;  %v6372_v15 = vld [vmem:[%s14235_s23 + $0x118] sm:$0xff]  ;;  %vm2674_vm4 = vcmp.eq.s32.totalorder %v11631_v11, %v11865_v16  ;;  %vm7787_vm6 = vmpackc.low %vm2673_vm3, %vm2672_vm2 }
 0x24a   :  { %v11902_v60 = vpop.permute.xlu0 %4135  ;;  %8857 = vmatprep.subr.bf16.mxu1 %v11745_v25  ;;  %6406 = vperm.xlu1 %9365, %v6370_v45   ;;  %v6377_v45 = vld [vmem:[%s14235_s23 + $0x140] sm:$0xff]  ;;  %vm7789_vm7 = vmpackc.low %vm2675_vm5, %vm2674_vm4 }
 0x24b   :  { %6403 = vperm.xlu0 %9364, %v6369_v28  }
 0x24d   :  { %8858 = vmatpush3.bf16.msra.mxu1 %v11745_v25  ;;  %v614_v53 = vpop.permute.xlu1 %613  ;;  %v6373_v25 = vld [vmem:[%s14235_s23 + $0x120] sm:$0xff] }
 0x24e   :  { %v612_v24 = vpop.permute.xlu0 %611  ;;  %723 = vst.msk [vmem:[#allocation2 + $0x298] sm:$0xff] %vm446_vm0, %v614_v53  ;;  %6412 = vperm.xlu1 %9365, %v6372_v15   ;;  %v6379_v53 = vld [vmem:[%s14235_s23 + $0x150] sm:$0xff] }
 0x24f   :  { %722 = vst.msk [vmem:[#allocation2 + $0x290] sm:$0xff] %vm446_vm0, %v612_v24  ;;  %6409 = vperm.xlu0 %9364, %v6371_v46   ;;  %v6380_v46 = vld [vmem:[%s14235_s23 + $0x158] sm:$0xff]  ;;  %v14210_v24 = vmov 0.0  }
 0x250   :  { %8860 = vmatmul.mubr.msk.bf16.vlgmr.msra.gmra.mrb[64].mxu1 %vm7779_vm9, %v14287_v62  ;;  %1113 = vst.msk [vmem:[#allocation3 + $0x10] sm:$0xff] %vm446_vm0, %v14210_v24  ;;  %1111 = vst.msk [vmem:[#allocation3] sm:$0xff] %vm446_vm0, %v14210_v24  ;;  %vm2677_vm9 = vcmp.eq.s32.totalorder %v11704_v38, %v11865_v16 }
 0x251   :  { %v11930_v47 = vpop.permute.xlu1 %4645  ;;  %8863 = vmatprep.mubr.msk.bf16.mxu1 %vm7781_vm10, %v14287_v62  ;;  %1112 = vst.msk [vmem:[#allocation3 + $0x8] sm:$0xff] %vm446_vm0, %v14210_v24  ;;  %1114 = vst.msk [vmem:[#allocation3 + $0x18] sm:$0xff] %vm446_vm0, %v14210_v24 }
 0x252   :  { %14460 = vst [vmem:[#allocation32_spill] sm:$0xff] %v11930_v47  ;;  %v11932_v4 = vpop.permute.xlu0 %4640  ;;  %6418 = vperm.xlu1 %9365, %v6374_v20   ;;  %1115 = vst.msk [vmem:[#allocation3 + $0x20] sm:$0xff] %vm446_vm0, %v14210_v24 }
 0x253   :  { %14461 = vst [vmem:[#allocation30_spill] sm:$0xff] %v11932_v4  ;;  %6415 = vperm.xlu0 %9364, %v6373_v25   ;;  %1116 = vst.msk [vmem:[#allocation3 + $0x28] sm:$0xff] %vm446_vm0, %v14210_v24 }
 0x254   :  { %1117 = vst.msk [vmem:[#allocation3 + $0x30] sm:$0xff] %vm446_vm0, %v14210_v24  ;;  %1118 = vst.msk [vmem:[#allocation3 + $0x38] sm:$0xff] %vm446_vm0, %v14210_v24 }
 0x255   :  { %v618_v12 = vpop.permute.xlu1 %617  ;;  %1119 = vst.msk [vmem:[#allocation3 + $0x40] sm:$0xff] %vm446_vm0, %v14210_v24  ;;  %1120 = vst.msk [vmem:[#allocation3 + $0x48] sm:$0xff] %vm446_vm0, %v14210_v24 }
 0x256   :  { %v616_v58 = vpop.permute.xlu0 %615  ;;  %725 = vst.msk [vmem:[#allocation2 + $0x2a8] sm:$0xff] %vm446_vm0, %v618_v12  ;;  %6424 = vperm.xlu1 %9365, %v6376_v50   ;;  %1121 = vst.msk [vmem:[#allocation3 + $0x50] sm:$0xff] %vm446_vm0, %v14210_v24  ;;  %v6382_v50 = vld [vmem:[%s14235_s23 + $0x168] sm:$0xff] }
 0x257   :  { %724 = vst.msk [vmem:[#allocation2 + $0x2a0] sm:$0xff] %vm446_vm0, %v616_v58  ;;  %6421 = vperm.xlu0 %9364, %v6375_v19   ;;  %1122 = vst.msk [vmem:[#allocation3 + $0x58] sm:$0xff] %vm446_vm0, %v14210_v24  ;;  %v6381_v19 = vld [vmem:[%s14235_s23 + $0x160] sm:$0xff] }
 0x258   :  { %8864 = vmatmul.mubr.msk.bf16.gmra.mrb[68].mxu1 %vm7783_vm15, %v14287_v62  ;;  %1123 = vst.msk [vmem:[#allocation3 + $0x60] sm:$0xff] %vm446_vm0, %v14210_v24  ;;  %1124 = vst.msk [vmem:[#allocation3 + $0x68] sm:$0xff] %vm446_vm0, %v14210_v24 }
 0x259   :  { %v11958_v28 = vpop.permute.xlu1 %4655  ;;  %8867 = vmatprep.mubr.msk.bf16.mxu1 %vm7785_vm1, %v14287_v62  ;;  %1125 = vst.msk [vmem:[#allocation3 + $0x70] sm:$0xff] %vm446_vm0, %v14210_v24  ;;  %1126 = vst.msk [vmem:[#allocation3 + $0x78] sm:$0xff] %vm446_vm0, %v14210_v24  ;;  %v5239_v24 = vld [vmem:[%s14111_s6 + $0x18] sm:$0xff] }
 0x25a   :  { %14462 = vst [vmem:[#allocation24_spill] sm:$0xff] %v11958_v28  ;;  %v11960_v15 = vpop.permute.xlu0 %4650  ;;  %6430 = vperm.xlu1 %9365, %v6378_v10   ;;  %v6384_v10 = vld [vmem:[%s14235_s23 + $0x178] sm:$0xff]  ;;  %vm7791_vm12 = vmpackc.low %vm2677_vm9, %vm2676_vm8 }
 0x25b   :  { %14463 = vst [vmem:[#allocation23_spill] sm:$0xff] %v11960_v15  ;;  %6427 = vperm.xlu0 %9364, %v6377_v45   ;;  %v6383_v45 = vld [vmem:[%s14235_s23 + $0x170] sm:$0xff]  ;;  %s9375_s23 = smov 64   ;;  %v14594_v28 = vld [vmem:[#allocation91_spill] sm:$0xff] }
 0x25d   :  { %v622_v20 = vpop.permute.xlu1 %621 }
 0x25e   :  { %v620_v25 = vpop.permute.xlu0 %619  ;;  %727 = vst.msk [vmem:[#allocation2 + $0x2b8] sm:$0xff] %vm446_vm0, %v622_v20  ;;  %6436 = vperm.xlu1 %9365, %v6380_v46   ;;  %v14466_v46 = vld [vmem:[#allocation4_spill] sm:$0xff] }
 0x25f   :  { %726 = vst.msk [vmem:[#allocation2 + $0x2b0] sm:$0xff] %vm446_vm0, %v620_v25  ;;  %6433 = vperm.xlu0 %9364, %v6379_v53   ;;  %vm3304_vm10 = vcmp.eq.s32.totalorder %v14466_v46, %v11067_v18  ;;  %vm3303_vm11 = vcmp.eq.s32.totalorder %v14466_v46, %v11069_v9  ;;  %v14469_v9 = vld [vmem:[#allocation34_spill] sm:$0xff]  ;;  %v14470_v25 = vld [vmem:[#allocation31_spill] sm:$0xff] }
 0x260   :  { %8868 = vmatmul.mubr.msk.bf16.gmra.mrb[72].mxu1 %vm7787_vm6, %v14287_v62  ;;  %vm7824_vm13 = vmpackc.low %vm3304_vm10, %vm3303_vm11 }
 0x261   :  { %v12030_v12 = vpop.permute.xlu1 %4665  ;;  %8871 = vmatprep.mubr.msk.bf16.mxu1 %vm7789_vm7, %v14287_v62 }
 0x262   :  { %14464 = vst [vmem:[#allocation44_spill] sm:$0xff] %v12030_v12  ;;  %v12032_v58 = vpop.permute.xlu0 %4660  ;;  %6442 = vperm.xlu1 %9365, %v6382_v50   ;;  %v14549_v12 = vld [vmem:[#allocation83_spill] sm:$0xff] }
 0x263   :  { %14465 = vst [vmem:[#allocation42_spill] sm:$0xff] %v12032_v58  ;;  %6439 = vperm.xlu0 %9364, %v6381_v19  }
 0x265   :  { %v626_v53 = vpop.permute.xlu1 %625 }
 0x266   :  { %v624_v20 = vpop.permute.xlu0 %623  ;;  %729 = vst.msk [vmem:[#allocation2 + $0x2c8] sm:$0xff] %vm446_vm0, %v626_v53  ;;  %6448 = vperm.xlu1 %9365, %v6384_v10   ;;  %v14471_v10 = vld [vmem:[#allocation33_spill] sm:$0xff] }
 0x267   :  { %728 = vst.msk [vmem:[#allocation2 + $0x2c0] sm:$0xff] %vm446_vm0, %v624_v20  ;;  %6445 = vperm.xlu0 %9364, %v6383_v45   ;;  %v14472_v45 = vld [vmem:[#allocation29_spill] sm:$0xff]  ;;  %v5236_v20 = vld [vmem:[%s14111_s6] sm:$0xff] }
 0x268   :  { %8872 = vmatmul.mubr.msk.bf16.gmra.mrb[76].mxu1 %vm7791_vm12, %v14287_v62  ;;  %v5237_v53 = vld [vmem:[%s14111_s6 + $0x8] sm:$0xff] }
 0x269   :  { %8911 = vmatprep.mubr.msk.bf16.mxu1 %vm7824_vm13, %v14287_v62  ;;  %v12053_v16 = vpop.permute.xlu1 %4675 }
 0x26a   :  { %14467 = vst [vmem:[#allocation36_spill] sm:$0xff] %v12053_v16  ;;  %v12055_v18 = vpop.permute.xlu0 %4670  ;;  %738 = vrot.lane.b32.xlu1 %v14469_v9, %s9375_s23 }
 0x26b   :  { %14468 = vst [vmem:[#allocation35_spill] sm:$0xff] %v12055_v18  ;;  %736 = vrot.lane.b32.xlu0 %v14470_v25, %s9375_s23 }
 0x26d   :  { %v630_v50 = vpop.permute.xlu1 %629 }
 0x26e   :  { %v628_v19 = vpop.permute.xlu0 %627  ;;  %731 = vst.msk [vmem:[#allocation2 + $0x2d8] sm:$0xff] %vm446_vm0, %v630_v50  ;;  %742 = vrot.lane.b32.xlu1 %v14471_v10, %s9375_s23  ;;  %v14475_v10 = vld [vmem:[#allocation46_spill] sm:$0xff] }
 0x26f   :  { %730 = vst.msk [vmem:[#allocation2 + $0x2d0] sm:$0xff] %vm446_vm0, %v628_v19  ;;  %740 = vrot.lane.b32.xlu0 %v14472_v45, %s9375_s23  ;;  %v14476_v45 = vld [vmem:[#allocation43_spill] sm:$0xff] }
 0x271   :  { %v12073_v9 = vpop.permute.xlu1 %4685 }
 0x272   :  { %14473 = vst [vmem:[#allocation61_spill] sm:$0xff] %v12073_v9  ;;  %v12075_v25 = vpop.permute.xlu0 %4680  ;;  %5492 = vperm.xlu1 %9365, %v5237_v53   ;;  %v5238_v53 = vld [vmem:[%s14111_s6 + $0x10] sm:$0xff]  ;;  %v14480_v9 = vld [vmem:[#allocation41_spill] sm:$0xff] }
 0x273   :  { %14474 = vst [vmem:[#allocation60_spill] sm:$0xff] %v12075_v25  ;;  %5487 = vperm.xlu0 %9364, %v5236_v20   ;;  %v5241_v25 = vld [vmem:[%s14111_s6 + $0x28] sm:$0xff] }
 0x275   :  { %v634_v50 = vpop.permute.xlu1 %633 }
 0x276   :  { %733 = vst.msk [vmem:[#allocation2 + $0x2e8] sm:$0xff] %vm446_vm0, %v634_v50  ;;  %v632_v19 = vpop.permute.xlu0 %631  ;;  %746 = vrot.lane.b32.xlu1 %v14475_v10, %s9375_s23 }
 0x277   :  { %732 = vst.msk [vmem:[#allocation2 + $0x2e0] sm:$0xff] %vm446_vm0, %v632_v19  ;;  %744 = vrot.lane.b32.xlu0 %v14476_v45, %s9375_s23  ;;  %v14479_v45 = vld [vmem:[#allocation45_spill] sm:$0xff] }
 0x279   :  { %v12089_v20 = vpop.permute.xlu1 %4695 }
 0x27a   :  { %14477 = vst [vmem:[#allocation72_spill] sm:$0xff] %v12089_v20  ;;  %v12091_v50 = vpop.permute.xlu0 %4690  ;;  %5502 = vperm.xlu1 %9365, %v5239_v24   ;;  %v5240_v24 = vld [vmem:[%s14111_s6 + $0x20] sm:$0xff] }
 0x27b   :  { %14478 = vst [vmem:[#allocation70_spill] sm:$0xff] %v12091_v50  ;;  %5497 = vperm.xlu0 %9364, %v5238_v53  }
 0x27d   :  { %v638_v10 = vpop.permute.xlu1 %637 }
 0x27e   :  { %735 = vst.msk [vmem:[#allocation2 + $0x2f8] sm:$0xff] %vm446_vm0, %v638_v10  ;;  %v636_v19 = vpop.permute.xlu0 %635  ;;  %750 = vrot.lane.b32.xlu1 %v14479_v45, %s9375_s23 }
 0x27f   :  { %734 = vst.msk [vmem:[#allocation2 + $0x2f0] sm:$0xff] %vm446_vm0, %v636_v19  ;;  %748 = vrot.lane.b32.xlu0 %v14480_v9, %s9375_s23  ;;  %v5243_v9 = vld [vmem:[%s14111_s6 + $0x38] sm:$0xff] }
 0x281   :  { %v12105_v53 = vpop.permute.xlu1 %4705 }
 0x282   :  { %14481 = vst [vmem:[#allocation67_spill] sm:$0xff] %v12105_v53  ;;  %v12107_v10 = vpop.permute.xlu0 %4700  ;;  %5512 = vperm.xlu1 %9365, %v5241_v25   ;;  %v5242_v53 = vld [vmem:[%s14111_s6 + $0x30] sm:$0xff] }
 0x283   :  { %14482 = vst [vmem:[#allocation66_spill] sm:$0xff] %v12107_v10  ;;  %5507 = vperm.xlu0 %9364, %v5240_v24  }
 0x285   :  { %v12109_v45 = vpop.permute.xlu1 %4715 }
 0x286   :  { %14483 = vst [vmem:[#allocation77_spill] sm:$0xff] %v12109_v45  ;;  %v12111_v19 = vpop.permute.xlu0 %4710  ;;  %754 = vrot.lane.b32.xlu1 %v10463_v13, %s9375_s23  ;;  %v5245_v45 = vld [vmem:[%s14111_s6 + $0x48] sm:$0xff] }
 0x287   :  { %14484 = vst [vmem:[#allocation76_spill] sm:$0xff] %v12111_v19  ;;  %752 = vrot.lane.b32.xlu0 %v10432_v54, %s9375_s23  ;;  %v14489_v54 = vld [vmem:[#allocation49_spill] sm:$0xff] }
 0x289   :  { %v12123_v25 = vpop.permute.xlu1 %5256 }
 0x28a   :  { %14485 = vst [vmem:[#allocation75_spill] sm:$0xff] %v12123_v25  ;;  %v12125_v24 = vpop.permute.xlu0 %5253  ;;  %5522 = vperm.xlu1 %9365, %v5243_v9  }
 0x28b   :  { %14486 = vst [vmem:[#allocation74_spill] sm:$0xff] %v12125_v24  ;;  %5517 = vperm.xlu0 %9364, %v5242_v53   ;;  %v5244_v24 = vld [vmem:[%s14111_s6 + $0x40] sm:$0xff] }
 0x28d   :  { %v12127_v10 = vpop.permute.xlu1 %5262 }
 0x28e   :  { %14487 = vst [vmem:[#allocation82_spill] sm:$0xff] %v12127_v10  ;;  %v12129_v13 = vpop.permute.xlu0 %5259  ;;  %758 = vrot.lane.b32.xlu1 %v10445_v2, %s9375_s23  ;;  %v5814_v10 = vld [vmem:[%s14111_s6 + $0x98] sm:$0xff] }
 0x28f   :  { %14488 = vst [vmem:[#allocation6_spill] sm:$0xff] %v12129_v13  ;;  %756 = vrot.lane.b32.xlu0 %v14489_v54, %s9375_s23  ;;  %v5247_v54 = vld [vmem:[%s14111_s6 + $0x58] sm:$0xff] }
 0x291   :  { %v12141_v9 = vpop.permute.xlu1 %5268 }
 0x292   :  { %14490 = vst [vmem:[#allocation79_spill] sm:$0xff] %v12141_v9  ;;  %v12143_v53 = vpop.permute.xlu0 %5265  ;;  %5532 = vperm.xlu1 %9365, %v5245_v45  }
 0x293   :  { %14491 = vst [vmem:[#allocation78_spill] sm:$0xff] %v12143_v53  ;;  %5527 = vperm.xlu0 %9364, %v5244_v24   ;;  %v5246_v53 = vld [vmem:[%s14111_s6 + $0x50] sm:$0xff] }
 0x295   :  { %v12145_v13 = vpop.permute.xlu1 %5274 }
 0x296   :  { %14492 = vst [vmem:[#allocation4_spill] sm:$0xff] %v12145_v13  ;;  %v12147_v2 = vpop.permute.xlu0 %5271  ;;  %762 = vrot.lane.b32.xlu1 %v10551_v48, %s9375_s23  ;;  %v5249_v13 = vld [vmem:[%s14111_s6 + $0x68] sm:$0xff] }
 0x297   :  { %14493 = vst [vmem:[#allocation34_spill] sm:$0xff] %v12147_v2  ;;  %760 = vrot.lane.b32.xlu0 %v10521_v23, %s9375_s23  ;;  %v14498_v23 = vld [vmem:[#allocation51_spill] sm:$0xff] }
 0x299   :  { %v12159_v45 = vpop.permute.xlu1 %5280 }
 0x29a   :  { %14494 = vst [vmem:[#allocation31_spill] sm:$0xff] %v12159_v45  ;;  %v12161_v24 = vpop.permute.xlu0 %5277  ;;  %5542 = vperm.xlu1 %9365, %v5247_v54   ;;  %v5251_v45 = vld [vmem:[%s14111_s6 + $0x78] sm:$0xff] }
 0x29b   :  { %14495 = vst [vmem:[#allocation33_spill] sm:$0xff] %v12161_v24  ;;  %5537 = vperm.xlu0 %9364, %v5246_v53   ;;  %v5248_v24 = vld [vmem:[%s14111_s6 + $0x60] sm:$0xff] }
 0x29d   :  { %v12163_v2 = vpop.permute.xlu1 %5286 }
 0x29e   :  { %14496 = vst [vmem:[#allocation29_spill] sm:$0xff] %v12163_v2  ;;  %v12165_v48 = vpop.permute.xlu0 %5283  ;;  %766 = vrot.lane.b32.xlu1 %v10533_v43, %s9375_s23  ;;  %v14504_v2 = vld [vmem:[#allocation53_spill] sm:$0xff] }
 0x29f   :  { %14497 = vst [vmem:[#allocation46_spill] sm:$0xff] %v12165_v48  ;;  %764 = vrot.lane.b32.xlu0 %v14498_v23, %s9375_s23  ;;  %v14503_v23 = vld [vmem:[#allocation55_spill] sm:$0xff] }
 0x2a1   :  { %v12177_v54 = vpop.permute.xlu1 %5292 }
 0x2a2   :  { %14499 = vst [vmem:[#allocation43_spill] sm:$0xff] %v12177_v54  ;;  %v12179_v53 = vpop.permute.xlu0 %5289  ;;  %5552 = vperm.xlu1 %9365, %v5249_v13   ;;  %v14509_v54 = vld [vmem:[#allocation54_spill] sm:$0xff] }
 0x2a3   :  { %14500 = vst [vmem:[#allocation45_spill] sm:$0xff] %v12179_v53  ;;  %5547 = vperm.xlu0 %9364, %v5248_v24   ;;  %v5250_v53 = vld [vmem:[%s14111_s6 + $0x70] sm:$0xff] }
 0x2a5   :  { %v12181_v48 = vpop.permute.xlu1 %5298 }
 0x2a6   :  { %14501 = vst [vmem:[#allocation41_spill] sm:$0xff] %v12181_v48  ;;  %v12183_v43 = vpop.permute.xlu0 %5295  ;;  %770 = vrot.lane.b32.xlu1 %v14503_v23, %s9375_s23  ;;  %v7795_v23 = vld [vmem:[%s14236_s26 + $0x28] sm:$0xff] }
 0x2a7   :  { %14502 = vst [vmem:[#allocation49_spill] sm:$0xff] %v12183_v43  ;;  %768 = vrot.lane.b32.xlu0 %v14504_v2, %s9375_s23  ;;  %v7794_v2 = vld [vmem:[%s14236_s26 + $0x20] sm:$0xff] }
 0x2a9   :  { %v12195_v13 = vpop.permute.xlu1 %5831 }
 0x2aa   :  { %14505 = vst [vmem:[#allocation51_spill] sm:$0xff] %v12195_v13  ;;  %v12197_v24 = vpop.permute.xlu0 %5828  ;;  %5562 = vperm.xlu1 %9365, %v5251_v45   ;;  %v3067_v13 = vpack.c.bf16 %v7795_v23, %v7794_v2  ;;  %v5812_v45 = vld [vmem:[%s14111_s6 + $0x88] sm:$0xff] }
 0x2ab   :  { %14506 = vst [vmem:[#allocation55_spill] sm:$0xff] %v12197_v24  ;;  %5557 = vperm.xlu0 %9364, %v5250_v53   ;;  %v14510_v24 = vld [vmem:[#allocation52_spill] sm:$0xff] }
 0x2ac   :  { %v5811_v53 = vld [vmem:[%s14111_s6 + $0x80] sm:$0xff]  ;;  %8875 = vmatprep.subr.bf16.mxu0 %v3067_v13 }
 0x2ad   :  { %v12199_v43 = vpop.permute.xlu1 %5837  ;;  %8876 = vmatpush3.bf16.msra.mxu0 %v3067_v13  ;;  %v14515_v13 = vld [vmem:[#allocation59_spill] sm:$0xff] }
 0x2ae   :  { %14507 = vst [vmem:[#allocation53_spill] sm:$0xff] %v12199_v43  ;;  %v12207_v48 = vpop.permute.xlu0 %5834  ;;  %774 = vrot.lane.b32.xlu1 %v14509_v54, %s9375_s23  ;;  %v7796_v54 = vld [vmem:[%s14236_s26 + $0x30] sm:$0xff] }
 0x2af   :  { %14508 = vst [vmem:[#allocation158_spill] sm:$0xff] %v12207_v48  ;;  %772 = vrot.lane.b32.xlu0 %v14510_v24, %s9375_s23  ;;  %v7797_v24 = vld [vmem:[%s14236_s26 + $0x38] sm:$0xff] }
 0x2b0   :  { %v3068_v23 = vpack.c.bf16 %v7797_v24, %v7796_v54 }
 0x2b1   :  { %v12219_v43 = vpop.permute.xlu1 %5843 }
 0x2b2   :  { %14511 = vst [vmem:[#allocation54_spill] sm:$0xff] %v12219_v43  ;;  %v12227_v2 = vpop.permute.xlu0 %5840  ;;  %6067 = vperm.xlu1 %9365, %v5812_v45   ;;  %8877 = vmatprep.subr.bf16.mxu0 %v3068_v23  ;;  %v14516_v43 = vld [vmem:[#allocation57_spill] sm:$0xff]  ;;  %v5813_v45 = vld [vmem:[%s14111_s6 + $0x90] sm:$0xff] }
 0x2b3   :  { %14512 = vst [vmem:[#allocation52_spill] sm:$0xff] %v12227_v2  ;;  %6062 = vperm.xlu0 %9364, %v5811_v53   ;;  %8878 = vmatpush3.bf16.msra.mxu0 %v3068_v23  ;;  %v1569_v2 = vld [vmem:[#allocation3 + $0x8] sm:$0xff] }
 0x2b5   :  { %v12229_v48 = vpop.permute.xlu1 %5849 }
 0x2b6   :  { %14513 = vst [vmem:[#allocation159_spill] sm:$0xff] %v12229_v48  ;;  %v12231_v9 = vpop.permute.xlu0 %5846  ;;  %778 = vrot.lane.b32.xlu1 %v14515_v13, %s9375_s23  ;;  %v14522_v13 = vld [vmem:[#allocation56_spill] sm:$0xff] }
 0x2b7   :  { %14514 = vst [vmem:[#allocation160_spill] sm:$0xff] %v12231_v9  ;;  %776 = vrot.lane.b32.xlu0 %v14516_v43, %s9375_s23  ;;  %v14521_v43 = vld [vmem:[#allocation58_spill] sm:$0xff]  ;;  %v5816_v9 = vld [vmem:[%s14111_s6 + $0xa8] sm:$0xff] }
 0x2b9   :  { %v12243_v53 = vpop.permute.xlu1 %5855 }
 0x2ba   :  { %14517 = vst [vmem:[#allocation59_spill] sm:$0xff] %v12243_v53  ;;  %v12245_v54 = vpop.permute.xlu0 %5852  ;;  %6077 = vperm.xlu1 %9365, %v5814_v10   ;;  %v5818_v53 = vld [vmem:[%s14111_s6 + $0xb8] sm:$0xff] }
 0x2bb   :  { %14518 = vst [vmem:[#allocation57_spill] sm:$0xff] %v12245_v54  ;;  %6072 = vperm.xlu0 %9364, %v5813_v45   ;;  %v5815_v54 = vld [vmem:[%s14111_s6 + $0xa0] sm:$0xff] }
 0x2bd   :  { %v12247_v24 = vpop.permute.xlu1 %5861 }
 0x2be   :  { %14519 = vst [vmem:[#allocation161_spill] sm:$0xff] %v12247_v24  ;;  %v12249_v23 = vpop.permute.xlu0 %5858  ;;  %782 = vrot.lane.b32.xlu1 %v14521_v43, %s9375_s23  ;;  %v14528_v24 = vld [vmem:[#allocation63_spill] sm:$0xff] }
 0x2bf   :  { %14520 = vst [vmem:[#allocation162_spill] sm:$0xff] %v12249_v23  ;;  %780 = vrot.lane.b32.xlu0 %v14522_v13, %s9375_s23  ;;  %v14527_v13 = vld [vmem:[#allocation65_spill] sm:$0xff] }
 0x2c1   :  { %v12261_v10 = vpop.permute.xlu1 %5867 }
 0x2c2   :  { %14523 = vst [vmem:[#allocation58_spill] sm:$0xff] %v12261_v10  ;;  %v12263_v45 = vpop.permute.xlu0 %5864  ;;  %6087 = vperm.xlu1 %9365, %v5816_v9   ;;  %v5820_v10 = vld [vmem:[%s14111_s6 + $0xc8] sm:$0xff] }
 0x2c3   :  { %14524 = vst [vmem:[#allocation56_spill] sm:$0xff] %v12263_v45  ;;  %6082 = vperm.xlu0 %9364, %v5815_v54   ;;  %v5817_v45 = vld [vmem:[%s14111_s6 + $0xb0] sm:$0xff] }
 0x2c5   :  { %v12265_v23 = vpop.permute.xlu1 %5873 }
 0x2c6   :  { %14525 = vst [vmem:[#allocation163_spill] sm:$0xff] %v12265_v23  ;;  %v12267_v43 = vpop.permute.xlu0 %5870  ;;  %786 = vrot.lane.b32.xlu1 %v14527_v13, %s9375_s23  ;;  %v14534_v23 = vld [vmem:[#allocation62_spill] sm:$0xff] }
 0x2c7   :  { %14526 = vst [vmem:[#allocation164_spill] sm:$0xff] %v12267_v43  ;;  %784 = vrot.lane.b32.xlu0 %v14528_v24, %s9375_s23  ;;  %v14533_v24 = vld [vmem:[#allocation64_spill] sm:$0xff] }
 0x2c9   :  { %v12279_v9 = vpop.permute.xlu1 %6406 }
 0x2ca   :  { %14529 = vst [vmem:[#allocation65_spill] sm:$0xff] %v12279_v9  ;;  %v12281_v54 = vpop.permute.xlu0 %6403  ;;  %6097 = vperm.xlu1 %9365, %v5818_v53   ;;  %v5822_v9 = vld [vmem:[%s14111_s6 + $0xd8] sm:$0xff] }
 0x2cb   :  { %14530 = vst [vmem:[#allocation63_spill] sm:$0xff] %v12281_v54  ;;  %6092 = vperm.xlu0 %9364, %v5817_v45   ;;  %v5819_v54 = vld [vmem:[%s14111_s6 + $0xc0] sm:$0xff] }
 0x2cd   :  { %v12283_v43 = vpop.permute.xlu1 %6412 }
 0x2ce   :  { %14531 = vst [vmem:[#allocation165_spill] sm:$0xff] %v12283_v43  ;;  %v12285_v13 = vpop.permute.xlu0 %6409  ;;  %790 = vrot.lane.b32.xlu1 %v14533_v24, %s9375_s23  ;;  %v14540_v43 = vld [vmem:[#allocation69_spill] sm:$0xff] }
 0x2cf   :  { %14532 = vst [vmem:[#allocation166_spill] sm:$0xff] %v12285_v13  ;;  %788 = vrot.lane.b32.xlu0 %v14534_v23, %s9375_s23  ;;  %v14539_v23 = vld [vmem:[#allocation73_spill] sm:$0xff] }
 0x2d1   :  { %v12297_v53 = vpop.permute.xlu1 %6418 }
 0x2d2   :  { %14535 = vst [vmem:[#allocation64_spill] sm:$0xff] %v12297_v53  ;;  %v12299_v45 = vpop.permute.xlu0 %6415  ;;  %6107 = vperm.xlu1 %9365, %v5820_v10   ;;  %v5824_v53 = vld [vmem:[%s14111_s6 + $0xe8] sm:$0xff] }
 0x2d3   :  { %14536 = vst [vmem:[#allocation62_spill] sm:$0xff] %v12299_v45  ;;  %6102 = vperm.xlu0 %9364, %v5819_v54   ;;  %v5821_v45 = vld [vmem:[%s14111_s6 + $0xd0] sm:$0xff] }
 0x2d5   :  { %v12301_v13 = vpop.permute.xlu1 %6424 }
 0x2d6   :  { %14537 = vst [vmem:[#allocation167_spill] sm:$0xff] %v12301_v13  ;;  %v12303_v24 = vpop.permute.xlu0 %6421  ;;  %794 = vrot.lane.b32.xlu1 %v14539_v23, %s9375_s23  ;;  %v14546_v13 = vld [vmem:[#allocation68_spill] sm:$0xff] }
 0x2d7   :  { %14538 = vst [vmem:[#allocation168_spill] sm:$0xff] %v12303_v24  ;;  %792 = vrot.lane.b32.xlu0 %v14540_v43, %s9375_s23  ;;  %v14545_v43 = vld [vmem:[#allocation71_spill] sm:$0xff] }
 0x2d9   :  { %v12315_v10 = vpop.permute.xlu1 %6430 }
 0x2da   :  { %14541 = vst [vmem:[#allocation73_spill] sm:$0xff] %v12315_v10  ;;  %v12317_v54 = vpop.permute.xlu0 %6427  ;;  %6117 = vperm.xlu1 %9365, %v5822_v9   ;;  %v1571_v10 = vld [vmem:[#allocation3 + $0x18] sm:$0xff] }
 0x2db   :  { %14542 = vst [vmem:[#allocation69_spill] sm:$0xff] %v12317_v54  ;;  %6112 = vperm.xlu0 %9364, %v5821_v45   ;;  %v5823_v54 = vld [vmem:[%s14111_s6 + $0xe0] sm:$0xff]  ;;  %v1570_v45 = vld [vmem:[#allocation3 + $0x10] sm:$0xff] }
 0x2dd   :  { %v12319_v24 = vpop.permute.xlu1 %6436 }
 0x2de   :  { %14543 = vst [vmem:[#allocation169_spill] sm:$0xff] %v12319_v24  ;;  %v12321_v23 = vpop.permute.xlu0 %6433  ;;  %798 = vrot.lane.b32.xlu1 %v14545_v43, %s9375_s23 }
 0x2df   :  { %14544 = vst [vmem:[#allocation170_spill] sm:$0xff] %v12321_v23  ;;  %796 = vrot.lane.b32.xlu0 %v14546_v13, %s9375_s23  ;;  %v1568_v23 = vld [vmem:[#allocation3] sm:$0xff] }
 0x2e1   :  { %v12333_v9 = vpop.permute.xlu1 %6442 }
 0x2e2   :  { %14547 = vst [vmem:[#allocation71_spill] sm:$0xff] %v12333_v9  ;;  %v12335_v24 = vpop.permute.xlu0 %6439  ;;  %6127 = vperm.xlu1 %9365, %v5824_v53   ;;  %v14554_v9 = vld [vmem:[#allocation81_spill] sm:$0xff] }
 0x2e3   :  { %14548 = vst [vmem:[#allocation68_spill] sm:$0xff] %v12335_v24  ;;  %6122 = vperm.xlu0 %9364, %v5823_v54   ;;  %v8733_v43 = vpop.f32.mrb[32].mxu1  ;;  %v14550_v54 = vld [vmem:[#allocation5_spill] sm:$0xff] }
 0x2e4   :  { %v1691_v48 = vadd.f32 %v8733_v43, %v1570_v45  ;;  %v1626_v13 = vpop.f32.mrb[33].mxu1  ;;  %v14551_v45 = vmov 0 }
 0x2e5   :  { %v6449_v25 = vpop.permute.xlu1 %6448  ;;  %v1689_v19 = vadd.f32 %v1626_v13, %v1568_v23  ;;  %v8734_v20 = vpop.f32.mrb[34].mxu1  ;;  %v5826_v23 = vld [vmem:[%s14111_s6 + $0xf8] sm:$0xff] }
 0x2e6   :  { %vm6465_vm14 = vcmp.eq.s32.totalorder %v14466_v46, %v6449_v25  ;;  %v6446_v50 = vpop.permute.xlu0 %6445  ;;  %802 = vrot.lane.b32.xlu1 %v14549_v12, %s9375_s23  ;;  %1707 = vst.msk [vmem:[#allocation3 + $0x10] sm:$0xff] %vm446_vm0, %v1691_v48  ;;  %v1692_v24 = vadd.f32 %v8734_v20, %v1571_v10  ;;  %v1629_v53 = vpop.f32.mrb[35].mxu1  ;;  %v5825_v12 = vld [vmem:[%s14111_s6 + $0xf0] sm:$0xff]  ;;  %v1575_v10 = vld [vmem:[#allocation3 + $0x38] sm:$0xff] }
 0x2e7   :  { %vm6464_vm15 = vcmp.eq.s32.totalorder %v14466_v46, %v6446_v50  ;;  %800 = vrot.lane.b32.xlu0 %v14550_v54, %s9375_s23  ;;  %1705 = vst.msk [vmem:[#allocation3] sm:$0xff] %vm446_vm0, %v1689_v19  ;;  %v1690_v25 = vadd.f32 %v1629_v53, %v1569_v2  ;;  %v1574_v50 = vld [vmem:[#allocation3 + $0x30] sm:$0xff]  ;;  %v1572_v19 = vld [vmem:[#allocation3 + $0x20] sm:$0xff]  ;;  %v1573_v53 = vld [vmem:[#allocation3 + $0x28] sm:$0xff] }
 0x2e8   :  { %vm12348_vm1 = vmpackc.low %vm6465_vm14, %vm6464_vm15  ;;  %1708 = vst.msk [vmem:[#allocation3 + $0x18] sm:$0xff] %vm446_vm0, %v1692_v24 }
 0x2e9   :  { %v14552_v45 = vsel %vm12348_vm1, 4294967295, %v14551_v45  ;;  %v739_v20 = vpop.permute.xlu1 %738  ;;  %1706 = vst.msk [vmem:[#allocation3 + $0x8] sm:$0xff] %vm446_vm0, %v1690_v25 }
 0x2ea   :  { %14553 = vst [vmem:[#allocation83_spill] sm:$0xff] %v14552_v45  ;;  %882 = vst.msk [vmem:[#allocation2 + $0x308] sm:$0xff] %vm446_vm0, %v739_v20  ;;  %v737_v48 = vpop.permute.xlu0 %736  ;;  %6137 = vperm.xlu1 %9365, %v5826_v23  }
 0x2eb   :  { %881 = vst.msk [vmem:[#allocation2 + $0x300] sm:$0xff] %vm446_vm0, %v737_v48  ;;  %6132 = vperm.xlu0 %9364, %v5825_v12   ;;  %v8737_v2 = vpop.f32.mrb[36].mxu1  ;;  %v14555_v12 = vld [vmem:[#allocation80_spill] sm:$0xff] }
 0x2ec   :  { %v1695_v43 = vadd.f32 %v8737_v2, %v1574_v50  ;;  %v1642_v13 = vpop.f32.mrb[37].mxu1  ;;  %v6387_v50 = vld [vmem:[%s14111_s6 + $0x108] sm:$0xff]  ;;  %v1578_v2 = vld [vmem:[#allocation3 + $0x50] sm:$0xff] }
 0x2ed   :  { %v743_v54 = vpop.permute.xlu1 %742  ;;  %v1693_v45 = vadd.f32 %v1642_v13, %v1572_v19  ;;  %v8738_v24 = vpop.f32.mrb[38].mxu1 }
 0x2ee   :  { %884 = vst.msk [vmem:[#allocation2 + $0x318] sm:$0xff] %vm446_vm0, %v743_v54  ;;  %v741_v25 = vpop.permute.xlu0 %740  ;;  %806 = vrot.lane.b32.xlu1 %v14554_v9, %s9375_s23  ;;  %1711 = vst.msk [vmem:[#allocation3 + $0x30] sm:$0xff] %vm446_vm0, %v1695_v43  ;;  %v1696_v23 = vadd.f32 %v8738_v24, %v1575_v10  ;;  %v1645_v20 = vpop.f32.mrb[39].mxu1  ;;  %v6386_v9 = vld [vmem:[%s14111_s6 + $0x100] sm:$0xff]  ;;  %v1579_v54 = vld [vmem:[#allocation3 + $0x58] sm:$0xff] }
 0x2ef   :  { %883 = vst.msk [vmem:[#allocation2 + $0x310] sm:$0xff] %vm446_vm0, %v741_v25  ;;  %804 = vrot.lane.b32.xlu0 %v14555_v12, %s9375_s23  ;;  %1709 = vst.msk [vmem:[#allocation3 + $0x20] sm:$0xff] %vm446_vm0, %v1693_v45  ;;  %v1694_v48 = vadd.f32 %v1645_v20, %v1573_v53  ;;  %v1576_v43 = vld [vmem:[#allocation3 + $0x40] sm:$0xff]  ;;  %v1577_v24 = vld [vmem:[#allocation3 + $0x48] sm:$0xff] }
 0x2f0   :  { %1712 = vst.msk [vmem:[#allocation3 + $0x38] sm:$0xff] %vm446_vm0, %v1696_v23 }
 0x2f1   :  { %v12374_v19 = vpop.permute.xlu1 %5492  ;;  %1710 = vst.msk [vmem:[#allocation3 + $0x28] sm:$0xff] %vm446_vm0, %v1694_v48 }
 0x2f2   :  { %14556 = vst [vmem:[#allocation5_spill] sm:$0xff] %v12374_v19  ;;  %v12377_v10 = vpop.permute.xlu0 %5487  ;;  %6642 = vperm.xlu1 %9365, %v6387_v50   ;;  %v14558_v19 = vld [vmem:[#allocation93_spill] sm:$0xff] }
 0x2f3   :  { %14557 = vst [vmem:[#allocation81_spill] sm:$0xff] %v12377_v10  ;;  %6637 = vperm.xlu0 %9364, %v6386_v9   ;;  %v8741_v13 = vpop.f32.mrb[40].mxu1  ;;  %v14559_v9 = vld [vmem:[#allocation90_spill] sm:$0xff] }
 0x2f4   :  { %v1699_v45 = vadd.f32 %v8741_v13, %v1578_v2  ;;  %v1658_v53 = vpop.f32.mrb[41].mxu1  ;;  %v6389_v2 = vld [vmem:[%s14111_s6 + $0x118] sm:$0xff] }
 0x2f5   :  { %v747_v25 = vpop.permute.xlu1 %746  ;;  %v1697_v20 = vadd.f32 %v1658_v53, %v1576_v43  ;;  %v8742_v12 = vpop.f32.mrb[42].mxu1  ;;  %v1580_v53 = vld [vmem:[#allocation3 + $0x60] sm:$0xff] }
 0x2f6   :  { %886 = vst.msk [vmem:[#allocation2 + $0x328] sm:$0xff] %vm446_vm0, %v747_v25  ;;  %v745_v23 = vpop.permute.xlu0 %744  ;;  %810 = vrot.lane.b32.xlu1 %v14558_v19, %s9375_s23  ;;  %1715 = vst.msk [vmem:[#allocation3 + $0x50] sm:$0xff] %vm446_vm0, %v1699_v45  ;;  %v1700_v48 = vadd.f32 %v8742_v12, %v1579_v54  ;;  %v1661_v50 = vpop.f32.mrb[43].mxu1  ;;  %v6388_v19 = vld [vmem:[%s14111_s6 + $0x110] sm:$0xff]  ;;  %v1583_v12 = vld [vmem:[#allocation3 + $0x78] sm:$0xff] }
 0x2f7   :  { %885 = vst.msk [vmem:[#allocation2 + $0x320] sm:$0xff] %vm446_vm0, %v745_v23  ;;  %808 = vrot.lane.b32.xlu0 %v14559_v9, %s9375_s23  ;;  %1713 = vst.msk [vmem:[#allocation3 + $0x40] sm:$0xff] %vm446_vm0, %v1697_v20  ;;  %v1698_v43 = vadd.f32 %v1661_v50, %v1577_v24  ;;  %v1582_v54 = vld [vmem:[#allocation3 + $0x70] sm:$0xff]  ;;  %v1581_v23 = vld [vmem:[#allocation3 + $0x68] sm:$0xff] }
 0x2f8   :  { %1716 = vst.msk [vmem:[#allocation3 + $0x58] sm:$0xff] %vm446_vm0, %v1700_v48 }
 0x2f9   :  { %v12394_v13 = vpop.permute.xlu1 %5502  ;;  %1714 = vst.msk [vmem:[#allocation3 + $0x48] sm:$0xff] %vm446_vm0, %v1698_v43 }
 0x2fa   :  { %14560 = vst [vmem:[#allocation80_spill] sm:$0xff] %v12394_v13  ;;  %v12397_v45 = vpop.permute.xlu0 %5497  ;;  %6652 = vperm.xlu1 %9365, %v6389_v2   ;;  %v14562_v13 = vld [vmem:[#allocation92_spill] sm:$0xff] }
 0x2fb   :  { %14561 = vst [vmem:[#allocation93_spill] sm:$0xff] %v12397_v45  ;;  %6647 = vperm.xlu0 %9364, %v6388_v19   ;;  %v8745_v25 = vpop.f32.mrb[44].mxu1  ;;  %v14563_v19 = vld [vmem:[#allocation88_spill] sm:$0xff] }
 0x2fc   :  { %v1703_v20 = vadd.f32 %v8745_v25, %v1582_v54  ;;  %v1674_v24 = vpop.f32.mrb[45].mxu1  ;;  %v6391_v54 = vld [vmem:[%s14111_s6 + $0x128] sm:$0xff] }
 0x2fd   :  { %v751_v50 = vpop.permute.xlu1 %750  ;;  %v1701_v9 = vadd.f32 %v1674_v24, %v1580_v53  ;;  %v8746_v10 = vpop.f32.mrb[46].mxu1 }
 0x2fe   :  { %888 = vst.msk [vmem:[#allocation2 + $0x338] sm:$0xff] %vm446_vm0, %v751_v50  ;;  %v749_v48 = vpop.permute.xlu0 %748  ;;  %814 = vrot.lane.b32.xlu1 %v14562_v13, %s9375_s23  ;;  %1719 = vst.msk [vmem:[#allocation3 + $0x70] sm:$0xff] %vm446_vm0, %v1703_v20  ;;  %v1704_v43 = vadd.f32 %v8746_v10, %v1583_v12  ;;  %v1677_v2 = vpop.f32.mrb[47].mxu1  ;;  %v6390_v13 = vld [vmem:[%s14111_s6 + $0x120] sm:$0xff]  ;;  %v2145_v12 = vld [vmem:[#allocation3 + $0x10] sm:$0xff] }
 0x2ff   :  { %887 = vst.msk [vmem:[#allocation2 + $0x330] sm:$0xff] %vm446_vm0, %v749_v48  ;;  %812 = vrot.lane.b32.xlu0 %v14563_v19, %s9375_s23  ;;  %1717 = vst.msk [vmem:[#allocation3 + $0x60] sm:$0xff] %vm446_vm0, %v1701_v9  ;;  %v1702_v53 = vadd.f32 %v1677_v2, %v1581_v23  ;;  %v2143_v50 = vld [vmem:[#allocation3] sm:$0xff]  ;;  %v2146_v2 = vld [vmem:[#allocation3 + $0x18] sm:$0xff] }
 0x300   :  { %1720 = vst.msk [vmem:[#allocation3 + $0x78] sm:$0xff] %vm446_vm0, %v1704_v43 }
 0x301   :  { %v12414_v10 = vpop.permute.xlu1 %5512  ;;  %1718 = vst.msk [vmem:[#allocation3 + $0x68] sm:$0xff] %vm446_vm0, %v1702_v53 }
 0x302   :  { %14564 = vst [vmem:[#allocation90_spill] sm:$0xff] %v12414_v10  ;;  %v12417_v25 = vpop.permute.xlu0 %5507  ;;  %6662 = vperm.xlu1 %9365, %v6391_v54   ;;  %v14566_v10 = vld [vmem:[#allocation101_spill] sm:$0xff] }
 0x303   :  { %14565 = vst [vmem:[#allocation92_spill] sm:$0xff] %v12417_v25  ;;  %6657 = vperm.xlu0 %9364, %v6390_v13   ;;  %v8797_v20 = vpop.f32.mrb[48].mxu1  ;;  %v2144_v54 = vld [vmem:[#allocation3 + $0x8] sm:$0xff] }
 0x304   :  { %v2266_v24 = vadd.f32 %v8797_v20, %v2145_v12  ;;  %v2201_v9 = vpop.f32.mrb[49].mxu1  ;;  %v14567_v12 = vld [vmem:[#allocation98_spill] sm:$0xff]  ;;  %v6393_v20 = vld [vmem:[%s14111_s6 + $0x138] sm:$0xff] }
 0x305   :  { %v755_v23 = vpop.permute.xlu1 %754  ;;  %v2264_v48 = vadd.f32 %v2201_v9, %v2143_v50  ;;  %v8798_v19 = vpop.f32.mrb[50].mxu1 }
 0x306   :  { %890 = vst.msk [vmem:[#allocation2 + $0x348] sm:$0xff] %vm446_vm0, %v755_v23  ;;  %v753_v43 = vpop.permute.xlu0 %752  ;;  %818 = vrot.lane.b32.xlu1 %v14566_v10, %s9375_s23  ;;  %2282 = vst.msk [vmem:[#allocation3 + $0x10] sm:$0xff] %vm446_vm0, %v2266_v24  ;;  %v2267_v53 = vadd.f32 %v8798_v19, %v2146_v2  ;;  %v2204_v13 = vpop.f32.mrb[51].mxu1  ;;  %v6392_v10 = vld [vmem:[%s14111_s6 + $0x130] sm:$0xff]  ;;  %v2147_v19 = vld [vmem:[#allocation3 + $0x20] sm:$0xff] }
 0x307   :  { %889 = vst.msk [vmem:[#allocation2 + $0x340] sm:$0xff] %vm446_vm0, %v753_v43  ;;  %816 = vrot.lane.b32.xlu0 %v14567_v12, %s9375_s23  ;;  %2280 = vst.msk [vmem:[#allocation3] sm:$0xff] %vm446_vm0, %v2264_v48  ;;  %v2265_v50 = vadd.f32 %v2204_v13, %v2144_v54  ;;  %v2149_v23 = vld [vmem:[#allocation3 + $0x30] sm:$0xff]  ;;  %v2150_v12 = vld [vmem:[#allocation3 + $0x38] sm:$0xff] }
 0x308   :  { %2283 = vst.msk [vmem:[#allocation3 + $0x18] sm:$0xff] %vm446_vm0, %v2267_v53 }
 0x309   :  { %v12434_v24 = vpop.permute.xlu1 %5522  ;;  %2281 = vst.msk [vmem:[#allocation3 + $0x8] sm:$0xff] %vm446_vm0, %v2265_v50 }
 0x30a   :  { %14568 = vst [vmem:[#allocation88_spill] sm:$0xff] %v12434_v24  ;;  %v12437_v9 = vpop.permute.xlu0 %5517  ;;  %6672 = vperm.xlu1 %9365, %v6393_v20   ;;  %v2148_v20 = vld [vmem:[#allocation3 + $0x28] sm:$0xff] }
 0x30b   :  { %14569 = vst [vmem:[#allocation101_spill] sm:$0xff] %v12437_v9  ;;  %6667 = vperm.xlu0 %9364, %v6392_v10   ;;  %v8801_v48 = vpop.f32.mrb[52].mxu1  ;;  %v14583_v9 = vld [vmem:[#allocation85_spill] sm:$0xff] }
 0x30c   :  { %v2270_v2 = vadd.f32 %v8801_v48, %v2149_v23  ;;  %v2217_v43 = vpop.f32.mrb[53].mxu1  ;;  %v6395_v23 = vld [vmem:[%s14111_s6 + $0x148] sm:$0xff] }
 0x30d   :  { %v759_v54 = vpop.permute.xlu1 %758  ;;  %v2268_v13 = vadd.f32 %v2217_v43, %v2147_v19  ;;  %v8802_v25 = vpop.f32.mrb[54].mxu1 }
 0x30e   :  { %892 = vst.msk [vmem:[#allocation2 + $0x358] sm:$0xff] %vm446_vm0, %v759_v54  ;;  %v757_v53 = vpop.permute.xlu0 %756  ;;  %822 = vrot.lane.b32.xlu1 %v11006_v41, %s9375_s23  ;;  %2286 = vst.msk [vmem:[#allocation3 + $0x30] sm:$0xff] %vm446_vm0, %v2270_v2  ;;  %v2271_v50 = vadd.f32 %v8802_v25, %v2150_v12  ;;  %v2220_v10 = vpop.f32.mrb[55].mxu1  ;;  %v6394_v41 = vld [vmem:[%s14111_s6 + $0x140] sm:$0xff] }
 0x30f   :  { %891 = vst.msk [vmem:[#allocation2 + $0x350] sm:$0xff] %vm446_vm0, %v757_v53  ;;  %820 = vrot.lane.b32.xlu0 %v10996_v3, %s9375_s23  ;;  %2284 = vst.msk [vmem:[#allocation3 + $0x20] sm:$0xff] %vm446_vm0, %v2268_v13  ;;  %v2269_v48 = vadd.f32 %v2220_v10, %v2148_v20  ;;  %v2153_v3 = vld [vmem:[#allocation3 + $0x50] sm:$0xff]  ;;  %v2151_v54 = vld [vmem:[#allocation3 + $0x40] sm:$0xff] }
 0x310   :  { %2287 = vst.msk [vmem:[#allocation3 + $0x38] sm:$0xff] %vm446_vm0, %v2271_v50  ;;  %v2154_v20 = vld [vmem:[#allocation3 + $0x58] sm:$0xff] }
 0x311   :  { %v12454_v25 = vpop.permute.xlu1 %5532  ;;  %2285 = vst.msk [vmem:[#allocation3 + $0x28] sm:$0xff] %vm446_vm0, %v2269_v48 }
 0x312   :  { %14570 = vst [vmem:[#allocation98_spill] sm:$0xff] %v12454_v25  ;;  %v12457_v2 = vpop.permute.xlu0 %5527  ;;  %6682 = vperm.xlu1 %9365, %v6395_v23   ;;  %v2152_v23 = vld [vmem:[#allocation3 + $0x48] sm:$0xff] }
 0x313   :  { %14571 = vst [vmem:[#allocation171_spill] sm:$0xff] %v12457_v2  ;;  %6677 = vperm.xlu0 %9364, %v6394_v41   ;;  %v8805_v19 = vpop.f32.mrb[56].mxu1  ;;  %v2719_v25 = vld [vmem:[#allocation3 + $0x8] sm:$0xff] }
 0x314   :  { %v2274_v43 = vadd.f32 %v8805_v19, %v2153_v3  ;;  %v2233_v13 = vpop.f32.mrb[57].mxu1  ;;  %v6397_v3 = vld [vmem:[%s14111_s6 + $0x158] sm:$0xff] }
 0x315   :  { %v763_v12 = vpop.permute.xlu1 %762  ;;  %v2272_v53 = vadd.f32 %v2233_v13, %v2151_v54  ;;  %v8806_v10 = vpop.f32.mrb[58].mxu1 }
 0x316   :  { %894 = vst.msk [vmem:[#allocation2 + $0x368] sm:$0xff] %vm446_vm0, %v763_v12  ;;  %v761_v50 = vpop.permute.xlu0 %760  ;;  %826 = vrot.lane.b32.xlu1 %v11047_v0, %s9375_s23  ;;  %2290 = vst.msk [vmem:[#allocation3 + $0x50] sm:$0xff] %vm446_vm0, %v2274_v43  ;;  %v2275_v48 = vadd.f32 %v8806_v10, %v2154_v20  ;;  %v2236_v41 = vpop.f32.mrb[59].mxu1  ;;  %v6396_v0 = vld [vmem:[%s14111_s6 + $0x150] sm:$0xff] }
 0x317   :  { %893 = vst.msk [vmem:[#allocation2 + $0x360] sm:$0xff] %vm446_vm0, %v761_v50  ;;  %824 = vrot.lane.b32.xlu0 %v11035_v37, %s9375_s23  ;;  %2288 = vst.msk [vmem:[#allocation3 + $0x40] sm:$0xff] %vm446_vm0, %v2272_v53  ;;  %v2273_v19 = vadd.f32 %v2236_v41, %v2152_v23  ;;  %v2157_v37 = vld [vmem:[#allocation3 + $0x70] sm:$0xff]  ;;  %v2155_v53 = vld [vmem:[#allocation3 + $0x60] sm:$0xff] }
 0x318   :  { %2291 = vst.msk [vmem:[#allocation3 + $0x58] sm:$0xff] %vm446_vm0, %v2275_v48  ;;  %v2158_v23 = vld [vmem:[#allocation3 + $0x78] sm:$0xff] }
 0x319   :  { %v12474_v43 = vpop.permute.xlu1 %5542  ;;  %2289 = vst.msk [vmem:[#allocation3 + $0x48] sm:$0xff] %vm446_vm0, %v2273_v19  ;;  %v2725_v58 = vld [vmem:[#allocation3 + $0x38] sm:$0xff] }
 0x31a   :  { %14572 = vst [vmem:[#allocation172_spill] sm:$0xff] %v12474_v43  ;;  %v12477_v54 = vpop.permute.xlu0 %5537  ;;  %6692 = vperm.xlu1 %9365, %v6397_v3   ;;  %v2156_v3 = vld [vmem:[#allocation3 + $0x68] sm:$0xff] }
 0x31b   :  { %14573 = vst [vmem:[#allocation173_spill] sm:$0xff] %v12477_v54  ;;  %6687 = vperm.xlu0 %9364, %v6396_v0   ;;  %v8809_v13 = vpop.f32.mrb[60].mxu1 }
 0x31c   :  { %v2278_v12 = vadd.f32 %v8809_v13, %v2157_v37  ;;  %v2249_v20 = vpop.f32.mrb[61].mxu1  ;;  %v6399_v13 = vld [vmem:[%s14111_s6 + $0x168] sm:$0xff] }
 0x31d   :  { %v767_v10 = vpop.permute.xlu1 %766  ;;  %v2276_v50 = vadd.f32 %v2249_v20, %v2155_v53  ;;  %v8810_v41 = vpop.f32.mrb[62].mxu1  ;;  %v2720_v20 = vld [vmem:[#allocation3 + $0x10] sm:$0xff] }
 0x31e   :  { %896 = vst.msk [vmem:[#allocation2 + $0x378] sm:$0xff] %vm446_vm0, %v767_v10  ;;  %v765_v48 = vpop.permute.xlu0 %764  ;;  %2294 = vst.msk [vmem:[#allocation3 + $0x70] sm:$0xff] %vm446_vm0, %v2278_v12  ;;  %830 = vrot.lane.b32.xlu1 %v11042_v14, %s9375_s23  ;;  %v2279_v19 = vadd.f32 %v8810_v41, %v2158_v23  ;;  %v2252_v0 = vpop.f32.mrb[63].mxu1  ;;  %v6398_v14 = vld [vmem:[%s14111_s6 + $0x160] sm:$0xff] }
 0x31f   :  { %895 = vst.msk [vmem:[#allocation2 + $0x370] sm:$0xff] %vm446_vm0, %v765_v48  ;;  %828 = vrot.lane.b32.xlu0 %v11030_v5, %s9375_s23  ;;  %2292 = vst.msk [vmem:[#allocation3 + $0x60] sm:$0xff] %vm446_vm0, %v2276_v50  ;;  %v2277_v37 = vadd.f32 %v2252_v0, %v2156_v3  ;;  %v12502_v5 = vld [vmem:[%s14116_s12] ss:$0 sm:$0xff]  ;;  %v6401_v50 = vld [vmem:[%s14111_s6 + $0x178] sm:$0xff] }
 0x320   :  { %2295 = vst.msk [vmem:[#allocation3 + $0x78] sm:$0xff] %vm446_vm0, %v2279_v19  ;;  %v2718_v41 = vld [vmem:[#allocation3] sm:$0xff]  ;;  %v6400_v19 = vld [vmem:[%s14111_s6 + $0x170] sm:$0xff]  ;;  %v2721_v0 = vld [vmem:[#allocation3 + $0x18] sm:$0xff] }
 0x321   :  { %2293 = vst.msk [vmem:[#allocation3 + $0x68] sm:$0xff] %vm446_vm0, %v2277_v37  ;;  %v12495_v12 = vpop.permute.xlu1 %5552  ;;  %v2726_v4 = vld [vmem:[#allocation3 + $0x40] sm:$0xff]  ;;  %v2729_v29 = vld [vmem:[#allocation3 + $0x58] sm:$0xff] }
 0x322   :  { %14574 = vst [vmem:[#allocation174_spill] sm:$0xff] %v12495_v12  ;;  %v12497_v53 = vpop.permute.xlu0 %5547  ;;  %6702 = vperm.xlu1 %9365, %v6399_v13   ;;  %v14576_v12 = vld [vmem:[#allocation9_spill] sm:$0xff] }
 0x323   :  { %14575 = vst [vmem:[#allocation175_spill] sm:$0xff] %v12497_v53  ;;  %v8861_v10 = vpop.f32.mrb[64].mxu1  ;;  %6697 = vperm.xlu0 %9364, %v6398_v14   ;;  %v2880_v53 = vadd.f32 %v12502_v5, %v14576_v12 }
 0x324   :  { %v2841_v23 = vadd.f32 %v8861_v10, %v2720_v20  ;;  %v2776_v48 = vpop.f32.mrb[65].mxu1  ;;  %v14577_v10 = vld [vmem:[#allocation11_spill] sm:$0xff] }
 0x325   :  { %v2839_v3 = vadd.f32 %v2776_v48, %v2718_v41  ;;  %v8862_v37 = vpop.f32.mrb[66].mxu1  ;;  %v771_v13 = vpop.permute.xlu1 %770  ;;  %v2878_v43 = vadd.f32 %v12502_v5, %v14577_v10  ;;  %v14578_v48 = vld [vmem:[#allocation10_spill] sm:$0xff] }
 0x326   :  { %2857 = vst.msk [vmem:[#allocation3 + $0x10] sm:$0xff] %vm446_vm0, %v2841_v23  ;;  %v2842_v14 = vadd.f32 %v8862_v37, %v2721_v0  ;;  %v2779_v2 = vpop.f32.mrb[67].mxu1  ;;  %898 = vst.msk [vmem:[#allocation2 + $0x388] sm:$0xff] %vm446_vm0, %v771_v13  ;;  %v769_v20 = vpop.permute.xlu0 %768  ;;  %6712 = vperm.xlu1 %9365, %v6401_v50   ;;  %v2881_v12 = vadd.f32 %v12502_v5, %v14578_v48  ;;  %v14579_v23 = vld [vmem:[#allocation12_spill] sm:$0xff]  ;;  %v2896_v37 = vmax.f32 %v2880_v53, 0.0  ;;  %v14584_v53 = vld [vmem:[#allocation17_spill] sm:$0xff] }
 0x327   :  { %2855 = vst.msk [vmem:[#allocation3] sm:$0xff] %vm446_vm0, %v2839_v3  ;;  %v2840_v41 = vadd.f32 %v2779_v2, %v2719_v25  ;;  %897 = vst.msk [vmem:[#allocation2 + $0x380] sm:$0xff] %vm446_vm0, %v769_v20  ;;  %6707 = vperm.xlu0 %9364, %v6400_v19   ;;  %v2879_v0 = vadd.f32 %v12502_v5, %v14579_v23  ;;  %v2894_v3 = vmax.f32 %v2878_v43, 0.0  ;;  %v2724_v25 = vld [vmem:[#allocation3 + $0x30] sm:$0xff]  ;;  %v14582_v19 = vld [vmem:[#allocation87_spill] sm:$0xff] }
 0x328   :  { %2858 = vst.msk [vmem:[#allocation3 + $0x18] sm:$0xff] %vm446_vm0, %v2842_v14  ;;  %v2897_v20 = vmax.f32 %v2881_v12, 0.0  ;;  %v2992_v10 = vmul.f32 %v14582_v19, %v2896_v37  ;;  %v2722_v48 = vld [vmem:[#allocation3 + $0x20] sm:$0xff]  ;;  %v14585_v43 = vld [vmem:[#allocation86_spill] sm:$0xff]  ;;  %v2723_v37 = vld [vmem:[#allocation3 + $0x28] sm:$0xff] }
 0x329   :  { %2856 = vst.msk [vmem:[#allocation3 + $0x8] sm:$0xff] %vm446_vm0, %v2840_v41  ;;  %v12524_v50 = vpop.permute.xlu1 %5562  ;;  %v2895_v14 = vmax.f32 %v2879_v0, 0.0  ;;  %v2990_v45 = vmul.f32 %v14583_v9, %v2894_v3  ;;  %v14588_v19 = vld [vmem:[#allocation84_spill] sm:$0xff] }
 0x32a   :  { %14580 = vst [vmem:[#allocation9_spill] sm:$0xff] %v12524_v50  ;;  %v12526_v13 = vpop.permute.xlu0 %5557  ;;  %v2993_v18 = vmul.f32 %v14585_v43, %v2897_v20 }
 0x32b   :  { %14581 = vst [vmem:[#allocation11_spill] sm:$0xff] %v12526_v13  ;;  %v8865_v2 = vpop.f32.mrb[68].mxu1  ;;  %v2884_v13 = vadd.f32 %v12502_v5, %v14584_v53  ;;  %v2991_v53 = vmul.f32 %v14588_v19, %v2895_v14  ;;  %v14590_v14 = vld [vmem:[#allocation20_spill] sm:$0xff] }
 0x32c   :  { %v2845_v54 = vadd.f32 %v8865_v2, %v2724_v25  ;;  %v2792_v24 = vpop.f32.mrb[69].mxu1 }
 0x32d   :  { %v2843_v23 = vadd.f32 %v2792_v24, %v2722_v48  ;;  %v8866_v41 = vpop.f32.mrb[70].mxu1  ;;  %v775_v16 = vpop.permute.xlu1 %774  ;;  %v3008_v50 = vld [vmem:[#allocation3 + $0x10] sm:$0xff]  ;;  %v14586_v24 = vmov 0.0   ;;  %v14587_v48 = vld [vmem:[#allocation19_spill] sm:$0xff] }
 0x32e   :  { %2861 = vst.msk [vmem:[#allocation3 + $0x30] sm:$0xff] %vm446_vm0, %v2845_v54  ;;  %v2846_v12 = vadd.f32 %v8866_v41, %v2725_v58  ;;  %v2795_v25 = vpop.f32.mrb[71].mxu1  ;;  %900 = vst.msk [vmem:[#allocation2 + $0x398] sm:$0xff] %vm446_vm0, %v775_v16  ;;  %v773_v0 = vpop.permute.xlu0 %772  ;;  %v3006_v2 = vld [vmem:[#allocation3] sm:$0xff]  ;;  %v3024_v3 = vadd.f32 %v3008_v50, %v2992_v10  ;;  %v2882_v9 = vadd.f32 %v12502_v5, %v14587_v48  ;;  %v14589_v54 = vld [vmem:[#allocation18_spill] sm:$0xff] }
 0x32f   :  { %3208 = vst.msk [vmem:[#allocation3 + $0x10] sm:$0xff] %vm446_vm0, %v14586_v24  ;;  %2859 = vst.msk [vmem:[#allocation3 + $0x20] sm:$0xff] %vm446_vm0, %v2843_v23  ;;  %v2844_v20 = vadd.f32 %v2795_v25, %v2723_v37  ;;  %v3022_v58 = vadd.f32 %v3006_v2, %v2990_v45  ;;  %v3009_v16 = vld [vmem:[#allocation3 + $0x18] sm:$0xff]  ;;  %v2885_v50 = vadd.f32 %v12502_v5, %v14589_v54  ;;  %v2900_v25 = vmax.f32 %v2884_v13, 0.0  ;;  %v2728_v48 = vld [vmem:[#allocation3 + $0x50] sm:$0xff] }
 0x330   :  { %899 = vst.msk [vmem:[#allocation2 + $0x390] sm:$0xff] %vm446_vm0, %v773_v0  ;;  %3206 = vst.msk [vmem:[#allocation3] sm:$0xff] %vm446_vm0, %v14586_v24  ;;  %v3007_v10 = vld [vmem:[#allocation3 + $0x8] sm:$0xff]  ;;  %v3025_v41 = vadd.f32 %v3009_v16, %v2993_v18  ;;  %v2883_v23 = vadd.f32 %v12502_v5, %v14590_v14  ;;  %v2898_v18 = vmax.f32 %v2882_v9, 0.0  ;;  %v14593_v14 = vld [vmem:[#allocation95_spill] sm:$0xff] }
 0x331   :  { %2862 = vst.msk [vmem:[#allocation3 + $0x38] sm:$0xff] %vm446_vm0, %v2846_v12  ;;  %3209 = vst.msk [vmem:[#allocation3 + $0x18] sm:$0xff] %vm446_vm0, %v14586_v24  ;;  %v12552_v45 = vpop.permute.xlu1 %6067  ;;  %v3023_v37 = vadd.f32 %v3007_v10, %v2991_v53  ;;  %v3040_v12 = vmax.f32 %v3024_v3, 0.0  ;;  %v3038_v54 = vmax.f32 %v3022_v58, 0.0  ;;  %v2901_v43 = vmax.f32 %v2885_v50, 0.0 }
 0x332   :  { %2860 = vst.msk [vmem:[#allocation3 + $0x28] sm:$0xff] %vm446_vm0, %v2844_v20  ;;  %14591 = vst [vmem:[#allocation10_spill] sm:$0xff] %v12552_v45  ;;  %v12556_v0 = vpop.permute.xlu0 %6062  ;;  %v3041_v2 = vmax.f32 %v3025_v41, 0.0  ;;  %v2996_v47 = vmul.f32 %v14593_v14, %v2900_v25  ;;  %v2899_v10 = vmax.f32 %v2883_v23, 0.0  ;;  %v2994_v15 = vmul.f32 %v14594_v28, %v2898_v18  ;;  %v2733_v28 = vld [vmem:[#allocation3 + $0x78] sm:$0xff]  ;;  %v14605_v14 = vld [vmem:[#allocation37_spill] sm:$0xff] }
 0x333   :  { %3207 = vst.msk [vmem:[#allocation3 + $0x8] sm:$0xff] %vm446_vm0, %v14586_v24  ;;  %14592 = vst [vmem:[#allocation12_spill] sm:$0xff] %v12556_v0  ;;  %v8869_v16 = vpop.f32.mrb[72].mxu1  ;;  %v3039_v19 = vmax.f32 %v3023_v37, 0.0  ;;  %v2888_v58 = vadd.f32 %v12502_v5, %v14595_v21  ;;  %v14596_v37 = vld [vmem:[#allocation94_spill] sm:$0xff] }
 0x334   :  { %v2849_v20 = vadd.f32 %v8869_v16, %v2728_v48  ;;  %v2808_v45 = vpop.f32.mrb[73].mxu1  ;;  %v3055_v53 = vpack.c.bf16 %v3041_v2, %v3040_v12  ;;  %v2997_v50 = vmul.f32 %v14596_v37, %v2901_v43  ;;  %v2727_v48 = vld [vmem:[#allocation3 + $0x48] sm:$0xff] }
 0x335   :  { %v2847_v13 = vadd.f32 %v2808_v45, %v2726_v4  ;;  %v8870_v0 = vpop.f32.mrb[74].mxu1  ;;  %v779_v3 = vpop.permute.xlu1 %778  ;;  %v3054_v41 = vpack.c.bf16 %v3039_v19, %v3038_v54  ;;  %v3012_v9 = vld [vmem:[#allocation3 + $0x30] sm:$0xff]  ;;  %v14597_v19 = vld [vmem:[#allocation27_spill] sm:$0xff]  ;;  %v14598_v2 = vld [vmem:[#allocation89_spill] sm:$0xff] }
 0x336   :  { %2865 = vst.msk [vmem:[#allocation3 + $0x50] sm:$0xff] %vm446_vm0, %v2849_v20  ;;  %v2850_v25 = vadd.f32 %v8870_v0, %v2729_v29  ;;  %v2811_v16 = vpop.f32.mrb[75].mxu1  ;;  %902 = vst.msk [vmem:[#allocation2 + $0x3a8] sm:$0xff] %vm446_vm0, %v779_v3  ;;  %v777_v23 = vpop.permute.xlu0 %776  ;;  %v3010_v12 = vld [vmem:[#allocation3 + $0x20] sm:$0xff]  ;;  %v3028_v4 = vadd.f32 %v3012_v9, %v2996_v47  ;;  %v2886_v45 = vadd.f32 %v12502_v5, %v14597_v19  ;;  %v14599_v0 = vld [vmem:[#allocation26_spill] sm:$0xff] }
 0x337   :  { %3212 = vst.msk [vmem:[#allocation3 + $0x30] sm:$0xff] %vm446_vm0, %v14586_v24  ;;  %v2995_v21 = vmul.f32 %v14598_v2, %v2899_v10  ;;  %2863 = vst.msk [vmem:[#allocation3 + $0x40] sm:$0xff] %vm446_vm0, %v2847_v13  ;;  %v2848_v43 = vadd.f32 %v2811_v16, %v2727_v48  ;;  %8879 = vmatprep.mubr.msk.bf16.mxu0 %vm446_vm0, %v3054_v41  ;;  %v3026_v29 = vadd.f32 %v3010_v12, %v2994_v15  ;;  %v14600_v10 = vld [vmem:[#allocation28_spill] sm:$0xff]  ;;  %v2732_v48 = vld [vmem:[#allocation3 + $0x70] sm:$0xff] }
 0x338   :  { %901 = vst.msk [vmem:[#allocation2 + $0x3a0] sm:$0xff] %vm446_vm0, %v777_v23  ;;  %3210 = vst.msk [vmem:[#allocation3 + $0x20] sm:$0xff] %vm446_vm0, %v14586_v24  ;;  %v3013_v47 = vld [vmem:[#allocation3 + $0x38] sm:$0xff]  ;;  %v2889_v18 = vadd.f32 %v12502_v5, %v14599_v0  ;;  %8880 = vmatmul.mubr.msk.bf16.vlgmr.msra.gmra.mrb[80].mxu0 %vm446_vm0, %v3055_v53  ;;  %v2887_v13 = vadd.f32 %v12502_v5, %v14600_v10  ;;  %v2904_v41 = vmax.f32 %v2888_v58, 0.0  ;;  %v3044_v53 = vmax.f32 %v3028_v4, 0.0  ;;  %v2730_v10 = vld [vmem:[#allocation3 + $0x60] sm:$0xff] }
 0x339   :  { %2866 = vst.msk [vmem:[#allocation3 + $0x58] sm:$0xff] %vm446_vm0, %v2850_v25  ;;  %v3011_v54 = vld [vmem:[#allocation3 + $0x28] sm:$0xff]  ;;  %v3029_v20 = vadd.f32 %v3013_v47, %v2997_v50  ;;  %3213 = vst.msk [vmem:[#allocation3 + $0x38] sm:$0xff] %vm446_vm0, %v14586_v24  ;;  %v12584_v15 = vpop.permute.xlu1 %6077  ;;  %v2902_v50 = vmax.f32 %v2886_v45, 0.0  ;;  %v3042_v23 = vmax.f32 %v3026_v29, 0.0  ;;  %v14603_v47 = vld [vmem:[#allocation100_spill] sm:$0xff]  ;;  %v2892_v29 = vadd.f32 %v12502_v5, %v14605_v14 }
 0x33a   :  { %2864 = vst.msk [vmem:[#allocation3 + $0x48] sm:$0xff] %vm446_vm0, %v2848_v43  ;;  %14601 = vst [vmem:[#allocation17_spill] sm:$0xff] %v12584_v15  ;;  %v3027_v3 = vadd.f32 %v3011_v54, %v2995_v21  ;;  %v12588_v9 = vpop.permute.xlu0 %6072  ;;  %v2905_v19 = vmax.f32 %v2889_v18, 0.0  ;;  %v3000_v0 = vmul.f32 %v14603_v47, %v2904_v41  ;;  %v2903_v54 = vmax.f32 %v2887_v13, 0.0  ;;  %v14604_v2 = vld [vmem:[#allocation97_spill] sm:$0xff]  ;;  %v14696_v47 = vld [vmem:[#allocation155_spill] sm:$0xff] }
 0x33b   :  { %3211 = vst.msk [vmem:[#allocation3 + $0x28] sm:$0xff] %vm446_vm0, %v14586_v24  ;;  %14602 = vst [vmem:[#allocation19_spill] sm:$0xff] %v12588_v9  ;;  %v3045_v25 = vmax.f32 %v3029_v20, 0.0  ;;  %v8873_v16 = vpop.f32.mrb[76].mxu1  ;;  %v2998_v37 = vmul.f32 %v14604_v2, %v2902_v50 }
 0x33c   :  { %v3043_v12 = vmax.f32 %v3027_v3, 0.0  ;;  %v2853_v43 = vadd.f32 %v8873_v16, %v2732_v48  ;;  %v2824_v15 = vpop.f32.mrb[77].mxu1  ;;  %v14606_v3 = vld [vmem:[#allocation99_spill] sm:$0xff]  ;;  %v2731_v48 = vld [vmem:[#allocation3 + $0x68] sm:$0xff] }
 0x33d   :  { %v3057_v21 = vpack.c.bf16 %v3045_v25, %v3044_v53  ;;  %v2851_v58 = vadd.f32 %v2824_v15, %v2730_v10  ;;  %v8874_v9 = vpop.f32.mrb[78].mxu1  ;;  %v783_v4 = vpop.permute.xlu1 %782  ;;  %v3016_v45 = vld [vmem:[#allocation3 + $0x50] sm:$0xff]  ;;  %v3001_v18 = vmul.f32 %v14606_v3, %v2905_v19  ;;  %v14607_v25 = vld [vmem:[#allocation39_spill] sm:$0xff] }
 0x33e   :  { %v3056_v20 = vpack.c.bf16 %v3043_v12, %v3042_v23  ;;  %2869 = vst.msk [vmem:[#allocation3 + $0x70] sm:$0xff] %vm446_vm0, %v2853_v43  ;;  %v2854_v41 = vadd.f32 %v8874_v9, %v2733_v28  ;;  %v2827_v16 = vpop.f32.mrb[79].mxu1  ;;  %904 = vst.msk [vmem:[#allocation2 + $0x3b8] sm:$0xff] %vm446_vm0, %v783_v4  ;;  %v781_v13 = vpop.permute.xlu0 %780  ;;  %v3014_v53 = vld [vmem:[#allocation3 + $0x40] sm:$0xff]  ;;  %v3032_v15 = vadd.f32 %v3016_v45, %v3000_v0  ;;  %v14609_v19 = vld [vmem:[#allocation38_spill] sm:$0xff] }
 0x33f   :  { %3216 = vst.msk [vmem:[#allocation3 + $0x50] sm:$0xff] %vm446_vm0, %v14586_v24  ;;  %v2890_v50 = vadd.f32 %v12502_v5, %v14607_v25  ;;  %v14608_v23 = vld [vmem:[#allocation96_spill] sm:$0xff]  ;;  %2867 = vst.msk [vmem:[#allocation3 + $0x60] sm:$0xff] %vm446_vm0, %v2851_v58  ;;  %v2852_v12 = vadd.f32 %v2827_v16, %v2731_v48  ;;  %v3030_v28 = vadd.f32 %v3014_v53, %v2998_v37  ;;  %v14613_v53 = vld [vmem:[#allocation105_spill] sm:$0xff] }
 0x340   :  { %v2999_v14 = vmul.f32 %v14608_v23, %v2903_v54  ;;  %903 = vst.msk [vmem:[#allocation2 + $0x3b0] sm:$0xff] %vm446_vm0, %v781_v13  ;;  %8883 = vmatprep.mubr.msk.bf16.mxu0 %vm446_vm0, %v3056_v20  ;;  %3214 = vst.msk [vmem:[#allocation3 + $0x40] sm:$0xff] %vm446_vm0, %v14586_v24  ;;  %v3017_v9 = vld [vmem:[#allocation3 + $0x58] sm:$0xff]  ;;  %v2893_v0 = vadd.f32 %v12502_v5, %v14609_v19  ;;  %v14610_v54 = vld [vmem:[#allocation40_spill] sm:$0xff]  ;;  %v2908_v20 = vmax.f32 %v2892_v29, 0.0 }
 0x341   :  { %2870 = vst.msk [vmem:[#allocation3 + $0x78] sm:$0xff] %vm446_vm0, %v2854_v41  ;;  %8884 = vmatmul.mubr.msk.bf16.gmra.mrb[84].mxu0 %vm446_vm0, %v3057_v21  ;;  %v3015_v43 = vld [vmem:[#allocation3 + $0x48] sm:$0xff]  ;;  %v3033_v10 = vadd.f32 %v3017_v9, %v3001_v18  ;;  %3217 = vst.msk [vmem:[#allocation3 + $0x58] sm:$0xff] %vm446_vm0, %v14586_v24  ;;  %v2891_v58 = vadd.f32 %v12502_v5, %v14610_v54  ;;  %v12616_v37 = vpop.permute.xlu1 %6087  ;;  %v3048_v21 = vmax.f32 %v3032_v15, 0.0  ;;  %v2906_v18 = vmax.f32 %v2890_v50, 0.0  ;;  %v14616_v50 = vld [vmem:[#allocation102_spill] sm:$0xff] }
 0x342   :  { %2868 = vst.msk [vmem:[#allocation3 + $0x68] sm:$0xff] %vm446_vm0, %v2852_v12  ;;  %14611 = vst [vmem:[#allocation18_spill] sm:$0xff] %v12616_v37  ;;  %v3031_v4 = vadd.f32 %v3015_v43, %v2999_v14  ;;  %v12620_v45 = vpop.permute.xlu0 %6082  ;;  %v3046_v48 = vmax.f32 %v3030_v28, 0.0  ;;  %v2909_v13 = vmax.f32 %v2893_v0, 0.0  ;;  %v3004_v25 = vmul.f32 %v14613_v53, %v2908_v20  ;;  %v14614_v12 = vld [vmem:[#allocation103_spill] sm:$0xff]  ;;  %v14615_v37 = vld [vmem:[#allocation104_spill] sm:$0xff] }
 0x343   :  { %3215 = vst.msk [vmem:[#allocation3 + $0x48] sm:$0xff] %vm446_vm0, %v14586_v24  ;;  %14612 = vst [vmem:[#allocation20_spill] sm:$0xff] %v12620_v45  ;;  %v3049_v41 = vmax.f32 %v3033_v10, 0.0  ;;  %v2907_v9 = vmax.f32 %v2891_v58, 0.0  ;;  %v3002_v19 = vmul.f32 %v14614_v12, %v2906_v18 }
 0x344   :  { %v3047_v16 = vmax.f32 %v3031_v4, 0.0  ;;  %v3005_v23 = vmul.f32 %v14615_v37, %v2909_v13 }
 0x345   :  { %v3059_v5 = vpack.c.bf16 %v3049_v41, %v3048_v21  ;;  %v787_v54 = vpop.permute.xlu1 %786  ;;  %v3020_v43 = vld [vmem:[#allocation3 + $0x70] sm:$0xff]  ;;  %v3003_v28 = vmul.f32 %v14616_v50, %v2907_v9 }
 0x346   :  { %v3058_v14 = vpack.c.bf16 %v3047_v16, %v3046_v48  ;;  %906 = vst.msk [vmem:[#allocation2 + $0x3c8] sm:$0xff] %vm446_vm0, %v787_v54  ;;  %v785_v29 = vpop.permute.xlu0 %784  ;;  %v3018_v15 = vld [vmem:[#allocation3 + $0x60] sm:$0xff]  ;;  %v3036_v10 = vadd.f32 %v3020_v43, %v3004_v25  ;;  %3220 = vst.msk [vmem:[#allocation3 + $0x70] sm:$0xff] %vm446_vm0, %v14586_v24 }
 0x347   :  { %905 = vst.msk [vmem:[#allocation2 + $0x3c0] sm:$0xff] %vm446_vm0, %v785_v29  ;;  %v3034_v0 = vadd.f32 %v3018_v15, %v3002_v19  ;;  %3218 = vst.msk [vmem:[#allocation3 + $0x60] sm:$0xff] %vm446_vm0, %v14586_v24 }
 0x348   :  { %8887 = vmatprep.mubr.msk.bf16.mxu0 %vm446_vm0, %v3058_v14  ;;  %v3021_v58 = vld [vmem:[#allocation3 + $0x78] sm:$0xff]  ;;  %v3052_v48 = vmax.f32 %v3036_v10, 0.0 }
 0x349   :  { %8888 = vmatmul.mubr.msk.bf16.gmra.mrb[88].mxu0 %vm446_vm0, %v3059_v5  ;;  %v3019_v4 = vld [vmem:[#allocation3 + $0x68] sm:$0xff]  ;;  %v3037_v20 = vadd.f32 %v3021_v58, %v3005_v23  ;;  %3221 = vst.msk [vmem:[#allocation3 + $0x78] sm:$0xff] %vm446_vm0, %v14586_v24  ;;  %v12636_v21 = vpop.permute.xlu1 %6097  ;;  %v3050_v13 = vmax.f32 %v3034_v0, 0.0 }
 0x34a   :  { %14617 = vst [vmem:[#allocation25_spill] sm:$0xff] %v12636_v21  ;;  %v3035_v41 = vadd.f32 %v3019_v4, %v3003_v28  ;;  %3219 = vst.msk [vmem:[#allocation3 + $0x68] sm:$0xff] %vm446_vm0, %v14586_v24  ;;  %v12640_v18 = vpop.permute.xlu0 %6092  ;;  %v3365_v24 = vld [vmem:[#allocation2 + $0x1b0] sm:$0xff] }
 0x34b   :  { %14618 = vst [vmem:[#allocation27_spill] sm:$0xff] %v12640_v18  ;;  %v3053_v16 = vmax.f32 %v3037_v20, 0.0 }
 0x34c   :  { %v3051_v25 = vmax.f32 %v3035_v41, 0.0 }
 0x34d   :  { %v3061_v9 = vpack.c.bf16 %v3053_v16, %v3052_v48  ;;  %v791_v19 = vpop.permute.xlu1 %790 }
 0x34e   :  { %v3060_v5 = vpack.c.bf16 %v3051_v25, %v3050_v13  ;;  %908 = vst.msk [vmem:[#allocation2 + $0x3d8] sm:$0xff] %vm446_vm0, %v791_v19  ;;  %v789_v23 = vpop.permute.xlu0 %788 }
 0x34f   :  { %907 = vst.msk [vmem:[#allocation2 + $0x3d0] sm:$0xff] %vm446_vm0, %v789_v23 }
 0x350   :  { %8891 = vmatprep.mubr.msk.bf16.mxu0 %vm446_vm0, %v3060_v5 }
 0x351   :  { %8892 = vmatmul.mubr.msk.bf16.gmra.mrb[92].mxu0 %vm446_vm0, %v3061_v9  ;;  %v12646_v54 = vpop.permute.xlu1 %6107 }
 0x352   :  { %14619 = vst [vmem:[#allocation26_spill] sm:$0xff] %v12646_v54  ;;  %v12648_v14 = vpop.permute.xlu0 %6102 }
 0x353   :  { %14620 = vst [vmem:[#allocation28_spill] sm:$0xff] %v12648_v14 }
 0x355   :  { %v795_v43 = vpop.permute.xlu1 %794 }
 0x356   :  { %910 = vst.msk [vmem:[#allocation2 + $0x3e8] sm:$0xff] %vm446_vm0, %v795_v43  ;;  %v793_v29 = vpop.permute.xlu0 %792 }
 0x357   :  { %909 = vst.msk [vmem:[#allocation2 + $0x3e0] sm:$0xff] %vm446_vm0, %v793_v29 }
 0x359   :  { %v12652_v15 = vpop.permute.xlu1 %6117 }
 0x35a   :  { %14621 = vst [vmem:[#allocation37_spill] sm:$0xff] %v12652_v15  ;;  %v12654_v10 = vpop.permute.xlu0 %6112 }
 0x35b   :  { %14622 = vst [vmem:[#allocation39_spill] sm:$0xff] %v12654_v10 }
 0x35d   :  { %v799_v28 = vpop.permute.xlu1 %798 }
 0x35e   :  { %912 = vst.msk [vmem:[#allocation2 + $0x3f8] sm:$0xff] %vm446_vm0, %v799_v28  ;;  %v797_v0 = vpop.permute.xlu0 %796 }
 0x35f   :  { %911 = vst.msk [vmem:[#allocation2 + $0x3f0] sm:$0xff] %vm446_vm0, %v797_v0 }
 0x361   :  { %v12658_v58 = vpop.permute.xlu1 %6127 }
 0x362   :  { %14623 = vst [vmem:[#allocation38_spill] sm:$0xff] %v12658_v58  ;;  %v12660_v4 = vpop.permute.xlu0 %6122 }
 0x363   :  { %14624 = vst [vmem:[#allocation40_spill] sm:$0xff] %v12660_v4 }
 0x365   :  { %v803_v20 = vpop.permute.xlu1 %802 }
 0x366   :  { %914 = vst.msk [vmem:[#allocation2 + $0x408] sm:$0xff] %vm446_vm0, %v803_v20  ;;  %v801_v41 = vpop.permute.xlu0 %800 }
 0x367   :  { %913 = vst.msk [vmem:[#allocation2 + $0x400] sm:$0xff] %vm446_vm0, %v801_v41 }
 0x369   :  { %v12664_v48 = vpop.permute.xlu1 %6137 }
 0x36a   :  { %14625 = vst [vmem:[#allocation176_spill] sm:$0xff] %v12664_v48  ;;  %v12666_v16 = vpop.permute.xlu0 %6132 }
 0x36b   :  { %14626 = vst [vmem:[#allocation177_spill] sm:$0xff] %v12666_v16 }
 0x36d   :  { %v807_v13 = vpop.permute.xlu1 %806 }
 0x36e   :  { %916 = vst.msk [vmem:[#allocation2 + $0x418] sm:$0xff] %vm446_vm0, %v807_v13  ;;  %v805_v25 = vpop.permute.xlu0 %804 }
 0x36f   :  { %915 = vst.msk [vmem:[#allocation2 + $0x410] sm:$0xff] %vm446_vm0, %v805_v25 }
 0x371   :  { %v12670_v9 = vpop.permute.xlu1 %6642 }
 0x372   :  { %14627 = vst [vmem:[#allocation178_spill] sm:$0xff] %v12670_v9  ;;  %v12672_v19 = vpop.permute.xlu0 %6637 }
 0x373   :  { %14628 = vst [vmem:[#allocation179_spill] sm:$0xff] %v12672_v19 }
 0x375   :  { %v811_v5 = vpop.permute.xlu1 %810 }
 0x376   :  { %918 = vst.msk [vmem:[#allocation2 + $0x428] sm:$0xff] %vm446_vm0, %v811_v5  ;;  %v809_v23 = vpop.permute.xlu0 %808 }
 0x377   :  { %917 = vst.msk [vmem:[#allocation2 + $0x420] sm:$0xff] %vm446_vm0, %v809_v23 }
 0x379   :  { %v12676_v43 = vpop.permute.xlu1 %6652 }
 0x37a   :  { %14629 = vst [vmem:[#allocation180_spill] sm:$0xff] %v12676_v43  ;;  %v12678_v29 = vpop.permute.xlu0 %6647 }
 0x37b   :  { %14630 = vst [vmem:[#allocation181_spill] sm:$0xff] %v12678_v29 }
 0x37d   :  { %v815_v28 = vpop.permute.xlu1 %814 }
 0x37e   :  { %920 = vst.msk [vmem:[#allocation2 + $0x438] sm:$0xff] %vm446_vm0, %v815_v28  ;;  %v813_v0 = vpop.permute.xlu0 %812 }
 0x37f   :  { %919 = vst.msk [vmem:[#allocation2 + $0x430] sm:$0xff] %vm446_vm0, %v813_v0 }
 0x381   :  { %v12682_v20 = vpop.permute.xlu1 %6662 }
 0x382   :  { %14631 = vst [vmem:[#allocation182_spill] sm:$0xff] %v12682_v20  ;;  %v12684_v41 = vpop.permute.xlu0 %6657 }
 0x383   :  { %14632 = vst [vmem:[#allocation183_spill] sm:$0xff] %v12684_v41 }
 0x385   :  { %v819_v13 = vpop.permute.xlu1 %818 }
 0x386   :  { %922 = vst.msk [vmem:[#allocation2 + $0x448] sm:$0xff] %vm446_vm0, %v819_v13  ;;  %v817_v25 = vpop.permute.xlu0 %816 }
 0x387   :  { %921 = vst.msk [vmem:[#allocation2 + $0x440] sm:$0xff] %vm446_vm0, %v817_v25 }
 0x389   :  { %v12688_v5 = vpop.permute.xlu1 %6672 }
 0x38a   :  { %14633 = vst [vmem:[#allocation184_spill] sm:$0xff] %v12688_v5  ;;  %v12690_v23 = vpop.permute.xlu0 %6667 }
 0x38b   :  { %14634 = vst [vmem:[#allocation185_spill] sm:$0xff] %v12690_v23 }
 0x38d   :  { %v823_v9 = vpop.permute.xlu1 %822 }
 0x38e   :  { %924 = vst.msk [vmem:[#allocation2 + $0x458] sm:$0xff] %vm446_vm0, %v823_v9  ;;  %v821_v28 = vpop.permute.xlu0 %820 }
 0x38f   :  { %923 = vst.msk [vmem:[#allocation2 + $0x450] sm:$0xff] %vm446_vm0, %v821_v28 }
 0x391   :  { %v12694_v0 = vpop.permute.xlu1 %6682 }
 0x392   :  { %14635 = vst [vmem:[#allocation186_spill] sm:$0xff] %v12694_v0  ;;  %v12696_v20 = vpop.permute.xlu0 %6677  ;;  %v7799_v0 = vld [vmem:[%s14113_s9 + $0x1] ss:$0 sm:$0xff] }
 0x393   :  { %14636 = vst [vmem:[#allocation187_spill] sm:$0xff] %v12696_v20 }
 0x395   :  { %v827_v41 = vpop.permute.xlu1 %826 }
 0x396   :  { %926 = vst.msk [vmem:[#allocation2 + $0x468] sm:$0xff] %vm446_vm0, %v827_v41  ;;  %v825_v13 = vpop.permute.xlu0 %824 }
 0x397   :  { %925 = vst.msk [vmem:[#allocation2 + $0x460] sm:$0xff] %vm446_vm0, %v825_v13 }
 0x399   :  { %v12700_v25 = vpop.permute.xlu1 %6692 }
 0x39a   :  { %14637 = vst [vmem:[#allocation188_spill] sm:$0xff] %v12700_v25  ;;  %v12702_v5 = vpop.permute.xlu0 %6687 }
 0x39b   :  { %14638 = vst [vmem:[#allocation189_spill] sm:$0xff] %v12702_v5 }
 0x39d   :  { %v831_v23 = vpop.permute.xlu1 %830 }
 0x39e   :  { %928 = vst.msk [vmem:[#allocation2 + $0x478] sm:$0xff] %vm446_vm0, %v831_v23  ;;  %v829_v9 = vpop.permute.xlu0 %828 }
 0x39f   :  { %927 = vst.msk [vmem:[#allocation2 + $0x470] sm:$0xff] %vm446_vm0, %v829_v9 }
 0x40b   :  { %v8881_v28 = vpop.f32.mrb[80].mxu0 }
 0x40c   :  { %v3135_v20 = vpop.f32.mrb[81].mxu0  ;;  %v12709_v19 = vadd.f32 %v8881_v28, %v7799_v0 }
 0x40d   :  { %v8882_v41 = vpop.f32.mrb[82].mxu0  ;;  %v12713_v43 = vadd.f32 %v7799_v0, %v3135_v20 }
 0x40e   :  { %v12711_v13 = vadd.f32 %v8882_v41, %v7799_v0  ;;  %v3138_v25 = vpop.f32.mrb[83].mxu0 }
 0x40f   :  { %v12715_v5 = vadd.f32 %v7799_v0, %v3138_v25 }
 0x410   :  { %v12719_v23 = vpack.c.bf16 %v12711_v13, %v12709_v19 }
 0x411   :  { %v12723_v9 = vpack.c.bf16 %v12715_v5, %v12713_v43 }
 0x413   :  { %8895 = vmatprep.subr.bf16.mxu1 %v12723_v9 }
 0x414   :  { %v8885_v29 = vpop.f32.mrb[84].mxu0  ;;  %8896 = vmatpush3.bf16.msra.mxu1 %v12723_v9 }
 0x415   :  { %v3151_v28 = vpop.f32.mrb[85].mxu0  ;;  %8897 = vmatprep.subr.bf16.mxu1 %v12719_v23  ;;  %v12728_v20 = vadd.f32 %v8885_v29, %v7799_v0 }
 0x416   :  { %v8886_v41 = vpop.f32.mrb[86].mxu0  ;;  %v12732_v4 = vadd.f32 %v7799_v0, %v3151_v28 }
 0x417   :  { %v12730_v25 = vadd.f32 %v8886_v41, %v7799_v0  ;;  %v3154_v58 = vpop.f32.mrb[87].mxu0 }
 0x418   :  { %14640 = vst [vmem:[#allocation191_spill] sm:$0xff] %v12732_v4  ;;  %v12734_v48 = vadd.f32 %v7799_v0, %v3154_v58  ;;  %8898 = vmatpush3.bf16.msra.mxu1 %v12719_v23 }
 0x419   :  { %14639 = vst [vmem:[#allocation190_spill] sm:$0xff] %v12730_v25  ;;  %v12738_v16 = vpack.c.bf16 %v12730_v25, %v12728_v20 }
 0x41a   :  { %14641 = vst [vmem:[#allocation192_spill] sm:$0xff] %v12734_v48  ;;  %v12743_v54 = vpack.c.bf16 %v12734_v48, %v12732_v4  ;;  %v3366_v4 = vld [vmem:[#allocation2 + $0x1b8] sm:$0xff] }
 0x41c   :  { %v8889_v14 = vpop.f32.mrb[88].mxu0  ;;  %8899 = vmatprep.subr.bf16.mxu1 %v12743_v54 }
 0x41d   :  { %v3167_v29 = vpop.f32.mrb[89].mxu0  ;;  %8900 = vmatpush3.bf16.msra.mxu1 %v12743_v54  ;;  %v12748_v58 = vadd.f32 %v8889_v14, %v7799_v0 }
 0x41e   :  { %v8890_v28 = vpop.f32.mrb[90].mxu0  ;;  %8901 = vmatprep.subr.bf16.mxu1 %v12738_v16  ;;  %v12752_v10 = vadd.f32 %v7799_v0, %v3167_v29 }
 0x41f   :  { %14642 = vst [vmem:[#allocation193_spill] sm:$0xff] %v12748_v58  ;;  %v12750_v41 = vadd.f32 %v8890_v28, %v7799_v0  ;;  %v3170_v15 = vpop.f32.mrb[91].mxu0 }
 0x420   :  { %14644 = vst [vmem:[#allocation195_spill] sm:$0xff] %v12752_v10  ;;  %v12754_v45 = vadd.f32 %v7799_v0, %v3170_v15 }
 0x421   :  { %14643 = vst [vmem:[#allocation194_spill] sm:$0xff] %v12750_v41  ;;  %v12758_v21 = vpack.c.bf16 %v12750_v41, %v12748_v58  ;;  %8902 = vmatpush3.bf16.msra.mxu1 %v12738_v16  ;;  %v14697_v41 = vld [vmem:[#allocation154_spill] sm:$0xff]  ;;  %v14698_v58 = vld [vmem:[#allocation153_spill] sm:$0xff] }
 0x422   :  { %14645 = vst [vmem:[#allocation196_spill] sm:$0xff] %v12754_v45  ;;  %v12763_v18 = vpack.c.bf16 %v12754_v45, %v12752_v10 }
 0x424   :  { %v8893_v50 = vpop.f32.mrb[92].mxu0  ;;  %8903 = vmatprep.subr.bf16.mxu1 %v12763_v18 }
 0x425   :  { %v3183_v14 = vpop.f32.mrb[93].mxu0  ;;  %8904 = vmatpush3.bf16.msra.mxu1 %v12763_v18  ;;  %v12768_v15 = vadd.f32 %v8893_v50, %v7799_v0  ;;  %v14650_v50 = vld [vmem:[#allocation106_spill] sm:$0xff] }
 0x426   :  { %v8894_v29 = vpop.f32.mrb[94].mxu0  ;;  %8905 = vmatprep.subr.bf16.mxu1 %v12758_v21  ;;  %v12772_v12 = vadd.f32 %v7799_v0, %v3183_v14  ;;  %vm3306_vm2 = vcmp.eq.s32.totalorder %v14466_v46, %v14650_v50  ;;  %v14653_v14 = vld [vmem:[#allocation109_spill] sm:$0xff]  ;;  %v14655_v50 = vld [vmem:[#allocation111_spill] sm:$0xff] }
 0x427   :  { %14646 = vst [vmem:[#allocation197_spill] sm:$0xff] %v12768_v15  ;;  %v12770_v28 = vadd.f32 %v8894_v29, %v7799_v0  ;;  %v3186_v37 = vpop.f32.mrb[95].mxu0  ;;  %vm3307_vm5 = vcmp.eq.s32.totalorder %v14466_v46, %v14653_v14  ;;  %v14654_v29 = vld [vmem:[#allocation110_spill] sm:$0xff]  ;;  %vm3309_vm9 = vcmp.eq.s32.totalorder %v14466_v46, %v14655_v50  ;;  %v14660_v50 = vld [vmem:[#allocation116_spill] sm:$0xff] }
 0x428   :  { %14648 = vst [vmem:[#allocation199_spill] sm:$0xff] %v12772_v12  ;;  %v12774_v53 = vadd.f32 %v7799_v0, %v3186_v37  ;;  %v14651_v37 = vld [vmem:[#allocation107_spill] sm:$0xff]  ;;  %v14652_v0 = vld [vmem:[#allocation108_spill] sm:$0xff]  ;;  %vm3310_vm8 = vcmp.eq.s32.totalorder %v14466_v46, %v14654_v29  ;;  %v14658_v14 = vld [vmem:[#allocation114_spill] sm:$0xff] }
 0x429   :  { %14647 = vst [vmem:[#allocation198_spill] sm:$0xff] %v12770_v28  ;;  %v12778_v3 = vpack.c.bf16 %v12770_v28, %v12768_v15  ;;  %8906 = vmatpush3.bf16.msra.mxu1 %v12758_v21  ;;  %vm3305_vm3 = vcmp.eq.s32.totalorder %v14466_v46, %v14651_v37  ;;  %vm3308_vm4 = vcmp.eq.s32.totalorder %v14466_v46, %v14652_v0  ;;  %v14656_v37 = vld [vmem:[#allocation112_spill] sm:$0xff]  ;;  %v14657_v0 = vld [vmem:[#allocation113_spill] sm:$0xff]  ;;  %vm7830_vm12 = vmpackc.low %vm3310_vm8, %vm3309_vm9 }
 0x42a   :  { %14649 = vst [vmem:[#allocation200_spill] sm:$0xff] %v12774_v53  ;;  %v12783_v2 = vpack.c.bf16 %v12774_v53, %v12772_v12  ;;  %vm7826_vm6 = vmpackc.low %vm3306_vm2, %vm3305_vm3  ;;  %vm3312_vm10 = vcmp.eq.s32.totalorder %v14466_v46, %v14656_v37  ;;  %vm3311_vm11 = vcmp.eq.s32.totalorder %v14466_v46, %v14657_v0  ;;  %vm3314_vm14 = vcmp.eq.s32.totalorder %v14466_v46, %v14658_v14  ;;  %v14659_v29 = vld [vmem:[#allocation115_spill] sm:$0xff]  ;;  %v14661_v37 = vld [vmem:[#allocation117_spill] sm:$0xff] }
 0x42b   :  { %vm7828_vm7 = vmpackc.low %vm3308_vm4, %vm3307_vm5  ;;  %vm3313_vm15 = vcmp.eq.s32.totalorder %v14466_v46, %v14659_v29  ;;  %vm3316_vm2 = vcmp.eq.s32.totalorder %v14466_v46, %v14660_v50  ;;  %vm3315_vm3 = vcmp.eq.s32.totalorder %v14466_v46, %v14661_v37  ;;  %v14662_v0 = vld [vmem:[#allocation118_spill] sm:$0xff]  ;;  %v14663_v14 = vld [vmem:[#allocation119_spill] sm:$0xff] }
 0x42c   :  { %8907 = vmatprep.subr.bf16.mxu1 %v12783_v2  ;;  %vm7832_vm13 = vmpackc.low %vm3312_vm10, %vm3311_vm11  ;;  %v14664_v29 = vld [vmem:[#allocation120_spill] sm:$0xff]  ;;  %v14665_v50 = vld [vmem:[#allocation121_spill] sm:$0xff] }
 0x42d   :  { %8908 = vmatpush3.bf16.msra.mxu1 %v12783_v2  ;;  %vm7834_vm4 = vmpackc.low %vm3314_vm14, %vm3313_vm15  ;;  %vm3879_vm8 = vcmp.eq.s32.totalorder %v14466_v46, %v14664_v29  ;;  %vm3878_vm9 = vcmp.eq.s32.totalorder %v14466_v46, %v14665_v50  ;;  %v14666_v37 = vld [vmem:[#allocation122_spill] sm:$0xff]  ;;  %v14669_v29 = vld [vmem:[#allocation125_spill] sm:$0xff] }
 0x42e   :  { %8909 = vmatprep.subr.bf16.mxu1 %v12778_v3  ;;  %vm7836_vm5 = vmpackc.low %vm3316_vm2, %vm3315_vm3  ;;  %vm3882_vm15 = vcmp.eq.s32.totalorder %v14466_v46, %v14669_v29  ;;  %v14670_v50 = vld [vmem:[#allocation126_spill] sm:$0xff]  ;;  %v14675_v29 = vld [vmem:[#allocation131_spill] sm:$0xff] }
 0x42f   :  { %vm7889_vm11 = vmpackc.low %vm3879_vm8, %vm3878_vm9 }
 0x431   :  { %8910 = vmatpush3.bf16.msra.mxu1 %v12778_v3 }
 0x432   :  { %8959 = vmatprep.subr.bf16.mxu1 %v12723_v9 }
 0x434   :  { %8912 = vmatmul.mubr.msk.bf16.vlgmr.msra.gmra.mrb[80].mxu1 %vm7826_vm6, %v14287_v62  ;;  %vm3318_vm6 = vcmp.eq.s32.totalorder %v14466_v46, %v14662_v0  ;;  %v14667_v0 = vld [vmem:[#allocation123_spill] sm:$0xff] }
 0x435   :  { %8915 = vmatprep.mubr.msk.bf16.mxu1 %vm7828_vm7, %v14287_v62  ;;  %8960 = vmatpush3.bf16.msra.mxu1 %v12723_v9  ;;  %vm3317_vm7 = vcmp.eq.s32.totalorder %v14466_v46, %v14663_v14  ;;  %v14668_v14 = vld [vmem:[#allocation124_spill] sm:$0xff] }
 0x436   :  { %8961 = vmatprep.subr.bf16.mxu1 %v12719_v23  ;;  %vm7838_vm10 = vmpackc.low %vm3318_vm6, %vm3317_vm7  ;;  %vm3883_vm14 = vcmp.eq.s32.totalorder %v14466_v46, %v14668_v14  ;;  %v14673_v14 = vld [vmem:[#allocation129_spill] sm:$0xff] }
 0x437   :  { %vm7893_vm3 = vmpackc.low %vm3883_vm14, %vm3882_vm15  ;;  %vm3886_vm7 = vcmp.eq.s32.totalorder %v14466_v46, %v14673_v14  ;;  %v14683_v14 = vld [vmem:[#allocation139_spill] sm:$0xff] }
 0x439   :  { %8962 = vmatpush3.bf16.msra.mxu1 %v12719_v23 }
 0x43a   :  { %8963 = vmatprep.subr.bf16.mxu1 %v12743_v54 }
 0x43c   :  { %8916 = vmatmul.mubr.msk.bf16.gmra.mrb[84].mxu1 %vm7830_vm12, %v14287_v62  ;;  %vm3881_vm12 = vcmp.eq.s32.totalorder %v14466_v46, %v14666_v37  ;;  %v14671_v37 = vld [vmem:[#allocation127_spill] sm:$0xff] }
 0x43d   :  { %8919 = vmatprep.mubr.msk.bf16.mxu1 %vm7832_vm13, %v14287_v62  ;;  %8964 = vmatpush3.bf16.msra.mxu1 %v12743_v54  ;;  %vm3880_vm13 = vcmp.eq.s32.totalorder %v14466_v46, %v14667_v0  ;;  %v14672_v0 = vld [vmem:[#allocation128_spill] sm:$0xff] }
 0x43e   :  { %8965 = vmatprep.subr.bf16.mxu1 %v12738_v16  ;;  %vm7891_vm2 = vmpackc.low %vm3881_vm12, %vm3880_vm13  ;;  %vm3887_vm6 = vcmp.eq.s32.totalorder %v14466_v46, %v14672_v0  ;;  %v14680_v0 = vld [vmem:[#allocation136_spill] sm:$0xff] }
 0x43f   :  { %vm7897_vm9 = vmpackc.low %vm3887_vm6, %vm3886_vm7 }
 0x441   :  { %8966 = vmatpush3.bf16.msra.mxu1 %v12738_v16 }
 0x442   :  { %8967 = vmatprep.subr.bf16.mxu1 %v12763_v18 }
 0x444   :  { %8920 = vmatmul.mubr.msk.bf16.gmra.mrb[88].mxu1 %vm7834_vm4, %v14287_v62  ;;  %vm3885_vm4 = vcmp.eq.s32.totalorder %v14466_v46, %v14670_v50  ;;  %v14676_v50 = vld [vmem:[#allocation132_spill] sm:$0xff] }
 0x445   :  { %8923 = vmatprep.mubr.msk.bf16.mxu1 %vm7836_vm5, %v14287_v62  ;;  %8968 = vmatpush3.bf16.msra.mxu1 %v12763_v18  ;;  %vm3884_vm5 = vcmp.eq.s32.totalorder %v14466_v46, %v14671_v37  ;;  %vm3891_vm12 = vcmp.eq.s32.totalorder %v14466_v46, %v14676_v50  ;;  %v14679_v37 = vld [vmem:[#allocation135_spill] sm:$0xff]  ;;  %v14688_v50 = vld [vmem:[#allocation144_spill] sm:$0xff] }
 0x446   :  { %8969 = vmatprep.subr.bf16.mxu1 %v12758_v21  ;;  %vm7895_vm8 = vmpackc.low %vm3885_vm4, %vm3884_vm5  ;;  %vm4454_vm4 = vcmp.eq.s32.totalorder %v14466_v46, %v14680_v0  ;;  %v14693_v0 = vld [vmem:[#allocation149_spill] sm:$0xff] }
 0x449   :  { %8970 = vmatpush3.bf16.msra.mxu1 %v12758_v21 }
 0x44a   :  { %8971 = vmatprep.subr.bf16.mxu1 %v12783_v2 }
 0x44c   :  { %8924 = vmatmul.mubr.msk.bf16.gmra.mrb[92].mxu1 %vm7838_vm10, %v14287_v62 }
 0x44d   :  { %8972 = vmatpush3.bf16.msra.mxu1 %v12783_v2  ;;  %8975 = vmatprep.mubr.msk.bf16.mxu1 %vm7889_vm11, %v14287_v62  ;;  %vm3888_vm11 = vcmp.eq.s32.totalorder %v14466_v46, %v14675_v29  ;;  %v14687_v29 = vld [vmem:[#allocation143_spill] sm:$0xff] }
 0x44e   :  { %8973 = vmatprep.subr.bf16.mxu1 %v12778_v3 }
 0x451   :  { %8974 = vmatpush3.bf16.msra.mxu1 %v12778_v3 }
 0x452   :  { %9023 = vmatprep.subr.bf16.mxu1 %v12723_v9 }
 0x454   :  { %8976 = vmatmul.mubr.msk.bf16.vlgmr.msra.gmra.mrb[96].mxu1 %vm7891_vm2, %v14287_v62 }
 0x455   :  { %8979 = vmatprep.mubr.msk.bf16.mxu1 %vm7893_vm3, %v14287_v62  ;;  %9024 = vmatpush3.bf16.msra.mxu1 %v12723_v9  ;;  %v14674_v9 = vld [vmem:[#allocation130_spill] sm:$0xff]  ;;  %vm3892_vm3 = vcmp.eq.s32.totalorder %v14466_v46, %v14679_v37  ;;  %v14692_v37 = vld [vmem:[#allocation148_spill] sm:$0xff] }
 0x456   :  { %9025 = vmatprep.subr.bf16.mxu1 %v12719_v23  ;;  %vm3889_vm10 = vcmp.eq.s32.totalorder %v14466_v46, %v14674_v9  ;;  %v14684_v9 = vld [vmem:[#allocation140_spill] sm:$0xff] }
 0x457   :  { %vm7899_vm14 = vmpackc.low %vm3889_vm10, %vm3888_vm11  ;;  %vm4458_vm10 = vcmp.eq.s32.totalorder %v14466_v46, %v14684_v9  ;;  %v3361_v9 = vld [vmem:[#allocation2 + $0x190] sm:$0xff] }
 0x459   :  { %9026 = vmatpush3.bf16.msra.mxu1 %v12719_v23  ;;  %v14677_v23 = vld [vmem:[#allocation133_spill] sm:$0xff] }
 0x45a   :  { %9027 = vmatprep.subr.bf16.mxu1 %v12743_v54  ;;  %vm3890_vm13 = vcmp.eq.s32.totalorder %v14466_v46, %v14677_v23  ;;  %v14689_v23 = vld [vmem:[#allocation145_spill] sm:$0xff] }
 0x45b   :  { %vm7901_vm15 = vmpackc.low %vm3891_vm12, %vm3890_vm13 }
 0x45c   :  { %8980 = vmatmul.mubr.msk.bf16.gmra.mrb[100].mxu1 %vm7895_vm8, %v14287_v62 }
 0x45d   :  { %8983 = vmatprep.mubr.msk.bf16.mxu1 %vm7897_vm9, %v14287_v62  ;;  %9028 = vmatpush3.bf16.msra.mxu1 %v12743_v54  ;;  %v14678_v54 = vld [vmem:[#allocation134_spill] sm:$0xff]  ;;  %vm4455_vm9 = vcmp.eq.s32.totalorder %v14466_v46, %v14683_v14  ;;  %v12939_v14 = vld [vmem:[%s14115_s4] ss:$0 sm:$0xff] }
 0x45e   :  { %9029 = vmatprep.subr.bf16.mxu1 %v12738_v16  ;;  %vm3893_vm2 = vcmp.eq.s32.totalorder %v14466_v46, %v14678_v54  ;;  %v14691_v54 = vld [vmem:[#allocation147_spill] sm:$0xff] }
 0x45f   :  { %vm7903_vm6 = vmpackc.low %vm3893_vm2, %vm3892_vm3  ;;  %vm4462_vm2 = vcmp.eq.s32.totalorder %v14466_v46, %v14688_v50  ;;  %vm4461_vm3 = vcmp.eq.s32.totalorder %v14466_v46, %v14689_v23  ;;  %v3359_v50 = vld [vmem:[#allocation2 + $0x180] sm:$0xff] }
 0x461   :  { %9030 = vmatpush3.bf16.msra.mxu1 %v12738_v16  ;;  %v14681_v16 = vld [vmem:[#allocation137_spill] sm:$0xff] }
 0x462   :  { %9031 = vmatprep.subr.bf16.mxu1 %v12763_v18  ;;  %vm4453_vm5 = vcmp.eq.s32.totalorder %v14466_v46, %v14681_v16  ;;  %v14694_v16 = vld [vmem:[#allocation150_spill] sm:$0xff] }
 0x463   :  { %vm7954_vm7 = vmpackc.low %vm4454_vm4, %vm4453_vm5 }
 0x464   :  { %8984 = vmatmul.mubr.msk.bf16.gmra.mrb[104].mxu1 %vm7899_vm14, %v14287_v62  ;;  %vm7962_vm5 = vmpackc.low %vm4462_vm2, %vm4461_vm3  ;;  %vm3589_vm2 = vcmp.eq.s32.totalorder %v11147_v22, %v12939_v14 }
 0x465   :  { %8987 = vmatprep.mubr.msk.bf16.mxu1 %vm7901_vm15, %v14287_v62  ;;  %9032 = vmatpush3.bf16.msra.mxu1 %v12763_v18  ;;  %v14682_v18 = vld [vmem:[#allocation138_spill] sm:$0xff]  ;;  %vm4459_vm15 = vcmp.eq.s32.totalorder %v14466_v46, %v14687_v29 }
 0x466   :  { %9033 = vmatprep.subr.bf16.mxu1 %v12758_v21  ;;  %vm4456_vm8 = vcmp.eq.s32.totalorder %v14466_v46, %v14682_v18  ;;  %v14695_v18 = vld [vmem:[#allocation151_spill] sm:$0xff] }
 0x467   :  { %vm7956_vm12 = vmpackc.low %vm4456_vm8, %vm4455_vm9  ;;  %vm4466_vm8 = vcmp.eq.s32.totalorder %v14466_v46, %v14692_v37  ;;  %vm4465_vm9 = vcmp.eq.s32.totalorder %v14466_v46, %v14693_v0 }
 0x469   :  { %9034 = vmatpush3.bf16.msra.mxu1 %v12758_v21  ;;  %v14685_v21 = vld [vmem:[#allocation141_spill] sm:$0xff] }
 0x46a   :  { %9035 = vmatprep.subr.bf16.mxu1 %v12783_v2  ;;  %vm4457_vm11 = vcmp.eq.s32.totalorder %v14466_v46, %v14685_v21 }
 0x46b   :  { %vm7958_vm13 = vmpackc.low %vm4458_vm10, %vm4457_vm11 }
 0x46c   :  { %8988 = vmatmul.mubr.msk.bf16.gmra.mrb[108].mxu1 %vm7903_vm6, %v14287_v62  ;;  %vm7966_vm11 = vmpackc.low %vm4466_vm8, %vm4465_vm9 }
 0x46d   :  { %9036 = vmatpush3.bf16.msra.mxu1 %v12783_v2  ;;  %9039 = vmatprep.mubr.msk.bf16.mxu1 %vm7954_vm7, %v14287_v62  ;;  %v14686_v2 = vld [vmem:[#allocation142_spill] sm:$0xff]  ;;  %vm4463_vm7 = vcmp.eq.s32.totalorder %v14466_v46, %v14691_v54 }
 0x46e   :  { %9037 = vmatprep.subr.bf16.mxu1 %v12778_v3  ;;  %vm4460_vm14 = vcmp.eq.s32.totalorder %v14466_v46, %v14686_v2 }
 0x46f   :  { %vm7960_vm4 = vmpackc.low %vm4460_vm14, %vm4459_vm15  ;;  %vm3588_vm15 = vcmp.eq.s32.totalorder %v11144_v34, %v12939_v14 }
 0x470   :  { %vm7857_vm3 = vmpackc.low %vm3589_vm2, %vm3588_vm15  ;;  %vm3598_vm2 = vcmp.eq.s32.totalorder %v11610_v59, %v12939_v14 }
 0x471   :  { %9038 = vmatpush3.bf16.msra.mxu1 %v12778_v3  ;;  %v14690_v3 = vld [vmem:[#allocation146_spill] sm:$0xff]  ;;  %8943 = vmatprep.mubr.msk.bf16.mxu0 %vm7857_vm3, %v14287_v62  ;;  %vm3599_vm3 = vcmp.eq.s32.totalorder %v11628_v56, %v12939_v14 }
 0x472   :  { %vm4464_vm6 = vcmp.eq.s32.totalorder %v14466_v46, %v14690_v3  ;;  %v3362_v3 = vld [vmem:[#allocation2 + $0x198] sm:$0xff] }
 0x473   :  { %vm7964_vm10 = vmpackc.low %vm4464_vm6, %vm4463_vm7  ;;  %vm3592_vm6 = vcmp.eq.s32.totalorder %v11486_v39, %v12939_v14  ;;  %vm3593_vm7 = vcmp.eq.s32.totalorder %v11489_v51, %v12939_v14 }
 0x474   :  { %9040 = vmatmul.mubr.msk.bf16.vlgmr.msra.gmra.mrb[112].mxu1 %vm7956_vm12, %v14287_v62  ;;  %vm4468_vm12 = vcmp.eq.s32.totalorder %v14466_v46, %v14694_v16  ;;  %vm7861_vm9 = vmpackc.low %vm3593_vm7, %vm3592_vm6 }
 0x475   :  { %9043 = vmatprep.mubr.msk.bf16.mxu1 %vm7958_vm13, %v14287_v62  ;;  %vm4467_vm13 = vcmp.eq.s32.totalorder %v14466_v46, %v14695_v18  ;;  %v3360_v18 = vld [vmem:[#allocation2 + $0x188] sm:$0xff]  ;;  %vm7867_vm6 = vmpackc.low %vm3599_vm3, %vm3598_vm2 }
 0x476   :  { %vm7968_vm14 = vmpackc.low %vm4468_vm12, %vm4467_vm13  ;;  %vm3596_vm12 = vcmp.eq.s32.totalorder %v11555_v44, %v12939_v14  ;;  %vm3597_vm13 = vcmp.eq.s32.totalorder %v11558_v40, %v12939_v14 }
 0x477   :  { %vm7865_vm15 = vmpackc.low %vm3597_vm13, %vm3596_vm12 }
 0x47c   :  { %9044 = vmatmul.mubr.msk.bf16.gmra.mrb[116].mxu1 %vm7960_vm4, %v14287_v62  ;;  %vm3590_vm4 = vcmp.eq.s32.totalorder %v11478_v63, %v12939_v14 }
 0x47d   :  { %9047 = vmatprep.mubr.msk.bf16.mxu1 %vm7962_vm5, %v14287_v62  ;;  %vm3591_vm5 = vcmp.eq.s32.totalorder %v11481_v32, %v12939_v14 }
 0x47e   :  { %vm7859_vm8 = vmpackc.low %vm3591_vm5, %vm3590_vm4  ;;  %vm3600_vm4 = vcmp.eq.s32.totalorder %v11631_v11, %v12939_v14  ;;  %vm3601_vm5 = vcmp.eq.s32.totalorder %v11634_v30, %v12939_v14 }
 0x47f   :  { %vm7869_vm7 = vmpackc.low %vm3601_vm5, %vm3600_vm4 }
 0x484   :  { %9048 = vmatmul.mubr.msk.bf16.gmra.mrb[120].mxu1 %vm7964_vm10, %v14287_v62  ;;  %vm3594_vm10 = vcmp.eq.s32.totalorder %v11534_v27, %v12939_v14 }
 0x485   :  { %9051 = vmatprep.mubr.msk.bf16.mxu1 %vm7966_vm11, %v14287_v62  ;;  %vm3595_vm11 = vcmp.eq.s32.totalorder %v11552_v36, %v12939_v14 }
 0x48c   :  { %9052 = vmatmul.mubr.msk.bf16.gmra.mrb[124].mxu1 %vm7968_vm14, %v14287_v62  ;;  %vm7863_vm14 = vmpackc.low %vm3595_vm11, %vm3594_vm10 }
 0x507   :  { %v8913_v21 = vpop.f32.mrb[80].mxu1 }
 0x508   :  { %v3418_v2 = vadd.f32 %v8913_v21, %v3361_v9  ;;  %v3409_v29 = vpop.f32.mrb[81].mxu1  ;;  %v14699_v9 = vld [vmem:[#allocation152_spill] sm:$0xff] }
 0x509   :  { %v3410_v23 = vadd.f32 %v3409_v29, %v3359_v50  ;;  %v8914_v54 = vpop.f32.mrb[82].mxu1 }
 0x50a   :  { %v3474_v37 = vmax.f32 %v3418_v2, 0.0  ;;  %v3421_v0 = vadd.f32 %v8914_v54, %v3362_v3  ;;  %v3412_v16 = vpop.f32.mrb[83].mxu1  ;;  %v3363_v2 = vld [vmem:[#allocation2 + $0x1a0] sm:$0xff] }
 0x50b   :  { %v3472_v53 = vmax.f32 %v3410_v23, 0.0  ;;  %v3413_v28 = vadd.f32 %v3412_v16, %v3360_v18 }
 0x50c   :  { %v3475_v12 = vmax.f32 %v3421_v0, 0.0  ;;  %v3570_v45 = vmul.f32 %v14696_v47, %v3474_v37  ;;  %v3364_v47 = vld [vmem:[#allocation2 + $0x1a8] sm:$0xff] }
 0x50d   :  { %v3473_v15 = vmax.f32 %v3413_v28, 0.0  ;;  %v3568_v48 = vmul.f32 %v14698_v58, %v3472_v53 }
 0x50e   :  { %v3571_v10 = vmul.f32 %v14697_v41, %v3475_v12  ;;  %v14700_v41 = vld [vmem:[#allocation13_spill] sm:$0xff] }
 0x50f   :  { %v3569_v21 = vmul.f32 %v14699_v9, %v3473_v15  ;;  %v8917_v29 = vpop.f32.mrb[84].mxu1  ;;  %v14701_v15 = vld [vmem:[#allocation14_spill] sm:$0xff] }
 0x510   :  { %v3434_v50 = vadd.f32 %v8917_v29, %v3365_v24  ;;  %v3425_v25 = vpop.f32.mrb[85].mxu1  ;;  %v3661_v3 = vpack.c.bf16 %v3571_v10, %v3570_v45  ;;  %v14702_v45 = vld [vmem:[#allocation157_spill] sm:$0xff] }
 0x511   :  { %v3426_v54 = vadd.f32 %v3425_v25, %v3363_v2  ;;  %v8918_v23 = vpop.f32.mrb[86].mxu1  ;;  %v3660_v16 = vpack.c.bf16 %v3569_v21, %v3568_v48  ;;  %v14703_v25 = vld [vmem:[#allocation156_spill] sm:$0xff]  ;;  %v3369_v48 = vld [vmem:[#allocation2 + $0x1d0] sm:$0xff] }
 0x512   :  { %v3478_v0 = vmax.f32 %v3434_v50, 0.0  ;;  %v3437_v28 = vadd.f32 %v8918_v23, %v3366_v4  ;;  %v3428_v18 = vpop.f32.mrb[87].mxu1  ;;  %v3367_v2 = vld [vmem:[#allocation2 + $0x1c0] sm:$0xff] }
 0x513   :  { %v3476_v37 = vmax.f32 %v3426_v54, 0.0  ;;  %v3429_v12 = vadd.f32 %v3428_v18, %v3364_v47  ;;  %8927 = vmatprep.subr.bf16.mxu0 %v3660_v16 }
 0x514   :  { %v3479_v53 = vmax.f32 %v3437_v28, 0.0  ;;  %8928 = vmatpush3.bf16.msra.mxu0 %v3660_v16  ;;  %v3574_v24 = vmul.f32 %v14700_v41, %v3478_v0  ;;  %v3370_v28 = vld [vmem:[#allocation2 + $0x1d8] sm:$0xff]  ;;  %v3368_v41 = vld [vmem:[#allocation2 + $0x1c8] sm:$0xff] }
 0x515   :  { %v3477_v58 = vmax.f32 %v3429_v12, 0.0  ;;  %8929 = vmatprep.subr.bf16.mxu0 %v3661_v3  ;;  %v3572_v10 = vmul.f32 %v14702_v45, %v3476_v37 }
 0x516   :  { %v3575_v9 = vmul.f32 %v14701_v15, %v3479_v53 }
 0x517   :  { %v3573_v29 = vmul.f32 %v14703_v25, %v3477_v58  ;;  %v8921_v21 = vpop.f32.mrb[88].mxu1 }
 0x518   :  { %v3450_v4 = vadd.f32 %v8921_v21, %v3369_v48  ;;  %v3441_v50 = vpop.f32.mrb[89].mxu1  ;;  %8930 = vmatpush3.bf16.msra.mxu0 %v3661_v3  ;;  %v3663_v54 = vpack.c.bf16 %v3575_v9, %v3574_v24  ;;  %v3371_v21 = vld [vmem:[#allocation2 + $0x1e0] sm:$0xff] }
 0x519   :  { %v3442_v23 = vadd.f32 %v3441_v50, %v3367_v2  ;;  %v8922_v16 = vpop.f32.mrb[90].mxu1  ;;  %v3662_v18 = vpack.c.bf16 %v3573_v29, %v3572_v10  ;;  %v3373_v10 = vld [vmem:[#allocation2 + $0x1f0] sm:$0xff]  ;;  %v3374_v2 = vld [vmem:[#allocation2 + $0x1f8] sm:$0xff] }
 0x51a   :  { %v3482_v47 = vmax.f32 %v3450_v4, 0.0  ;;  %v3453_v12 = vadd.f32 %v8922_v16, %v3370_v28  ;;  %v3444_v0 = vpop.f32.mrb[91].mxu1 }
 0x51b   :  { %v3480_v53 = vmax.f32 %v3442_v23, 0.0  ;;  %v3445_v15 = vadd.f32 %v3444_v0, %v3368_v41  ;;  %8931 = vmatprep.subr.bf16.mxu0 %v3662_v18  ;;  %v14704_v41 = vld [vmem:[#allocation48_spill] sm:$0xff] }
 0x51c   :  { %v3483_v37 = vmax.f32 %v3453_v12, 0.0  ;;  %8932 = vmatpush3.bf16.msra.mxu0 %v3662_v18  ;;  %v3578_v45 = vmul.f32 %v11429_v49, %v3482_v47  ;;  %v3372_v47 = vld [vmem:[#allocation2 + $0x1e8] sm:$0xff] }
 0x51d   :  { %v3481_v58 = vmax.f32 %v3445_v15, 0.0  ;;  %8933 = vmatprep.subr.bf16.mxu0 %v3663_v54  ;;  %v3576_v24 = vmul.f32 %v11397_v42, %v3480_v53  ;;  %v14705_v53 = vld [vmem:[#allocation8_spill] sm:$0xff] }
 0x51e   :  { %v3579_v3 = vmul.f32 %v11427_v61, %v3483_v37  ;;  %v14706_v37 = vld [vmem:[#allocation50_spill] sm:$0xff] }
 0x51f   :  { %v3577_v9 = vmul.f32 %v11395_v26, %v3481_v58  ;;  %v8925_v25 = vpop.f32.mrb[92].mxu1 }
 0x520   :  { %v3466_v29 = vadd.f32 %v8925_v25, %v3373_v10  ;;  %v3457_v48 = vpop.f32.mrb[93].mxu1  ;;  %8934 = vmatpush3.bf16.msra.mxu0 %v3663_v54  ;;  %v3665_v4 = vpack.c.bf16 %v3579_v3, %v3578_v45  ;;  %v3936_v45 = vld [vmem:[#allocation2 + $0x210] sm:$0xff]  ;;  %v3934_v10 = vld [vmem:[#allocation2 + $0x200] sm:$0xff] }
 0x521   :  { %v3458_v50 = vadd.f32 %v3457_v48, %v3371_v21  ;;  %v8926_v23 = vpop.f32.mrb[94].mxu1  ;;  %v3664_v28 = vpack.c.bf16 %v3577_v9, %v3576_v24  ;;  %v3937_v48 = vld [vmem:[#allocation2 + $0x218] sm:$0xff] }
 0x522   :  { %v3486_v16 = vmax.f32 %v3466_v29, 0.0  ;;  %v3469_v18 = vadd.f32 %v8926_v23, %v3374_v2  ;;  %v3460_v49 = vpop.f32.mrb[95].mxu1 }
 0x523   :  { %v3484_v61 = vmax.f32 %v3458_v50, 0.0  ;;  %v3461_v12 = vadd.f32 %v3460_v49, %v3372_v47  ;;  %8935 = vmatprep.subr.bf16.mxu0 %v3664_v28 }
 0x524   :  { %v3487_v42 = vmax.f32 %v3469_v18, 0.0  ;;  %8936 = vmatpush3.bf16.msra.mxu0 %v3664_v28  ;;  %v3582_v0 = vmul.f32 %v11503_v57, %v3486_v16  ;;  %v3935_v28 = vld [vmem:[#allocation2 + $0x208] sm:$0xff] }
 0x525   :  { %v3485_v26 = vmax.f32 %v3461_v12, 0.0  ;;  %8937 = vmatprep.subr.bf16.mxu0 %v3665_v4  ;;  %v3580_v15 = vmul.f32 %v14705_v53, %v3484_v61  ;;  %v14708_v12 = vld [vmem:[#allocation22_spill] sm:$0xff] }
 0x526   :  { %v3583_v54 = vmul.f32 %v14704_v41, %v3487_v42  ;;  %v14710_v41 = vld [vmem:[#allocation7_spill] sm:$0xff]  ;;  %v3940_v53 = vld [vmem:[#allocation2 + $0x230] sm:$0xff] }
 0x527   :  { %v3581_v58 = vmul.f32 %v14706_v37, %v3485_v26  ;;  %v8977_v3 = vpop.f32.mrb[96].mxu1  ;;  %v14709_v26 = vld [vmem:[#allocation47_spill] sm:$0xff] }
 0x528   :  { %v3993_v24 = vadd.f32 %v8977_v3, %v3936_v45  ;;  %8938 = vmatpush3.bf16.msra.mxu0 %v3665_v4  ;;  %v3984_v9 = vpop.f32.mrb[97].mxu1  ;;  %v3667_v25 = vpack.c.bf16 %v3583_v54, %v3582_v0  ;;  %v14707_v4 = vld [vmem:[#allocation21_spill] sm:$0xff]  ;;  %v3938_v45 = vld [vmem:[#allocation2 + $0x220] sm:$0xff] }
 0x529   :  { %v3985_v29 = vadd.f32 %v3984_v9, %v3934_v10  ;;  %v8978_v21 = vpop.f32.mrb[98].mxu1  ;;  %v3666_v50 = vpack.c.bf16 %v3581_v58, %v3580_v15  ;;  %v3941_v9 = vld [vmem:[#allocation2 + $0x238] sm:$0xff] }
 0x52a   :  { %v4049_v2 = vmax.f32 %v3993_v24, 0.0  ;;  %v3996_v23 = vadd.f32 %v8978_v21, %v3937_v48  ;;  %v3987_v57 = vpop.f32.mrb[99].mxu1 }
 0x52b   :  { %v4047_v16 = vmax.f32 %v3985_v29, 0.0  ;;  %v3988_v18 = vadd.f32 %v3987_v57, %v3935_v28  ;;  %8939 = vmatprep.subr.bf16.mxu0 %v3666_v50 }
 0x52c   :  { %v4050_v49 = vmax.f32 %v3996_v23, 0.0  ;;  %8940 = vmatpush3.bf16.msra.mxu0 %v3666_v50  ;;  %v4145_v61 = vmul.f32 %v14707_v4, %v4049_v2  ;;  %v3939_v2 = vld [vmem:[#allocation2 + $0x228] sm:$0xff]  ;;  %v3944_v4 = vld [vmem:[#allocation2 + $0x250] sm:$0xff] }
 0x52d   :  { %v4048_v47 = vmax.f32 %v3988_v18, 0.0  ;;  %8941 = vmatprep.subr.bf16.mxu0 %v3667_v25  ;;  %v4143_v0 = vmul.f32 %v14709_v26, %v4047_v16  ;;  %v3942_v26 = vld [vmem:[#allocation2 + $0x240] sm:$0xff] }
 0x52e   :  { %v4146_v42 = vmul.f32 %v14708_v12, %v4050_v49 }
 0x52f   :  { %v4144_v54 = vmul.f32 %v14710_v41, %v4048_v47  ;;  %v8981_v15 = vpop.f32.mrb[100].mxu1 }
 0x530   :  { %v4009_v37 = vadd.f32 %v8981_v15, %v3940_v53  ;;  %8942 = vmatpush3.bf16.msra.mxu0 %v3667_v25  ;;  %v4000_v58 = vpop.f32.mrb[101].mxu1  ;;  %v4236_v3 = vpack.c.bf16 %v4146_v42, %v4145_v61  ;;  %v3943_v15 = vld [vmem:[#allocation2 + $0x248] sm:$0xff] }
 0x531   :  { %v4001_v24 = vadd.f32 %v4000_v58, %v3938_v45  ;;  %v8982_v10 = vpop.f32.mrb[102].mxu1  ;;  %v4235_v29 = vpack.c.bf16 %v4144_v54, %v4143_v0 }
 0x532   :  { %v4053_v48 = vmax.f32 %v4009_v37, 0.0  ;;  %v4012_v21 = vadd.f32 %v8982_v10, %v3941_v9  ;;  %v4003_v50 = vpop.f32.mrb[103].mxu1 }
 0x533   :  { %v4051_v25 = vmax.f32 %v4001_v24, 0.0  ;;  %v4004_v23 = vadd.f32 %v4003_v50, %v3939_v2  ;;  %8944 = vmatmul.mubr.msk.bf16.vlgmr.msra.gmra.mrb[96].mxu0 %vm7859_vm8, %v14287_v62  ;;  %8991 = vmatprep.subr.bf16.mxu0 %v4235_v29  ;;  %vm3602_vm8 = vcmp.eq.s32.totalorder %v11701_v55, %v12939_v14 }
 0x534   :  { %v4054_v57 = vmax.f32 %v4012_v21, 0.0  ;;  %8992 = vmatpush3.bf16.msra.mxu0 %v4235_v29  ;;  %8947 = vmatprep.mubr.msk.bf16.mxu0 %vm7861_vm9, %v14287_v62  ;;  %v4149_v16 = vmul.f32 %v11769_v52, %v4053_v48  ;;  %v3948_v48 = vld [vmem:[#allocation2 + $0x270] sm:$0xff]  ;;  %vm3603_vm9 = vcmp.eq.s32.totalorder %v11704_v38, %v12939_v14  ;;  %v4509_v14 = vld [vmem:[#allocation2 + $0x280] sm:$0xff] }
 0x535   :  { %v4052_v28 = vmax.f32 %v4004_v23, 0.0  ;;  %8993 = vmatprep.subr.bf16.mxu0 %v4236_v3  ;;  %v4147_v49 = vmul.f32 %v11725_v7, %v4051_v25  ;;  %v3946_v25 = vld [vmem:[#allocation2 + $0x260] sm:$0xff]  ;;  %vm7871_vm12 = vmpackc.low %vm3603_vm9, %vm3602_vm8 }
 0x536   :  { %v4150_v18 = vmul.f32 %v11767_v1, %v4054_v57  ;;  %v3945_v1 = vld [vmem:[#allocation2 + $0x258] sm:$0xff] }
 0x537   :  { %v4148_v47 = vmul.f32 %v11723_v6, %v4052_v28  ;;  %v8985_v61 = vpop.f32.mrb[104].mxu1 }
 0x538   :  { %v4025_v12 = vadd.f32 %v8985_v61, %v3944_v4  ;;  %v4016_v42 = vpop.f32.mrb[105].mxu1  ;;  %8994 = vmatpush3.bf16.msra.mxu0 %v4236_v3  ;;  %v4238_v52 = vpack.c.bf16 %v4150_v18, %v4149_v16  ;;  %v3947_v18 = vld [vmem:[#allocation2 + $0x268] sm:$0xff]  ;;  %v13024_v4 = vld [vmem:[%s14115_s4 + $0x1] ss:$0 sm:$0xff] }
 0x539   :  { %v4017_v0 = vadd.f32 %v4016_v42, %v3942_v26  ;;  %v8986_v41 = vpop.f32.mrb[106].mxu1  ;;  %v4237_v54 = vpack.c.bf16 %v4148_v47, %v4147_v49  ;;  %vm4163_vm10 = vcmp.eq.s32.totalorder %v11144_v34, %v13024_v4  ;;  %vm4164_vm11 = vcmp.eq.s32.totalorder %v11147_v22, %v13024_v4 }
 0x53a   :  { %v4057_v6 = vmax.f32 %v4025_v12, 0.0  ;;  %v4028_v7 = vadd.f32 %v8986_v41, %v3945_v1  ;;  %v4019_v53 = vpop.f32.mrb[107].mxu1  ;;  %v14712_v1 = vld [vmem:[#allocation16_spill] sm:$0xff]  ;;  %vm7922_vm13 = vmpackc.low %vm4164_vm11, %vm4163_vm10  ;;  %vm4167_vm2 = vcmp.eq.s32.totalorder %v11486_v39, %v13024_v4  ;;  %vm4168_vm3 = vcmp.eq.s32.totalorder %v11489_v51, %v13024_v4 }
 0x53b   :  { %v4055_v37 = vmax.f32 %v4017_v0, 0.0  ;;  %v4020_v58 = vadd.f32 %v4019_v53, %v3943_v15  ;;  %8948 = vmatmul.mubr.msk.bf16.gmra.mrb[100].mxu0 %vm7863_vm14, %v14287_v62  ;;  %8995 = vmatprep.subr.bf16.mxu0 %v4237_v54  ;;  %vm4165_vm14 = vcmp.eq.s32.totalorder %v11478_v63, %v13024_v4  ;;  %vm7926_vm5 = vmpackc.low %vm4168_vm3, %vm4167_vm2  ;;  %vm4171_vm8 = vcmp.eq.s32.totalorder %v11555_v44, %v13024_v4 }
 0x53c   :  { %v4058_v45 = vmax.f32 %v4028_v7, 0.0  ;;  %8996 = vmatpush3.bf16.msra.mxu0 %v4237_v54  ;;  %8951 = vmatprep.mubr.msk.bf16.mxu0 %vm7865_vm15, %v14287_v62  ;;  %v4153_v24 = vmul.f32 %v11833_v33, %v4057_v6  ;;  %v4511_v54 = vld [vmem:[#allocation2 + $0x290] sm:$0xff]  ;;  %vm4166_vm15 = vcmp.eq.s32.totalorder %v11481_v32, %v13024_v4  ;;  %vm4172_vm9 = vcmp.eq.s32.totalorder %v11558_v40, %v13024_v4 }
 0x53d   :  { %v4056_v3 = vmax.f32 %v4020_v58, 0.0  ;;  %8997 = vmatprep.subr.bf16.mxu0 %v4238_v52  ;;  %v4151_v10 = vmul.f32 %v11801_v8, %v4055_v37  ;;  %vm7924_vm4 = vmpackc.low %vm4166_vm15, %vm4165_vm14  ;;  %vm4175_vm14 = vcmp.eq.s32.totalorder %v11631_v11, %v13024_v4  ;;  %vm4176_vm15 = vcmp.eq.s32.totalorder %v11634_v30, %v13024_v4 }
 0x53e   :  { %v4154_v9 = vmul.f32 %v11831_v31, %v4058_v45  ;;  %v3949_v31 = vld [vmem:[#allocation2 + $0x278] sm:$0xff]  ;;  %vm7930_vm11 = vmpackc.low %vm4172_vm9, %vm4171_vm8 }
 0x53f   :  { %v4152_v29 = vmul.f32 %v11799_v35, %v4056_v3  ;;  %v8989_v21 = vpop.f32.mrb[108].mxu1  ;;  %vm7934_vm3 = vmpackc.low %vm4176_vm15, %vm4175_vm14 }
 0x540   :  { %v4041_v50 = vadd.f32 %v8989_v21, %v3948_v48  ;;  %v4032_v2 = vpop.f32.mrb[109].mxu1  ;;  %8998 = vmatpush3.bf16.msra.mxu0 %v4238_v52  ;;  %v4240_v33 = vpack.c.bf16 %v4154_v9, %v4153_v24  ;;  %v14711_v52 = vld [vmem:[#allocation15_spill] sm:$0xff]  ;;  %v4510_v9 = vld [vmem:[#allocation2 + $0x288] sm:$0xff] }
 0x541   :  { %v4033_v23 = vadd.f32 %v4032_v2, %v3946_v25  ;;  %v8990_v57 = vpop.f32.mrb[110].mxu1  ;;  %v4239_v28 = vpack.c.bf16 %v4152_v29, %v4151_v10  ;;  %v14714_v25 = vld [vmem:[#allocation24_spill] sm:$0xff] }
 0x542   :  { %v4061_v35 = vmax.f32 %v4041_v50, 0.0  ;;  %v4044_v8 = vadd.f32 %v8990_v57, %v3949_v31  ;;  %v4035_v16 = vpop.f32.mrb[111].mxu1  ;;  %v14713_v50 = vld [vmem:[#allocation23_spill] sm:$0xff]  ;;  %v14716_v57 = vld [vmem:[#allocation32_spill] sm:$0xff] }
 0x543   :  { %v4059_v49 = vmax.f32 %v4033_v23, 0.0  ;;  %v4036_v47 = vadd.f32 %v4035_v16, %v3947_v18  ;;  %8952 = vmatmul.mubr.msk.bf16.gmra.mrb[104].mxu0 %vm7867_vm6, %v14287_v62  ;;  %8999 = vmatprep.subr.bf16.mxu0 %v4239_v28  ;;  %v14715_v23 = vld [vmem:[#allocation30_spill] sm:$0xff]  ;;  %vm4169_vm6 = vcmp.eq.s32.totalorder %v11534_v27, %v13024_v4 }
 0x544   :  { %v4062_v61 = vmax.f32 %v4044_v8, 0.0  ;;  %9000 = vmatpush3.bf16.msra.mxu0 %v4239_v28  ;;  %8955 = vmatprep.mubr.msk.bf16.mxu0 %vm7869_vm7, %v14287_v62  ;;  %v4157_v42 = vmul.f32 %v11902_v60, %v4061_v35  ;;  %v4515_v35 = vld [vmem:[#allocation2 + $0x2b0] sm:$0xff]  ;;  %vm4170_vm7 = vcmp.eq.s32.totalorder %v11552_v36, %v13024_v4 }
 0x545   :  { %v4060_v12 = vmax.f32 %v4036_v47, 0.0  ;;  %9001 = vmatprep.subr.bf16.mxu0 %v4240_v33  ;;  %v4155_v0 = vmul.f32 %v14711_v52, %v4059_v49  ;;  %v4513_v49 = vld [vmem:[#allocation2 + $0x2a0] sm:$0xff]  ;;  %vm7928_vm10 = vmpackc.low %vm4170_vm7, %vm4169_vm6 }
 0x546   :  { %v4158_v26 = vmul.f32 %v11900_v17, %v4062_v61  ;;  %v4512_v17 = vld [vmem:[#allocation2 + $0x298] sm:$0xff] }
 0x547   :  { %v4156_v41 = vmul.f32 %v14712_v1, %v4060_v12  ;;  %v9041_v6 = vpop.f32.mrb[112].mxu1  ;;  %v4516_v12 = vld [vmem:[#allocation2 + $0x2b8] sm:$0xff] }
 0x548   :  { %v4568_v7 = vadd.f32 %v9041_v6, %v4511_v54  ;;  %9002 = vmatpush3.bf16.msra.mxu0 %v4240_v33  ;;  %v4559_v53 = vpop.f32.mrb[113].mxu1  ;;  %v4242_v60 = vpack.c.bf16 %v4158_v26, %v4157_v42 }
 0x549   :  { %v4560_v15 = vadd.f32 %v4559_v53, %v4509_v14  ;;  %v9042_v37 = vpop.f32.mrb[114].mxu1  ;;  %v4241_v58 = vpack.c.bf16 %v4156_v41, %v4155_v0  ;;  %v4514_v41 = vld [vmem:[#allocation2 + $0x2a8] sm:$0xff]  ;;  %v14717_v14 = vld [vmem:[#allocation35_spill] sm:$0xff] }
 0x54a   :  { %v4624_v45 = vmax.f32 %v4568_v7, 0.0  ;;  %v4571_v3 = vadd.f32 %v9042_v37, %v4512_v17  ;;  %v4562_v24 = vpop.f32.mrb[115].mxu1  ;;  %v14719_v37 = vld [vmem:[#allocation42_spill] sm:$0xff] }
 0x54b   :  { %v4622_v10 = vmax.f32 %v4560_v15, 0.0  ;;  %v4563_v29 = vadd.f32 %v4562_v24, %v4510_v9  ;;  %8956 = vmatmul.mubr.msk.bf16.gmra.mrb[108].mxu0 %vm7871_vm12, %v14287_v62  ;;  %9003 = vmatprep.subr.bf16.mxu0 %v4241_v58  ;;  %v14718_v15 = vld [vmem:[#allocation36_spill] sm:$0xff]  ;;  %v4519_v24 = vld [vmem:[#allocation2 + $0x2d0] sm:$0xff]  ;;  %vm4173_vm12 = vcmp.eq.s32.totalorder %v11610_v59, %v13024_v4 }
 0x54c   :  { %v4625_v48 = vmax.f32 %v4571_v3, 0.0  ;;  %9004 = vmatpush3.bf16.msra.mxu0 %v4241_v58  ;;  %9007 = vmatprep.mubr.msk.bf16.mxu0 %vm7922_vm13, %v14287_v62  ;;  %v4720_v2 = vmul.f32 %v14713_v50, %v4624_v45  ;;  %v14720_v45 = vld [vmem:[#allocation44_spill] sm:$0xff]  ;;  %vm4174_vm13 = vcmp.eq.s32.totalorder %v11628_v56, %v13024_v4 }
 0x54d   :  { %v4623_v21 = vmax.f32 %v4563_v29, 0.0  ;;  %9005 = vmatprep.subr.bf16.mxu0 %v4242_v60  ;;  %v4718_v31 = vmul.f32 %v14715_v23, %v4622_v10  ;;  %vm7932_vm2 = vmpackc.low %vm4174_vm13, %vm4173_vm12 }
 0x54e   :  { %v4721_v33 = vmul.f32 %v14714_v25, %v4625_v48  ;;  %v4517_v48 = vld [vmem:[#allocation2 + $0x2c0] sm:$0xff] }
 0x54f   :  { %v4719_v28 = vmul.f32 %v14716_v57, %v4623_v21  ;;  %v9045_v8 = vpop.f32.mrb[116].mxu1 }
 0x550   :  { %v4584_v16 = vadd.f32 %v9045_v8, %v4515_v35  ;;  %9006 = vmatpush3.bf16.msra.mxu0 %v4242_v60  ;;  %v4575_v18 = vpop.f32.mrb[117].mxu1  ;;  %v4811_v47 = vpack.c.bf16 %v4721_v33, %v4720_v2  ;;  %v4520_v2 = vld [vmem:[#allocation2 + $0x2d8] sm:$0xff] }
 0x551   :  { %v4576_v61 = vadd.f32 %v4575_v18, %v4513_v49  ;;  %v9046_v42 = vpop.f32.mrb[118].mxu1  ;;  %v4810_v26 = vpack.c.bf16 %v4719_v28, %v4718_v31  ;;  %v4518_v28 = vld [vmem:[#allocation2 + $0x2c8] sm:$0xff]  ;;  %v14721_v49 = vld [vmem:[#allocation70_spill] sm:$0xff] }
 0x552   :  { %v4628_v52 = vmax.f32 %v4584_v16, 0.0  ;;  %v4587_v0 = vadd.f32 %v9046_v42, %v4516_v12  ;;  %v4578_v1 = vpop.f32.mrb[119].mxu1  ;;  %v14723_v42 = vld [vmem:[#allocation60_spill] sm:$0xff] }
 0x553   :  { %v4626_v54 = vmax.f32 %v4576_v61, 0.0  ;;  %v4579_v6 = vadd.f32 %v4578_v1, %v4514_v41  ;;  %9008 = vmatmul.mubr.msk.bf16.vlgmr.msra.gmra.mrb[112].mxu0 %vm7924_vm4, %v14287_v62  ;;  %9055 = vmatprep.subr.bf16.mxu0 %v4810_v26  ;;  %v14722_v61 = vld [vmem:[#allocation72_spill] sm:$0xff]  ;;  %v4523_v1 = vld [vmem:[#allocation2 + $0x2f0] sm:$0xff]  ;;  %vm4177_vm4 = vcmp.eq.s32.totalorder %v11701_v55, %v13024_v4 }
 0x554   :  { %v4629_v7 = vmax.f32 %v4587_v0, 0.0  ;;  %9056 = vmatpush3.bf16.msra.mxu0 %v4810_v26  ;;  %9011 = vmatprep.mubr.msk.bf16.mxu0 %vm7926_vm5, %v14287_v62  ;;  %v4724_v60 = vmul.f32 %v14717_v14, %v4628_v52  ;;  %v14724_v52 = vld [vmem:[#allocation61_spill] sm:$0xff]  ;;  %vm4178_vm5 = vcmp.eq.s32.totalorder %v11704_v38, %v13024_v4  ;;  %v14729_v4 = vld [vmem:[#allocation75_spill] sm:$0xff] }
 0x555   :  { %v4627_v53 = vmax.f32 %v4579_v6, 0.0  ;;  %9057 = vmatprep.subr.bf16.mxu0 %v4811_v47  ;;  %v4722_v58 = vmul.f32 %v14719_v37, %v4626_v54  ;;  %vm7936_vm8 = vmpackc.low %vm4178_vm5, %vm4177_vm4 }
 0x556   :  { %v4725_v17 = vmul.f32 %v14718_v15, %v4629_v7  ;;  %v4521_v7 = vld [vmem:[#allocation2 + $0x2e0] sm:$0xff] }
 0x557   :  { %v4723_v3 = vmul.f32 %v14720_v45, %v4627_v53  ;;  %v9049_v9 = vpop.f32.mrb[120].mxu1 }
 0x558   :  { %v4600_v10 = vadd.f32 %v9049_v9, %v4519_v24  ;;  %v4591_v29 = vpop.f32.mrb[121].mxu1  ;;  %9058 = vmatpush3.bf16.msra.mxu0 %v4811_v47  ;;  %v4813_v21 = vpack.c.bf16 %v4725_v17, %v4724_v60  ;;  %v4524_v60 = vld [vmem:[#allocation2 + $0x2f8] sm:$0xff] }
 0x559   :  { %v4592_v50 = vadd.f32 %v4591_v29, %v4517_v48  ;;  %v9050_v25 = vpop.f32.mrb[122].mxu1  ;;  %v4812_v33 = vpack.c.bf16 %v4723_v3, %v4722_v58  ;;  %v4522_v3 = vld [vmem:[#allocation2 + $0x2e8] sm:$0xff] }
 0x55a   :  { %v4632_v23 = vmax.f32 %v4600_v10, 0.0  ;;  %v4603_v31 = vadd.f32 %v9050_v25, %v4520_v2  ;;  %v4594_v57 = vpop.f32.mrb[123].mxu1  ;;  %v7970_v10 = vld [vmem:[%s14115_s4 + $0x2] ss:$0 sm:$0xff]  ;;  %v14726_v2 = vld [vmem:[#allocation77_spill] sm:$0xff] }
 0x55b   :  { %v4630_v35 = vmax.f32 %v4592_v50, 0.0  ;;  %v4595_v8 = vadd.f32 %v4594_v57, %v4518_v28  ;;  %9012 = vmatmul.mubr.msk.bf16.gmra.mrb[116].mxu0 %vm7928_vm10, %v14287_v62  ;;  %9059 = vmatprep.subr.bf16.mxu0 %v4812_v33  ;;  %vm4738_vm6 = vcmp.eq.s32.totalorder %v11144_v34, %v7970_v10  ;;  %vm4739_vm7 = vcmp.eq.s32.totalorder %v11147_v22, %v7970_v10 }
 0x55c   :  { %v4633_v16 = vmax.f32 %v4603_v31, 0.0  ;;  %9060 = vmatpush3.bf16.msra.mxu0 %v4812_v33  ;;  %9015 = vmatprep.mubr.msk.bf16.mxu0 %vm7930_vm11, %v14287_v62  ;;  %v4728_v47 = vmul.f32 %v14721_v49, %v4632_v23  ;;  %v14727_v33 = vld [vmem:[#allocation66_spill] sm:$0xff]  ;;  %v14728_v31 = vld [vmem:[#allocation67_spill] sm:$0xff]  ;;  %vm7987_vm9 = vmpackc.low %vm4739_vm7, %vm4738_vm6  ;;  %vm4740_vm10 = vcmp.eq.s32.totalorder %v11478_v63, %v7970_v10  ;;  %vm4741_vm11 = vcmp.eq.s32.totalorder %v11481_v32, %v7970_v10 }
 0x55d   :  { %v4631_v18 = vmax.f32 %v4595_v8, 0.0  ;;  %9061 = vmatprep.subr.bf16.mxu0 %v4813_v21  ;;  %v4726_v26 = vmul.f32 %v14723_v42, %v4630_v35  ;;  %vm4742_vm12 = vcmp.eq.s32.totalorder %v11486_v39, %v7970_v10  ;;  %vm4743_vm13 = vcmp.eq.s32.totalorder %v11489_v51, %v7970_v10  ;;  %vm7989_vm14 = vmpackc.low %vm4741_vm11, %vm4740_vm10  ;;  %v14730_v8 = vld [vmem:[#allocation74_spill] sm:$0xff] }
 0x55e   :  { %v4729_v12 = vmul.f32 %v14722_v61, %v4633_v16  ;;  %vm7991_vm15 = vmpackc.low %vm4743_vm13, %vm4742_vm12  ;;  %vm4746_vm4 = vcmp.eq.s32.totalorder %v11555_v44, %v7970_v10  ;;  %vm4747_vm5 = vcmp.eq.s32.totalorder %v11558_v40, %v7970_v10  ;;  %vm4750_vm10 = vcmp.eq.s32.totalorder %v11631_v11, %v7970_v10  ;;  %v8005_v16 = vld [vmem:[%s14236_s26 + $0x40] sm:$0xff]  ;;  %v8008_v61 = vld [vmem:[%s14236_s26 + $0x58] sm:$0xff] }
 0x55f   :  { %v4727_v0 = vmul.f32 %v14724_v52, %v4631_v18  ;;  %v9053_v41 = vpop.f32.mrb[124].mxu1  ;;  %vm7995_vm7 = vmpackc.low %vm4747_vm5, %vm4746_vm4  ;;  %vm4751_vm11 = vcmp.eq.s32.totalorder %v11634_v30, %v7970_v10  ;;  %v8006_v18 = vld [vmem:[%s14236_s26 + $0x48] sm:$0xff]  ;;  %v3646_v42 = vld [vmem:[#allocation3 + $0x10] sm:$0xff] }
 0x560   :  { %v4616_v54 = vadd.f32 %v9053_v41, %v4523_v1  ;;  %v4607_v6 = vpop.f32.mrb[125].mxu1  ;;  %9062 = vmatpush3.bf16.msra.mxu0 %v4813_v21  ;;  %v4815_v53 = vpack.c.bf16 %v4729_v12, %v4728_v47  ;;  %v14725_v21 = vld [vmem:[#allocation76_spill] sm:$0xff]  ;;  %vm7999_vm13 = vmpackc.low %vm4751_vm11, %vm4750_vm10  ;;  %v5064_v49 = vpack.c.bf16 %v8006_v18, %v8005_v16  ;;  %v8007_v47 = vld [vmem:[%s14236_s26 + $0x50] sm:$0xff] }
 0x561   :  { %v4608_v14 = vadd.f32 %v4607_v6, %v4521_v7  ;;  %v9054_v15 = vpop.f32.mrb[126].mxu1  ;;  %v4814_v17 = vpack.c.bf16 %v4727_v0, %v4726_v26  ;;  %v5065_v12 = vpack.c.bf16 %v8008_v61, %v8007_v47  ;;  %v3644_v26 = vld [vmem:[#allocation3] sm:$0xff]  ;;  %v3647_v0 = vld [vmem:[#allocation3 + $0x18] sm:$0xff]  ;;  %v3658_v18 = vld [vmem:[#allocation3 + $0x70] sm:$0xff] }
 0x562   :  { %v4636_v37 = vmax.f32 %v4616_v54, 0.0  ;;  %v4619_v58 = vadd.f32 %v9054_v15, %v4524_v60  ;;  %v4610_v45 = vpop.f32.mrb[127].mxu1  ;;  %9087 = vmatprep.subr.bf16.mxu1 %v5064_v49  ;;  %v3645_v54 = vld [vmem:[#allocation3 + $0x8] sm:$0xff]  ;;  %v3650_v15 = vld [vmem:[#allocation3 + $0x30] sm:$0xff]  ;;  %v3659_v61 = vld [vmem:[#allocation3 + $0x78] sm:$0xff] }
 0x563   :  { %v4634_v24 = vmax.f32 %v4608_v14, 0.0  ;;  %v4611_v9 = vadd.f32 %v4610_v45, %v4522_v3  ;;  %9016 = vmatmul.mubr.msk.bf16.gmra.mrb[120].mxu0 %vm7932_vm2, %v14287_v62  ;;  %9063 = vmatprep.subr.bf16.mxu0 %v4814_v17  ;;  %vm4744_vm2 = vcmp.eq.s32.totalorder %v11534_v27, %v7970_v10 }
 0x564   :  { %v4637_v29 = vmax.f32 %v4619_v58, 0.0  ;;  %9064 = vmatpush3.bf16.msra.mxu0 %v4814_v17  ;;  %9019 = vmatprep.mubr.msk.bf16.mxu0 %vm7934_vm3, %v14287_v62  ;;  %v4732_v50 = vmul.f32 %v14725_v21, %v4636_v37  ;;  %vm4745_vm3 = vcmp.eq.s32.totalorder %v11552_v36, %v7970_v10  ;;  %v3648_v17 = vld [vmem:[#allocation3 + $0x20] sm:$0xff]  ;;  %v3651_v58 = vld [vmem:[#allocation3 + $0x38] sm:$0xff] }
 0x565   :  { %v4635_v48 = vmax.f32 %v4611_v9, 0.0  ;;  %9065 = vmatprep.subr.bf16.mxu0 %v4815_v53  ;;  %v4730_v23 = vmul.f32 %v14727_v33, %v4634_v24  ;;  %vm7993_vm6 = vmpackc.low %vm4745_vm3, %vm4744_vm2  ;;  %vm5301_vm2 = vcmp.eq.s32.totalorder %v14466_v46, %v14729_v4  ;;  %vm5300_vm3 = vcmp.eq.s32.totalorder %v14466_v46, %v14730_v8  ;;  %9088 = vmatpush3.bf16.msra.mxu1 %v5064_v49  ;;  %v3649_v24 = vld [vmem:[#allocation3 + $0x28] sm:$0xff]  ;;  %v3655_v33 = vld [vmem:[#allocation3 + $0x58] sm:$0xff] }
 0x566   :  { %v4733_v25 = vmul.f32 %v14726_v2, %v4637_v29  ;;  %vm8035_vm5 = vmpackc.low %vm5301_vm2, %vm5300_vm3  ;;  %9089 = vmatprep.subr.bf16.mxu1 %v5065_v12  ;;  %v3652_v2 = vld [vmem:[#allocation3 + $0x40] sm:$0xff] }
 0x567   :  { %v4731_v57 = vmul.f32 %v14728_v31, %v4635_v48  ;;  %v3656_v49 = vld [vmem:[#allocation3 + $0x60] sm:$0xff] }
 0x568   :  { %9066 = vmatpush3.bf16.msra.mxu0 %v4815_v53  ;;  %v4817_v28 = vpack.c.bf16 %v4733_v25, %v4732_v50  ;;  %v3654_v50 = vld [vmem:[#allocation3 + $0x50] sm:$0xff] }
 0x569   :  { %v4816_v35 = vpack.c.bf16 %v4731_v57, %v4730_v23  ;;  %9090 = vmatpush3.bf16.msra.mxu1 %v5065_v12  ;;  %v3653_v57 = vld [vmem:[#allocation3 + $0x48] sm:$0xff] }
 0x56b   :  { %9020 = vmatmul.mubr.msk.bf16.gmra.mrb[124].mxu0 %vm7936_vm8, %v14287_v62  ;;  %9067 = vmatprep.subr.bf16.mxu0 %v4816_v35  ;;  %vm4748_vm8 = vcmp.eq.s32.totalorder %v11610_v59, %v7970_v10 }
 0x56c   :  { %9068 = vmatpush3.bf16.msra.mxu0 %v4816_v35  ;;  %9071 = vmatprep.mubr.msk.bf16.mxu0 %vm7987_vm9, %v14287_v62  ;;  %vm4749_vm9 = vcmp.eq.s32.totalorder %v11628_v56, %v7970_v10 }
 0x56d   :  { %9069 = vmatprep.subr.bf16.mxu0 %v4817_v28  ;;  %vm7997_vm12 = vmpackc.low %vm4749_vm9, %vm4748_vm8 }
 0x570   :  { %9070 = vmatpush3.bf16.msra.mxu0 %v4817_v28 }
 0x573   :  { %9072 = vmatmul.mubr.msk.bf16.vlgmr.msra.gmra.mrb[128].mxu0 %vm7989_vm14, %v14287_v62  ;;  %vm4752_vm14 = vcmp.eq.s32.totalorder %v11701_v55, %v7970_v10 }
 0x574   :  { %9075 = vmatprep.mubr.msk.bf16.mxu0 %vm7991_vm15, %v14287_v62  ;;  %vm4753_vm15 = vcmp.eq.s32.totalorder %v11704_v38, %v7970_v10 }
 0x575   :  { %vm8001_vm4 = vmpackc.low %vm4753_vm15, %vm4752_vm14 }
 0x57b   :  { %9076 = vmatmul.mubr.msk.bf16.gmra.mrb[132].mxu0 %vm7993_vm6, %v14287_v62 }
 0x57c   :  { %9079 = vmatprep.mubr.msk.bf16.mxu0 %vm7995_vm7, %v14287_v62 }
 0x583   :  { %9080 = vmatmul.mubr.msk.bf16.gmra.mrb[136].mxu0 %vm7997_vm12, %v14287_v62 }
 0x584   :  { %9083 = vmatprep.mubr.msk.bf16.mxu0 %vm7999_vm13, %v14287_v62 }
 0x58b   :  { %9084 = vmatmul.mubr.msk.bf16.gmra.mrb[140].mxu0 %vm8001_vm4, %v14287_v62 }
 0x58c   :  { %9123 = vmatprep.mubr.msk.bf16.mxu0 %vm8035_vm5, %v14287_v62 }
 0x606   :  { %v8945_v52 = vpop.f32.mrb[96].mxu0 }
 0x607   :  { %v3767_v1 = vadd.f32 %v8945_v52, %v3646_v42  ;;  %v3702_v41 = vpop.f32.mrb[97].mxu0 }
 0x608   :  { %v3765_v6 = vadd.f32 %v3702_v41, %v3644_v26  ;;  %v8946_v7 = vpop.f32.mrb[98].mxu0  ;;  %v3657_v26 = vld [vmem:[#allocation3 + $0x68] sm:$0xff] }
 0x609   :  { %3783 = vst.msk [vmem:[#allocation3 + $0x10] sm:$0xff] %vm446_vm0, %v3767_v1  ;;  %v3768_v53 = vadd.f32 %v8946_v7, %v3647_v0  ;;  %v3705_v14 = vpop.f32.mrb[99].mxu0 }
 0x60a   :  { %3781 = vst.msk [vmem:[#allocation3] sm:$0xff] %vm446_vm0, %v3765_v6  ;;  %v3766_v60 = vadd.f32 %v3705_v14, %v3645_v54 }
 0x60b   :  { %3784 = vst.msk [vmem:[#allocation3 + $0x18] sm:$0xff] %vm446_vm0, %v3768_v53 }
 0x60c   :  { %3782 = vst.msk [vmem:[#allocation3 + $0x8] sm:$0xff] %vm446_vm0, %v3766_v60 }
 0x60e   :  { %v8949_v37 = vpop.f32.mrb[100].mxu0 }
 0x60f   :  { %v3771_v45 = vadd.f32 %v8949_v37, %v3650_v15  ;;  %v3718_v3 = vpop.f32.mrb[101].mxu0 }
 0x610   :  { %v3769_v9 = vadd.f32 %v3718_v3, %v3648_v17  ;;  %v8950_v10 = vpop.f32.mrb[102].mxu0  ;;  %v4221_v6 = vld [vmem:[#allocation3 + $0x10] sm:$0xff] }
 0x611   :  { %3787 = vst.msk [vmem:[#allocation3 + $0x30] sm:$0xff] %vm446_vm0, %v3771_v45  ;;  %v3772_v29 = vadd.f32 %v8950_v10, %v3651_v58  ;;  %v3721_v48 = vpop.f32.mrb[103].mxu0  ;;  %v4219_v14 = vld [vmem:[#allocation3] sm:$0xff] }
 0x612   :  { %3785 = vst.msk [vmem:[#allocation3 + $0x20] sm:$0xff] %vm446_vm0, %v3769_v9  ;;  %v3770_v21 = vadd.f32 %v3721_v48, %v3649_v24  ;;  %v4222_v17 = vld [vmem:[#allocation3 + $0x18] sm:$0xff] }
 0x613   :  { %3788 = vst.msk [vmem:[#allocation3 + $0x38] sm:$0xff] %vm446_vm0, %v3772_v29  ;;  %v4220_v45 = vld [vmem:[#allocation3 + $0x8] sm:$0xff] }
 0x614   :  { %3786 = vst.msk [vmem:[#allocation3 + $0x28] sm:$0xff] %vm446_vm0, %v3770_v21 }
 0x616   :  { %v8953_v25 = vpop.f32.mrb[104].mxu0 }
 0x617   :  { %v3775_v23 = vadd.f32 %v8953_v25, %v3654_v50  ;;  %v3734_v31 = vpop.f32.mrb[105].mxu0 }
 0x618   :  { %v3773_v28 = vadd.f32 %v3734_v31, %v3652_v2  ;;  %v8954_v35 = vpop.f32.mrb[106].mxu0  ;;  %v4225_v9 = vld [vmem:[#allocation3 + $0x30] sm:$0xff] }
 0x619   :  { %3791 = vst.msk [vmem:[#allocation3 + $0x50] sm:$0xff] %vm446_vm0, %v3775_v23  ;;  %v3776_v4 = vadd.f32 %v8954_v35, %v3655_v33  ;;  %v3737_v8 = vpop.f32.mrb[107].mxu0  ;;  %v4223_v48 = vld [vmem:[#allocation3 + $0x20] sm:$0xff] }
 0x61a   :  { %3789 = vst.msk [vmem:[#allocation3 + $0x40] sm:$0xff] %vm446_vm0, %v3773_v28  ;;  %v3774_v16 = vadd.f32 %v3737_v8, %v3653_v57  ;;  %v4226_v2 = vld [vmem:[#allocation3 + $0x38] sm:$0xff] }
 0x61b   :  { %3792 = vst.msk [vmem:[#allocation3 + $0x58] sm:$0xff] %vm446_vm0, %v3776_v4  ;;  %v4224_v23 = vld [vmem:[#allocation3 + $0x28] sm:$0xff] }
 0x61c   :  { %3790 = vst.msk [vmem:[#allocation3 + $0x48] sm:$0xff] %vm446_vm0, %v3774_v16 }
 0x61e   :  { %v8957_v47 = vpop.f32.mrb[108].mxu0 }
 0x61f   :  { %v3779_v12 = vadd.f32 %v8957_v47, %v3658_v18  ;;  %v3750_v42 = vpop.f32.mrb[109].mxu0 }
 0x620   :  { %v3777_v52 = vadd.f32 %v3750_v42, %v3656_v49  ;;  %v8958_v0 = vpop.f32.mrb[110].mxu0  ;;  %v4229_v28 = vld [vmem:[#allocation3 + $0x50] sm:$0xff] }
 0x621   :  { %3795 = vst.msk [vmem:[#allocation3 + $0x70] sm:$0xff] %vm446_vm0, %v3779_v12  ;;  %v3780_v1 = vadd.f32 %v8958_v0, %v3659_v61  ;;  %v3753_v41 = vpop.f32.mrb[111].mxu0  ;;  %v4227_v8 = vld [vmem:[#allocation3 + $0x40] sm:$0xff] }
 0x622   :  { %3793 = vst.msk [vmem:[#allocation3 + $0x60] sm:$0xff] %vm446_vm0, %v3777_v52  ;;  %v3778_v54 = vadd.f32 %v3753_v41, %v3657_v26  ;;  %v4230_v49 = vld [vmem:[#allocation3 + $0x58] sm:$0xff] }
 0x623   :  { %3796 = vst.msk [vmem:[#allocation3 + $0x78] sm:$0xff] %vm446_vm0, %v3780_v1  ;;  %v4228_v12 = vld [vmem:[#allocation3 + $0x48] sm:$0xff] }
 0x624   :  { %3794 = vst.msk [vmem:[#allocation3 + $0x68] sm:$0xff] %vm446_vm0, %v3778_v54 }
 0x626   :  { %v9009_v7 = vpop.f32.mrb[112].mxu0 }
 0x627   :  { %v4342_v53 = vadd.f32 %v9009_v7, %v4221_v6  ;;  %v4277_v60 = vpop.f32.mrb[113].mxu0 }
 0x628   :  { %v4340_v15 = vadd.f32 %v4277_v60, %v4219_v14  ;;  %v9010_v37 = vpop.f32.mrb[114].mxu0  ;;  %v4233_v52 = vld [vmem:[#allocation3 + $0x70] sm:$0xff] }
 0x629   :  { %4358 = vst.msk [vmem:[#allocation3 + $0x10] sm:$0xff] %vm446_vm0, %v4342_v53  ;;  %v4343_v58 = vadd.f32 %v9010_v37, %v4222_v17  ;;  %v4280_v3 = vpop.f32.mrb[115].mxu0  ;;  %v4231_v41 = vld [vmem:[#allocation3 + $0x60] sm:$0xff] }
 0x62a   :  { %4356 = vst.msk [vmem:[#allocation3] sm:$0xff] %vm446_vm0, %v4340_v15  ;;  %v4341_v24 = vadd.f32 %v4280_v3, %v4220_v45  ;;  %v4234_v7 = vld [vmem:[#allocation3 + $0x78] sm:$0xff]  ;;  %v13194_v37 = vld [vmem:[%s14116_s12 + $0x1] ss:$0 sm:$0xff] }
 0x62b   :  { %4359 = vst.msk [vmem:[#allocation3 + $0x18] sm:$0xff] %vm446_vm0, %v4343_v58  ;;  %v4232_v60 = vld [vmem:[#allocation3 + $0x68] sm:$0xff]  ;;  %v4957_v3 = vadd.f32 %v13194_v37, %v12709_v19  ;;  %v4956_v19 = vadd.f32 %v13194_v37, %v12715_v5 }
 0x62c   :  { %4357 = vst.msk [vmem:[#allocation3 + $0x8] sm:$0xff] %vm446_vm0, %v4341_v24 }
 0x62e   :  { %v9013_v10 = vpop.f32.mrb[116].mxu0 }
 0x62f   :  { %v4346_v29 = vadd.f32 %v9013_v10, %v4225_v9  ;;  %v4293_v21 = vpop.f32.mrb[117].mxu0 }
 0x630   :  { %v4344_v50 = vadd.f32 %v4293_v21, %v4223_v48  ;;  %v9014_v25 = vpop.f32.mrb[118].mxu0  ;;  %v4796_v58 = vld [vmem:[#allocation3 + $0x10] sm:$0xff] }
 0x631   :  { %4362 = vst.msk [vmem:[#allocation3 + $0x30] sm:$0xff] %vm446_vm0, %v4346_v29  ;;  %v4347_v33 = vadd.f32 %v9014_v25, %v4226_v2  ;;  %v4296_v31 = vpop.f32.mrb[119].mxu0  ;;  %v4794_v9 = vld [vmem:[#allocation3] sm:$0xff]  ;;  %v4955_v29 = vadd.f32 %v13194_v37, %v12713_v43  ;;  %v4958_v2 = vadd.f32 %v13194_v37, %v12711_v13 }
 0x632   :  { %4360 = vst.msk [vmem:[#allocation3 + $0x20] sm:$0xff] %vm446_vm0, %v4344_v50  ;;  %v4345_v57 = vadd.f32 %v4296_v31, %v4224_v23  ;;  %v4797_v21 = vld [vmem:[#allocation3 + $0x18] sm:$0xff] }
 0x633   :  { %4363 = vst.msk [vmem:[#allocation3 + $0x38] sm:$0xff] %vm446_vm0, %v4347_v33  ;;  %v4795_v33 = vld [vmem:[#allocation3 + $0x8] sm:$0xff]  ;;  %v4971_v43 = vmax.f32 %v4955_v29, 0.0 }
 0x634   :  { %4361 = vst.msk [vmem:[#allocation3 + $0x28] sm:$0xff] %vm446_vm0, %v4345_v57  ;;  %v4973_v57 = vmax.f32 %v4957_v3, 0.0 }
 0x636   :  { %v9017_v35 = vpop.f32.mrb[120].mxu0 }
 0x637   :  { %v4350_v4 = vadd.f32 %v9017_v35, %v4229_v28  ;;  %v4309_v16 = vpop.f32.mrb[121].mxu0  ;;  %v4974_v28 = vmax.f32 %v4958_v2, 0.0  ;;  %v4972_v35 = vmax.f32 %v4956_v19, 0.0 }
 0x638   :  { %v4348_v18 = vadd.f32 %v4309_v16, %v4227_v8  ;;  %v9018_v47 = vpop.f32.mrb[122].mxu0  ;;  %v4800_v13 = vld [vmem:[#allocation3 + $0x30] sm:$0xff]  ;;  %v14731_v8 = vld [vmem:[#allocation87_spill] sm:$0xff] }
 0x639   :  { %4366 = vst.msk [vmem:[#allocation3 + $0x50] sm:$0xff] %vm446_vm0, %v4350_v4  ;;  %v4351_v61 = vadd.f32 %v9018_v47, %v4230_v49  ;;  %v4312_v42 = vpop.f32.mrb[123].mxu0  ;;  %v4989_v16 = vmul.f32 %v4973_v57, %v14731_v8  ;;  %v4798_v5 = vld [vmem:[#allocation3 + $0x20] sm:$0xff] }
 0x63a   :  { %4364 = vst.msk [vmem:[#allocation3 + $0x40] sm:$0xff] %vm446_vm0, %v4348_v18  ;;  %v4349_v26 = vadd.f32 %v4312_v42, %v4228_v12  ;;  %v4961_v18 = vadd.f32 %v13194_v37, %v12728_v20  ;;  %v14733_v42 = vld [vmem:[#allocation191_spill] sm:$0xff] }
 0x63b   :  { %4367 = vst.msk [vmem:[#allocation3 + $0x58] sm:$0xff] %vm446_vm0, %v4351_v61  ;;  %v14732_v61 = vld [vmem:[#allocation85_spill] sm:$0xff] }
 0x63c   :  { %4365 = vst.msk [vmem:[#allocation3 + $0x48] sm:$0xff] %vm446_vm0, %v4349_v26  ;;  %v4987_v12 = vmul.f32 %v4971_v43, %v14732_v61  ;;  %v4959_v26 = vadd.f32 %v13194_v37, %v14733_v42 }
 0x63e   :  { %v9021_v0 = vpop.f32.mrb[124].mxu0 }
 0x63f   :  { %v4354_v1 = vadd.f32 %v9021_v0, %v4233_v52  ;;  %v4325_v54 = vpop.f32.mrb[125].mxu0  ;;  %v4801_v0 = vld [vmem:[#allocation3 + $0x38] sm:$0xff] }
 0x640   :  { %v4352_v6 = vadd.f32 %v4325_v54, %v4231_v41  ;;  %v9022_v53 = vpop.f32.mrb[126].mxu0  ;;  %v14734_v54 = vld [vmem:[#allocation86_spill] sm:$0xff] }
 0x641   :  { %4370 = vst.msk [vmem:[#allocation3 + $0x70] sm:$0xff] %vm446_vm0, %v4354_v1  ;;  %v4355_v14 = vadd.f32 %v9022_v53, %v4234_v7  ;;  %v4328_v15 = vpop.f32.mrb[127].mxu0  ;;  %v14735_v7 = vld [vmem:[#allocation190_spill] sm:$0xff] }
 0x642   :  { %4368 = vst.msk [vmem:[#allocation3 + $0x60] sm:$0xff] %vm446_vm0, %v4352_v6  ;;  %v4353_v17 = vadd.f32 %v4328_v15, %v4232_v60  ;;  %v4990_v6 = vmul.f32 %v4974_v28, %v14734_v54  ;;  %v4962_v53 = vadd.f32 %v13194_v37, %v14735_v7  ;;  %v4804_v43 = vld [vmem:[#allocation3 + $0x50] sm:$0xff] }
 0x643   :  { %4371 = vst.msk [vmem:[#allocation3 + $0x78] sm:$0xff] %vm446_vm0, %v4355_v14  ;;  %v4799_v14 = vld [vmem:[#allocation3 + $0x28] sm:$0xff] }
 0x644   :  { %4369 = vst.msk [vmem:[#allocation3 + $0x68] sm:$0xff] %vm446_vm0, %v4353_v17 }
 0x646   :  { %v9073_v45 = vpop.f32.mrb[128].mxu0 }
 0x647   :  { %v4917_v24 = vadd.f32 %v9073_v45, %v4796_v58  ;;  %v4852_v10 = vpop.f32.mrb[129].mxu0  ;;  %v14736_v58 = vmov 0.0   ;;  %v14737_v45 = vld [vmem:[#allocation84_spill] sm:$0xff] }
 0x648   :  { %v4915_v48 = vadd.f32 %v4852_v10, %v4794_v9  ;;  %v9074_v50 = vpop.f32.mrb[130].mxu0  ;;  %v4988_v3 = vmul.f32 %v4972_v35, %v14737_v45 }
 0x649   :  { %4933 = vst.msk [vmem:[#allocation3 + $0x10] sm:$0xff] %vm446_vm0, %v4917_v24  ;;  %v4918_v25 = vadd.f32 %v9074_v50, %v4797_v21  ;;  %v4855_v23 = vpop.f32.mrb[131].mxu0  ;;  %v14738_v24 = vld [vmem:[#allocation192_spill] sm:$0xff]  ;;  %v4977_v21 = vmax.f32 %v4961_v18, 0.0  ;;  %v14740_v18 = vld [vmem:[#allocation193_spill] sm:$0xff] }
 0x64a   :  { %4931 = vst.msk [vmem:[#allocation3] sm:$0xff] %vm446_vm0, %v4915_v48  ;;  %v4916_v31 = vadd.f32 %v4855_v23, %v4795_v33  ;;  %v4960_v9 = vadd.f32 %v13194_v37, %v14738_v24  ;;  %v4978_v23 = vmax.f32 %v4962_v53, 0.0  ;;  %v4803_v24 = vld [vmem:[#allocation3 + $0x48] sm:$0xff] }
 0x64b   :  { %4934 = vst.msk [vmem:[#allocation3 + $0x18] sm:$0xff] %vm446_vm0, %v4918_v25  ;;  %v4975_v25 = vmax.f32 %v4959_v26, 0.0  ;;  %v14741_v26 = vld [vmem:[#allocation91_spill] sm:$0xff] }
 0x64c   :  { %4932 = vst.msk [vmem:[#allocation3 + $0x8] sm:$0xff] %vm446_vm0, %v4916_v31  ;;  %v4976_v57 = vmax.f32 %v4960_v9, 0.0 }
 0x64e   :  { %v9077_v4 = vpop.f32.mrb[132].mxu0 }
 0x64f   :  { %v4921_v49 = vadd.f32 %v9077_v4, %v4800_v13  ;;  %v4868_v47 = vpop.f32.mrb[133].mxu0  ;;  %v14739_v4 = vld [vmem:[#allocation95_spill] sm:$0xff] }
 0x650   :  { %v4919_v52 = vadd.f32 %v4868_v47, %v4798_v5  ;;  %v9078_v1 = vpop.f32.mrb[134].mxu0  ;;  %v5005_v41 = vld [vmem:[#allocation3 + $0x10] sm:$0xff]  ;;  %v4802_v47 = vld [vmem:[#allocation3 + $0x40] sm:$0xff] }
 0x651   :  { %4937 = vst.msk [vmem:[#allocation3 + $0x30] sm:$0xff] %vm446_vm0, %v4921_v49  ;;  %v4922_v20 = vadd.f32 %v9078_v1, %v4801_v0  ;;  %v4871_v60 = vpop.f32.mrb[135].mxu0  ;;  %v5003_v15 = vld [vmem:[#allocation3] sm:$0xff]  ;;  %v5021_v17 = vadd.f32 %v5005_v41, %v4989_v16  ;;  %5205 = vst.msk [vmem:[#allocation3 + $0x10] sm:$0xff] %vm446_vm0, %v14736_v58  ;;  %v4993_v16 = vmul.f32 %v4977_v21, %v14739_v4  ;;  %v14742_v0 = vld [vmem:[#allocation195_spill] sm:$0xff] }
 0x652   :  { %4935 = vst.msk [vmem:[#allocation3 + $0x20] sm:$0xff] %vm446_vm0, %v4919_v52  ;;  %v4920_v10 = vadd.f32 %v4871_v60, %v4799_v14  ;;  %v5019_v29 = vadd.f32 %v5003_v15, %v4987_v12  ;;  %5203 = vst.msk [vmem:[#allocation3] sm:$0xff] %vm446_vm0, %v14736_v58  ;;  %v5006_v48 = vld [vmem:[#allocation3 + $0x18] sm:$0xff]  ;;  %v4965_v49 = vadd.f32 %v13194_v37, %v14740_v18  ;;  %v14743_v14 = vld [vmem:[#allocation94_spill] sm:$0xff] }
 0x653   :  { %4938 = vst.msk [vmem:[#allocation3 + $0x38] sm:$0xff] %vm446_vm0, %v4922_v20  ;;  %v5004_v50 = vld [vmem:[#allocation3 + $0x8] sm:$0xff]  ;;  %v5022_v2 = vadd.f32 %v5006_v48, %v4990_v6  ;;  %5206 = vst.msk [vmem:[#allocation3 + $0x18] sm:$0xff] %vm446_vm0, %v14736_v58  ;;  %v5037_v19 = vmax.f32 %v5021_v17, 0.0  ;;  %v4991_v52 = vmul.f32 %v4975_v25, %v14741_v26  ;;  %v4963_v1 = vadd.f32 %v13194_v37, %v14742_v0  ;;  %v4805_v6 = vld [vmem:[#allocation3 + $0x58] sm:$0xff] }
 0x654   :  { %4936 = vst.msk [vmem:[#allocation3 + $0x28] sm:$0xff] %vm446_vm0, %v4920_v10  ;;  %v5020_v33 = vadd.f32 %v5004_v50, %v4988_v3  ;;  %5204 = vst.msk [vmem:[#allocation3 + $0x8] sm:$0xff] %vm446_vm0, %v14736_v58  ;;  %v5035_v35 = vmax.f32 %v5019_v29, 0.0  ;;  %v4994_v60 = vmul.f32 %v4978_v23, %v14743_v14  ;;  %v14744_v15 = vld [vmem:[#allocation194_spill] sm:$0xff]  ;;  %v14745_v48 = vld [vmem:[#allocation89_spill] sm:$0xff] }
 0x655   :  { %v5038_v31 = vmax.f32 %v5022_v2, 0.0  ;;  %v4966_v17 = vadd.f32 %v13194_v37, %v14744_v15  ;;  %v4992_v21 = vmul.f32 %v4976_v57, %v14745_v48  ;;  %v14746_v50 = vld [vmem:[#allocation196_spill] sm:$0xff]  ;;  %v14748_v0 = vld [vmem:[#allocation197_spill] sm:$0xff]  ;;  %v14750_v15 = vld [vmem:[#allocation199_spill] sm:$0xff] }
 0x656   :  { %v9081_v28 = vpop.f32.mrb[136].mxu0  ;;  %v5036_v13 = vmax.f32 %v5020_v33, 0.0  ;;  %v4964_v2 = vadd.f32 %v13194_v37, %v14746_v50 }
 0x657   :  { %v4925_v5 = vadd.f32 %v9081_v28, %v4804_v43  ;;  %v4884_v12 = vpop.f32.mrb[137].mxu0  ;;  %v5052_v42 = vpack.c.bf16 %v5038_v31, %v5037_v19  ;;  %v4981_v19 = vmax.f32 %v4965_v49, 0.0  ;;  %v4979_v43 = vmax.f32 %v4963_v1, 0.0  ;;  %v4808_v49 = vld [vmem:[#allocation3 + $0x70] sm:$0xff] }
 0x658   :  { %v4923_v41 = vadd.f32 %v4884_v12, %v4802_v47  ;;  %v9082_v7 = vpop.f32.mrb[138].mxu0  ;;  %v5051_v53 = vpack.c.bf16 %v5036_v13, %v5035_v35  ;;  %v5009_v20 = vld [vmem:[#allocation3 + $0x30] sm:$0xff]  ;;  %v4982_v35 = vmax.f32 %v4966_v17, 0.0  ;;  %v4980_v18 = vmax.f32 %v4964_v2, 0.0 }
 0x659   :  { %4941 = vst.msk [vmem:[#allocation3 + $0x50] sm:$0xff] %vm446_vm0, %v4925_v5  ;;  %v4926_v3 = vadd.f32 %v9082_v7, %v4805_v6  ;;  %v4887_v9 = vpop.f32.mrb[139].mxu0  ;;  %v5007_v10 = vld [vmem:[#allocation3 + $0x20] sm:$0xff]  ;;  %v5025_v29 = vadd.f32 %v5009_v20, %v4993_v16  ;;  %5209 = vst.msk [vmem:[#allocation3 + $0x30] sm:$0xff] %vm446_vm0, %v14736_v58  ;;  %v14749_v20 = vld [vmem:[#allocation97_spill] sm:$0xff]  ;;  %v4967_v17 = vadd.f32 %v13194_v37, %v14750_v15 }
 0x65a   :  { %4939 = vst.msk [vmem:[#allocation3 + $0x40] sm:$0xff] %vm446_vm0, %v4923_v41  ;;  %v4924_v25 = vadd.f32 %v4887_v9, %v4803_v24  ;;  %9091 = vmatprep.mubr.msk.bf16.mxu1 %vm446_vm0, %v5051_v53  ;;  %v5023_v33 = vadd.f32 %v5007_v10, %v4991_v52  ;;  %5207 = vst.msk [vmem:[#allocation3 + $0x20] sm:$0xff] %vm446_vm0, %v14736_v58  ;;  %v5010_v23 = vld [vmem:[#allocation3 + $0x38] sm:$0xff]  ;;  %v4969_v41 = vadd.f32 %v13194_v37, %v14748_v0  ;;  %v4806_v6 = vld [vmem:[#allocation3 + $0x60] sm:$0xff] }
 0x65b   :  { %4942 = vst.msk [vmem:[#allocation3 + $0x58] sm:$0xff] %vm446_vm0, %v4926_v3  ;;  %9092 = vmatmul.mubr.msk.bf16.vlgmr.msra.gmra.mrb[128].mxu1 %vm446_vm0, %v5052_v42  ;;  %v5008_v31 = vld [vmem:[#allocation3 + $0x28] sm:$0xff]  ;;  %v5026_v57 = vadd.f32 %v5010_v23, %v4994_v60  ;;  %5210 = vst.msk [vmem:[#allocation3 + $0x38] sm:$0xff] %vm446_vm0, %v14736_v58  ;;  %v5041_v13 = vmax.f32 %v5025_v29, 0.0  ;;  %v14747_v42 = vld [vmem:[#allocation100_spill] sm:$0xff]  ;;  %v4995_v60 = vmul.f32 %v4979_v43, %v14749_v20 }
 0x65c   :  { %4940 = vst.msk [vmem:[#allocation3 + $0x48] sm:$0xff] %vm446_vm0, %v4924_v25  ;;  %v5024_v28 = vadd.f32 %v5008_v31, %v4992_v21  ;;  %5208 = vst.msk [vmem:[#allocation3 + $0x28] sm:$0xff] %vm446_vm0, %v14736_v58  ;;  %v5039_v47 = vmax.f32 %v5023_v33, 0.0  ;;  %v4997_v52 = vmul.f32 %v4981_v19, %v14747_v42  ;;  %v4809_v24 = vld [vmem:[#allocation3 + $0x78] sm:$0xff]  ;;  %v14752_v2 = vld [vmem:[#allocation198_spill] sm:$0xff] }
 0x65d   :  { %v5042_v16 = vmax.f32 %v5026_v57, 0.0  ;;  %v14751_v21 = vld [vmem:[#allocation99_spill] sm:$0xff]  ;;  %v4970_v25 = vadd.f32 %v13194_v37, %v14752_v2  ;;  %v4807_v23 = vld [vmem:[#allocation3 + $0x68] sm:$0xff]  ;;  %v14753_v43 = vld [vmem:[#allocation96_spill] sm:$0xff] }
 0x65e   :  { %v9085_v5 = vpop.f32.mrb[140].mxu0  ;;  %v5040_v12 = vmax.f32 %v5024_v28, 0.0  ;;  %v4998_v50 = vmul.f32 %v4982_v35, %v14751_v21  ;;  %v4996_v28 = vmul.f32 %v4980_v18, %v14753_v43  ;;  %v14755_v15 = vld [vmem:[#allocation105_spill] sm:$0xff] }
 0x65f   :  { %v4929_v1 = vadd.f32 %v9085_v5, %v4808_v49  ;;  %v4900_v7 = vpop.f32.mrb[141].mxu0  ;;  %v5054_v53 = vpack.c.bf16 %v5042_v16, %v5041_v13  ;;  %v14754_v13 = vld [vmem:[#allocation200_spill] sm:$0xff]  ;;  %v4986_v0 = vmax.f32 %v4970_v25, 0.0  ;;  %v14758_v25 = vld [vmem:[#allocation102_spill] sm:$0xff] }
 0x660   :  { %v4927_v3 = vadd.f32 %v4900_v7, %v4806_v6  ;;  %v9086_v9 = vpop.f32.mrb[142].mxu0  ;;  %v5053_v10 = vpack.c.bf16 %v5040_v12, %v5039_v47  ;;  %v5013_v29 = vld [vmem:[#allocation3 + $0x50] sm:$0xff]  ;;  %v4968_v16 = vadd.f32 %v13194_v37, %v14754_v13  ;;  %v4985_v47 = vmax.f32 %v4969_v41, 0.0 }
 0x661   :  { %4945 = vst.msk [vmem:[#allocation3 + $0x70] sm:$0xff] %vm446_vm0, %v4929_v1  ;;  %v4930_v33 = vadd.f32 %v9086_v9, %v4809_v24  ;;  %v4903_v19 = vpop.f32.mrb[143].mxu0  ;;  %v5011_v31 = vld [vmem:[#allocation3 + $0x40] sm:$0xff]  ;;  %v5029_v57 = vadd.f32 %v5013_v29, %v4997_v52  ;;  %5213 = vst.msk [vmem:[#allocation3 + $0x50] sm:$0xff] %vm446_vm0, %v14736_v58  ;;  %v4983_v37 = vmax.f32 %v4967_v17, 0.0  ;;  %v14756_v24 = vld [vmem:[#allocation103_spill] sm:$0xff] }
 0x662   :  { %4943 = vst.msk [vmem:[#allocation3 + $0x60] sm:$0xff] %vm446_vm0, %v4927_v3  ;;  %v4928_v35 = vadd.f32 %v4903_v19, %v4807_v23  ;;  %9095 = vmatprep.mubr.msk.bf16.mxu1 %vm446_vm0, %v5053_v10  ;;  %v5027_v49 = vadd.f32 %v5011_v31, %v4995_v60  ;;  %5211 = vst.msk [vmem:[#allocation3 + $0x40] sm:$0xff] %vm446_vm0, %v14736_v58  ;;  %v5014_v5 = vld [vmem:[#allocation3 + $0x58] sm:$0xff]  ;;  %v4984_v41 = vmax.f32 %v4968_v16, 0.0  ;;  %v14757_v17 = vld [vmem:[#allocation104_spill] sm:$0xff] }
 0x663   :  { %4946 = vst.msk [vmem:[#allocation3 + $0x78] sm:$0xff] %vm446_vm0, %v4930_v33  ;;  %9096 = vmatmul.mubr.msk.bf16.gmra.mrb[132].mxu1 %vm446_vm0, %v5054_v53  ;;  %v5012_v12 = vld [vmem:[#allocation3 + $0x48] sm:$0xff]  ;;  %v5030_v18 = vadd.f32 %v5014_v5, %v4998_v50  ;;  %5214 = vst.msk [vmem:[#allocation3 + $0x58] sm:$0xff] %vm446_vm0, %v14736_v58  ;;  %v5045_v1 = vmax.f32 %v5029_v57, 0.0  ;;  %v5001_v53 = vmul.f32 %v4985_v47, %v14755_v15 }
 0x664   :  { %4944 = vst.msk [vmem:[#allocation3 + $0x68] sm:$0xff] %vm446_vm0, %v4928_v35  ;;  %v5028_v52 = vadd.f32 %v5012_v12, %v4996_v28  ;;  %5212 = vst.msk [vmem:[#allocation3 + $0x48] sm:$0xff] %vm446_vm0, %v14736_v58  ;;  %v5043_v7 = vmax.f32 %v5027_v49, 0.0  ;;  %v4999_v9 = vmul.f32 %v4983_v37, %v14756_v24  ;;  %v5002_v50 = vmul.f32 %v4986_v0, %v14757_v17  ;;  %v8010_v37 = vld [vmem:[%s14113_s9 + $0x2] ss:$0 sm:$0xff]  ;;  %v14808_v24 = vld [vmem:[#allocation93_spill] sm:$0xff] }
 0x665   :  { %v5046_v6 = vmax.f32 %v5030_v18, 0.0  ;;  %v5000_v23 = vmul.f32 %v4984_v41, %v14758_v25 }
 0x666   :  { %v5044_v60 = vmax.f32 %v5028_v52, 0.0 }
 0x667   :  { %v5056_v3 = vpack.c.bf16 %v5046_v6, %v5045_v1 }
 0x668   :  { %v5055_v10 = vpack.c.bf16 %v5044_v60, %v5043_v7  ;;  %v5017_v29 = vld [vmem:[#allocation3 + $0x70] sm:$0xff] }
 0x669   :  { %v5015_v2 = vld [vmem:[#allocation3 + $0x60] sm:$0xff]  ;;  %v5033_v33 = vadd.f32 %v5017_v29, %v5001_v53  ;;  %5217 = vst.msk [vmem:[#allocation3 + $0x70] sm:$0xff] %vm446_vm0, %v14736_v58 }
 0x66a   :  { %9099 = vmatprep.mubr.msk.bf16.mxu1 %vm446_vm0, %v5055_v10  ;;  %v5031_v19 = vadd.f32 %v5015_v2, %v4999_v9  ;;  %5215 = vst.msk [vmem:[#allocation3 + $0x60] sm:$0xff] %vm446_vm0, %v14736_v58  ;;  %v5018_v31 = vld [vmem:[#allocation3 + $0x78] sm:$0xff] }
 0x66b   :  { %9100 = vmatmul.mubr.msk.bf16.gmra.mrb[136].mxu1 %vm446_vm0, %v5056_v3  ;;  %v5016_v57 = vld [vmem:[#allocation3 + $0x68] sm:$0xff]  ;;  %v5034_v28 = vadd.f32 %v5018_v31, %v5002_v50  ;;  %5218 = vst.msk [vmem:[#allocation3 + $0x78] sm:$0xff] %vm446_vm0, %v14736_v58  ;;  %v5049_v16 = vmax.f32 %v5033_v33, 0.0 }
 0x66c   :  { %v5032_v13 = vadd.f32 %v5016_v57, %v5000_v23  ;;  %5216 = vst.msk [vmem:[#allocation3 + $0x68] sm:$0xff] %vm446_vm0, %v14736_v58  ;;  %v5047_v49 = vmax.f32 %v5031_v19, 0.0 }
 0x66d   :  { %v5050_v35 = vmax.f32 %v5034_v28, 0.0 }
 0x66e   :  { %v5048_v5 = vmax.f32 %v5032_v13, 0.0 }
 0x66f   :  { %v5058_v47 = vpack.c.bf16 %v5050_v35, %v5049_v16 }
 0x670   :  { %v5057_v12 = vpack.c.bf16 %v5048_v5, %v5047_v49 }
 0x672   :  { %9103 = vmatprep.mubr.msk.bf16.mxu1 %vm446_vm0, %v5057_v12 }
 0x673   :  { %9104 = vmatmul.mubr.msk.bf16.gmra.mrb[140].mxu1 %vm446_vm0, %v5058_v47 }
 0x72e   :  { %v9093_v18 = vpop.f32.mrb[128].mxu1 }
 0x72f   :  { %v5132_v52 = vpop.f32.mrb[129].mxu1  ;;  %v13304_v1 = vadd.f32 %v9093_v18, %v8010_v37 }
 0x730   :  { %v9094_v0 = vpop.f32.mrb[130].mxu1  ;;  %v13308_v41 = vadd.f32 %v8010_v37, %v5132_v52 }
 0x731   :  { %v13306_v58 = vadd.f32 %v9094_v0, %v8010_v37  ;;  %v5135_v6 = vpop.f32.mrb[131].mxu1 }
 0x732   :  { %v13310_v7 = vadd.f32 %v8010_v37, %v5135_v6 }
 0x733   :  { %v13314_v60 = vpack.c.bf16 %v13306_v58, %v13304_v1 }
 0x734   :  { %v13318_v53 = vpack.c.bf16 %v13310_v7, %v13308_v41 }
 0x736   :  { %v9097_v3 = vpop.f32.mrb[132].mxu1  ;;  %9107 = vmatprep.subr.bf16.mxu0 %v13318_v53 }
 0x737   :  { %v5148_v9 = vpop.f32.mrb[133].mxu1  ;;  %9108 = vmatpush3.bf16.msra.mxu0 %v13318_v53  ;;  %v13323_v29 = vadd.f32 %v9097_v3, %v8010_v37 }
 0x738   :  { %v9098_v10 = vpop.f32.mrb[134].mxu1  ;;  %9109 = vmatprep.subr.bf16.mxu0 %v13314_v60  ;;  %v13327_v33 = vadd.f32 %v8010_v37, %v5148_v9 }
 0x739   :  { %v13325_v50 = vadd.f32 %v9098_v10, %v8010_v37  ;;  %v5151_v2 = vpop.f32.mrb[135].mxu1 }
 0x73a   :  { %v13329_v23 = vadd.f32 %v8010_v37, %v5151_v2 }
 0x73b   :  { %v13333_v19 = vpack.c.bf16 %v13325_v50, %v13323_v29  ;;  %9110 = vmatpush3.bf16.msra.mxu0 %v13314_v60 }
 0x73c   :  { %v13338_v31 = vpack.c.bf16 %v13329_v23, %v13327_v33 }
 0x73e   :  { %v9101_v57 = vpop.f32.mrb[136].mxu1  ;;  %9111 = vmatprep.subr.bf16.mxu0 %v13338_v31 }
 0x73f   :  { %v5164_v28 = vpop.f32.mrb[137].mxu1  ;;  %9112 = vmatpush3.bf16.msra.mxu0 %v13338_v31  ;;  %v13343_v16 = vadd.f32 %v9101_v57, %v8010_v37 }
 0x740   :  { %v9102_v13 = vpop.f32.mrb[138].mxu1  ;;  %9113 = vmatprep.subr.bf16.mxu0 %v13333_v19  ;;  %v13347_v5 = vadd.f32 %v8010_v37, %v5164_v28 }
 0x741   :  { %v13345_v35 = vadd.f32 %v9102_v13, %v8010_v37  ;;  %v5167_v49 = vpop.f32.mrb[139].mxu1 }
 0x742   :  { %v13349_v47 = vadd.f32 %v8010_v37, %v5167_v49  ;;  %v14763_v49 = vld [vmem:[#allocation82_spill] sm:$0xff] }
 0x743   :  { %v13353_v12 = vpack.c.bf16 %v13345_v35, %v13343_v16  ;;  %9114 = vmatpush3.bf16.msra.mxu0 %v13333_v19  ;;  %vm5303_vm6 = vcmp.eq.s32.totalorder %v14466_v46, %v14763_v49  ;;  %v14769_v49 = vld [vmem:[#allocation31_spill] sm:$0xff] }
 0x744   :  { %v13358_v18 = vpack.c.bf16 %v13349_v47, %v13347_v5  ;;  %vm5309_vm14 = vcmp.eq.s32.totalorder %v14466_v46, %v14769_v49  ;;  %v14775_v49 = vld [vmem:[#allocation41_spill] sm:$0xff] }
 0x746   :  { %v9105_v52 = vpop.f32.mrb[140].mxu1  ;;  %9115 = vmatprep.subr.bf16.mxu0 %v13358_v18 }
 0x747   :  { %v5180_v0 = vpop.f32.mrb[141].mxu1  ;;  %9116 = vmatpush3.bf16.msra.mxu0 %v13358_v18  ;;  %v13363_v3 = vadd.f32 %v9105_v52, %v8010_v37  ;;  %v14765_v52 = vld [vmem:[#allocation79_spill] sm:$0xff] }
 0x748   :  { %v9106_v6 = vpop.f32.mrb[142].mxu1  ;;  %9117 = vmatprep.subr.bf16.mxu0 %v13353_v12  ;;  %v13367_v2 = vadd.f32 %v8010_v37, %v5180_v0  ;;  %vm5305_vm8 = vcmp.eq.s32.totalorder %v14466_v46, %v14765_v52  ;;  %v14766_v0 = vld [vmem:[#allocation78_spill] sm:$0xff]  ;;  %v14771_v52 = vld [vmem:[#allocation29_spill] sm:$0xff] }
 0x749   :  { %14759 = vst [vmem:[#allocation106_spill] sm:$0xff] %v13363_v3  ;;  %v13365_v9 = vadd.f32 %v9106_v6, %v8010_v37  ;;  %v5183_v10 = vpop.f32.mrb[143].mxu1  ;;  %vm5304_vm9 = vcmp.eq.s32.totalorder %v14466_v46, %v14766_v0  ;;  %v14767_v6 = vld [vmem:[#allocation4_spill] sm:$0xff]  ;;  %vm5311_vm4 = vcmp.eq.s32.totalorder %v14466_v46, %v14771_v52  ;;  %v14772_v0 = vld [vmem:[#allocation46_spill] sm:$0xff]  ;;  %v14777_v52 = vld [vmem:[#allocation51_spill] sm:$0xff] }
 0x74a   :  { %14761 = vst [vmem:[#allocation108_spill] sm:$0xff] %v13367_v2  ;;  %v13369_v57 = vadd.f32 %v8010_v37, %v5183_v10  ;;  %v14764_v37 = vld [vmem:[#allocation6_spill] sm:$0xff]  ;;  %vm8039_vm11 = vmpackc.low %vm5305_vm8, %vm5304_vm9  ;;  %vm5307_vm12 = vcmp.eq.s32.totalorder %v14466_v46, %v14767_v6  ;;  %vm5310_vm5 = vcmp.eq.s32.totalorder %v14466_v46, %v14772_v0  ;;  %v14773_v6 = vld [vmem:[#allocation43_spill] sm:$0xff] }
 0x74b   :  { %14760 = vst [vmem:[#allocation107_spill] sm:$0xff] %v13365_v9  ;;  %v13373_v28 = vpack.c.bf16 %v13365_v9, %v13363_v3  ;;  %9118 = vmatpush3.bf16.msra.mxu0 %v13353_v12  ;;  %vm5302_vm7 = vcmp.eq.s32.totalorder %v14466_v46, %v14764_v37  ;;  %v14768_v10 = vld [vmem:[#allocation34_spill] sm:$0xff]  ;;  %v14770_v37 = vld [vmem:[#allocation33_spill] sm:$0xff]  ;;  %vm8045_vm8 = vmpackc.low %vm5311_vm4, %vm5310_vm5 }
 0x74c   :  { %14762 = vst [vmem:[#allocation109_spill] sm:$0xff] %v13369_v57  ;;  %v13378_v13 = vpack.c.bf16 %v13369_v57, %v13367_v2  ;;  %vm8037_vm10 = vmpackc.low %vm5303_vm6, %vm5302_vm7  ;;  %vm5306_vm13 = vcmp.eq.s32.totalorder %v14466_v46, %v14768_v10  ;;  %vm5308_vm15 = vcmp.eq.s32.totalorder %v14466_v46, %v14770_v37  ;;  %vm5313_vm6 = vcmp.eq.s32.totalorder %v14466_v46, %v14773_v6  ;;  %v14774_v10 = vld [vmem:[#allocation45_spill] sm:$0xff]  ;;  %v14778_v0 = vld [vmem:[#allocation55_spill] sm:$0xff] }
 0x74d   :  { %vm8041_vm2 = vmpackc.low %vm5307_vm12, %vm5306_vm13  ;;  %vm5312_vm7 = vcmp.eq.s32.totalorder %v14466_v46, %v14774_v10  ;;  %v14776_v37 = vld [vmem:[#allocation49_spill] sm:$0xff]  ;;  %vm5876_vm12 = vcmp.eq.s32.totalorder %v14466_v46, %v14777_v52  ;;  %vm5875_vm13 = vcmp.eq.s32.totalorder %v14466_v46, %v14778_v0  ;;  %v14780_v10 = vld [vmem:[#allocation158_spill] sm:$0xff] }
 0x74e   :  { %9119 = vmatprep.subr.bf16.mxu0 %v13378_v13  ;;  %vm8043_vm3 = vmpackc.low %vm5309_vm14, %vm5308_vm15  ;;  %v14779_v6 = vld [vmem:[#allocation53_spill] sm:$0xff]  ;;  %v14783_v52 = vld [vmem:[#allocation159_spill] sm:$0xff] }
 0x74f   :  { %9120 = vmatpush3.bf16.msra.mxu0 %v13378_v13  ;;  %vm8047_vm9 = vmpackc.low %vm5313_vm6, %vm5312_vm7  ;;  %v14784_v0 = vld [vmem:[#allocation160_spill] sm:$0xff]  ;;  %v14810_v9 = vld [vmem:[#allocation81_spill] sm:$0xff] }
 0x750   :  { %9121 = vmatprep.subr.bf16.mxu0 %v13373_v28  ;;  %vm8100_vm15 = vmpackc.low %vm5876_vm12, %vm5875_vm13  ;;  %v14809_v57 = vld [vmem:[#allocation80_spill] sm:$0xff]  ;;  %v5362_v2 = vld [vmem:[#allocation2 + $0x330] sm:$0xff] }
 0x751   :  { %v5363_v3 = vld [vmem:[#allocation2 + $0x338] sm:$0xff] }
 0x753   :  { %9122 = vmatpush3.bf16.msra.mxu0 %v13373_v28 }
 0x754   :  { %9171 = vmatprep.subr.bf16.mxu0 %v13318_v53 }
 0x756   :  { %9124 = vmatmul.mubr.msk.bf16.vlgmr.msra.gmra.mrb[144].mxu0 %vm8037_vm10, %v14287_v62  ;;  %vm5315_vm10 = vcmp.eq.s32.totalorder %v14466_v46, %v14775_v49  ;;  %v14781_v49 = vld [vmem:[#allocation54_spill] sm:$0xff] }
 0x757   :  { %9127 = vmatprep.mubr.msk.bf16.mxu0 %vm8039_vm11, %v14287_v62  ;;  %9172 = vmatpush3.bf16.msra.mxu0 %v13318_v53  ;;  %vm5314_vm11 = vcmp.eq.s32.totalorder %v14466_v46, %v14776_v37  ;;  %vm5880_vm4 = vcmp.eq.s32.totalorder %v14466_v46, %v14781_v49  ;;  %v14782_v37 = vld [vmem:[#allocation52_spill] sm:$0xff]  ;;  %v14788_v49 = vld [vmem:[#allocation162_spill] sm:$0xff] }
 0x758   :  { %9173 = vmatprep.subr.bf16.mxu0 %v13314_v60  ;;  %vm8049_vm14 = vmpackc.low %vm5315_vm10, %vm5314_vm11  ;;  %vm5879_vm5 = vcmp.eq.s32.totalorder %v14466_v46, %v14782_v37  ;;  %v14789_v37 = vld [vmem:[#allocation58_spill] sm:$0xff] }
 0x759   :  { %vm8104_vm7 = vmpackc.low %vm5880_vm4, %vm5879_vm5 }
 0x75b   :  { %9174 = vmatpush3.bf16.msra.mxu0 %v13314_v60 }
 0x75c   :  { %9175 = vmatprep.subr.bf16.mxu0 %v13338_v31 }
 0x75e   :  { %9128 = vmatmul.mubr.msk.bf16.gmra.mrb[148].mxu0 %vm8041_vm2, %v14287_v62  ;;  %vm5878_vm2 = vcmp.eq.s32.totalorder %v14466_v46, %v14779_v6  ;;  %v14785_v6 = vld [vmem:[#allocation59_spill] sm:$0xff] }
 0x75f   :  { %9131 = vmatprep.mubr.msk.bf16.mxu0 %vm8043_vm3, %v14287_v62  ;;  %9176 = vmatpush3.bf16.msra.mxu0 %v13338_v31  ;;  %vm5877_vm3 = vcmp.eq.s32.totalorder %v14466_v46, %v14780_v10  ;;  %vm5884_vm10 = vcmp.eq.s32.totalorder %v14466_v46, %v14785_v6  ;;  %v14786_v10 = vld [vmem:[#allocation57_spill] sm:$0xff]  ;;  %v14796_v6 = vld [vmem:[#allocation166_spill] sm:$0xff] }
 0x760   :  { %9177 = vmatprep.subr.bf16.mxu0 %v13333_v19  ;;  %vm8102_vm6 = vmpackc.low %vm5878_vm2, %vm5877_vm3  ;;  %vm5883_vm11 = vcmp.eq.s32.totalorder %v14466_v46, %v14786_v10  ;;  %vm5888_vm2 = vcmp.eq.s32.totalorder %v14466_v46, %v14789_v37  ;;  %v14797_v10 = vld [vmem:[#allocation64_spill] sm:$0xff]  ;;  %v14802_v37 = vld [vmem:[#allocation69_spill] sm:$0xff] }
 0x761   :  { %vm8108_vm13 = vmpackc.low %vm5884_vm10, %vm5883_vm11 }
 0x763   :  { %9178 = vmatpush3.bf16.msra.mxu0 %v13333_v19 }
 0x764   :  { %9179 = vmatprep.subr.bf16.mxu0 %v13358_v18 }
 0x766   :  { %9132 = vmatmul.mubr.msk.bf16.gmra.mrb[152].mxu0 %vm8045_vm8, %v14287_v62  ;;  %vm5882_vm8 = vcmp.eq.s32.totalorder %v14466_v46, %v14783_v52  ;;  %v14792_v52 = vld [vmem:[#allocation164_spill] sm:$0xff] }
 0x767   :  { %9135 = vmatprep.mubr.msk.bf16.mxu0 %vm8047_vm9, %v14287_v62  ;;  %9180 = vmatpush3.bf16.msra.mxu0 %v13358_v18  ;;  %vm5881_vm9 = vcmp.eq.s32.totalorder %v14466_v46, %v14784_v0  ;;  %v14793_v0 = vld [vmem:[#allocation65_spill] sm:$0xff] }
 0x768   :  { %9181 = vmatprep.subr.bf16.mxu0 %v13353_v12  ;;  %vm8106_vm12 = vmpackc.low %vm5882_vm8, %vm5881_vm9  ;;  %vm6451_vm8 = vcmp.eq.s32.totalorder %v14466_v46, %v14793_v0 }
 0x76b   :  { %9182 = vmatpush3.bf16.msra.mxu0 %v13353_v12 }
 0x76c   :  { %9183 = vmatprep.subr.bf16.mxu0 %v13378_v13 }
 0x76e   :  { %9136 = vmatmul.mubr.msk.bf16.gmra.mrb[156].mxu0 %vm8049_vm14, %v14287_v62 }
 0x76f   :  { %9184 = vmatpush3.bf16.msra.mxu0 %v13378_v13  ;;  %9187 = vmatprep.mubr.msk.bf16.mxu0 %vm8100_vm15, %v14287_v62  ;;  %vm5885_vm15 = vcmp.eq.s32.totalorder %v14466_v46, %v14788_v49  ;;  %v14801_v49 = vld [vmem:[#allocation73_spill] sm:$0xff] }
 0x770   :  { %9185 = vmatprep.subr.bf16.mxu0 %v13373_v28 }
 0x773   :  { %9186 = vmatpush3.bf16.msra.mxu0 %v13373_v28 }
 0x774   :  { %9235 = vmatprep.subr.bf16.mxu0 %v13318_v53 }
 0x776   :  { %9188 = vmatmul.mubr.msk.bf16.vlgmr.msra.gmra.mrb[160].mxu0 %vm8102_vm6, %v14287_v62 }
 0x777   :  { %9191 = vmatprep.mubr.msk.bf16.mxu0 %vm8104_vm7, %v14287_v62  ;;  %9236 = vmatpush3.bf16.msra.mxu0 %v13318_v53  ;;  %v14787_v53 = vld [vmem:[#allocation161_spill] sm:$0xff]  ;;  %vm5889_vm7 = vcmp.eq.s32.totalorder %v14466_v46, %v14792_v52  ;;  %v14806_v52 = vld [vmem:[#allocation68_spill] sm:$0xff] }
 0x778   :  { %9237 = vmatprep.subr.bf16.mxu0 %v13314_v60  ;;  %vm5886_vm14 = vcmp.eq.s32.totalorder %v14466_v46, %v14787_v53  ;;  %v14800_v53 = vld [vmem:[#allocation168_spill] sm:$0xff] }
 0x779   :  { %vm8110_vm4 = vmpackc.low %vm5886_vm14, %vm5885_vm15  ;;  %vm6455_vm14 = vcmp.eq.s32.totalorder %v14466_v46, %v14797_v10 }
 0x77b   :  { %9238 = vmatpush3.bf16.msra.mxu0 %v13314_v60  ;;  %v14790_v60 = vld [vmem:[#allocation56_spill] sm:$0xff] }
 0x77c   :  { %9239 = vmatprep.subr.bf16.mxu0 %v13338_v31  ;;  %vm5887_vm3 = vcmp.eq.s32.totalorder %v14466_v46, %v14790_v60  ;;  %v14804_v60 = vld [vmem:[#allocation170_spill] sm:$0xff] }
 0x77d   :  { %vm8112_vm5 = vmpackc.low %vm5888_vm2, %vm5887_vm3 }
 0x77e   :  { %9192 = vmatmul.mubr.msk.bf16.gmra.mrb[164].mxu0 %vm8106_vm12, %v14287_v62 }
 0x77f   :  { %9195 = vmatprep.mubr.msk.bf16.mxu0 %vm8108_vm13, %v14287_v62  ;;  %9240 = vmatpush3.bf16.msra.mxu0 %v13338_v31  ;;  %v14791_v31 = vld [vmem:[#allocation163_spill] sm:$0xff]  ;;  %vm6452_vm13 = vcmp.eq.s32.totalorder %v14466_v46, %v14796_v6 }
 0x780   :  { %9241 = vmatprep.subr.bf16.mxu0 %v13333_v19  ;;  %vm5890_vm6 = vcmp.eq.s32.totalorder %v14466_v46, %v14791_v31  ;;  %v14805_v31 = vld [vmem:[#allocation71_spill] sm:$0xff] }
 0x781   :  { %vm8114_vm10 = vmpackc.low %vm5890_vm6, %vm5889_vm7  ;;  %vm6459_vm6 = vcmp.eq.s32.totalorder %v14466_v46, %v14801_v49  ;;  %vm6458_vm7 = vcmp.eq.s32.totalorder %v14466_v46, %v14802_v37 }
 0x783   :  { %9242 = vmatpush3.bf16.msra.mxu0 %v13333_v19  ;;  %v14794_v19 = vld [vmem:[#allocation63_spill] sm:$0xff] }
 0x784   :  { %9243 = vmatprep.subr.bf16.mxu0 %v13358_v18  ;;  %vm6450_vm9 = vcmp.eq.s32.totalorder %v14466_v46, %v14794_v19  ;;  %v13532_v19 = vld [vmem:[%s14115_s4] ss:$0 sm:$0xff] }
 0x785   :  { %vm8165_vm11 = vmpackc.low %vm6451_vm8, %vm6450_vm9 }
 0x786   :  { %9196 = vmatmul.mubr.msk.bf16.gmra.mrb[168].mxu0 %vm8110_vm4, %v14287_v62  ;;  %vm8173_vm9 = vmpackc.low %vm6459_vm6, %vm6458_vm7  ;;  %vm5589_vm6 = vcmp.eq.s32.totalorder %v11486_v39, %v13532_v19  ;;  %vm5590_vm7 = vcmp.eq.s32.totalorder %v11489_v51, %v13532_v19 }
 0x787   :  { %9199 = vmatprep.mubr.msk.bf16.mxu0 %vm8112_vm5, %v14287_v62  ;;  %9244 = vmatpush3.bf16.msra.mxu0 %v13358_v18  ;;  %v14795_v18 = vld [vmem:[#allocation165_spill] sm:$0xff]  ;;  %vm6456_vm5 = vcmp.eq.s32.totalorder %v14466_v46, %v14800_v53  ;;  %v5359_v53 = vld [vmem:[#allocation2 + $0x318] sm:$0xff] }
 0x788   :  { %9245 = vmatprep.subr.bf16.mxu0 %v13353_v12  ;;  %vm6453_vm12 = vcmp.eq.s32.totalorder %v14466_v46, %v14795_v18 }
 0x789   :  { %vm8167_vm2 = vmpackc.low %vm6453_vm12, %vm6452_vm13  ;;  %vm6463_vm12 = vcmp.eq.s32.totalorder %v14466_v46, %v14805_v31  ;;  %vm6462_vm13 = vcmp.eq.s32.totalorder %v14466_v46, %v14806_v52  ;;  %v5357_v31 = vld [vmem:[#allocation2 + $0x308] sm:$0xff] }
 0x78b   :  { %9246 = vmatpush3.bf16.msra.mxu0 %v13353_v12  ;;  %v14798_v12 = vld [vmem:[#allocation62_spill] sm:$0xff] }
 0x78c   :  { %9247 = vmatprep.subr.bf16.mxu0 %v13378_v13  ;;  %vm6454_vm15 = vcmp.eq.s32.totalorder %v14466_v46, %v14798_v12  ;;  %v5356_v12 = vld [vmem:[#allocation2 + $0x300] sm:$0xff] }
 0x78d   :  { %vm8169_vm3 = vmpackc.low %vm6455_vm14, %vm6454_vm15 }
 0x78e   :  { %9200 = vmatmul.mubr.msk.bf16.gmra.mrb[172].mxu0 %vm8114_vm10, %v14287_v62  ;;  %vm8177_vm15 = vmpackc.low %vm6463_vm12, %vm6462_vm13  ;;  %vm5593_vm12 = vcmp.eq.s32.totalorder %v11555_v44, %v13532_v19  ;;  %vm5594_vm13 = vcmp.eq.s32.totalorder %v11558_v40, %v13532_v19 }
 0x78f   :  { %9248 = vmatpush3.bf16.msra.mxu0 %v13378_v13  ;;  %9251 = vmatprep.mubr.msk.bf16.mxu0 %vm8165_vm11, %v14287_v62  ;;  %v14799_v13 = vld [vmem:[#allocation167_spill] sm:$0xff]  ;;  %vm6460_vm11 = vcmp.eq.s32.totalorder %v14466_v46, %v14804_v60 }
 0x790   :  { %9249 = vmatprep.subr.bf16.mxu0 %v13373_v28  ;;  %vm6457_vm4 = vcmp.eq.s32.totalorder %v14466_v46, %v14799_v13 }
 0x791   :  { %vm8171_vm8 = vmpackc.low %vm6457_vm4, %vm6456_vm5  ;;  %vm5588_vm5 = vcmp.eq.s32.totalorder %v11481_v32, %v13532_v19 }
 0x793   :  { %9250 = vmatpush3.bf16.msra.mxu0 %v13373_v28  ;;  %v14803_v28 = vld [vmem:[#allocation169_spill] sm:$0xff] }
 0x794   :  { %vm6461_vm10 = vcmp.eq.s32.totalorder %v14466_v46, %v14803_v28  ;;  %v5358_v46 = vld [vmem:[#allocation2 + $0x310] sm:$0xff] }
 0x795   :  { %vm8175_vm14 = vmpackc.low %vm6461_vm10, %vm6460_vm11  ;;  %vm5591_vm10 = vcmp.eq.s32.totalorder %v11534_v27, %v13532_v19  ;;  %vm5592_vm11 = vcmp.eq.s32.totalorder %v11552_v36, %v13532_v19 }
 0x796   :  { %9252 = vmatmul.mubr.msk.bf16.vlgmr.msra.gmra.mrb[176].mxu0 %vm8167_vm2, %v14287_v62  ;;  %vm5585_vm2 = vcmp.eq.s32.totalorder %v11144_v34, %v13532_v19 }
 0x797   :  { %9255 = vmatprep.mubr.msk.bf16.mxu0 %vm8169_vm3, %v14287_v62  ;;  %vm5586_vm3 = vcmp.eq.s32.totalorder %v11147_v22, %v13532_v19 }
 0x798   :  { %vm8068_vm4 = vmpackc.low %vm5586_vm3, %vm5585_vm2  ;;  %vm5595_vm2 = vcmp.eq.s32.totalorder %v11610_v59, %v13532_v19  ;;  %vm5596_vm3 = vcmp.eq.s32.totalorder %v11628_v56, %v13532_v19 }
 0x799   :  { %9155 = vmatprep.mubr.msk.bf16.mxu1 %vm8068_vm4, %v14287_v62  ;;  %vm5597_vm4 = vcmp.eq.s32.totalorder %v11631_v11, %v13532_v19 }
 0x79e   :  { %9256 = vmatmul.mubr.msk.bf16.gmra.mrb[180].mxu0 %vm8171_vm8, %v14287_v62 }
 0x79f   :  { %9259 = vmatprep.mubr.msk.bf16.mxu0 %vm8173_vm9, %v14287_v62  ;;  %vm8072_vm9 = vmpackc.low %vm5590_vm7, %vm5589_vm6  ;;  %vm5599_vm7 = vcmp.eq.s32.totalorder %v11701_v55, %v13532_v19 }
 0x7a6   :  { %9260 = vmatmul.mubr.msk.bf16.gmra.mrb[184].mxu0 %vm8175_vm14, %v14287_v62  ;;  %vm8074_vm14 = vmpackc.low %vm5592_vm11, %vm5591_vm10 }
 0x7a7   :  { %9263 = vmatprep.mubr.msk.bf16.mxu0 %vm8177_vm15, %v14287_v62  ;;  %vm8076_vm15 = vmpackc.low %vm5594_vm13, %vm5593_vm12 }
 0x7ae   :  { %9264 = vmatmul.mubr.msk.bf16.gmra.mrb[188].mxu0 %vm12348_vm1, %v14287_v62  ;;  %vm5587_vm1 = vcmp.eq.s32.totalorder %v11478_v63, %v13532_v19 }
 0x7af   :  { %vm8070_vm8 = vmpackc.low %vm5588_vm5, %vm5587_vm1  ;;  %vm5598_vm1 = vcmp.eq.s32.totalorder %v11634_v30, %v13532_v19 }
 0x7b0   :  { %vm8078_vm5 = vmpackc.low %vm5596_vm3, %vm5595_vm2 }
 0x7b1   :  { %vm8080_vm6 = vmpackc.low %vm5598_vm1, %vm5597_vm4 }
 0x829   :  { %v9125_v18 = vpop.f32.mrb[144].mxu0 }
 0x82a   :  { %v5415_v6 = vadd.f32 %v9125_v18, %v5358_v46  ;;  %v5406_v10 = vpop.f32.mrb[145].mxu0  ;;  %v14811_v46 = vld [vmem:[#allocation5_spill] sm:$0xff] }
 0x82b   :  { %v5407_v13 = vadd.f32 %v5406_v10, %v5356_v12  ;;  %v9126_v49 = vpop.f32.mrb[146].mxu0 }
 0x82c   :  { %v5471_v37 = vmax.f32 %v5415_v6, 0.0  ;;  %v5418_v28 = vadd.f32 %v9126_v49, %v5359_v53  ;;  %v5409_v60 = vpop.f32.mrb[147].mxu0  ;;  %v5360_v6 = vld [vmem:[#allocation2 + $0x320] sm:$0xff] }
 0x82d   :  { %v5469_v52 = vmax.f32 %v5407_v13, 0.0  ;;  %v5410_v0 = vadd.f32 %v5409_v60, %v5357_v31 }
 0x82e   :  { %v5472_v25 = vmax.f32 %v5418_v28, 0.0  ;;  %v5567_v15 = vmul.f32 %v14808_v24, %v5471_v37  ;;  %v5361_v24 = vld [vmem:[#allocation2 + $0x328] sm:$0xff] }
 0x82f   :  { %v5470_v17 = vmax.f32 %v5410_v0, 0.0  ;;  %v5565_v21 = vmul.f32 %v14810_v9, %v5469_v52  ;;  %v14813_v52 = vld [vmem:[#allocation88_spill] sm:$0xff] }
 0x830   :  { %v5568_v43 = vmul.f32 %v14809_v57, %v5472_v25  ;;  %v14812_v57 = vld [vmem:[#allocation101_spill] sm:$0xff] }
 0x831   :  { %v5566_v18 = vmul.f32 %v14811_v46, %v5470_v17  ;;  %v9129_v10 = vpop.f32.mrb[148].mxu0 }
 0x832   :  { %v5431_v12 = vadd.f32 %v9129_v10, %v5362_v2  ;;  %v5422_v20 = vpop.f32.mrb[149].mxu0  ;;  %v5658_v53 = vpack.c.bf16 %v5568_v43, %v5567_v15  ;;  %v14814_v43 = vld [vmem:[#allocation92_spill] sm:$0xff]  ;;  %v14815_v15 = vld [vmem:[#allocation90_spill] sm:$0xff] }
 0x833   :  { %v5423_v49 = vadd.f32 %v5422_v20, %v5360_v6  ;;  %v9130_v13 = vpop.f32.mrb[150].mxu0  ;;  %v5657_v60 = vpack.c.bf16 %v5566_v18, %v5565_v21  ;;  %v5366_v21 = vld [vmem:[#allocation2 + $0x350] sm:$0xff]  ;;  %v5364_v6 = vld [vmem:[#allocation2 + $0x340] sm:$0xff] }
 0x834   :  { %v5475_v28 = vmax.f32 %v5431_v12, 0.0  ;;  %v5434_v31 = vadd.f32 %v9130_v13, %v5363_v3  ;;  %v5425_v0 = vpop.f32.mrb[151].mxu0 }
 0x835   :  { %v5473_v37 = vmax.f32 %v5423_v49, 0.0  ;;  %v5426_v25 = vadd.f32 %v5425_v0, %v5361_v24  ;;  %9139 = vmatprep.subr.bf16.mxu1 %v5657_v60 }
 0x836   :  { %v5476_v9 = vmax.f32 %v5434_v31, 0.0  ;;  %9140 = vmatpush3.bf16.msra.mxu1 %v5657_v60  ;;  %v5571_v2 = vmul.f32 %v14812_v57, %v5475_v28  ;;  %v5367_v31 = vld [vmem:[#allocation2 + $0x358] sm:$0xff]  ;;  %v5365_v57 = vld [vmem:[#allocation2 + $0x348] sm:$0xff] }
 0x837   :  { %v5474_v17 = vmax.f32 %v5426_v25, 0.0  ;;  %9141 = vmatprep.subr.bf16.mxu1 %v5658_v53  ;;  %v5569_v20 = vmul.f32 %v14814_v43, %v5473_v37  ;;  %v14816_v43 = vld [vmem:[#allocation173_spill] sm:$0xff] }
 0x838   :  { %v5572_v46 = vmul.f32 %v14813_v52, %v5476_v9 }
 0x839   :  { %v5570_v10 = vmul.f32 %v14815_v15, %v5474_v17  ;;  %v9133_v18 = vpop.f32.mrb[152].mxu0 }
 0x83a   :  { %v5447_v3 = vadd.f32 %v9133_v18, %v5366_v21  ;;  %v5438_v12 = vpop.f32.mrb[153].mxu0  ;;  %9142 = vmatpush3.bf16.msra.mxu1 %v5658_v53  ;;  %v5660_v49 = vpack.c.bf16 %v5572_v46, %v5571_v2  ;;  %v14817_v21 = vld [vmem:[#allocation172_spill] sm:$0xff]  ;;  %v14818_v2 = vld [vmem:[#allocation171_spill] sm:$0xff]  ;;  %v14819_v18 = vld [vmem:[#allocation98_spill] sm:$0xff] }
 0x83b   :  { %v5439_v13 = vadd.f32 %v5438_v12, %v5364_v6  ;;  %v9134_v60 = vpop.f32.mrb[154].mxu0  ;;  %v5659_v0 = vpack.c.bf16 %v5570_v10, %v5569_v20  ;;  %v5370_v20 = vld [vmem:[#allocation2 + $0x370] sm:$0xff] }
 0x83c   :  { %v5479_v24 = vmax.f32 %v5447_v3, 0.0  ;;  %v5450_v25 = vadd.f32 %v9134_v60, %v5367_v31  ;;  %v5441_v28 = vpop.f32.mrb[155].mxu0  ;;  %v5368_v31 = vld [vmem:[#allocation2 + $0x360] sm:$0xff] }
 0x83d   :  { %v5477_v9 = vmax.f32 %v5439_v13, 0.0  ;;  %v5442_v52 = vadd.f32 %v5441_v28, %v5365_v57  ;;  %9143 = vmatprep.subr.bf16.mxu1 %v5659_v0 }
 0x83e   :  { %v5480_v37 = vmax.f32 %v5450_v25, 0.0  ;;  %9144 = vmatpush3.bf16.msra.mxu1 %v5659_v0  ;;  %v5575_v15 = vmul.f32 %v14816_v43, %v5479_v24  ;;  %v5371_v25 = vld [vmem:[#allocation2 + $0x378] sm:$0xff]  ;;  %v5369_v43 = vld [vmem:[#allocation2 + $0x368] sm:$0xff] }
 0x83f   :  { %v5478_v17 = vmax.f32 %v5442_v52, 0.0  ;;  %9145 = vmatprep.subr.bf16.mxu1 %v5660_v49  ;;  %v5573_v46 = vmul.f32 %v14818_v2, %v5477_v9  ;;  %v14820_v2 = vld [vmem:[#allocation11_spill] sm:$0xff] }
 0x840   :  { %v5576_v53 = vmul.f32 %v14817_v21, %v5480_v37 }
 0x841   :  { %v5574_v12 = vmul.f32 %v14819_v18, %v5478_v17  ;;  %v9137_v10 = vpop.f32.mrb[156].mxu0 }
 0x842   :  { %v5463_v3 = vadd.f32 %v9137_v10, %v5370_v20  ;;  %v5454_v6 = vpop.f32.mrb[157].mxu0  ;;  %9146 = vmatpush3.bf16.msra.mxu1 %v5660_v49  ;;  %v5662_v13 = vpack.c.bf16 %v5576_v53, %v5575_v15  ;;  %v14821_v20 = vld [vmem:[#allocation9_spill] sm:$0xff]  ;;  %v14822_v15 = vld [vmem:[#allocation175_spill] sm:$0xff]  ;;  %v14823_v10 = vld [vmem:[#allocation174_spill] sm:$0xff] }
 0x843   :  { %v5455_v60 = vadd.f32 %v5454_v6, %v5368_v31  ;;  %v9138_v0 = vpop.f32.mrb[158].mxu0  ;;  %v5661_v28 = vpack.c.bf16 %v5574_v12, %v5573_v46  ;;  %v5933_v46 = vld [vmem:[#allocation2 + $0x390] sm:$0xff] }
 0x844   :  { %v5483_v57 = vmax.f32 %v5463_v3, 0.0  ;;  %v5466_v52 = vadd.f32 %v9138_v0, %v5371_v25  ;;  %v5457_v24 = vpop.f32.mrb[159].mxu0 }
 0x845   :  { %v5481_v37 = vmax.f32 %v5455_v60, 0.0  ;;  %v5458_v21 = vadd.f32 %v5457_v24, %v5369_v43  ;;  %9147 = vmatprep.subr.bf16.mxu1 %v5661_v28  ;;  %v5931_v60 = vld [vmem:[#allocation2 + $0x380] sm:$0xff] }
 0x846   :  { %v5484_v9 = vmax.f32 %v5466_v52, 0.0  ;;  %9148 = vmatpush3.bf16.msra.mxu1 %v5661_v28  ;;  %v5579_v18 = vmul.f32 %v14820_v2, %v5483_v57  ;;  %v5934_v52 = vld [vmem:[#allocation2 + $0x398] sm:$0xff]  ;;  %v5932_v2 = vld [vmem:[#allocation2 + $0x388] sm:$0xff] }
 0x847   :  { %v5482_v17 = vmax.f32 %v5458_v21, 0.0  ;;  %9149 = vmatprep.subr.bf16.mxu1 %v5662_v13  ;;  %v5577_v53 = vmul.f32 %v14822_v15, %v5481_v37 }
 0x848   :  { %v5580_v49 = vmul.f32 %v14821_v20, %v5484_v9 }
 0x849   :  { %v5578_v6 = vmul.f32 %v14823_v10, %v5482_v17  ;;  %v9189_v12 = vpop.f32.mrb[160].mxu0 }
 0x84a   :  { %v5990_v3 = vadd.f32 %v9189_v12, %v5933_v46  ;;  %9150 = vmatpush3.bf16.msra.mxu1 %v5662_v13  ;;  %v5981_v31 = vpop.f32.mrb[161].mxu0  ;;  %v5664_v25 = vpack.c.bf16 %v5580_v49, %v5579_v18  ;;  %v14824_v13 = vld [vmem:[#allocation19_spill] sm:$0xff]  ;;  %v14825_v49 = vld [vmem:[#allocation17_spill] sm:$0xff]  ;;  %v5937_v12 = vld [vmem:[#allocation2 + $0x3b0] sm:$0xff] }
 0x84b   :  { %v5982_v0 = vadd.f32 %v5981_v31, %v5931_v60  ;;  %v9190_v28 = vpop.f32.mrb[162].mxu0  ;;  %v5663_v24 = vpack.c.bf16 %v5578_v6, %v5577_v53  ;;  %v14826_v53 = vld [vmem:[#allocation12_spill] sm:$0xff]  ;;  %v14827_v6 = vld [vmem:[#allocation10_spill] sm:$0xff] }
 0x84c   :  { %v6046_v43 = vmax.f32 %v5990_v3, 0.0  ;;  %v5993_v21 = vadd.f32 %v9190_v28, %v5934_v52  ;;  %v5984_v57 = vpop.f32.mrb[163].mxu0 }
 0x84d   :  { %v6044_v9 = vmax.f32 %v5982_v0, 0.0  ;;  %v5985_v20 = vadd.f32 %v5984_v57, %v5932_v2  ;;  %9151 = vmatprep.subr.bf16.mxu1 %v5663_v24  ;;  %v5935_v0 = vld [vmem:[#allocation2 + $0x3a0] sm:$0xff] }
 0x84e   :  { %v6047_v37 = vmax.f32 %v5993_v21, 0.0  ;;  %9152 = vmatpush3.bf16.msra.mxu1 %v5663_v24  ;;  %v6142_v18 = vmul.f32 %v14824_v13, %v6046_v43  ;;  %v5938_v24 = vld [vmem:[#allocation2 + $0x3b8] sm:$0xff] }
 0x84f   :  { %v6045_v17 = vmax.f32 %v5985_v20, 0.0  ;;  %9153 = vmatprep.subr.bf16.mxu1 %v5664_v25  ;;  %v6140_v10 = vmul.f32 %v14826_v53, %v6044_v9  ;;  %v5936_v20 = vld [vmem:[#allocation2 + $0x3a8] sm:$0xff] }
 0x850   :  { %v6143_v15 = vmul.f32 %v14825_v49, %v6047_v37 }
 0x851   :  { %v6141_v46 = vmul.f32 %v14827_v6, %v6045_v17  ;;  %v9193_v3 = vpop.f32.mrb[164].mxu0 }
 0x852   :  { %v6006_v31 = vadd.f32 %v9193_v3, %v5937_v12  ;;  %9154 = vmatpush3.bf16.msra.mxu1 %v5664_v25  ;;  %v5997_v60 = vpop.f32.mrb[165].mxu0  ;;  %v6233_v52 = vpack.c.bf16 %v6143_v15, %v6142_v18  ;;  %v14828_v18 = vld [vmem:[#allocation27_spill] sm:$0xff]  ;;  %v14829_v15 = vld [vmem:[#allocation25_spill] sm:$0xff]  ;;  %v5941_v3 = vld [vmem:[#allocation2 + $0x3d0] sm:$0xff] }
 0x853   :  { %v5998_v28 = vadd.f32 %v5997_v60, %v5935_v0  ;;  %v9194_v43 = vpop.f32.mrb[166].mxu0  ;;  %v6232_v21 = vpack.c.bf16 %v6141_v46, %v6140_v10  ;;  %v14830_v10 = vld [vmem:[#allocation20_spill] sm:$0xff]  ;;  %v14831_v46 = vld [vmem:[#allocation18_spill] sm:$0xff] }
 0x854   :  { %v6050_v57 = vmax.f32 %v6006_v31, 0.0  ;;  %v6009_v2 = vadd.f32 %v9194_v43, %v5938_v24  ;;  %v6000_v9 = vpop.f32.mrb[167].mxu0 }
 0x855   :  { %v6048_v25 = vmax.f32 %v5998_v28, 0.0  ;;  %v6001_v37 = vadd.f32 %v6000_v9, %v5936_v20  ;;  %9156 = vmatmul.mubr.msk.bf16.vlgmr.msra.gmra.mrb[144].mxu1 %vm8070_vm8, %v14287_v62  ;;  %9203 = vmatprep.subr.bf16.mxu1 %v6232_v21  ;;  %v5939_v28 = vld [vmem:[#allocation2 + $0x3c0] sm:$0xff]  ;;  %vm5600_vm8 = vcmp.eq.s32.totalorder %v11704_v38, %v13532_v19 }
 0x856   :  { %v6051_v17 = vmax.f32 %v6009_v2, 0.0  ;;  %9204 = vmatpush3.bf16.msra.mxu1 %v6232_v21  ;;  %9159 = vmatprep.mubr.msk.bf16.mxu1 %vm8072_vm9, %v14287_v62  ;;  %v6146_v49 = vmul.f32 %v14828_v18, %v6050_v57  ;;  %v5942_v21 = vld [vmem:[#allocation2 + $0x3d8] sm:$0xff]  ;;  %v6506_v19 = vld [vmem:[#allocation2 + $0x400] sm:$0xff]  ;;  %vm8082_vm11 = vmpackc.low %vm5600_vm8, %vm5599_vm7 }
 0x857   :  { %v6049_v13 = vmax.f32 %v6001_v37, 0.0  ;;  %9205 = vmatprep.subr.bf16.mxu1 %v6233_v52  ;;  %v6144_v6 = vmul.f32 %v14830_v10, %v6048_v25  ;;  %v5940_v37 = vld [vmem:[#allocation2 + $0x3c8] sm:$0xff] }
 0x858   :  { %v6147_v53 = vmul.f32 %v14829_v15, %v6051_v17 }
 0x859   :  { %v6145_v12 = vmul.f32 %v14831_v46, %v6049_v13  ;;  %v9197_v31 = vpop.f32.mrb[168].mxu0 }
 0x85a   :  { %v6022_v60 = vadd.f32 %v9197_v31, %v5941_v3  ;;  %v6013_v0 = vpop.f32.mrb[169].mxu0  ;;  %9206 = vmatpush3.bf16.msra.mxu1 %v6233_v52  ;;  %v6235_v24 = vpack.c.bf16 %v6147_v53, %v6146_v49  ;;  %v14832_v49 = vld [vmem:[#allocation39_spill] sm:$0xff]  ;;  %v14833_v53 = vld [vmem:[#allocation37_spill] sm:$0xff]  ;;  %v5945_v31 = vld [vmem:[#allocation2 + $0x3f0] sm:$0xff] }
 0x85b   :  { %v6014_v43 = vadd.f32 %v6013_v0, %v5939_v28  ;;  %v9198_v57 = vpop.f32.mrb[170].mxu0  ;;  %v6234_v2 = vpack.c.bf16 %v6145_v12, %v6144_v6  ;;  %v14834_v6 = vld [vmem:[#allocation28_spill] sm:$0xff]  ;;  %v14835_v12 = vld [vmem:[#allocation26_spill] sm:$0xff] }
 0x85c   :  { %v6054_v9 = vmax.f32 %v6022_v60, 0.0  ;;  %v6025_v20 = vadd.f32 %v9198_v57, %v5942_v21  ;;  %v6016_v25 = vpop.f32.mrb[171].mxu0 }
 0x85d   :  { %v6052_v17 = vmax.f32 %v6014_v43, 0.0  ;;  %v6017_v13 = vadd.f32 %v6016_v25, %v5940_v37  ;;  %9160 = vmatmul.mubr.msk.bf16.gmra.mrb[148].mxu1 %vm8074_vm14, %v14287_v62  ;;  %9207 = vmatprep.subr.bf16.mxu1 %v6234_v2  ;;  %v5943_v43 = vld [vmem:[#allocation2 + $0x3e0] sm:$0xff] }
 0x85e   :  { %v6055_v52 = vmax.f32 %v6025_v20, 0.0  ;;  %9208 = vmatpush3.bf16.msra.mxu1 %v6234_v2  ;;  %9163 = vmatprep.mubr.msk.bf16.mxu1 %vm8076_vm15, %v14287_v62  ;;  %v6150_v15 = vmul.f32 %v14832_v49, %v6054_v9  ;;  %v5946_v2 = vld [vmem:[#allocation2 + $0x3f8] sm:$0xff] }
 0x85f   :  { %v6053_v18 = vmax.f32 %v6017_v13, 0.0  ;;  %9209 = vmatprep.subr.bf16.mxu1 %v6235_v24  ;;  %v6148_v46 = vmul.f32 %v14834_v6, %v6052_v17  ;;  %v5944_v13 = vld [vmem:[#allocation2 + $0x3e8] sm:$0xff]  ;;  %v14837_v6 = vld [vmem:[#allocation176_spill] sm:$0xff] }
 0x860   :  { %v6151_v10 = vmul.f32 %v14833_v53, %v6055_v52  ;;  %v14836_v53 = vld [vmem:[#allocation177_spill] sm:$0xff] }
 0x861   :  { %v6149_v3 = vmul.f32 %v14835_v12, %v6053_v18  ;;  %v9201_v60 = vpop.f32.mrb[172].mxu0  ;;  %v14838_v12 = vld [vmem:[#allocation40_spill] sm:$0xff] }
 0x862   :  { %v6038_v0 = vadd.f32 %v9201_v60, %v5945_v31  ;;  %v6029_v28 = vpop.f32.mrb[173].mxu0  ;;  %9210 = vmatpush3.bf16.msra.mxu1 %v6235_v24  ;;  %v6237_v21 = vpack.c.bf16 %v6151_v10, %v6150_v15  ;;  %v13617_v24 = vld [vmem:[%s14115_s4 + $0x1] ss:$0 sm:$0xff]  ;;  %v14839_v31 = vld [vmem:[#allocation38_spill] sm:$0xff] }
 0x863   :  { %v6030_v57 = vadd.f32 %v6029_v28, %v5943_v43  ;;  %v9202_v9 = vpop.f32.mrb[174].mxu0  ;;  %v6236_v20 = vpack.c.bf16 %v6149_v3, %v6148_v46  ;;  %vm6160_vm9 = vcmp.eq.s32.totalorder %v11144_v34, %v13617_v24  ;;  %vm6161_vm10 = vcmp.eq.s32.totalorder %v11147_v22, %v13617_v24 }
 0x864   :  { %v6058_v25 = vmax.f32 %v6038_v0, 0.0  ;;  %v6041_v37 = vadd.f32 %v9202_v9, %v5946_v2  ;;  %v6032_v17 = vpop.f32.mrb[175].mxu0  ;;  %v6508_v0 = vld [vmem:[#allocation2 + $0x410] sm:$0xff]  ;;  %vm8133_vm12 = vmpackc.low %vm6161_vm10, %vm6160_vm9  ;;  %vm6162_vm13 = vcmp.eq.s32.totalorder %v11478_v63, %v13617_v24  ;;  %vm6163_vm14 = vcmp.eq.s32.totalorder %v11481_v32, %v13617_v24 }
 0x865   :  { %v6056_v52 = vmax.f32 %v6030_v57, 0.0  ;;  %v6033_v18 = vadd.f32 %v6032_v17, %v5944_v13  ;;  %9164 = vmatmul.mubr.msk.bf16.gmra.mrb[152].mxu1 %vm8078_vm5, %v14287_v62  ;;  %9211 = vmatprep.subr.bf16.mxu1 %v6236_v20  ;;  %vm6164_vm15 = vcmp.eq.s32.totalorder %v11486_v39, %v13617_v24  ;;  %vm6165_vm2 = vcmp.eq.s32.totalorder %v11489_v51, %v13617_v24  ;;  %vm8135_vm3 = vmpackc.low %vm6163_vm14, %vm6162_vm13 }
 0x866   :  { %v6059_v49 = vmax.f32 %v6041_v37, 0.0  ;;  %9212 = vmatpush3.bf16.msra.mxu1 %v6236_v20  ;;  %9167 = vmatprep.mubr.msk.bf16.mxu1 %vm8080_vm6, %v14287_v62  ;;  %v6154_v10 = vmul.f32 %v14836_v53, %v6058_v25  ;;  %v6509_v20 = vld [vmem:[#allocation2 + $0x418] sm:$0xff]  ;;  %vm8137_vm4 = vmpackc.low %vm6165_vm2, %vm6164_vm15  ;;  %vm6166_vm1 = vcmp.eq.s32.totalorder %v11534_v27, %v13617_v24  ;;  %vm6167_vm5 = vcmp.eq.s32.totalorder %v11552_v36, %v13617_v24 }
 0x867   :  { %v6057_v15 = vmax.f32 %v6033_v18, 0.0  ;;  %9213 = vmatprep.subr.bf16.mxu1 %v6237_v21  ;;  %v6152_v3 = vmul.f32 %v14838_v12, %v6056_v52  ;;  %v6507_v18 = vld [vmem:[#allocation2 + $0x408] sm:$0xff]  ;;  %vm6168_vm6 = vcmp.eq.s32.totalorder %v11555_v44, %v13617_v24  ;;  %vm6169_vm7 = vcmp.eq.s32.totalorder %v11558_v40, %v13617_v24  ;;  %vm8139_vm8 = vmpackc.low %vm6167_vm5, %vm6166_vm1 }
 0x868   :  { %v6155_v46 = vmul.f32 %v14837_v6, %v6059_v49  ;;  %vm8141_vm9 = vmpackc.low %vm6169_vm7, %vm6168_vm6  ;;  %vm6170_vm10 = vcmp.eq.s32.totalorder %v11610_v59, %v13617_v24  ;;  %vm6173_vm13 = vcmp.eq.s32.totalorder %v11634_v30, %v13617_v24  ;;  %vm6174_vm2 = vcmp.eq.s32.totalorder %v11701_v55, %v13617_v24 }
 0x869   :  { %v6153_v60 = vmul.f32 %v14839_v31, %v6057_v15  ;;  %v9253_v28 = vpop.f32.mrb[176].mxu0 }
 0x86a   :  { %v6565_v43 = vadd.f32 %v9253_v28, %v6508_v0  ;;  %9214 = vmatpush3.bf16.msra.mxu1 %v6237_v21  ;;  %v6556_v57 = vpop.f32.mrb[177].mxu0  ;;  %v6239_v2 = vpack.c.bf16 %v6155_v46, %v6154_v10  ;;  %v14840_v10 = vld [vmem:[#allocation181_spill] sm:$0xff]  ;;  %v14841_v46 = vld [vmem:[#allocation180_spill] sm:$0xff]  ;;  %v6512_v28 = vld [vmem:[#allocation2 + $0x430] sm:$0xff] }
 0x86b   :  { %v6557_v9 = vadd.f32 %v6556_v57, %v6506_v19  ;;  %v9254_v25 = vpop.f32.mrb[178].mxu0  ;;  %v6238_v37 = vpack.c.bf16 %v6153_v60, %v6152_v3  ;;  %v14842_v3 = vld [vmem:[#allocation179_spill] sm:$0xff]  ;;  %v14843_v60 = vld [vmem:[#allocation178_spill] sm:$0xff] }
 0x86c   :  { %v6621_v17 = vmax.f32 %v6565_v43, 0.0  ;;  %v6568_v13 = vadd.f32 %v9254_v25, %v6509_v20  ;;  %v6559_v52 = vpop.f32.mrb[179].mxu0 }
 0x86d   :  { %v6619_v21 = vmax.f32 %v6557_v9, 0.0  ;;  %v6560_v49 = vadd.f32 %v6559_v52, %v6507_v18  ;;  %9168 = vmatmul.mubr.msk.bf16.gmra.mrb[156].mxu1 %vm8082_vm11, %v14287_v62  ;;  %9215 = vmatprep.subr.bf16.mxu1 %v6238_v37  ;;  %v6510_v9 = vld [vmem:[#allocation2 + $0x420] sm:$0xff]  ;;  %vm6171_vm11 = vcmp.eq.s32.totalorder %v11628_v56, %v13617_v24 }
 0x86e   :  { %v6622_v15 = vmax.f32 %v6568_v13, 0.0  ;;  %9216 = vmatpush3.bf16.msra.mxu1 %v6238_v37  ;;  %9219 = vmatprep.mubr.msk.bf16.mxu1 %vm8133_vm12, %v14287_v62  ;;  %v6717_v6 = vmul.f32 %v14840_v10, %v6621_v17  ;;  %v6513_v37 = vld [vmem:[#allocation2 + $0x438] sm:$0xff]  ;;  %vm6172_vm12 = vcmp.eq.s32.totalorder %v11631_v11, %v13617_v24  ;;  %vm8143_vm14 = vmpackc.low %vm6171_vm11, %vm6170_vm10 }
 0x86f   :  { %v6620_v53 = vmax.f32 %v6560_v49, 0.0  ;;  %9217 = vmatprep.subr.bf16.mxu1 %v6239_v2  ;;  %v6715_v31 = vmul.f32 %v14842_v3, %v6619_v21  ;;  %v6511_v49 = vld [vmem:[#allocation2 + $0x428] sm:$0xff]  ;;  %vm8145_vm15 = vmpackc.low %vm6173_vm13, %vm6172_vm12 }
 0x870   :  { %v6718_v12 = vmul.f32 %v14841_v46, %v6622_v15 }
 0x871   :  { %v6716_v0 = vmul.f32 %v14843_v60, %v6620_v53  ;;  %v9257_v43 = vpop.f32.mrb[180].mxu0 }
 0x872   :  { %v6581_v57 = vadd.f32 %v9257_v43, %v6512_v28  ;;  %9218 = vmatpush3.bf16.msra.mxu1 %v6239_v2  ;;  %v6572_v19 = vpop.f32.mrb[181].mxu0  ;;  %v6808_v20 = vpack.c.bf16 %v6718_v12, %v6717_v6  ;;  %v14844_v6 = vld [vmem:[#allocation185_spill] sm:$0xff]  ;;  %v14845_v12 = vld [vmem:[#allocation184_spill] sm:$0xff]  ;;  %v6516_v43 = vld [vmem:[#allocation2 + $0x450] sm:$0xff] }
 0x873   :  { %v6573_v25 = vadd.f32 %v6572_v19, %v6510_v9  ;;  %v9258_v17 = vpop.f32.mrb[182].mxu0  ;;  %v6807_v13 = vpack.c.bf16 %v6716_v0, %v6715_v31  ;;  %v14846_v31 = vld [vmem:[#allocation183_spill] sm:$0xff]  ;;  %v14847_v0 = vld [vmem:[#allocation182_spill] sm:$0xff] }
 0x874   :  { %v6625_v52 = vmax.f32 %v6581_v57, 0.0  ;;  %v6584_v18 = vadd.f32 %v9258_v17, %v6513_v37  ;;  %v6575_v21 = vpop.f32.mrb[183].mxu0 }
 0x875   :  { %v6623_v2 = vmax.f32 %v6573_v25, 0.0  ;;  %v6576_v15 = vadd.f32 %v6575_v21, %v6511_v49  ;;  %9220 = vmatmul.mubr.msk.bf16.vlgmr.msra.gmra.mrb[160].mxu1 %vm8135_vm3, %v14287_v62  ;;  %9267 = vmatprep.subr.bf16.mxu1 %v6807_v13  ;;  %v6514_v25 = vld [vmem:[#allocation2 + $0x440] sm:$0xff]  ;;  %vm6175_vm3 = vcmp.eq.s32.totalorder %v11704_v38, %v13617_v24 }
 0x876   :  { %v6626_v53 = vmax.f32 %v6584_v18, 0.0  ;;  %9268 = vmatpush3.bf16.msra.mxu1 %v6807_v13  ;;  %9223 = vmatprep.mubr.msk.bf16.mxu1 %vm8137_vm4, %v14287_v62  ;;  %v6721_v46 = vmul.f32 %v14844_v6, %v6625_v52  ;;  %v6517_v13 = vld [vmem:[#allocation2 + $0x458] sm:$0xff]  ;;  %vm8147_vm5 = vmpackc.low %vm6175_vm3, %vm6174_vm2 }
 0x877   :  { %v6624_v10 = vmax.f32 %v6576_v15, 0.0  ;;  %9269 = vmatprep.subr.bf16.mxu1 %v6808_v20  ;;  %v6719_v60 = vmul.f32 %v14846_v31, %v6623_v2  ;;  %v6515_v15 = vld [vmem:[#allocation2 + $0x448] sm:$0xff]  ;;  %v14849_v31 = vld [vmem:[#allocation188_spill] sm:$0xff] }
 0x878   :  { %v6722_v3 = vmul.f32 %v14845_v12, %v6626_v53  ;;  %v14848_v12 = vld [vmem:[#allocation189_spill] sm:$0xff] }
 0x879   :  { %v6720_v28 = vmul.f32 %v14847_v0, %v6624_v10  ;;  %v9261_v57 = vpop.f32.mrb[184].mxu0  ;;  %v6698_v0 = vpop.permute.xlu0 %6697 }
 0x87a   :  { %v6597_v19 = vadd.f32 %v9261_v57, %v6516_v43  ;;  %v6588_v9 = vpop.f32.mrb[185].mxu0  ;;  %9270 = vmatpush3.bf16.msra.mxu1 %v6808_v20  ;;  %v6810_v37 = vpack.c.bf16 %v6722_v3, %v6721_v46  ;;  %v6703_v46 = vpop.permute.xlu1 %6702  ;;  %v14851_v57 = vld [vmem:[#allocation186_spill] sm:$0xff] }
 0x87b   :  { %v6589_v17 = vadd.f32 %v6588_v9, %v6514_v25  ;;  %v9262_v52 = vpop.f32.mrb[186].mxu0  ;;  %v6809_v18 = vpack.c.bf16 %v6720_v28, %v6719_v60  ;;  %v14850_v28 = vld [vmem:[#allocation187_spill] sm:$0xff]  ;;  %v6520_v9 = vld [vmem:[#allocation2 + $0x470] sm:$0xff] }
 0x87c   :  { %v6629_v21 = vmax.f32 %v6597_v19, 0.0  ;;  %v6600_v49 = vadd.f32 %v9262_v52, %v6517_v13  ;;  %v6591_v2 = vpop.f32.mrb[187].mxu0  ;;  %v6518_v52 = vld [vmem:[#allocation2 + $0x460] sm:$0xff] }
 0x87d   :  { %v6627_v53 = vmax.f32 %v6589_v17, 0.0  ;;  %v6592_v10 = vadd.f32 %v6591_v2, %v6515_v15  ;;  %9224 = vmatmul.mubr.msk.bf16.gmra.mrb[164].mxu1 %vm8139_vm8, %v14287_v62  ;;  %9271 = vmatprep.subr.bf16.mxu1 %v6809_v18 }
 0x87e   :  { %v6630_v20 = vmax.f32 %v6600_v49, 0.0  ;;  %9272 = vmatpush3.bf16.msra.mxu1 %v6809_v18  ;;  %9227 = vmatprep.mubr.msk.bf16.mxu1 %vm8141_vm9, %v14287_v62  ;;  %v6725_v3 = vmul.f32 %v14848_v12, %v6629_v21  ;;  %v6521_v49 = vld [vmem:[#allocation2 + $0x478] sm:$0xff] }
 0x87f   :  { %v6628_v6 = vmax.f32 %v6592_v10, 0.0  ;;  %9273 = vmatprep.subr.bf16.mxu1 %v6810_v37  ;;  %v6723_v43 = vmul.f32 %v14850_v28, %v6627_v53  ;;  %v6708_v28 = vpop.permute.xlu0 %6707 }
 0x880   :  { %v6726_v60 = vmul.f32 %v14849_v31, %v6630_v20  ;;  %v6519_v20 = vld [vmem:[#allocation2 + $0x468] sm:$0xff] }
 0x881   :  { %v6724_v19 = vmul.f32 %v14851_v57, %v6628_v6  ;;  %v9265_v25 = vpop.f32.mrb[188].mxu0 }
 0x882   :  { %v6613_v17 = vadd.f32 %v9265_v25, %v6520_v9  ;;  %v6604_v13 = vpop.f32.mrb[189].mxu0  ;;  %9274 = vmatpush3.bf16.msra.mxu1 %v6810_v37  ;;  %v6812_v18 = vpack.c.bf16 %v6726_v60, %v6725_v3  ;;  %v8181_v3 = vld [vmem:[%s14115_s4 + $0x2] ss:$0 sm:$0xff]  ;;  %v6713_v60 = vpop.permute.xlu1 %6712 }
 0x883   :  { %v6605_v21 = vadd.f32 %v6604_v13, %v6518_v52  ;;  %v9266_v2 = vpop.f32.mrb[190].mxu0  ;;  %v6811_v15 = vpack.c.bf16 %v6724_v19, %v6723_v43  ;;  %vm6735_vm4 = vcmp.eq.s32.totalorder %v11144_v34, %v8181_v3  ;;  %vm6736_vm1 = vcmp.eq.s32.totalorder %v11147_v22, %v8181_v3 }
 0x884   :  { %v6633_v37 = vmax.f32 %v6613_v17, 0.0  ;;  %v6616_v53 = vadd.f32 %v9266_v2, %v6521_v49  ;;  %v6607_v10 = vpop.f32.mrb[191].mxu0  ;;  %vm8198_vm6 = vmpackc.low %vm6736_vm1, %vm6735_vm4  ;;  %vm6737_vm7 = vcmp.eq.s32.totalorder %v11478_v63, %v8181_v3  ;;  %vm6738_vm8 = vcmp.eq.s32.totalorder %v11481_v32, %v8181_v3  ;;  %v5648_v49 = vld [vmem:[#allocation3 + $0x38] sm:$0xff] }
 0x885   :  { %v6631_v6 = vmax.f32 %v6605_v21, 0.0  ;;  %v6608_v12 = vadd.f32 %v6607_v10, %v6519_v20  ;;  %9228 = vmatmul.mubr.msk.bf16.gmra.mrb[168].mxu1 %vm8143_vm14, %v14287_v62  ;;  %9275 = vmatprep.subr.bf16.mxu1 %v6811_v15  ;;  %vm6739_vm9 = vcmp.eq.s32.totalorder %v11486_v39, %v8181_v3  ;;  %vm6740_vm10 = vcmp.eq.s32.totalorder %v11489_v51, %v8181_v3  ;;  %vm8200_vm11 = vmpackc.low %vm6738_vm8, %vm6737_vm7 }
 0x886   :  { %v6634_v31 = vmax.f32 %v6616_v53, 0.0  ;;  %9276 = vmatpush3.bf16.msra.mxu1 %v6811_v15  ;;  %9231 = vmatprep.mubr.msk.bf16.mxu1 %vm8145_vm15, %v14287_v62  ;;  %v6729_v57 = vmul.f32 %v6708_v28, %v6633_v37  ;;  %vm8202_vm12 = vmpackc.low %vm6740_vm10, %vm6739_vm9  ;;  %vm6741_vm13 = vcmp.eq.s32.totalorder %v11534_v27, %v8181_v3  ;;  %vm6742_vm14 = vcmp.eq.s32.totalorder %v11552_v36, %v8181_v3  ;;  %v5646_v37 = vld [vmem:[#allocation3 + $0x28] sm:$0xff]  ;;  %v5652_v28 = vld [vmem:[#allocation3 + $0x58] sm:$0xff] }
 0x887   :  { %v6632_v43 = vmax.f32 %v6608_v12, 0.0  ;;  %9277 = vmatprep.subr.bf16.mxu1 %v6812_v18  ;;  %v6727_v9 = vmul.f32 %v6698_v0, %v6631_v6  ;;  %vm6743_vm15 = vcmp.eq.s32.totalorder %v11555_v44, %v8181_v3  ;;  %vm6744_vm2 = vcmp.eq.s32.totalorder %v11558_v40, %v8181_v3  ;;  %vm8204_vm3 = vmpackc.low %vm6742_vm14, %vm6741_vm13  ;;  %v13741_v44 = vld [vmem:[%s14117_s5] ss:$0 sm:$0xff]  ;;  %v5643_v40 = vld [vmem:[#allocation3 + $0x10] sm:$0xff] }
 0x888   :  { %v6730_v19 = vmul.f32 %v6713_v60, %v6634_v31  ;;  %vm8206_vm4 = vmpackc.low %vm6744_vm2, %vm6743_vm15  ;;  %vm6745_vm1 = vcmp.eq.s32.totalorder %v11610_v59, %v8181_v3  ;;  %vm6748_vm7 = vcmp.eq.s32.totalorder %v11634_v30, %v8181_v3  ;;  %vm6749_vm10 = vcmp.eq.s32.totalorder %v11701_v55, %v8181_v3  ;;  %v5641_v59 = vld [vmem:[#allocation3] sm:$0xff] }
 0x889   :  { %v6728_v25 = vmul.f32 %v6703_v46, %v6632_v43  ;;  %vm7053_vm13 = vcmp.eq.s32.totalorder %v11144_v34, %v13741_v44  ;;  %vm7054_vm14 = vcmp.eq.s32.totalorder %v11147_v22, %v13741_v44  ;;  %v5647_v22 = vld [vmem:[#allocation3 + $0x30] sm:$0xff]  ;;  %v5649_v31 = vld [vmem:[#allocation3 + $0x40] sm:$0xff]  ;;  %vm7055_vm2 = vcmp.eq.s32.totalorder %v11478_v63, %v13741_v44 }
 0x88a   :  { %9278 = vmatpush3.bf16.msra.mxu1 %v6812_v18  ;;  %v6814_v17 = vpack.c.bf16 %v6730_v19, %v6729_v57  ;;  %vm8225_vm15 = vmpackc.low %vm7054_vm14, %vm7053_vm13  ;;  %v5645_v18 = vld [vmem:[#allocation3 + $0x20] sm:$0xff]  ;;  %v5650_v19 = vld [vmem:[#allocation3 + $0x48] sm:$0xff] }
 0x88b   :  { %v6813_v13 = vpack.c.bf16 %v6728_v25, %v6727_v9  ;;  %9315 = vmatprep.mubr.msk.bf16.mxu0 %vm8225_vm15, %v14287_v62  ;;  %v7154_v63 = vld [vmem:[%s14118_s1] sm:$0xff] }
 0x88d   :  { %9232 = vmatmul.mubr.msk.bf16.gmra.mrb[172].mxu1 %vm8147_vm5, %v14287_v62  ;;  %9279 = vmatprep.subr.bf16.mxu1 %v6813_v13  ;;  %vm6746_vm5 = vcmp.eq.s32.totalorder %v11628_v56, %v8181_v3 }
 0x88e   :  { %9280 = vmatpush3.bf16.msra.mxu1 %v6813_v13  ;;  %9283 = vmatprep.mubr.msk.bf16.mxu1 %vm8198_vm6, %v14287_v62  ;;  %vm6747_vm6 = vcmp.eq.s32.totalorder %v11631_v11, %v8181_v3  ;;  %vm8208_vm8 = vmpackc.low %vm6746_vm5, %vm6745_vm1  ;;  %v5644_v11 = vld [vmem:[#allocation3 + $0x18] sm:$0xff]  ;;  %vm7058_vm1 = vcmp.eq.s32.totalorder %v11489_v51, %v13741_v44 }
 0x88f   :  { %9281 = vmatprep.subr.bf16.mxu1 %v6814_v17  ;;  %vm8210_vm9 = vmpackc.low %vm6748_vm7, %vm6747_vm6  ;;  %vm7059_vm7 = vcmp.eq.s32.totalorder %v11534_v27, %v13741_v44  ;;  %v7156_v27 = vld [vmem:[%s14118_s1 + $0x10] sm:$0xff] }
 0x892   :  { %9282 = vmatpush3.bf16.msra.mxu1 %v6814_v17 }
 0x895   :  { %9284 = vmatmul.mubr.msk.bf16.vlgmr.msra.gmra.mrb[176].mxu1 %vm8200_vm11, %v14287_v62  ;;  %vm6750_vm11 = vcmp.eq.s32.totalorder %v11704_v38, %v8181_v3  ;;  %v5642_v38 = vld [vmem:[#allocation3 + $0x8] sm:$0xff]  ;;  %v5651_v3 = vld [vmem:[#allocation3 + $0x50] sm:$0xff] }
 0x896   :  { %9287 = vmatprep.mubr.msk.bf16.mxu1 %vm8202_vm12, %v14287_v62  ;;  %vm8212_vm12 = vmpackc.low %vm6750_vm11, %vm6749_vm10 }
 0x89d   :  { %9288 = vmatmul.mubr.msk.bf16.gmra.mrb[180].mxu1 %vm8204_vm3, %v14287_v62  ;;  %vm7056_vm3 = vcmp.eq.s32.totalorder %v11481_v32, %v13741_v44  ;;  %v7155_v32 = vld [vmem:[%s14118_s1 + $0x8] sm:$0xff] }
 0x89e   :  { %9291 = vmatprep.mubr.msk.bf16.mxu1 %vm8206_vm4, %v14287_v62  ;;  %vm7057_vm4 = vcmp.eq.s32.totalorder %v11486_v39, %v13741_v44  ;;  %vm8227_vm5 = vmpackc.low %vm7056_vm3, %vm7055_vm2  ;;  %v7164_v39 = vsel %vm446_vm0, %v7154_v63, 0.0  ;;  %v7165_v51 = vsel %vm446_vm0, %v7155_v32, 0.0 }
 0x89f   :  { %vm8229_vm6 = vmpackc.low %vm7058_vm1, %vm7057_vm4 }
 0x8a5   :  { %9292 = vmatmul.mubr.msk.bf16.gmra.mrb[184].mxu1 %vm8208_vm8, %v14287_v62  ;;  %vm7060_vm8 = vcmp.eq.s32.totalorder %v11552_v36, %v13741_v44  ;;  %v7166_v36 = vadd.f32 %v7165_v51, %v7164_v39  ;;  %v7167_v44 = vsel %vm446_vm0, %v7156_v27, 0.0 }
 0x8a6   :  { %9295 = vmatprep.mubr.msk.bf16.mxu1 %vm8210_vm9, %v14287_v62  ;;  %vm8231_vm9 = vmpackc.low %vm7060_vm8, %vm7059_vm7 }
 0x8ad   :  { %9296 = vmatmul.mubr.msk.bf16.gmra.mrb[188].mxu1 %vm8212_vm12, %v14287_v62 }
 0x928   :  { %v9157_v56 = vpop.f32.mrb[144].mxu1 }
 0x929   :  { %v5764_v30 = vadd.f32 %v9157_v56, %v5643_v40  ;;  %v5699_v55 = vpop.f32.mrb[145].mxu1  ;;  %v5653_v56 = vld [vmem:[#allocation3 + $0x60] sm:$0xff] }
 0x92a   :  { %v5762_v24 = vadd.f32 %v5699_v55, %v5641_v59  ;;  %v9158_v46 = vpop.f32.mrb[146].mxu1  ;;  %v5655_v59 = vld [vmem:[#allocation3 + $0x70] sm:$0xff] }
 0x92b   :  { %5780 = vst.msk [vmem:[#allocation3 + $0x10] sm:$0xff] %vm446_vm0, %v5764_v30  ;;  %v5765_v0 = vadd.f32 %v9158_v46, %v5644_v11  ;;  %v5702_v52 = vpop.f32.mrb[147].mxu1  ;;  %v5656_v30 = vld [vmem:[#allocation3 + $0x78] sm:$0xff] }
 0x92c   :  { %5778 = vst.msk [vmem:[#allocation3] sm:$0xff] %vm446_vm0, %v5762_v24  ;;  %v5763_v34 = vadd.f32 %v5702_v52, %v5642_v38  ;;  %v5654_v24 = vld [vmem:[#allocation3 + $0x68] sm:$0xff] }
 0x92d   :  { %5781 = vst.msk [vmem:[#allocation3 + $0x18] sm:$0xff] %vm446_vm0, %v5765_v0 }
 0x92e   :  { %5779 = vst.msk [vmem:[#allocation3 + $0x8] sm:$0xff] %vm446_vm0, %v5763_v34 }
 0x930   :  { %v9161_v21 = vpop.f32.mrb[148].mxu1 }
 0x931   :  { %v5768_v2 = vadd.f32 %v9161_v21, %v5647_v22  ;;  %v5715_v15 = vpop.f32.mrb[149].mxu1 }
 0x932   :  { %v5766_v53 = vadd.f32 %v5715_v15, %v5645_v18  ;;  %v9162_v10 = vpop.f32.mrb[150].mxu1  ;;  %v6218_v18 = vld [vmem:[#allocation3 + $0x10] sm:$0xff] }
 0x933   :  { %5784 = vst.msk [vmem:[#allocation3 + $0x30] sm:$0xff] %vm446_vm0, %v5768_v2  ;;  %v5769_v20 = vadd.f32 %v9162_v10, %v5648_v49  ;;  %v5718_v6 = vpop.f32.mrb[151].mxu1  ;;  %v6216_v2 = vld [vmem:[#allocation3] sm:$0xff] }
 0x934   :  { %5782 = vst.msk [vmem:[#allocation3 + $0x20] sm:$0xff] %vm446_vm0, %v5766_v53  ;;  %v5767_v12 = vadd.f32 %v5718_v6, %v5646_v37  ;;  %v6219_v53 = vld [vmem:[#allocation3 + $0x18] sm:$0xff] }
 0x935   :  { %5785 = vst.msk [vmem:[#allocation3 + $0x38] sm:$0xff] %vm446_vm0, %v5769_v20  ;;  %v6217_v6 = vld [vmem:[#allocation3 + $0x8] sm:$0xff] }
 0x936   :  { %5783 = vst.msk [vmem:[#allocation3 + $0x28] sm:$0xff] %vm446_vm0, %v5767_v12 }
 0x938   :  { %v9165_v60 = vpop.f32.mrb[152].mxu1 }
 0x939   :  { %v5772_v43 = vadd.f32 %v9165_v60, %v5651_v3  ;;  %v5731_v57 = vpop.f32.mrb[153].mxu1 }
 0x93a   :  { %v5770_v9 = vadd.f32 %v5731_v57, %v5649_v31  ;;  %v9166_v25 = vpop.f32.mrb[154].mxu1  ;;  %v6222_v31 = vld [vmem:[#allocation3 + $0x30] sm:$0xff] }
 0x93b   :  { %5788 = vst.msk [vmem:[#allocation3 + $0x50] sm:$0xff] %vm446_vm0, %v5772_v43  ;;  %v5773_v17 = vadd.f32 %v9166_v25, %v5652_v28  ;;  %v5734_v13 = vpop.f32.mrb[155].mxu1  ;;  %v6220_v43 = vld [vmem:[#allocation3 + $0x20] sm:$0xff] }
 0x93c   :  { %5786 = vst.msk [vmem:[#allocation3 + $0x40] sm:$0xff] %vm446_vm0, %v5770_v9  ;;  %v5771_v40 = vadd.f32 %v5734_v13, %v5650_v19  ;;  %v6223_v9 = vld [vmem:[#allocation3 + $0x38] sm:$0xff] }
 0x93d   :  { %5789 = vst.msk [vmem:[#allocation3 + $0x58] sm:$0xff] %vm446_vm0, %v5773_v17  ;;  %v6221_v13 = vld [vmem:[#allocation3 + $0x28] sm:$0xff] }
 0x93e   :  { %5787 = vst.msk [vmem:[#allocation3 + $0x48] sm:$0xff] %vm446_vm0, %v5771_v40 }
 0x940   :  { %v9169_v11 = vpop.f32.mrb[156].mxu1 }
 0x941   :  { %v5776_v55 = vadd.f32 %v9169_v11, %v5655_v59  ;;  %v5747_v38 = vpop.f32.mrb[157].mxu1 }
 0x942   :  { %v5774_v46 = vadd.f32 %v5747_v38, %v5653_v56  ;;  %v9170_v0 = vpop.f32.mrb[158].mxu1  ;;  %v6226_v56 = vld [vmem:[#allocation3 + $0x50] sm:$0xff] }
 0x943   :  { %5792 = vst.msk [vmem:[#allocation3 + $0x70] sm:$0xff] %vm446_vm0, %v5776_v55  ;;  %v5777_v52 = vadd.f32 %v9170_v0, %v5656_v30  ;;  %v5750_v34 = vpop.f32.mrb[159].mxu1  ;;  %v6224_v55 = vld [vmem:[#allocation3 + $0x40] sm:$0xff] }
 0x944   :  { %5790 = vst.msk [vmem:[#allocation3 + $0x60] sm:$0xff] %vm446_vm0, %v5774_v46  ;;  %v5775_v22 = vadd.f32 %v5750_v34, %v5654_v24  ;;  %v6227_v46 = vld [vmem:[#allocation3 + $0x58] sm:$0xff] }
 0x945   :  { %5793 = vst.msk [vmem:[#allocation3 + $0x78] sm:$0xff] %vm446_vm0, %v5777_v52  ;;  %v6225_v34 = vld [vmem:[#allocation3 + $0x48] sm:$0xff] }
 0x946   :  { %5791 = vst.msk [vmem:[#allocation3 + $0x68] sm:$0xff] %vm446_vm0, %v5775_v22 }
 0x948   :  { %v9221_v21 = vpop.f32.mrb[160].mxu1 }
 0x949   :  { %v6339_v49 = vadd.f32 %v9221_v21, %v6218_v18  ;;  %v6274_v15 = vpop.f32.mrb[161].mxu1 }
 0x94a   :  { %v6337_v37 = vadd.f32 %v6274_v15, %v6216_v2  ;;  %v9222_v10 = vpop.f32.mrb[162].mxu1  ;;  %v6230_v21 = vld [vmem:[#allocation3 + $0x70] sm:$0xff] }
 0x94b   :  { %6355 = vst.msk [vmem:[#allocation3 + $0x10] sm:$0xff] %vm446_vm0, %v6339_v49  ;;  %v6340_v20 = vadd.f32 %v9222_v10, %v6219_v53  ;;  %v6277_v12 = vpop.f32.mrb[163].mxu1  ;;  %v6228_v15 = vld [vmem:[#allocation3 + $0x60] sm:$0xff] }
 0x94c   :  { %6353 = vst.msk [vmem:[#allocation3] sm:$0xff] %vm446_vm0, %v6337_v37  ;;  %v6338_v3 = vadd.f32 %v6277_v12, %v6217_v6  ;;  %v6231_v10 = vld [vmem:[#allocation3 + $0x78] sm:$0xff] }
 0x94d   :  { %6356 = vst.msk [vmem:[#allocation3 + $0x18] sm:$0xff] %vm446_vm0, %v6340_v20  ;;  %v6229_v12 = vld [vmem:[#allocation3 + $0x68] sm:$0xff] }
 0x94e   :  { %6354 = vst.msk [vmem:[#allocation3 + $0x8] sm:$0xff] %vm446_vm0, %v6338_v3 }
 0x950   :  { %v9225_v60 = vpop.f32.mrb[164].mxu1 }
 0x951   :  { %v6343_v28 = vadd.f32 %v9225_v60, %v6222_v31  ;;  %v6290_v57 = vpop.f32.mrb[165].mxu1  ;;  %v13782_v60 = vld [vmem:[%s14116_s12 + $0x2] ss:$0 sm:$0xff] }
 0x952   :  { %v6341_v19 = vadd.f32 %v6290_v57, %v6220_v43  ;;  %v9226_v25 = vpop.f32.mrb[166].mxu1  ;;  %v6954_v57 = vadd.f32 %v13782_v60, %v13304_v1  ;;  %v6953_v1 = vadd.f32 %v13782_v60, %v13310_v7 }
 0x953   :  { %6359 = vst.msk [vmem:[#allocation3 + $0x30] sm:$0xff] %vm446_vm0, %v6343_v28  ;;  %v6344_v17 = vadd.f32 %v9226_v25, %v6223_v9  ;;  %v6293_v40 = vpop.f32.mrb[167].mxu1  ;;  %v6793_v28 = vld [vmem:[#allocation3 + $0x10] sm:$0xff]  ;;  %v6791_v9 = vld [vmem:[#allocation3] sm:$0xff] }
 0x954   :  { %6357 = vst.msk [vmem:[#allocation3 + $0x20] sm:$0xff] %vm446_vm0, %v6341_v19  ;;  %v6342_v59 = vadd.f32 %v6293_v40, %v6221_v13  ;;  %v6794_v40 = vld [vmem:[#allocation3 + $0x18] sm:$0xff] }
 0x955   :  { %6360 = vst.msk [vmem:[#allocation3 + $0x38] sm:$0xff] %vm446_vm0, %v6344_v17  ;;  %v6952_v17 = vadd.f32 %v13782_v60, %v13308_v41 }
 0x956   :  { %6358 = vst.msk [vmem:[#allocation3 + $0x28] sm:$0xff] %vm446_vm0, %v6342_v59 }
 0x957   :  { %v6968_v41 = vmax.f32 %v6952_v17, 0.0 }
 0x958   :  { %v9229_v11 = vpop.f32.mrb[168].mxu1 }
 0x959   :  { %v6347_v30 = vadd.f32 %v9229_v11, %v6226_v56  ;;  %v6306_v38 = vpop.f32.mrb[169].mxu1  ;;  %v6955_v56 = vadd.f32 %v13782_v60, %v13306_v58 }
 0x95a   :  { %v6345_v24 = vadd.f32 %v6306_v38, %v6224_v55  ;;  %v9230_v0 = vpop.f32.mrb[170].mxu1  ;;  %v6797_v58 = vld [vmem:[#allocation3 + $0x30] sm:$0xff] }
 0x95b   :  { %6363 = vst.msk [vmem:[#allocation3 + $0x50] sm:$0xff] %vm446_vm0, %v6347_v30  ;;  %v6348_v52 = vadd.f32 %v9230_v0, %v6227_v46  ;;  %v6309_v22 = vpop.f32.mrb[171].mxu1  ;;  %v6792_v30 = vld [vmem:[#allocation3 + $0x8] sm:$0xff]  ;;  %v6971_v46 = vmax.f32 %v6955_v56, 0.0  ;;  %v6969_v0 = vmax.f32 %v6953_v1, 0.0  ;;  %v6795_v7 = vld [vmem:[#allocation3 + $0x20] sm:$0xff] }
 0x95c   :  { %6361 = vst.msk [vmem:[#allocation3 + $0x40] sm:$0xff] %vm446_vm0, %v6345_v24  ;;  %v6346_v18 = vadd.f32 %v6309_v22, %v6225_v34  ;;  %v6970_v24 = vmax.f32 %v6954_v57, 0.0  ;;  %v6958_v22 = vadd.f32 %v13782_v60, %v13323_v29 }
 0x95d   :  { %6364 = vst.msk [vmem:[#allocation3 + $0x58] sm:$0xff] %vm446_vm0, %v6348_v52 }
 0x95e   :  { %6362 = vst.msk [vmem:[#allocation3 + $0x48] sm:$0xff] %vm446_vm0, %v6346_v18  ;;  %v6986_v34 = vmul.f32 %v6970_v24, %v14731_v8  ;;  %v6959_v8 = vadd.f32 %v13782_v60, %v13325_v50  ;;  %v6974_v57 = vmax.f32 %v6958_v22, 0.0 }
 0x960   :  { %v9233_v49 = vpop.f32.mrb[172].mxu1  ;;  %v6975_v17 = vmax.f32 %v6959_v8, 0.0 }
 0x961   :  { %v6351_v2 = vadd.f32 %v9233_v49, %v6230_v21  ;;  %v6322_v37 = vpop.f32.mrb[173].mxu1  ;;  %v6984_v49 = vmul.f32 %v6968_v41, %v14732_v61  ;;  %v6985_v61 = vmul.f32 %v6969_v0, %v14737_v45  ;;  %v6960_v0 = vadd.f32 %v13782_v60, %v13347_v5 }
 0x962   :  { %v6349_v53 = vadd.f32 %v6322_v37, %v6228_v15  ;;  %v9234_v20 = vpop.f32.mrb[174].mxu1  ;;  %v6798_v37 = vld [vmem:[#allocation3 + $0x38] sm:$0xff]  ;;  %v6961_v5 = vadd.f32 %v13782_v60, %v13349_v47 }
 0x963   :  { %6367 = vst.msk [vmem:[#allocation3 + $0x70] sm:$0xff] %vm446_vm0, %v6351_v2  ;;  %v6352_v6 = vadd.f32 %v9234_v20, %v6231_v10  ;;  %v6325_v3 = vpop.f32.mrb[175].mxu1  ;;  %v6956_v2 = vadd.f32 %v13782_v60, %v13327_v33  ;;  %v6987_v20 = vmul.f32 %v6971_v46, %v14734_v54  ;;  %v6957_v33 = vadd.f32 %v13782_v60, %v13329_v23 }
 0x964   :  { %6365 = vst.msk [vmem:[#allocation3 + $0x60] sm:$0xff] %vm446_vm0, %v6349_v53  ;;  %v6350_v31 = vadd.f32 %v6325_v3, %v6229_v12  ;;  %v6976_v8 = vmax.f32 %v6960_v0, 0.0 }
 0x965   :  { %6368 = vst.msk [vmem:[#allocation3 + $0x78] sm:$0xff] %vm446_vm0, %v6352_v6  ;;  %v6796_v6 = vld [vmem:[#allocation3 + $0x28] sm:$0xff] }
 0x966   :  { %6366 = vst.msk [vmem:[#allocation3 + $0x68] sm:$0xff] %vm446_vm0, %v6350_v31 }
 0x968   :  { %v9285_v43 = vpop.f32.mrb[176].mxu1 }
 0x969   :  { %v6914_v19 = vadd.f32 %v9285_v43, %v6793_v28  ;;  %v6849_v25 = vpop.f32.mrb[177].mxu1 }
 0x96a   :  { %v6912_v13 = vadd.f32 %v6849_v25, %v6791_v9  ;;  %v9286_v59 = vpop.f32.mrb[178].mxu1  ;;  %v6972_v9 = vmax.f32 %v6956_v2, 0.0 }
 0x96b   :  { %6930 = vst.msk [vmem:[#allocation3 + $0x10] sm:$0xff] %vm446_vm0, %v6914_v19  ;;  %v6915_v11 = vadd.f32 %v9286_v59, %v6794_v40  ;;  %v6852_v55 = vpop.f32.mrb[179].mxu1  ;;  %v6973_v40 = vmax.f32 %v6957_v33, 0.0  ;;  %v6801_v59 = vld [vmem:[#allocation3 + $0x50] sm:$0xff] }
 0x96c   :  { %6928 = vst.msk [vmem:[#allocation3] sm:$0xff] %vm446_vm0, %v6912_v13  ;;  %v6913_v38 = vadd.f32 %v6852_v55, %v6792_v30  ;;  %v6990_v30 = vmul.f32 %v6974_v57, %v14739_v4  ;;  %v6962_v55 = vadd.f32 %v13782_v60, %v13343_v16  ;;  %v6988_v46 = vmul.f32 %v6972_v9, %v14741_v26 }
 0x96d   :  { %6931 = vst.msk [vmem:[#allocation3 + $0x18] sm:$0xff] %vm446_vm0, %v6915_v11  ;;  %v6963_v4 = vadd.f32 %v13782_v60, %v13345_v35 }
 0x96e   :  { %6929 = vst.msk [vmem:[#allocation3 + $0x8] sm:$0xff] %vm446_vm0, %v6913_v38  ;;  %v6799_v38 = vld [vmem:[#allocation3 + $0x40] sm:$0xff] }
 0x970   :  { %v9289_v52 = vpop.f32.mrb[180].mxu1 }
 0x971   :  { %v6918_v18 = vadd.f32 %v9289_v52, %v6797_v58  ;;  %v6865_v21 = vpop.f32.mrb[181].mxu1  ;;  %v6802_v52 = vld [vmem:[#allocation3 + $0x58] sm:$0xff] }
 0x972   :  { %v6916_v15 = vadd.f32 %v6865_v21, %v6795_v7  ;;  %v9290_v53 = vpop.f32.mrb[182].mxu1  ;;  %v7002_v10 = vld [vmem:[#allocation3 + $0x10] sm:$0xff]  ;;  %v6991_v7 = vmul.f32 %v6975_v17, %v14743_v14  ;;  %v6800_v21 = vld [vmem:[#allocation3 + $0x48] sm:$0xff] }
 0x973   :  { %6934 = vst.msk [vmem:[#allocation3 + $0x30] sm:$0xff] %vm446_vm0, %v6918_v18  ;;  %v6919_v29 = vadd.f32 %v9290_v53, %v6798_v37  ;;  %v6868_v12 = vpop.f32.mrb[183].mxu1  ;;  %v7000_v3 = vld [vmem:[#allocation3] sm:$0xff]  ;;  %v7018_v31 = vadd.f32 %v7002_v10, %v6986_v34  ;;  %v6978_v10 = vmax.f32 %v6962_v55, 0.0  ;;  %v14856_v55 = vld [vmem:[#allocation107_spill] sm:$0xff] }
 0x974   :  { %6932 = vst.msk [vmem:[#allocation3 + $0x20] sm:$0xff] %vm446_vm0, %v6916_v15  ;;  %v6917_v28 = vadd.f32 %v6868_v12, %v6796_v6  ;;  %v7016_v43 = vadd.f32 %v7000_v3, %v6984_v49  ;;  %v7003_v54 = vld [vmem:[#allocation3 + $0x18] sm:$0xff]  ;;  %v6989_v15 = vmul.f32 %v6973_v40, %v14745_v48  ;;  %v6977_v12 = vmax.f32 %v6961_v5, 0.0  ;;  %v6805_v3 = vld [vmem:[#allocation3 + $0x70] sm:$0xff] }
 0x975   :  { %6935 = vst.msk [vmem:[#allocation3 + $0x38] sm:$0xff] %vm446_vm0, %v6919_v29  ;;  %v7001_v50 = vld [vmem:[#allocation3 + $0x8] sm:$0xff]  ;;  %v7019_v19 = vadd.f32 %v7003_v54, %v6987_v20  ;;  %v7034_v13 = vmax.f32 %v7018_v31, 0.0  ;;  %v6979_v29 = vmax.f32 %v6963_v4, 0.0 }
 0x976   :  { %6933 = vst.msk [vmem:[#allocation3 + $0x28] sm:$0xff] %vm446_vm0, %v6917_v28  ;;  %v7017_v25 = vadd.f32 %v7001_v50, %v6985_v61  ;;  %v7032_v56 = vmax.f32 %v7016_v43, 0.0  ;;  %v6994_v28 = vmul.f32 %v6978_v10, %v14747_v42  ;;  %v14852_v43 = vld [vmem:[#allocation106_spill] sm:$0xff]  ;;  %v6803_v50 = vld [vmem:[#allocation3 + $0x60] sm:$0xff]  ;;  %v14859_v10 = vld [vmem:[#allocation105_spill] sm:$0xff] }
 0x977   :  { %v7035_v45 = vmax.f32 %v7019_v19, 0.0  ;;  %v6966_v54 = vadd.f32 %v13782_v60, %v14852_v43 }
 0x978   :  { %v9293_v23 = vpop.f32.mrb[184].mxu1  ;;  %v7033_v11 = vmax.f32 %v7017_v25, 0.0  ;;  %v14853_v25 = vld [vmem:[#allocation97_spill] sm:$0xff] }
 0x979   :  { %v6922_v1 = vadd.f32 %v9293_v23, %v6801_v59  ;;  %v6881_v24 = vpop.f32.mrb[185].mxu1  ;;  %v7082_v41 = vpack.c.bf16 %v7035_v45, %v7034_v13  ;;  %v6992_v17 = vmul.f32 %v6976_v8, %v14853_v25  ;;  %v14854_v13 = vld [vmem:[#allocation108_spill] sm:$0xff]  ;;  %v6806_v59 = vld [vmem:[#allocation3 + $0x78] sm:$0xff] }
 0x97a   :  { %v6920_v58 = vadd.f32 %v6881_v24, %v6799_v38  ;;  %v9294_v34 = vpop.f32.mrb[186].mxu1  ;;  %v7081_v22 = vpack.c.bf16 %v7033_v11, %v7032_v56  ;;  %v7006_v18 = vld [vmem:[#allocation3 + $0x30] sm:$0xff]  ;;  %v6964_v45 = vadd.f32 %v13782_v60, %v14854_v13  ;;  %v6804_v24 = vld [vmem:[#allocation3 + $0x68] sm:$0xff]  ;;  %v14860_v8 = vld [vmem:[#allocation103_spill] sm:$0xff] }
 0x97b   :  { %6938 = vst.msk [vmem:[#allocation3 + $0x50] sm:$0xff] %vm446_vm0, %v6922_v1  ;;  %v6923_v16 = vadd.f32 %v9294_v34, %v6802_v52  ;;  %v6884_v49 = vpop.f32.mrb[187].mxu1  ;;  %v7004_v2 = vld [vmem:[#allocation3 + $0x20] sm:$0xff]  ;;  %v7022_v26 = vadd.f32 %v7006_v18, %v6990_v30  ;;  %v14855_v30 = vld [vmem:[#allocation99_spill] sm:$0xff]  ;;  %v6967_v1 = vadd.f32 %v13782_v60, %v14856_v55  ;;  %v14858_v34 = vld [vmem:[#allocation109_spill] sm:$0xff] }
 0x97c   :  { %6936 = vst.msk [vmem:[#allocation3 + $0x40] sm:$0xff] %vm446_vm0, %v6920_v58  ;;  %v6921_v37 = vadd.f32 %v6884_v49, %v6800_v21  ;;  %9299 = vmatprep.subr.bf16.mxu0 %v7081_v22  ;;  %v7020_v14 = vadd.f32 %v7004_v2, %v6988_v46  ;;  %v7007_v53 = vld [vmem:[#allocation3 + $0x38] sm:$0xff]  ;;  %v6995_v42 = vmul.f32 %v6979_v29, %v14855_v30  ;;  %v14857_v58 = vld [vmem:[#allocation96_spill] sm:$0xff]  ;;  %v6980_v2 = vmax.f32 %v6964_v45, 0.0  ;;  %v7159_v30 = vld [vmem:[%s14118_s1 + $0x28] sm:$0xff] }
 0x97d   :  { %6939 = vst.msk [vmem:[#allocation3 + $0x58] sm:$0xff] %vm446_vm0, %v6923_v16  ;;  %9300 = vmatpush3.bf16.msra.mxu0 %v7081_v22  ;;  %v7005_v35 = vld [vmem:[#allocation3 + $0x28] sm:$0xff]  ;;  %v7023_v20 = vadd.f32 %v7007_v53, %v6991_v7  ;;  %v7038_v6 = vmax.f32 %v7022_v26, 0.0  ;;  %v6993_v52 = vmul.f32 %v6977_v12, %v14857_v58  ;;  %v6965_v22 = vadd.f32 %v13782_v60, %v14858_v34  ;;  %v7379_v34 = vld [vmem:[%s14119_s18 + $0x10] sm:$0xff] }
 0x97e   :  { %6937 = vst.msk [vmem:[#allocation3 + $0x48] sm:$0xff] %vm446_vm0, %v6921_v37  ;;  %9301 = vmatprep.subr.bf16.mxu0 %v7082_v41  ;;  %v7021_v48 = vadd.f32 %v7005_v35, %v6989_v15  ;;  %v7036_v61 = vmax.f32 %v7020_v14, 0.0  ;;  %v6982_v16 = vmax.f32 %v6966_v54, 0.0  ;;  %v6983_v15 = vmax.f32 %v6967_v1, 0.0  ;;  %v13891_v1 = vld [vmem:[%s14118_s1 + $0x30] sm:$0xff] }
 0x97f   :  { %v7039_v47 = vmax.f32 %v7023_v20, 0.0  ;;  %v6981_v37 = vmax.f32 %v6965_v22, 0.0  ;;  %v7173_v55 = vsel %vm446_vm0, %v7159_v30, 0.0  ;;  %v7380_v22 = vld [vmem:[%s14119_s18 + $0x18] sm:$0xff] }
 0x980   :  { %v9297_v31 = vpop.f32.mrb[188].mxu1  ;;  %v7037_v33 = vmax.f32 %v7021_v48, 0.0  ;;  %v6998_v35 = vmul.f32 %v6982_v16, %v14859_v10  ;;  %v6996_v48 = vmul.f32 %v6980_v2, %v14860_v8  ;;  %v7367_v16 = vld [vmem:[%s14120_s17] sm:$0xff] }
 0x981   :  { %v6926_v57 = vadd.f32 %v9297_v31, %v6805_v3  ;;  %v6897_v19 = vpop.f32.mrb[189].mxu1  ;;  %9302 = vmatpush3.bf16.msra.mxu0 %v7082_v41  ;;  %v7084_v9 = vpack.c.bf16 %v7039_v47, %v7038_v6  ;;  %v14861_v47 = vld [vmem:[#allocation104_spill] sm:$0xff] }
 0x982   :  { %v6924_v40 = vadd.f32 %v6897_v19, %v6803_v50  ;;  %v9298_v23 = vpop.f32.mrb[190].mxu1  ;;  %v7083_v56 = vpack.c.bf16 %v7037_v33, %v7036_v61  ;;  %v7010_v11 = vld [vmem:[#allocation3 + $0x50] sm:$0xff]  ;;  %v6999_v12 = vmul.f32 %v6983_v15, %v14861_v47 }
 0x983   :  { %6942 = vst.msk [vmem:[#allocation3 + $0x70] sm:$0xff] %vm446_vm0, %v6926_v57  ;;  %v6927_v38 = vadd.f32 %v9298_v23, %v6806_v59  ;;  %v6900_v41 = vpop.f32.mrb[191].mxu1  ;;  %v7008_v46 = vld [vmem:[#allocation3 + $0x40] sm:$0xff]  ;;  %v7026_v0 = vadd.f32 %v7010_v11, %v6994_v28  ;;  %v14862_v61 = vld [vmem:[#allocation102_spill] sm:$0xff] }
 0x984   :  { %6940 = vst.msk [vmem:[#allocation3 + $0x60] sm:$0xff] %vm446_vm0, %v6924_v40  ;;  %v6925_v18 = vadd.f32 %v6900_v41, %v6804_v24  ;;  %9303 = vmatprep.subr.bf16.mxu0 %v7083_v56  ;;  %v7024_v7 = vadd.f32 %v7008_v46, %v6992_v17  ;;  %v7011_v4 = vld [vmem:[#allocation3 + $0x58] sm:$0xff]  ;;  %v6997_v33 = vmul.f32 %v6981_v37, %v14862_v61  ;;  %v7158_v23 = vld [vmem:[%s14118_s1 + $0x20] sm:$0xff]  ;;  %v7175_v24 = vsel %vm446_vm0, %v13891_v1, 0.0 }
 0x985   :  { %6943 = vst.msk [vmem:[#allocation3 + $0x78] sm:$0xff] %vm446_vm0, %v6927_v38  ;;  %9304 = vmatpush3.bf16.msra.mxu0 %v7083_v56  ;;  %v7009_v21 = vld [vmem:[#allocation3 + $0x48] sm:$0xff]  ;;  %v7027_v49 = vadd.f32 %v7011_v4, %v6995_v42  ;;  %v7042_v5 = vmax.f32 %v7026_v0, 0.0  ;;  %v7168_v40 = vadd.f32 %v7167_v44, %v7166_v36  ;;  %v7171_v11 = vsel %vm446_vm0, %v7158_v23, 0.0  ;;  %v13898_v41 = vld [vmem:[%s14118_s1 + $0x38] sm:$0xff]  ;;  %v7377_v46 = vld [vmem:[%s14119_s18] sm:$0xff] }
 0x986   :  { %6941 = vst.msk [vmem:[#allocation3 + $0x68] sm:$0xff] %vm446_vm0, %v6925_v18  ;;  %9305 = vmatprep.subr.bf16.mxu0 %v7084_v9  ;;  %v7025_v26 = vadd.f32 %v7009_v21, %v6993_v52  ;;  %v7040_v14 = vmax.f32 %v7024_v7, 0.0  ;;  %v7378_v0 = vld [vmem:[%s14119_s18 + $0x8] sm:$0xff]  ;;  %v7177_v18 = vsel %vm446_vm0, %v13898_v41, 0.0  ;;  %v7382_v7 = vpack.c.bf16 %v7380_v22, %v7379_v34 }
 0x987   :  { %v7043_v60 = vmax.f32 %v7027_v49, 0.0  ;;  %v7381_v52 = vpack.c.bf16 %v7378_v0, %v7377_v46  ;;  %v7368_v21 = vld [vmem:[%s14120_s17 + $0x8] sm:$0xff] }
 0x988   :  { %v7041_v53 = vmax.f32 %v7025_v26, 0.0  ;;  %v13920_v2 = vpack.c.bf16 %v7368_v21, %v7367_v16 }
 0x989   :  { %9306 = vmatpush3.bf16.msra.mxu0 %v7084_v9  ;;  %v7086_v20 = vpack.c.bf16 %v7043_v60, %v7042_v5  ;;  %9347 = vmatprep.subr.bf16.mxu1 %v7381_v52 }
 0x98a   :  { %v7085_v29 = vpack.c.bf16 %v7041_v53, %v7040_v14  ;;  %v7014_v6 = vld [vmem:[#allocation3 + $0x70] sm:$0xff]  ;;  %9349 = vmatpush3.bf16.msra.mxu1 %v7381_v52 }
 0x98b   :  { %v7012_v3 = vld [vmem:[#allocation3 + $0x60] sm:$0xff]  ;;  %v7030_v31 = vadd.f32 %v7014_v6, %v6998_v35  ;;  %9348 = vmatprep.subr.bf16.mxu1 %v7382_v7 }
 0x98c   :  { %9307 = vmatprep.subr.bf16.mxu0 %v7085_v29  ;;  %v7028_v28 = vadd.f32 %v7012_v3, %v6996_v48  ;;  %v7015_v43 = vld [vmem:[#allocation3 + $0x78] sm:$0xff] }
 0x98d   :  { %9308 = vmatpush3.bf16.msra.mxu0 %v7085_v29  ;;  %v7013_v54 = vld [vmem:[#allocation3 + $0x68] sm:$0xff]  ;;  %v7031_v57 = vadd.f32 %v7015_v43, %v6999_v12  ;;  %v7046_v19 = vmax.f32 %v7030_v31, 0.0 }
 0x98e   :  { %9309 = vmatprep.subr.bf16.mxu0 %v7086_v20  ;;  %v7029_v50 = vadd.f32 %v7013_v54, %v6997_v33  ;;  %v7044_v25 = vmax.f32 %v7028_v28, 0.0  ;;  %9350 = vmatpush3.bf16.msra.mxu1 %v7382_v7 }
 0x98f   :  { %v7047_v9 = vmax.f32 %v7031_v57, 0.0  ;;  %9335 = vmatprep.subr.bf16.mxu1 %v13920_v2 }
 0x990   :  { %v7045_v17 = vmax.f32 %v7029_v50, 0.0 }
 0x991   :  { %9310 = vmatpush3.bf16.msra.mxu0 %v7086_v20  ;;  %v7088_v13 = vpack.c.bf16 %v7047_v9, %v7046_v19 }
 0x992   :  { %v7087_v45 = vpack.c.bf16 %v7045_v17, %v7044_v25 }
 0x994   :  { %9311 = vmatprep.subr.bf16.mxu0 %v7087_v45 }
 0x995   :  { %9312 = vmatpush3.bf16.msra.mxu0 %v7087_v45 }
 0x996   :  { %9313 = vmatprep.subr.bf16.mxu0 %v7088_v13 }
 0x999   :  { %9314 = vmatpush3.bf16.msra.mxu0 %v7088_v13 }
 0x99a   :  { %9323 = vmatprep.subr.bf16.mxu0 %v7381_v52 }
 0x99c   :  { %9316 = vmatmul.mubr.msk.bf16.vlgmr.msra.gmra.mrb[192].mxu0 %vm8227_vm5, %v14287_v62 }
 0x99d   :  { %9319 = vmatprep.mubr.msk.bf16.mxu0 %vm8229_vm6, %v14287_v62  ;;  %9324 = vmatpush3.bf16.msra.mxu0 %v7381_v52 }
 0x99e   :  { %9325 = vmatprep.subr.bf16.mxu0 %v7382_v7 }
 0x9a1   :  { %9326 = vmatpush3.bf16.msra.mxu0 %v7382_v7 }
 0x9a4   :  { %9320 = vmatmul.mubr.msk.bf16.gmra.mrb[196].mxu0 %vm8231_vm9, %v14287_v62  ;;  %v7157_v62 = vld [vmem:[%s14118_s1 + $0x18] sm:$0xff] }
 0x9a5   :  { %v7169_v59 = vsel %vm446_vm0, %v7157_v62, 0.0 }
 0x9a6   :  { %v7170_v56 = vadd.f32 %v7169_v59, %v7168_v40 }
 0x9a8   :  { %v7172_v42 = vadd.f32 %v7171_v11, %v7170_v56 }
 0x9aa   :  { %v7174_v38 = vadd.f32 %v7173_v55, %v7172_v42 }
 0x9ac   :  { %v7176_v58 = vadd.f32 %v7175_v24, %v7174_v38 }
 0x9ae   :  { %v7178_v4 = vadd.f32 %v7177_v18, %v7176_v58 }
 0x9b0   :  { %v7179_v49 = vrot.slane %v7178_v4, 4 }
 0x9b2   :  { %v7180_v26 = vadd.f32 %v7179_v49, %v7178_v4 }
 0x9b4   :  { %v7181_v15 = vrot.slane %v7180_v26, 2 }
 0x9b6   :  { %v7182_v5 = vadd.f32 %v7181_v15, %v7180_v26 }
 0x9b8   :  { %v7183_v60 = vrot.slane %v7182_v5, 1 }
 0x9ba   :  { %v7184_v37 = vadd.f32 %v7183_v60, %v7182_v5 }
 0x9bc   :  { %v7186_v14 = vmul.f32 0.015625, %v7184_v37 }
 0x9be   :  { %v13923_v53 = vsub.f32 %v7154_v63, %v7186_v14  ;;  %v13925_v10 = vsub.f32 %v7155_v32, %v7186_v14  ;;  %v13927_v35 = vsub.f32 %v7156_v27, %v7186_v14  ;;  %v13933_v48 = vsub.f32 %v7157_v62, %v7186_v14 }
 0x9bf   :  { %v13939_v31 = vsub.f32 %v7158_v23, %v7186_v14  ;;  %v13944_v57 = vsub.f32 %v7159_v30, %v7186_v14  ;;  %v13954_v27 = vsub.f32 %v13891_v1, %v7186_v14  ;;  %v13962_v55 = vsub.f32 %v13898_v41, %v7186_v14 }
 0x9c0   :  { %v7195_v20 = vmul.f32 %v13923_v53, %v13923_v53  ;;  %v7196_v8 = vmul.f32 %v13925_v10, %v13925_v10  ;;  %v7197_v29 = vmul.f32 %v13927_v35, %v13927_v35  ;;  %v7198_v61 = vmul.f32 %v13933_v48, %v13933_v48 }
 0x9c1   :  { %v7199_v25 = vmul.f32 %v13939_v31, %v13939_v31  ;;  %v7200_v36 = vmul.f32 %v13944_v57, %v13944_v57  ;;  %v7201_v1 = vmul.f32 %v13954_v27, %v13954_v27  ;;  %v7202_v34 = vmul.f32 %v13962_v55, %v13962_v55 }
 0x9c2   :  { %v7203_v6 = vsel %vm446_vm0, %v7195_v20, 0.0  ;;  %v7204_v47 = vsel %vm446_vm0, %v7196_v8, 0.0  ;;  %v7206_v33 = vsel %vm446_vm0, %v7197_v29, 0.0  ;;  %v7208_v17 = vsel %vm446_vm0, %v7198_v61, 0.0 }
 0x9c3   :  { %v7205_v12 = vadd.f32 %v7204_v47, %v7203_v6  ;;  %v7210_v44 = vsel %vm446_vm0, %v7199_v25, 0.0  ;;  %v7212_v38 = vsel %vm446_vm0, %v7200_v36, 0.0  ;;  %v7214_v22 = vsel %vm446_vm0, %v7201_v1, 0.0 }
 0x9c4   :  { %v7216_v4 = vsel %vm446_vm0, %v7202_v34, 0.0 }
 0x9c5   :  { %v7207_v50 = vadd.f32 %v7206_v33, %v7205_v12 }
 0x9c7   :  { %v7209_v32 = vadd.f32 %v7208_v17, %v7207_v50 }
 0x9c9   :  { %v7211_v30 = vadd.f32 %v7210_v44, %v7209_v32 }
 0x9cb   :  { %v7213_v58 = vadd.f32 %v7212_v38, %v7211_v30 }
 0x9cd   :  { %v7215_v7 = vadd.f32 %v7214_v22, %v7213_v58 }
 0x9cf   :  { %v7217_v49 = vadd.f32 %v7216_v4, %v7215_v7  ;;  %v14004_v7 = vld [vmem:[%s14121_s13] ss:$0 sm:$0xff] }
 0x9d1   :  { %v7218_v5 = vrot.slane %v7217_v49, 4 }
 0x9d3   :  { %v7219_v14 = vadd.f32 %v7218_v5, %v7217_v49 }
 0xa6f   :  { %v9317_v3 = vpop.f32.mrb[192].mxu0 }
 0xa70   :  { %v7123_v28 = vpop.f32.mrb[193].mxu0  ;;  %v7268_v45 = vsel %vm446_vm0, %v9317_v3, 0.0 }
 0xa71   :  { %v9318_v43 = vpop.f32.mrb[194].mxu0  ;;  %v7265_v19 = vsel %vm446_vm0, %v7123_v28, 0.0 }
 0xa72   :  { %v7126_v54 = vpop.f32.mrb[195].mxu0  ;;  %v7270_v39 = vsel %vm446_vm0, %v9318_v43, 0.0 }
 0xa73   :  { %v7266_v9 = vsel %vm446_vm0, %v7126_v54, 0.0 }
 0xa74   :  { %v7267_v13 = vadd.f32 %v7266_v9, %v7265_v19 }
 0xa76   :  { %v7269_v63 = vadd.f32 %v7268_v45, %v7267_v13 }
 0xa77   :  { %v9321_v51 = vpop.f32.mrb[196].mxu0 }
 0xa78   :  { %v7139_v62 = vpop.f32.mrb[197].mxu0  ;;  %v7271_v40 = vadd.f32 %v7270_v39, %v7269_v63  ;;  %v7276_v46 = vsel %vm446_vm0, %v9321_v51, 0.0 }
 0xa79   :  { %v7272_v59 = vsel %vm446_vm0, %v7139_v62, 0.0  ;;  %v9322_v23 = vpop.f32.mrb[198].mxu0 }
 0xa7a   :  { %v7273_v56 = vadd.f32 %v7272_v59, %v7271_v40  ;;  %v7142_v11 = vpop.f32.mrb[199].mxu0  ;;  %v7278_v52 = vsel %vm446_vm0, %v9322_v23, 0.0 }
 0xa7b   :  { %v7274_v42 = vsel %vm446_vm0, %v7142_v11, 0.0 }
 0xa7c   :  { %v7275_v24 = vadd.f32 %v7274_v42, %v7273_v56 }
 0xa7e   :  { %v7277_v0 = vadd.f32 %v7276_v46, %v7275_v24 }
 0xa80   :  { %v7279_v18 = vadd.f32 %v7278_v52, %v7277_v0 }
 0xa82   :  { %v7280_v41 = vrot.slane %v7279_v18, 4 }
 0xa84   :  { %v7281_v16 = vadd.f32 %v7280_v41, %v7279_v18 }
 0xa86   :  { %v7282_v21 = vrot.slane %v7281_v16, 2 }
 0xa88   :  { %v7283_v26 = vadd.f32 %v7282_v21, %v7281_v16  ;;  %v7231_v16 = vmul.f32 %v14004_v7, %v13923_v53  ;;  %v7232_v21 = vmul.f32 %v14004_v7, %v13925_v10  ;;  %v8235_v53 = vld [vmem:[%s14123_s15] ss:$0 sm:$0xff]  ;;  %v7234_v10 = vmul.f32 %v14004_v7, %v13933_v48 }
 0xa89   :  { %v8236_v48 = vld [vmem:[%s14124_s16] ss:$0 sm:$0xff] }
 0xa8a   :  { %v7284_v15 = vrot.slane %v7283_v26, 1 }
 0xa8c   :  { %v7285_v60 = vadd.f32 %v7284_v15, %v7283_v26  ;;  %v7233_v26 = vmul.f32 %v14004_v7, %v13927_v35 }
 0xa8e   :  { %v7286_v37 = vmul.f32 0.015625, %v7285_v60  ;;  %v14019_v60 = vld [vmem:[%s14122_s14] ss:$0 sm:$0xff] }
 0xa90   :  { %v13973_v20 = vsub.f32 %v7123_v28, %v7286_v37  ;;  %v13975_v8 = vsub.f32 %v7126_v54, %v7286_v37  ;;  %v13977_v29 = vsub.f32 %v9317_v3, %v7286_v37  ;;  %v13979_v6 = vsub.f32 %v9318_v43, %v7286_v37 }
 0xa91   :  { %v13981_v47 = vsub.f32 %v7139_v62, %v7286_v37  ;;  %v7292_v12 = vsub.f32 %v7142_v11, %v7286_v37  ;;  %v7293_v61 = vsub.f32 %v9321_v51, %v7286_v37  ;;  %v7294_v33 = vsub.f32 %v9322_v23, %v7286_v37 }
 0xa92   :  { %v7295_v50 = vmul.f32 %v13973_v20, %v13973_v20  ;;  %v7296_v19 = vmul.f32 %v13975_v8, %v13975_v8  ;;  %v7297_v28 = vmul.f32 %v13977_v29, %v13977_v29  ;;  %v7220_v54 = vrot.slane %v7219_v14, 2 }
 0xa93   :  { %v7298_v3 = vmul.f32 %v13979_v6, %v13979_v6  ;;  %v7299_v17 = vmul.f32 %v13981_v47, %v13981_v47  ;;  %v7300_v32 = vmul.f32 %v7292_v12, %v7292_v12  ;;  %v7301_v36 = vmul.f32 %v7293_v61, %v7293_v61 }
 0xa94   :  { %v7303_v43 = vsel %vm446_vm0, %v7295_v50, 0.0  ;;  %v7304_v9 = vsel %vm446_vm0, %v7296_v19, 0.0  ;;  %v7306_v13 = vsel %vm446_vm0, %v7297_v28, 0.0  ;;  %v7221_v45 = vadd.f32 %v7220_v54, %v7219_v14 }
 0xa95   :  { %v7305_v25 = vadd.f32 %v7304_v9, %v7303_v43  ;;  %v7308_v39 = vsel %vm446_vm0, %v7298_v3, 0.0  ;;  %v7310_v44 = vsel %vm446_vm0, %v7299_v17, 0.0  ;;  %v7302_v59 = vmul.f32 %v7294_v33, %v7294_v33 }
 0xa96   :  { %v7222_v62 = vrot.slane %v7221_v45, 1  ;;  %v7312_v23 = vsel %vm446_vm0, %v7300_v32, 0.0  ;;  %v7314_v11 = vsel %vm446_vm0, %v7301_v36, 0.0  ;;  %v7235_v50 = vmul.f32 %v14004_v7, %v13939_v31 }
 0xa97   :  { %v7307_v63 = vadd.f32 %v7306_v13, %v7305_v25  ;;  %v7316_v1 = vsel %vm446_vm0, %v7302_v59, 0.0  ;;  %v7236_v19 = vmul.f32 %v14004_v7, %v13944_v57  ;;  %v7334_v28 = vmul.f32 %v8235_v53, %v13979_v6 }
 0xa98   :  { %v7223_v30 = vadd.f32 %v7222_v62, %v7221_v45  ;;  %v7336_v54 = vmul.f32 %v8235_v53, %v7292_v12  ;;  %v7337_v3 = vmul.f32 %v8235_v53, %v7293_v61  ;;  %v7338_v43 = vmul.f32 %v8235_v53, %v7294_v33 }
 0xa99   :  { %v7309_v51 = vadd.f32 %v7308_v39, %v7307_v63  ;;  %v7333_v25 = vmul.f32 %v8235_v53, %v13977_v29  ;;  %v7331_v17 = vmul.f32 %v8235_v53, %v13973_v20  ;;  %v7332_v13 = vmul.f32 %v8235_v53, %v13975_v8  ;;  %v7369_v8 = vld [vmem:[%s14120_s17 + $0x10] sm:$0xff] }
 0xa9a   :  { %v7224_v24 = vmul.f32 0.015625, %v7223_v30  ;;  %v7335_v31 = vmul.f32 %v8235_v53, %v13981_v47  ;;  %v7370_v47 = vld [vmem:[%s14120_s17 + $0x18] sm:$0xff] }
 0xa9b   :  { %v7311_v40 = vadd.f32 %v7310_v44, %v7309_v51 }
 0xa9c   :  { %v7239_v58 = vadd.f32 1e-05, %v7224_v24  ;;  %v7372_v24 = vpack.c.bf16 %v7370_v47, %v7369_v8 }
 0xa9d   :  { %v7313_v56 = vadd.f32 %v7312_v23, %v7311_v40 }
 0xa9e   :  { %9366 = vrsqrt.f32 %v7239_v58  ;;  %v7237_v58 = vmul.f32 %v14004_v7, %v13954_v27 }
 0xa9f   :  { %v7315_v42 = vadd.f32 %v7314_v11, %v7313_v56 }
 0xaa1   :  { %v7317_v38 = vadd.f32 %v7316_v1, %v7315_v42 }
 0xaa3   :  { %v7318_v46 = vrot.slane %v7317_v38, 4 }
 0xaa5   :  { %v7319_v0 = vadd.f32 %v7318_v46, %v7317_v38 }
 0xaa7   :  { %v7320_v52 = vrot.slane %v7319_v0, 2 }
 0xaa8   :  { %v14010_v49 = vpop.eup %9366 }
 0xaa9   :  { %v7321_v34 = vadd.f32 %v7320_v52, %v7319_v0  ;;  %v7241_v15 = vmul.f32 %v14010_v49, %v7231_v16  ;;  %v7242_v5 = vmul.f32 %v14010_v49, %v7232_v21  ;;  %v7243_v37 = vmul.f32 %v14010_v49, %v7233_v26 }
 0xaaa   :  { %v7244_v56 = vmul.f32 %v14010_v49, %v7234_v10  ;;  %v7245_v11 = vmul.f32 %v14010_v49, %v7235_v50  ;;  %v7246_v38 = vmul.f32 %v14010_v49, %v7236_v19  ;;  %v7238_v52 = vmul.f32 %v14004_v7, %v13962_v55 }
 0xaab   :  { %v7322_v22 = vrot.slane %v7321_v34, 1  ;;  %v7255_v35 = vadd.f32 %v14019_v60, %v7241_v15  ;;  %v7256_v14 = vadd.f32 %v14019_v60, %v7242_v5  ;;  %v7257_v46 = vadd.f32 %v14019_v60, %v7243_v37 }
 0xaac   :  { %v7258_v0 = vadd.f32 %v14019_v60, %v7244_v56 }
 0xaad   :  { %v7323_v18 = vadd.f32 %v7322_v22, %v7321_v34  ;;  %v7363_v23 = vpack.c.bf16 %v7256_v14, %v7255_v35  ;;  %v7259_v34 = vadd.f32 %v14019_v60, %v7245_v11  ;;  %v7260_v22 = vadd.f32 %v14019_v60, %v7246_v38 }
 0xaaf   :  { %v7324_v41 = vmul.f32 0.015625, %v7323_v18  ;;  %v7364_v18 = vpack.c.bf16 %v7258_v0, %v7257_v46  ;;  %v7365_v16 = vpack.c.bf16 %v7260_v22, %v7259_v34 }
 0xab1   :  { %v7339_v4 = vadd.f32 1e-05, %v7324_v41  ;;  %v7247_v41 = vmul.f32 %v14010_v49, %v7237_v58 }
 0xab3   :  { %9368 = vrsqrt.f32 %v7339_v4  ;;  %v7248_v4 = vmul.f32 %v14010_v49, %v7238_v52  ;;  %v7261_v27 = vadd.f32 %v14019_v60, %v7247_v41  ;;  %v8245_v49 = vld [vmem:[%s14125_s19] ss:$0 sm:$0xff] }
 0xabd   :  { %v9369_v9 = vpop.eup %9368 }
 0xabe   :  { %v7344_v45 = vmul.f32 %v9369_v9, %v7334_v28  ;;  %v7346_v57 = vmul.f32 %v9369_v9, %v7336_v54  ;;  %v7347_v63 = vmul.f32 %v9369_v9, %v7337_v3  ;;  %v7348_v6 = vmul.f32 %v9369_v9, %v7338_v43 }
 0xabf   :  { %v7341_v12 = vmul.f32 %v9369_v9, %v7331_v17  ;;  %v7342_v61 = vmul.f32 %v9369_v9, %v7332_v13  ;;  %v7345_v33 = vmul.f32 %v9369_v9, %v7335_v31  ;;  %v7343_v32 = vmul.f32 %v9369_v9, %v7333_v25 }
 0xac0   :  { %v7360_v39 = vadd.f32 %v8236_v48, %v7346_v57  ;;  %v7358_v51 = vadd.f32 %v8236_v48, %v7344_v45  ;;  %v7361_v36 = vadd.f32 %v8236_v48, %v7347_v63  ;;  %v7362_v44 = vadd.f32 %v8236_v48, %v7348_v6 }
 0xac1   :  { %v7355_v62 = vadd.f32 %v8236_v48, %v7341_v12  ;;  %v7356_v29 = vadd.f32 %v8236_v48, %v7342_v61  ;;  %v7359_v40 = vadd.f32 %v8236_v48, %v7345_v33  ;;  %v7357_v20 = vadd.f32 %v8236_v48, %v7343_v32 }
 0xac2   :  { %v7376_v59 = vpack.c.bf16 %v7362_v44, %v7361_v36 }
 0xac3   :  { %v7373_v30 = vpack.c.bf16 %v7356_v29, %v7355_v62  ;;  %v7375_v42 = vpack.c.bf16 %v7360_v39, %v7359_v40  ;;  %v7374_v1 = vpack.c.bf16 %v7358_v51, %v7357_v20 }
 0xac5   :  { %9327 = vmatprep.mubr.msk.bf16.mxu0 %vm446_vm0, %v7373_v30  ;;  %9331 = vmatprep.mubr.msk.bf16.mxu1 %vm446_vm0, %v7375_v42 }
 0xac6   :  { %9328 = vmatmul.mubr.msk.bf16.vlgmr.msra.gmra.mrb[200].mxu0 %vm446_vm0, %v7374_v1  ;;  %9332 = vmatmul.mubr.msk.bf16.vlgmr.msra.gmra.mrb[192].mxu1 %vm446_vm0, %v7376_v59 }
 0xac7   :  { %9336 = vmatpush3.bf16.msra.mxu1 %v13920_v2  ;;  %9339 = vmatprep.mubr.msk.bf16.mxu1 %vm446_vm0, %v7363_v23  ;;  %v7262_v2 = vadd.f32 %v14019_v60, %v7248_v4 }
 0xac8   :  { %9337 = vmatprep.subr.bf16.mxu1 %v7372_v24 }
 0xac9   :  { %v7366_v55 = vpack.c.bf16 %v7262_v2, %v7261_v27 }
 0xacb   :  { %9338 = vmatpush3.bf16.msra.mxu1 %v7372_v24 }
 0xace   :  { %9340 = vmatmul.mubr.msk.bf16.vlgmr.msra.gmra.mrb[196].mxu1 %vm446_vm0, %v7364_v18 }
 0xacf   :  { %9343 = vmatprep.mubr.msk.bf16.mxu1 %vm446_vm0, %v7365_v16 }
 0xad6   :  { %9344 = vmatmul.mubr.msk.bf16.gmra.mrb[192].mxu1 %vm446_vm0, %v7366_v55 }
 0xb99   :  { %v9329_v7 = vpop.f32.mrb[200].mxu0 }
 0xb9a   :  { %v7429_v21 = vpop.f32.mrb[201].mxu0 }
 0xb9b   :  { %v9330_v26 = vpop.f32.mrb[202].mxu0 }
 0xb9c   :  { %v7432_v15 = vpop.f32.mrb[203].mxu0 }
 0xba1   :  { %v9341_v5 = vpop.f32.mrb[196].mxu1 }
 0xba2   :  { %v7515_v53 = vadd.f32 %v9341_v5, %v9329_v7  ;;  %v7506_v10 = vpop.f32.mrb[197].mxu1 }
 0xba3   :  { %v7507_v37 = vadd.f32 %v7506_v10, %v7429_v21  ;;  %v9342_v35 = vpop.f32.mrb[198].mxu1 }
 0xba4   :  { %v7546_v14 = vadd.f32 %v8245_v49, %v7515_v53  ;;  %v7518_v60 = vadd.f32 %v9342_v35, %v9330_v26  ;;  %v7509_v50 = vpop.f32.mrb[199].mxu1 }
 0xba5   :  { %v7544_v19 = vadd.f32 %v8245_v49, %v7507_v37  ;;  %v7510_v28 = vadd.f32 %v7509_v50, %v7432_v15 }
 0xba6   :  { %7554 = vst.msk [vmem:[%s14863_s2 + $0x10] sm:$0xff] %vm446_vm0, %v7546_v14  ;;  %v7547_v54 = vadd.f32 %v8245_v49, %v7518_v60 }
 0xba7   :  { %7552 = vst.msk [vmem:[%s14863_s2] sm:$0xff] %vm446_vm0, %v7544_v19  ;;  %v7545_v3 = vadd.f32 %v8245_v49, %v7510_v28 }
 0xba8   :  { %7555 = vst.msk [vmem:[%s14863_s2 + $0x18] sm:$0xff] %vm446_vm0, %v7547_v54 }
 0xba9   :  { %7553 = vst.msk [vmem:[%s14863_s2 + $0x8] sm:$0xff] %vm446_vm0, %v7545_v3  ;;  %v9345_v43 = vpop.f32.mrb[192].mxu1 }
 0xbaa   :  { %v7550_v9 = vadd.f32 %v9345_v43, %v8245_v49  ;;  %v7522_v48 = vpop.f32.mrb[193].mxu1 }
 0xbab   :  { %v7548_v25 = vadd.f32 %v8245_v49, %v7522_v48  ;;  %v9346_v17 = vpop.f32.mrb[194].mxu1 }
 0xbac   :  { %7558 = vst.msk [vmem:[%s14863_s2 + $0x30] sm:$0xff] %vm446_vm0, %v7550_v9  ;;  %v7551_v13 = vadd.f32 %v9346_v17, %v8245_v49  ;;  %v7525_v31 = vpop.f32.mrb[195].mxu1 }
 0xbad   :  { %7556 = vst.msk [vmem:[%s14863_s2 + $0x20] sm:$0xff] %vm446_vm0, %v7548_v25  ;;  %v7549_v45 = vadd.f32 %v8245_v49, %v7525_v31 }
 0xbae   :  { %7559 = vst.msk [vmem:[%s14863_s2 + $0x38] sm:$0xff] %vm446_vm0, %v7551_v13 }
 0xbaf   :  { %7557 = vst.msk [vmem:[%s14863_s2 + $0x28] sm:$0xff] %vm446_vm0, %v7549_v45 }

</bundles_post_ra>
